<compile_context>
chip_gen: v5e
topology: v5e:2x2
jax: 0.10.0
libtpu: 0.0.40
codegen_flags: <defaults>
</compile_context>

<pallas_src>
import jax
import jax.numpy as jnp
from jax.experimental import pallas as pl
from jax.experimental.pallas import tpu as pltpu

EMBED_LEN = 300
MAX_WORDS = 30
IN_DIM = MAX_WORDS * EMBED_LEN          # 9000
HIDDEN = (256, 128, 64)
HID3_PAD = 128                          # pad 64 -> 128 so intermediates stay lane-dense
NUM_CLASSES = 4                         # ['anger', 'fear', 'joy', 'sadness']
OUT_PAD = 128                           # lane-dense output block; cols 4..127 are zero


def _round_up(x, m):
    return (x + m - 1) // m * m


def _mlp_kernel(x_ref,
                w1_ref, b1_ref,
                w2_ref, b2_ref,
                w3_ref, b3_ref,
                w4_ref, b4_ref,
                o_ref):
    # x tile (tb, 9000) in its original dtype; cast to bf16 in-kernel (VPU pack,
    # cheap vs. the DMA). Weights bf16, biases f32, MXU accumulates in f32.
    x = x_ref[...].astype(jnp.bfloat16)
    h = jnp.dot(x, w1_ref[...], preferred_element_type=jnp.float32) + b1_ref[...]
    h = jnp.maximum(h, 0.0)
    h = jnp.dot(h.astype(jnp.bfloat16), w2_ref[...],
                preferred_element_type=jnp.float32) + b2_ref[...]
    h = jnp.maximum(h, 0.0)
    h = jnp.dot(h.astype(jnp.bfloat16), w3_ref[...],
                preferred_element_type=jnp.float32) + b3_ref[...]
    h = jnp.maximum(h, 0.0)
    out = jnp.dot(h.astype(jnp.bfloat16), w4_ref[...],
                  preferred_element_type=jnp.float32) + b4_ref[...]
    o_ref[...] = out.astype(o_ref.dtype)


def prepare_params(params):
    """Cast weights to bf16 and pad to lane-friendly shapes (do once, reuse)."""
    def bias(p, n_pad=None):
        b = jnp.asarray(p, jnp.float32).reshape(1, -1)
        if n_pad is None or b.shape[1] == n_pad:
            return b
        out = jnp.zeros((1, n_pad), jnp.float32)
        return out.at[:, :b.shape[1]].set(b)

    w1 = params["w1"].astype(jnp.bfloat16)                       # (9000, 256)
    w2 = params["w2"].astype(jnp.bfloat16)                       # (256, 128)
    w3 = jnp.zeros((HIDDEN[1], HID3_PAD), jnp.bfloat16)          # (128, 128)
    w3 = w3.at[:, :HIDDEN[2]].set(params["w3"].astype(jnp.bfloat16))
    w4 = jnp.zeros((HID3_PAD, OUT_PAD), jnp.bfloat16)            # (128, 128)
    w4 = w4.at[:HIDDEN[2], :NUM_CLASSES].set(params["w4"].astype(jnp.bfloat16))
    return dict(
        w1=w1, b1=bias(params["b1"]),
        w2=w2, b2=bias(params["b2"]),
        w3=w3, b3=bias(params["b3"], HID3_PAD),
        w4=w4, b4=bias(params["b4"], OUT_PAD),
    )


def _pick_batch_tile(batch, device_kind=None):
    """Generation-aware batch tile. tb never exceeds the batch dim (so only the
    last grid block can be partial, the well-supported case)."""
    if device_kind is None:
        device_kind = jax.devices()[0].device_kind
    kind = device_kind.lower()
    if batch < 8:
        return batch                      # full-extent row block is always legal
    # v5e: 4x128 MXU -> M=128 already fills it. v6e/v7x: 2x256 MXU -> M=256.
    tb_max = 128 if "v5" in kind else 256
    tb_max = min(tb_max, (batch // 8) * 8)
    num_tiles = pl.cdiv(batch, tb_max)
    if "v7" in kind and num_tiles == 1 and batch >= 16:
        num_tiles = 2                     # keep both v7x TensorCores busy
    # Tighten: spread rows evenly so the last tile has little dead work.
    tb = min(_round_up(pl.cdiv(batch, num_tiles), 8), tb_max)
    return max(tb, 8)


def _resident_spec(shape):
    """Constant block index -> fetched once, VMEM-resident across the grid.
    Single-buffered (no point double-buffering a block that never changes)."""
    try:
        return pl.BlockSpec(shape, lambda i: (0, 0),
                            pipeline_mode=pl.Buffered(buffer_count=1))
    except TypeError:
        # Older API without pipeline_mode: fall back to default buffering.
        return pl.BlockSpec(shape, lambda i: (0, 0))


def embedding_classifier_forward(x, prepared, *, batch_tile=None):
    """x: (batch, 9000) f32 or bf16 (bf16 upstream halves the dominant DMA).
    prepared: output of prepare_params. Returns (batch, 4) f32 logits."""
    batch = x.shape[0]
    assert x.shape[1] == IN_DIM, x.shape

    if batch_tile is None:
        tb = _pick_batch_tile(batch)
    else:
        tb = batch if batch < 8 else min(_round_up(batch_tile, 8),
                                         max(8, (batch // 8) * 8))
    num_tiles = pl.cdiv(batch, tb)

    in_specs = [
        pl.BlockSpec((tb, IN_DIM), lambda i: (i, 0)),            # x: tiled over batch
        _resident_spec((IN_DIM, HIDDEN[0])),   _resident_spec((1, HIDDEN[0])),
        _resident_spec((HIDDEN[0], HIDDEN[1])), _resident_spec((1, HIDDEN[1])),
        _resident_spec((HIDDEN[1], HID3_PAD)),  _resident_spec((1, HID3_PAD)),
        _resident_spec((HID3_PAD, OUT_PAD)),    _resident_spec((1, OUT_PAD)),
    ]
    out_specs = pl.BlockSpec((tb, OUT_PAD), lambda i: (i, 0))

    rows = num_tiles * tb                 # rows actually pushed through the MXU
    flops = 2 * rows * (IN_DIM * HIDDEN[0]
                        + HIDDEN[0] * HIDDEN[1]
                        + HIDDEN[1] * HID3_PAD
                        + HID3_PAD * OUT_PAD)
    bytes_accessed = (
        batch * IN_DIM * jnp.dtype(x.dtype).itemsize
        + sum(int(prepared[k].size) * 2 for k in ("w1", "w2", "w3", "w4"))
        + sum(int(prepared[k].size) * 4 for k in ("b1", "b2", "b3", "b4"))
        + batch * OUT_PAD * 4
    )

    out = pl.pallas_call(
        _mlp_kernel,
        out_shape=jax.ShapeDtypeStruct((batch, OUT_PAD), jnp.float32),
        grid=(num_tiles,),
        in_specs=in_specs,
        out_specs=out_specs,
        compiler_params=pltpu.CompilerParams(
            dimension_semantics=("parallel",),
            vmem_limit_bytes=40 << 20,     # fits tb=256 f32 x double-buffered + W1
        ),
        cost_estimate=pl.CostEstimate(
            flops=int(flops), transcendentals=0, bytes_accessed=int(bytes_accessed)),
    )(x,
      prepared["w1"], prepared["b1"],
      prepared["w2"], prepared["b2"],
      prepared["w3"], prepared["b3"],
      prepared["w4"], prepared["b4"])
    return out[:, :NUM_CLASSES]


def init_params(key):
    """Deterministic init mimicking PyTorch nn.Linear defaults:
    U(-1/sqrt(fan_in), 1/sqrt(fan_in)) for both weight and bias."""
    dims = (IN_DIM,) + HIDDEN + (NUM_CLASSES,)
    params = {}
    for i in range(len(dims) - 1):
        fan_in, fan_out = dims[i], dims[i + 1]
        key, kw, kb = jax.random.split(key, 3)
        bound = 1.0 / jnp.sqrt(jnp.float32(fan_in))
        params[f"w{i+1}"] = jax.random.uniform(
            kw, (fan_in, fan_out), jnp.float32, minval=-bound, maxval=bound)
        params[f"b{i+1}"] = jax.random.uniform(
            kb, (1, fan_out), jnp.float32, minval=-bound, maxval=bound)
    return params


def reference_forward(x, params):
    """Pure-JAX reference using the same mixed precision as the kernel
    (bf16 operands, f32 accumulation, f32 biases)."""
    def dense(h, w, b):
        return jnp.dot(h.astype(jnp.bfloat16), w.astype(jnp.bfloat16),
                       preferred_element_type=jnp.float32) + b.astype(jnp.float32)
    h = jnp.maximum(dense(x, params["w1"], params["b1"]), 0.0)
    h = jnp.maximum(dense(h, params["w2"], params["b2"]), 0.0)
    h = jnp.maximum(dense(h, params["w3"], params["b3"]), 0.0)
    return dense(h, params["w4"], params["b4"])


if __name__ == "__main__":
    key = jax.random.PRNGKey(0)
    kx, kp = jax.random.split(key)

    batch = 2
    x = jax.random.normal(kx, (batch, IN_DIM), dtype=jnp.float32)
    params = init_params(kp)
    prepared = prepare_params(params)   # cast/pad once, reused across calls

    out = embedding_classifier_forward(x, prepared)
    out = jax.block_until_ready(out)

    ref = reference_forward(x, params)
    assert out.shape == (batch, NUM_CLASSES)
    assert jnp.allclose(out, ref, atol=1e-2, rtol=1e-2), (out, ref)

    print("KERNEL_OK")
</pallas_src>

<mosaic_0001>
module attributes {stable_mosaic.version = 11 : i64} {
  func.func @_mlp_kernel(%arg0: i32, %arg1: memref<2x9000xf32, #tpu.memory_space<vmem>>, %arg2: memref<9000x256xbf16, #tpu.memory_space<vmem>>, %arg3: memref<1x256xf32, #tpu.memory_space<vmem>>, %arg4: memref<256x128xbf16, #tpu.memory_space<vmem>>, %arg5: memref<1x128xf32, #tpu.memory_space<vmem>>, %arg6: memref<128x128xbf16, #tpu.memory_space<vmem>>, %arg7: memref<1x128xf32, #tpu.memory_space<vmem>>, %arg8: memref<128x128xbf16, #tpu.memory_space<vmem>>, %arg9: memref<1x128xf32, #tpu.memory_space<vmem>>, %arg10: memref<2x128xf32, #tpu.memory_space<vmem>>) attributes {dimension_semantics = [#tpu.dimension_semantics<parallel>], iteration_bounds = array<i64: 1>, scalar_prefetch = 0 : i64, scratch_operands = 0 : i64, tpu.core_type = #tpu.core_type<tc>, window_params = [{transform_indices = @transform_0, window_bounds = array<i64: 2, 9000>}, {pipeline_mode = #tpu.pipeline_mode<synchronous>, transform_indices = @transform_1, window_bounds = array<i64: 9000, 256>}, {pipeline_mode = #tpu.pipeline_mode<synchronous>, transform_indices = @transform_2, window_bounds = array<i64: 1, 256>}, {pipeline_mode = #tpu.pipeline_mode<synchronous>, transform_indices = @transform_3, window_bounds = array<i64: 256, 128>}, {pipeline_mode = #tpu.pipeline_mode<synchronous>, transform_indices = @transform_4, window_bounds = array<i64: 1, 128>}, {pipeline_mode = #tpu.pipeline_mode<synchronous>, transform_indices = @transform_5, window_bounds = array<i64: 128, 128>}, {pipeline_mode = #tpu.pipeline_mode<synchronous>, transform_indices = @transform_6, window_bounds = array<i64: 1, 128>}, {pipeline_mode = #tpu.pipeline_mode<synchronous>, transform_indices = @transform_7, window_bounds = array<i64: 128, 128>}, {pipeline_mode = #tpu.pipeline_mode<synchronous>, transform_indices = @transform_8, window_bounds = array<i64: 1, 128>}, {transform_indices = @transform_9, window_bounds = array<i64: 2, 128>}]} {
    %c0 = arith.constant 0 : index
    %c0_0 = arith.constant 0 : index
    %0 = vector.load %arg1[%c0, %c0_0] : memref<2x9000xf32, #tpu.memory_space<vmem>>, vector<2x9000xf32>
    %1 = arith.truncf %0 : vector<2x9000xf32> to vector<2x9000xbf16>
    %c0_1 = arith.constant 0 : index
    %c0_2 = arith.constant 0 : index
    %2 = vector.load %arg2[%c0_1, %c0_2] : memref<9000x256xbf16, #tpu.memory_space<vmem>>, vector<9000x256xbf16>
    %cst = arith.constant dense<0.000000e+00> : vector<2x256xf32>
    %3 = tpu.matmul %1, %2, %cst {dimension_numbers = #tpu.dot_dimension_numbers<[1], [0], [0], [1], [0, 0, 1, 1], [], []>} : vector<2x9000xbf16>, vector<9000x256xbf16>, vector<2x256xf32> -> vector<2x256xf32>
    %c0_3 = arith.constant 0 : index
    %c0_4 = arith.constant 0 : index
    %4 = vector.load %arg3[%c0_3, %c0_4] : memref<1x256xf32, #tpu.memory_space<vmem>>, vector<1x256xf32>
    %5 = vector.broadcast %4 : vector<1x256xf32> to vector<2x256xf32>
    %6 = arith.addf %3, %5 : vector<2x256xf32>
    %cst_5 = arith.constant 0.000000e+00 : f32
    %7 = vector.broadcast %cst_5 : f32 to vector<2x256xf32>
    %8 = arith.maximumf %6, %7 : vector<2x256xf32>
    %9 = arith.truncf %8 : vector<2x256xf32> to vector<2x256xbf16>
    %c0_6 = arith.constant 0 : index
    %c0_7 = arith.constant 0 : index
    %10 = vector.load %arg4[%c0_6, %c0_7] : memref<256x128xbf16, #tpu.memory_space<vmem>>, vector<256x128xbf16>
    %cst_8 = arith.constant dense<0.000000e+00> : vector<2x128xf32>
    %11 = tpu.matmul %9, %10, %cst_8 {dimension_numbers = #tpu.dot_dimension_numbers<[1], [0], [0], [1], [0, 0, 1, 1], [], []>} : vector<2x256xbf16>, vector<256x128xbf16>, vector<2x128xf32> -> vector<2x128xf32>
    %c0_9 = arith.constant 0 : index
    %c0_10 = arith.constant 0 : index
    %12 = vector.load %arg5[%c0_9, %c0_10] : memref<1x128xf32, #tpu.memory_space<vmem>>, vector<1x128xf32>
    %13 = vector.broadcast %12 : vector<1x128xf32> to vector<2x128xf32>
    %14 = arith.addf %11, %13 : vector<2x128xf32>
    %cst_11 = arith.constant 0.000000e+00 : f32
    %15 = vector.broadcast %cst_11 : f32 to vector<2x128xf32>
    %16 = arith.maximumf %14, %15 : vector<2x128xf32>
    %17 = arith.truncf %16 : vector<2x128xf32> to vector<2x128xbf16>
    %c0_12 = arith.constant 0 : index
    %c0_13 = arith.constant 0 : index
    %18 = vector.load %arg6[%c0_12, %c0_13] : memref<128x128xbf16, #tpu.memory_space<vmem>>, vector<128x128xbf16>
    %cst_14 = arith.constant dense<0.000000e+00> : vector<2x128xf32>
    %19 = tpu.matmul %17, %18, %cst_14 {dimension_numbers = #tpu.dot_dimension_numbers<[1], [0], [0], [1], [0, 0, 1, 1], [], []>} : vector<2x128xbf16>, vector<128x128xbf16>, vector<2x128xf32> -> vector<2x128xf32>
    %c0_15 = arith.constant 0 : index
    %c0_16 = arith.constant 0 : index
    %20 = vector.load %arg7[%c0_15, %c0_16] : memref<1x128xf32, #tpu.memory_space<vmem>>, vector<1x128xf32>
    %21 = vector.broadcast %20 : vector<1x128xf32> to vector<2x128xf32>
    %22 = arith.addf %19, %21 : vector<2x128xf32>
    %cst_17 = arith.constant 0.000000e+00 : f32
    %23 = vector.broadcast %cst_17 : f32 to vector<2x128xf32>
    %24 = arith.maximumf %22, %23 : vector<2x128xf32>
    %25 = arith.truncf %24 : vector<2x128xf32> to vector<2x128xbf16>
    %c0_18 = arith.constant 0 : index
    %c0_19 = arith.constant 0 : index
    %26 = vector.load %arg8[%c0_18, %c0_19] : memref<128x128xbf16, #tpu.memory_space<vmem>>, vector<128x128xbf16>
    %cst_20 = arith.constant dense<0.000000e+00> : vector<2x128xf32>
    %27 = tpu.matmul %25, %26, %cst_20 {dimension_numbers = #tpu.dot_dimension_numbers<[1], [0], [0], [1], [0, 0, 1, 1], [], []>} : vector<2x128xbf16>, vector<128x128xbf16>, vector<2x128xf32> -> vector<2x128xf32>
    %c0_21 = arith.constant 0 : index
    %c0_22 = arith.constant 0 : index
    %28 = vector.load %arg9[%c0_21, %c0_22] : memref<1x128xf32, #tpu.memory_space<vmem>>, vector<1x128xf32>
    %29 = vector.broadcast %28 : vector<1x128xf32> to vector<2x128xf32>
    %30 = arith.addf %27, %29 : vector<2x128xf32>
    %c0_23 = arith.constant 0 : index
    %c0_24 = arith.constant 0 : index
    %31 = vector.load %arg10[%c0_23, %c0_24] : memref<2x128xf32, #tpu.memory_space<vmem>>, vector<2x128xf32>
    tpu.vector_store %arg10[%c0_23, %c0_24], %30 {strides = array<i32>} : memref<2x128xf32, #tpu.memory_space<vmem>>, vector<2x128xf32>,
    return
  }
  func.func @transform_0(%arg0: i32) -> (i32, i32) {
    %c0_i32 = arith.constant 0 : i32
    %c0_i32_0 = arith.constant 0 : i32
    return %arg0, %c0_i32 : i32, i32
  }
  func.func @transform_1(%arg0: i32) -> (i32, i32) {
    %c0_i32 = arith.constant 0 : i32
    %c0_i32_0 = arith.constant 0 : i32
    %c0_i32_1 = arith.constant 0 : i32
    return %c0_i32, %c0_i32_0 : i32, i32
  }
  func.func @transform_2(%arg0: i32) -> (i32, i32) {
    %c0_i32 = arith.constant 0 : i32
    %c0_i32_0 = arith.constant 0 : i32
    %c0_i32_1 = arith.constant 0 : i32
    return %c0_i32, %c0_i32_0 : i32, i32
  }
  func.func @transform_3(%arg0: i32) -> (i32, i32) {
    %c0_i32 = arith.constant 0 : i32
    %c0_i32_0 = arith.constant 0 : i32
    %c0_i32_1 = arith.constant 0 : i32
    return %c0_i32, %c0_i32_0 : i32, i32
  }
  func.func @transform_4(%arg0: i32) -> (i32, i32) {
    %c0_i32 = arith.constant 0 : i32
    %c0_i32_0 = arith.constant 0 : i32
    %c0_i32_1 = arith.constant 0 : i32
    return %c0_i32, %c0_i32_0 : i32, i32
  }
  func.func @transform_5(%arg0: i32) -> (i32, i32) {
    %c0_i32 = arith.constant 0 : i32
    %c0_i32_0 = arith.constant 0 : i32
    %c0_i32_1 = arith.constant 0 : i32
    return %c0_i32, %c0_i32_0 : i32, i32
  }
  func.func @transform_6(%arg0: i32) -> (i32, i32) {
    %c0_i32 = arith.constant 0 : i32
    %c0_i32_0 = arith.constant 0 : i32
    %c0_i32_1 = arith.constant 0 : i32
    return %c0_i32, %c0_i32_0 : i32, i32
  }
  func.func @transform_7(%arg0: i32) -> (i32, i32) {
    %c0_i32 = arith.constant 0 : i32
    %c0_i32_0 = arith.constant 0 : i32
    %c0_i32_1 = arith.constant 0 : i32
    return %c0_i32, %c0_i32_0 : i32, i32
  }
  func.func @transform_8(%arg0: i32) -> (i32, i32) {
    %c0_i32 = arith.constant 0 : i32
    %c0_i32_0 = arith.constant 0 : i32
    %c0_i32_1 = arith.constant 0 : i32
    return %c0_i32, %c0_i32_0 : i32, i32
  }
  func.func @transform_9(%arg0: i32) -> (i32, i32) {
    %c0_i32 = arith.constant 0 : i32
    %c0_i32_0 = arith.constant 0 : i32
    return %arg0, %c0_i32 : i32, i32
  }
}

</mosaic_0001>

<bundles_post_ra>
// kernel: tpu_custom_call.1
= control target key start
LH: loop header
LB: loop body
LE: loop exit
PB: predicated region body
PF: predicated region fallthrough
CT: control target
= control target key end

     0   :  { %14 = vsyncpa [#allocation3], 0  ;;  %s15920_s0 = inlined_call_operand.hbm [shape: f32[2,9000], index: 0, kind: input, shape index: {}]   ;;  %s15921_s1 = inlined_call_operand.hbm [shape: bf16[9000,256], index: 1, kind: input, shape index: {}]   ;;  %s15922_s2 = inlined_call_operand.hbm [shape: f32[1,256], index: 2, kind: input, shape index: {}]   ;;  %s15923_s3 = inlined_call_operand.hbm [shape: bf16[256,128], index: 3, kind: input, shape index: {}]   ;;  %s15924_s4 = inlined_call_operand.hbm [shape: f32[1,128], index: 4, kind: input, shape index: {}]   ;;  %s15925_s5 = inlined_call_operand.hbm [shape: bf16[128,128], index: 5, kind: input, shape index: {}]   ;;  %s15926_s6 = inlined_call_operand.hbm [shape: f32[1,128], index: 6, kind: input, shape index: {}]   ;;  %s15927_s7 = inlined_call_operand.hbm [shape: bf16[128,128], index: 7, kind: input, shape index: {}]   ;;  %s15928_s8 = inlined_call_operand.hbm [shape: f32[1,128], index: 8, kind: input, shape index: {}]   ;;  %s15929_s9 = inlined_call_operand.hbm [shape: f32[2,128], index: 9, kind: output, shape index: {}]  }
   0x1   :  { %15 = vsyncpa [#allocation6], 0 }
   0x2   :  { %16 = vsyncpa [#allocation9], 0 }
   0x3   :  { %17 = vsyncpa [#allocation12], 0 }
   0x4   :  { %18 = vsyncpa [#allocation15], 0  ;;  %s35_s11 = sshll.u32 %s15921_s1, 4  ;;  %s36_s11 = int_to_ptr.hbm [resolvable:$true] %s35_s11 }
   0x5   :  { %19 = vsyncpa [#allocation4], 0  ;;  %s15448_s12 = smov [#allocation5]   ;;  %s59_s16 = sshll.u32 %s15923_s3, 4  ;;  %s60_s16 = int_to_ptr.hbm [resolvable:$true] %s59_s16 }
   0x6   :  { %s37_s13 = sshll.u32 %s15448_s12, 4  ;;  %s15449_s17 = smov 128   ;;  %s38_s13 = int_to_ptr.vmem [resolvable:$true] %s37_s13 }
   0x7   :  { %s15450_s18 = smov 8   ;;  %s15451_s19 = smov [#allocation8]  }
   0x8   :  { %43 = dma.hbm_to_vmem [thread:$0]  %s36_s11, 144000, %s38_s13, [#allocation6], %s15449_s17, %s15449_s17, %s15450_s18  }
   0x9   :  { %s61_s20 = sshll.u32 %s15451_s19, 4  ;;  %s15452_s21 = smov 64   ;;  %s62_s20 = int_to_ptr.vmem [resolvable:$true] %s61_s20 }
   0xa   :  { %s15453_s22 = smov 4   ;;  %s83_s24 = sshll.u32 %s15925_s5, 4  ;;  %s84_s24 = int_to_ptr.hbm [resolvable:$true] %s83_s24 }
   0xb   :  { %67 = dma.hbm_to_vmem [thread:$0]  %s60_s16, 2048, %s62_s20, [#allocation9], %s15452_s21, %s15452_s21, %s15453_s22  }
   0xc   :  { %s15454_s25 = smov [#allocation11]   ;;  %s107_s28 = sshll.u32 %s15927_s7, 4  ;;  %s108_s28 = int_to_ptr.hbm [resolvable:$true] %s107_s28 }
   0xd   :  { %s85_s26 = sshll.u32 %s15454_s25, 4  ;;  %s15455_s29 = smov [#allocation14]   ;;  %s86_s26 = int_to_ptr.vmem [resolvable:$true] %s85_s26 }
   0xe   :  { %91 = dma.hbm_to_vmem [thread:$0]  %s84_s24, 1024, %s86_s26, [#allocation12], %s15452_s21, %s15452_s21, %s15453_s22  }
   0xf   :  { %s109_s30 = sshll.u32 %s15455_s29, 4  ;;  %s25_s12 = sshll.u32 %s15920_s0, 4  ;;  %s110_s30 = int_to_ptr.vmem [resolvable:$true] %s109_s30  ;;  %s26_s12 = int_to_ptr.hbm [resolvable:$true] %s25_s12 }
  0x10   :  { %115 = dma.hbm_to_vmem [thread:$0]  %s108_s28, 1024, %s110_s30, [#allocation15], %s15452_s21, %s15452_s21, %s15453_s22  }
  0x11   :  { %s49_s14 = sshll.u32 %s15922_s2, 4  ;;  %s15456_s15 = smov [#allocation2]   ;;  %s50_s14 = int_to_ptr.hbm [resolvable:$true] %s49_s14 }
  0x12   :  { %s27_s16 = sshll.u32 %s15456_s15, 4  ;;  %s15457_s7 = smov [#allocation7]   ;;  %s28_s16 = int_to_ptr.vmem [resolvable:$true] %s27_s16 }
  0x13   :  { %30 = dma.hbm_to_vmem [thread:$0]  %s26_s12, 2272, %s28_s16, [#allocation3]  }
  0x14   :  { %s51_s17 = sshll.u32 %s15457_s7, 4  ;;  %s73_s20 = sshll.u32 %s15924_s4, 4  ;;  %s52_s17 = int_to_ptr.vmem [resolvable:$true] %s51_s17  ;;  %s74_s20 = int_to_ptr.hbm [resolvable:$true] %s73_s20 }
  0x15   :  { %54 = dma.hbm_to_vmem [thread:$0]  %s50_s14, 32, %s52_s17, [#allocation6]  }
  0x16   :  { %s97_s22 = sshll.u32 %s15926_s6, 4  ;;  %s15458_s1 = smov [#allocation10]   ;;  %s98_s22 = int_to_ptr.hbm [resolvable:$true] %s97_s22 }
  0x17   :  { %s75_s2 = sshll.u32 %s15458_s1, 4  ;;  %s15459_s23 = smov [#allocation13]   ;;  %s76_s2 = int_to_ptr.vmem [resolvable:$true] %s75_s2 }
  0x18   :  { %78 = dma.hbm_to_vmem [thread:$0]  %s74_s20, 16, %s76_s2, [#allocation9]  }
  0x19   :  { %s99_s24 = sshll.u32 %s15459_s23, 4  ;;  %s121_s27 = sshll.u32 %s15928_s8, 4  ;;  %s100_s24 = int_to_ptr.vmem [resolvable:$true] %s99_s24  ;;  %s122_s27 = int_to_ptr.hbm [resolvable:$true] %s121_s27 }
  0x1a   :  { %102 = dma.hbm_to_vmem [thread:$0]  %s98_s22, 16, %s100_s24, [#allocation12]  }
  0x1b   :  { %s15460_s4 = smov [#allocation16]  }
  0x1c   :  { %s123_s3 = sshll.u32 %s15460_s4, 4  ;;  %s124_s3 = int_to_ptr.vmem [resolvable:$true] %s123_s3 }
  0x1d   :  { %126 = dma.hbm_to_vmem [thread:$0]  %s122_s27, 16, %s124_s3, [#allocation15]  }
  0x1e   :  { %15436 = dma.done.wait [#allocation3], 2272  }
  0x1f   :  { %15437 = vsyncadd [#allocation3], 4294965024 }
  0x20   :  { %15438 = dma.done.wait [#allocation6], 144032  }
  0x21   :  { %15439 = vsyncadd [#allocation6], 4294823264 }
  0x22   :  { %15440 = dma.done.wait [#allocation9], 2064  }
  0x23   :  { %15441 = vsyncadd [#allocation9], 4294965232 }
  0x24   :  { %15442 = dma.done.wait [#allocation12], 1040  }
  0x25   :  { %15443 = vsyncadd [#allocation12], 4294966256 }
  0x26   :  { %15444 = dma.done.wait [#allocation15], 1040  }
  0x27   :  { %15445 = vsyncadd [#allocation15], 4294966256  ;;  %v9453_v0 = vld [vmem:[#allocation5 + $0x70] sm:$0xf]  ;;  %v14036_v1 = vld [vmem:[#allocation5 + $0x74] sm:$0xf0] }
  0x28   :  { %v9517_v2 = vld [vmem:[#allocation5 + $0xf0] sm:$0xf]  ;;  %v9454_v3 = vor.u32 %v14036_v1, %v9453_v0  ;;  %v14052_v4 = vld [vmem:[#allocation5 + $0xf4] sm:$0xf0]  ;;  %v9445_v11 = vld [vmem:[#allocation5 + $0x60] sm:$0xf] }
  0x29   :  { %v9581_v5 = vld [vmem:[#allocation5 + $0x170] sm:$0xf]  ;;  %v14068_v6 = vld [vmem:[#allocation5 + $0x174] sm:$0xf0]  ;;  %v9518_v7 = vor.u32 %v14052_v4, %v9517_v2  ;;  %v14034_v13 = vld [vmem:[#allocation5 + $0x64] sm:$0xf0] }
  0x2a   :  { %v9582_v8 = vor.u32 %v14068_v6, %v9581_v5  ;;  %v9645_v9 = vld [vmem:[#allocation5 + $0x1f0] sm:$0xf]  ;;  %v14084_v10 = vld [vmem:[#allocation5 + $0x1f4] sm:$0xf0]  ;;  %7199 = vmatpush.bf16.msra.mxu0 %v9454_v3  ;;  %v9509_v14 = vld [vmem:[#allocation5 + $0xe0] sm:$0xf]  ;;  %v9446_v16 = vor.u32 %v14034_v13, %v9445_v11 }
  0x2b   :  { %v9646_v12 = vor.u32 %v14084_v10, %v9645_v9  ;;  %v14050_v15 = vld [vmem:[#allocation5 + $0xe4] sm:$0xf0]  ;;  %7212 = vmatpush.bf16.msra.mxu1 %v9518_v7  ;;  %v9573_v18 = vld [vmem:[#allocation5 + $0x160] sm:$0xf]  ;;  %v9437_v23 = vld [vmem:[#allocation5 + $0x50] sm:$0xf] }
  0x2c   :  { %7225 = vmatpush.bf16.msra.mxu2 %v9582_v8  ;;  %v9510_v17 = vor.u32 %v14050_v15, %v9509_v14  ;;  %v14066_v19 = vld [vmem:[#allocation5 + $0x164] sm:$0xf0]  ;;  %v9637_v20 = vld [vmem:[#allocation5 + $0x1e0] sm:$0xf]  ;;  %v14032_v24 = vld [vmem:[#allocation5 + $0x54] sm:$0xf0] }
  0x2d   :  { %7238 = vmatpush.bf16.msra.mxu3 %v9646_v12  ;;  %v9574_v21 = vor.u32 %v14066_v19, %v9573_v18  ;;  %v14082_v22 = vld [vmem:[#allocation5 + $0x1e4] sm:$0xf0]  ;;  %v9501_v26 = vld [vmem:[#allocation5 + $0xd0] sm:$0xf]  ;;  %v14048_v27 = vld [vmem:[#allocation5 + $0xd4] sm:$0xf0]  ;;  %v9438_v29 = vor.u32 %v14032_v24, %v9437_v23 }
  0x2e   :  { %v9638_v25 = vor.u32 %v14082_v22, %v9637_v20  ;;  %v9565_v28 = vld [vmem:[#allocation5 + $0x150] sm:$0xf]  ;;  %7200 = vmatpush.bf16.msra.mxu0 %v9446_v16  ;;  %v14064_v30 = vld [vmem:[#allocation5 + $0x154] sm:$0xf0]  ;;  %v9502_v33 = vor.u32 %v14048_v27, %v9501_v26  ;;  %v9429_v35 = vld [vmem:[#allocation5 + $0x40] sm:$0xf] }
  0x2f   :  { %v9629_v31 = vld [vmem:[#allocation5 + $0x1d0] sm:$0xf]  ;;  %v14080_v32 = vld [vmem:[#allocation5 + $0x1d4] sm:$0xf0]  ;;  %7213 = vmatpush.bf16.msra.mxu1 %v9510_v17  ;;  %v9566_v34 = vor.u32 %v14064_v30, %v9565_v28  ;;  %v14030_v36 = vld [vmem:[#allocation5 + $0x44] sm:$0xf0] }
  0x30   :  { %7226 = vmatpush.bf16.msra.mxu2 %v9574_v21  ;;  %v9493_v37 = vld [vmem:[#allocation5 + $0xc0] sm:$0xf]  ;;  %v9630_v38 = vor.u32 %v14080_v32, %v9629_v31  ;;  %v14046_v39 = vld [vmem:[#allocation5 + $0xc4] sm:$0xf0]  ;;  %v9430_v44 = vor.u32 %v14030_v36, %v9429_v35  ;;  %v9421_v47 = vld [vmem:[#allocation5 + $0x30] sm:$0xf] }
  0x31   :  { %7239 = vmatpush.bf16.msra.mxu3 %v9638_v25  ;;  %v9557_v40 = vld [vmem:[#allocation5 + $0x140] sm:$0xf]  ;;  %v14062_v41 = vld [vmem:[#allocation5 + $0x144] sm:$0xf0]  ;;  %v9494_v45 = vor.u32 %v14046_v39, %v9493_v37  ;;  %v14028_v48 = vld [vmem:[#allocation5 + $0x34] sm:$0xf0] }
  0x32   :  { %v9621_v42 = vld [vmem:[#allocation5 + $0x1c0] sm:$0xf]  ;;  %v14078_v43 = vld [vmem:[#allocation5 + $0x1c4] sm:$0xf0]  ;;  %7201 = vmatpush.bf16.msra.mxu0 %v9438_v29  ;;  %v9558_v46 = vor.u32 %v14062_v41, %v9557_v40  ;;  %v9485_v49 = vld [vmem:[#allocation5 + $0xb0] sm:$0xf]  ;;  %v9422_v56 = vor.u32 %v14028_v48, %v9421_v47 }
  0x33   :  { %7214 = vmatpush.bf16.msra.mxu1 %v9502_v33  ;;  %v9622_v50 = vor.u32 %v14078_v43, %v9621_v42  ;;  %v14044_v51 = vld [vmem:[#allocation5 + $0xb4] sm:$0xf0]  ;;  %v9549_v52 = vld [vmem:[#allocation5 + $0x130] sm:$0xf]  ;;  %v9413_v59 = vld [vmem:[#allocation5 + $0x20] sm:$0xf] }
  0x34   :  { %7227 = vmatpush.bf16.msra.mxu2 %v9566_v34  ;;  %v14060_v53 = vld [vmem:[#allocation5 + $0x134] sm:$0xf0]  ;;  %v9613_v54 = vld [vmem:[#allocation5 + $0x1b0] sm:$0xf]  ;;  %v9486_v57 = vor.u32 %v14044_v51, %v9485_v49  ;;  %v14026_v60 = vld [vmem:[#allocation5 + $0x24] sm:$0xf0] }
  0x35   :  { %7240 = vmatpush.bf16.msra.mxu3 %v9630_v38  ;;  %v14076_v55 = vld [vmem:[#allocation5 + $0x1b4] sm:$0xf0]  ;;  %v9550_v58 = vor.u32 %v14060_v53, %v9549_v52  ;;  %v9477_v61 = vld [vmem:[#allocation5 + $0xa0] sm:$0xf]  ;;  %v14042_v63 = vld [vmem:[#allocation5 + $0xa4] sm:$0xf0]  ;;  %v9414_v4 = vor.u32 %v14026_v60, %v9413_v59 }
  0x36   :  { %7202 = vmatpush.bf16.msra.mxu0 %v9430_v44  ;;  %v9614_v62 = vor.u32 %v14076_v55, %v9613_v54  ;;  %v9541_v0 = vld [vmem:[#allocation5 + $0x120] sm:$0xf]  ;;  %v14058_v1 = vld [vmem:[#allocation5 + $0x124] sm:$0xf0]  ;;  %v9478_v5 = vor.u32 %v14042_v63, %v9477_v61  ;;  %v9405_v7 = vld [vmem:[#allocation5 + $0x10] sm:$0xf] }
  0x37   :  { %7215 = vmatpush.bf16.msra.mxu1 %v9494_v45  ;;  %v9605_v2 = vld [vmem:[#allocation5 + $0x1a0] sm:$0xf]  ;;  %v14074_v3 = vld [vmem:[#allocation5 + $0x1a4] sm:$0xf0]  ;;  %v9542_v6 = vor.u32 %v14058_v1, %v9541_v0  ;;  %v14024_v8 = vld [vmem:[#allocation5 + $0x14] sm:$0xf0] }
  0x38   :  { %7228 = vmatpush.bf16.msra.mxu2 %v9558_v46  ;;  %v9469_v9 = vld [vmem:[#allocation5 + $0x90] sm:$0xf]  ;;  %v9606_v10 = vor.u32 %v14074_v3, %v9605_v2  ;;  %v14040_v11 = vld [vmem:[#allocation5 + $0x94] sm:$0xf0]  ;;  %v9406_v16 = vor.u32 %v14024_v8, %v9405_v7  ;;  %v9397_v17 = vld [vmem:[#allocation5] sm:$0xf] }
  0x39   :  { %7241 = vmatpush.bf16.msra.mxu3 %v9622_v50  ;;  %v9533_v12 = vld [vmem:[#allocation5 + $0x110] sm:$0xf]  ;;  %v14056_v13 = vld [vmem:[#allocation5 + $0x114] sm:$0xf0]  ;;  %v14022_v18 = vld [vmem:[#allocation5 + $0x4] sm:$0xf0]  ;;  %v9470_v19 = vor.u32 %v14040_v11, %v9469_v9 }
  0x3a   :  { %7203 = vmatpush.bf16.msra.mxu0 %v9422_v56  ;;  %v9597_v14 = vld [vmem:[#allocation5 + $0x190] sm:$0xf]  ;;  %v14072_v15 = vld [vmem:[#allocation5 + $0x194] sm:$0xf0]  ;;  %v9534_v20 = vor.u32 %v14056_v13, %v9533_v12  ;;  %v9461_v21 = vld [vmem:[#allocation5 + $0x80] sm:$0xf]  ;;  %v9398_v31 = vor.u32 %v14022_v18, %v9397_v17 }
  0x3b   :  { %7216 = vmatpush.bf16.msra.mxu1 %v9486_v57  ;;  %v14038_v22 = vld [vmem:[#allocation5 + $0x84] sm:$0xf0]  ;;  %v9525_v23 = vld [vmem:[#allocation5 + $0x100] sm:$0xf]  ;;  %v9598_v24 = vor.u32 %v14072_v15, %v9597_v14  ;;  %v9709_v28 = vld [vmem:[#allocation5 + $0x270] sm:$0xf] }
  0x3c   :  { %7229 = vmatpush.bf16.msra.mxu2 %v9550_v58  ;;  %v14054_v25 = vld [vmem:[#allocation5 + $0x104] sm:$0xf0]  ;;  %v9589_v26 = vld [vmem:[#allocation5 + $0x180] sm:$0xf]  ;;  %v14100_v29 = vld [vmem:[#allocation5 + $0x274] sm:$0xf0]  ;;  %v9462_v35 = vor.u32 %v14038_v22, %v9461_v21 }
  0x3d   :  { %7242 = vmatpush.bf16.msra.mxu3 %v9614_v62  ;;  %v14070_v27 = vld [vmem:[#allocation5 + $0x184] sm:$0xf0]  ;;  %v9773_v30 = vld [vmem:[#allocation5 + $0x2f0] sm:$0xf]  ;;  %v14116_v32 = vld [vmem:[#allocation5 + $0x2f4] sm:$0xf0]  ;;  %v9526_v36 = vor.u32 %v14054_v25, %v9525_v23  ;;  %v9710_v40 = vor.u32 %v14100_v29, %v9709_v28 }
  0x3e   :  { %7204 = vmatpush.bf16.msra.mxu0 %v9414_v4  ;;  %v9837_v33 = vld [vmem:[#allocation5 + $0x370] sm:$0xf]  ;;  %v14132_v34 = vld [vmem:[#allocation5 + $0x374] sm:$0xf0]  ;;  %v9590_v39 = vor.u32 %v14070_v27, %v9589_v26  ;;  %v9774_v41 = vor.u32 %v14116_v32, %v9773_v30  ;;  %v9701_v43 = vld [vmem:[#allocation5 + $0x260] sm:$0xf] }
  0x3f   :  { %7217 = vmatpush.bf16.msra.mxu1 %v9478_v5  ;;  %v9901_v37 = vld [vmem:[#allocation5 + $0x3f0] sm:$0xf]  ;;  %v14148_v38 = vld [vmem:[#allocation5 + $0x3f4] sm:$0xf0]  ;;  %v9838_v42 = vor.u32 %v14132_v34, %v9837_v33  ;;  %v14098_v44 = vld [vmem:[#allocation5 + $0x264] sm:$0xf0] }
  0x40   :  { %7230 = vmatpush.bf16.msra.mxu2 %v9542_v6  ;;  %v9765_v45 = vld [vmem:[#allocation5 + $0x2e0] sm:$0xf]  ;;  %v9902_v46 = vor.u32 %v14148_v38, %v9901_v37  ;;  %v14114_v47 = vld [vmem:[#allocation5 + $0x2e4] sm:$0xf0]  ;;  %v9702_v52 = vor.u32 %v14098_v44, %v9701_v43  ;;  %v9693_v53 = vld [vmem:[#allocation5 + $0x250] sm:$0xf] }
  0x41   :  { %7243 = vmatpush.bf16.msra.mxu3 %v9606_v10  ;;  %v9829_v48 = vld [vmem:[#allocation5 + $0x360] sm:$0xf]  ;;  %v14130_v49 = vld [vmem:[#allocation5 + $0x364] sm:$0xf0]  ;;  %v14096_v54 = vld [vmem:[#allocation5 + $0x254] sm:$0xf0]  ;;  %v9766_v55 = vor.u32 %v14114_v47, %v9765_v45 }
  0x42   :  { %7205 = vmatpush.bf16.msra.mxu0 %v9406_v16  ;;  %v9893_v50 = vld [vmem:[#allocation5 + $0x3e0] sm:$0xf]  ;;  %v14146_v51 = vld [vmem:[#allocation5 + $0x3e4] sm:$0xf0]  ;;  %v9830_v56 = vor.u32 %v14130_v49, %v9829_v48  ;;  %v9757_v57 = vld [vmem:[#allocation5 + $0x2d0] sm:$0xf]  ;;  %v9694_v1 = vor.u32 %v14096_v54, %v9693_v53 }
  0x43   :  { %7218 = vmatpush.bf16.msra.mxu1 %v9470_v19  ;;  %v14112_v58 = vld [vmem:[#allocation5 + $0x2d4] sm:$0xf0]  ;;  %v9894_v60 = vor.u32 %v14146_v51, %v9893_v50  ;;  %v9821_v61 = vld [vmem:[#allocation5 + $0x350] sm:$0xf]  ;;  %v9685_v2 = vld [vmem:[#allocation5 + $0x240] sm:$0xf] }
  0x44   :  { %7231 = vmatpush.bf16.msra.mxu2 %v9534_v20  ;;  %v164_v59 = vld [vmem:[#allocation2] sm:$0xff]  ;;  %v9758_v3 = vor.u32 %v14112_v58, %v9757_v57  ;;  %v14094_v5 = vld [vmem:[#allocation5 + $0x244] sm:$0xf0]  ;;  %v9749_v6 = vld [vmem:[#allocation5 + $0x2c0] sm:$0xf]  ;;  %vm7192_vm0 = vcmask 1043456  }
  0x45   :  { %7244 = vmatpush.bf16.msra.mxu3 %v9598_v24  ;;  %v14128_v62 = vld [vmem:[#allocation5 + $0x354] sm:$0xf0]  ;;  %200 = vst [vmem:[#allocation1] ss:$4 sm:$0xff] %v164_v59  ;;  %v9885_v63 = vld [vmem:[#allocation5 + $0x3d0] sm:$0xf]  ;;  %v9686_v15 = vor.u32 %v14094_v5, %v9685_v2 }
  0x46   :  { %7206 = vmatpush.bf16.msra.mxu0 %v9398_v31  ;;  %v14144_v0 = vld [vmem:[#allocation5 + $0x3d4] sm:$0xf0]  ;;  %v9822_v4 = vor.u32 %v14128_v62, %v9821_v61  ;;  %v14110_v7 = vld [vmem:[#allocation5 + $0x2c4] sm:$0xf0]  ;;  %v9813_v9 = vld [vmem:[#allocation5 + $0x340] sm:$0xf] }
  0x47   :  { %7219 = vmatpush.bf16.msra.mxu1 %v9462_v35  ;;  %v9886_v8 = vor.u32 %v14144_v0, %v9885_v63  ;;  %v14126_v10 = vld [vmem:[#allocation5 + $0x344] sm:$0xf0]  ;;  %v9877_v11 = vld [vmem:[#allocation5 + $0x3c0] sm:$0xf]  ;;  %v9677_v13 = vld [vmem:[#allocation5 + $0x230] sm:$0xf]  ;;  %v9750_v21 = vor.u32 %v14110_v7, %v9749_v6 }
  0x48   :  { %7232 = vmatpush.bf16.msra.mxu2 %v9526_v36  ;;  %v14142_v12 = vld [vmem:[#allocation5 + $0x3c4] sm:$0xf0]  ;;  %v14092_v14 = vld [vmem:[#allocation5 + $0x234] sm:$0xf0]  ;;  %v9741_v16 = vld [vmem:[#allocation5 + $0x2b0] sm:$0xf]  ;;  %v9814_v22 = vor.u32 %v14126_v10, %v9813_v9 }
  0x49   :  { %7245 = vmatpush.bf16.msra.mxu3 %v9590_v39  ;;  %v14108_v17 = vld [vmem:[#allocation5 + $0x2b4] sm:$0xf0]  ;;  %v9805_v18 = vld [vmem:[#allocation5 + $0x330] sm:$0xf]  ;;  %v166_v20 = vld [vmem:[#allocation2 + $0x10] sm:$0xff]  ;;  %v9878_v25 = vor.u32 %v14142_v12, %v9877_v11  ;;  %v9678_v34 = vor.u32 %v14092_v14, %v9677_v13  ;;  %vm7188_vm1 = vcmask 326656  }
  0x4a   :  { %7251 = vmatpush.bf16.msrb.mxu0 %v9710_v40  ;;  %v14124_v19 = vld [vmem:[#allocation5 + $0x334] sm:$0xf0]  ;;  %v9869_v30 = vld [vmem:[#allocation5 + $0x3b0] sm:$0xf]  ;;  %v9742_v35 = vor.u32 %v14108_v17, %v9741_v16  ;;  %v9669_v37 = vld [vmem:[#allocation5 + $0x220] sm:$0xf] }
  0x4b   :  { %7264 = vmatpush.bf16.msrb.mxu1 %v9774_v41  ;;  %v14140_v31 = vld [vmem:[#allocation5 + $0x3b4] sm:$0xf0]  ;;  %v9806_v36 = vor.u32 %v14124_v19, %v9805_v18  ;;  %v14090_v38 = vld [vmem:[#allocation5 + $0x224] sm:$0xf0]  ;;  %v9733_v39 = vld [vmem:[#allocation5 + $0x2a0] sm:$0xf] }
  0x4c   :  { %7277 = vmatpush.bf16.msrb.mxu2 %v9838_v42  ;;  %v205_v23 = vld.sshfl [vmem:[#allocation1 + $0x10] sm:$0xff pattern:$0x73625140]  ;;  %v203_v24 = vld.sshfl [vmem:[#allocation1] sm:$0xff pattern:$0x73625140]  ;;  %v9870_v40 = vor.u32 %v14140_v31, %v9869_v30 }
  0x4d   :  { %7290 = vmatpush.bf16.msrb.mxu3 %v9902_v46  ;;  %v15539_v26 = vpack.c.bf16 %v205_v23, %v205_v23  ;;  %v15541_v27 = vpack.c.bf16 %v203_v24, %v203_v24  ;;  %v206_v28 = vld.sshfl [vmem:[#allocation1 + $0x18] sm:$0xff pattern:$0x73625140]  ;;  %v204_v29 = vld.sshfl [vmem:[#allocation1 + $0x8] sm:$0xff pattern:$0x73625140]  ;;  %v9670_v46 = vor.u32 %v14090_v38, %v9669_v37 }
  0x4e   :  { %7252 = vmatpush.bf16.msrb.mxu0 %v9702_v52  ;;  %v15543_v32 = vpack.c.bf16 %v206_v28, %v206_v28  ;;  %211 = vst [vmem:[#allocation1] ss:$4 sm:$0xff] %v166_v20  ;;  %v15545_v33 = vpack.c.bf16 %v204_v29, %v204_v29  ;;  %v14106_v41 = vld [vmem:[#allocation5 + $0x2a4] sm:$0xf0]  ;;  %v9797_v42 = vld [vmem:[#allocation5 + $0x320] sm:$0xf] }
  0x4f   :  { %7265 = vmatpush.bf16.msrb.mxu1 %v9766_v55  ;;  %7233 = vmatmul.bf16.vlgmr.msra.gmra.mxu2 %v15539_v26  ;;  %v14122_v43 = vld [vmem:[#allocation5 + $0x324] sm:$0xf0]  ;;  %v9861_v44 = vld [vmem:[#allocation5 + $0x3a0] sm:$0xf]  ;;  %v9661_v47 = vld [vmem:[#allocation5 + $0x210] sm:$0xf]  ;;  %v9734_v49 = vor.u32 %v14106_v41, %v9733_v39 }
  0x50   :  { %7278 = vmatpush.bf16.msrb.mxu2 %v9830_v56  ;;  %7207 = vmatmul.bf16.vlgmr.msra.gmra.mxu0 %v15541_v27  ;;  %v14138_v45 = vld [vmem:[#allocation5 + $0x3a4] sm:$0xf0]  ;;  %v14088_v48 = vld [vmem:[#allocation5 + $0x214] sm:$0xf0]  ;;  %v9798_v50 = vor.u32 %v14122_v43, %v9797_v42  ;;  %v9725_v51 = vld [vmem:[#allocation5 + $0x290] sm:$0xf] }
  0x51   :  { %7291 = vmatpush.bf16.msrb.mxu3 %v9894_v60  ;;  %7220 = vmatmul.bf16.vlgmr.msra.gmra.mxu1 %v15545_v33  ;;  %v14104_v52 = vld [vmem:[#allocation5 + $0x294] sm:$0xf0]  ;;  %v9789_v53 = vld [vmem:[#allocation5 + $0x310] sm:$0xf]  ;;  %v9862_v54 = vor.u32 %v14138_v45, %v9861_v44  ;;  %v9653_v59 = vld [vmem:[#allocation5 + $0x200] sm:$0xf]  ;;  %v9662_v60 = vor.u32 %v14088_v48, %v9661_v47 }
  0x52   :  { %7253 = vmatpush.bf16.msrb.mxu0 %v9694_v1  ;;  %7246 = vmatmul.bf16.vlgmr.msra.gmra.mxu3 %v15543_v32  ;;  %v14120_v55 = vld [vmem:[#allocation5 + $0x314] sm:$0xf0]  ;;  %v9853_v56 = vld [vmem:[#allocation5 + $0x390] sm:$0xf]  ;;  %v14086_v61 = vld [vmem:[#allocation5 + $0x204] sm:$0xf0]  ;;  %v9726_v0 = vor.u32 %v14104_v52, %v9725_v51 }
  0x53   :  { %7266 = vmatpush.bf16.msrb.mxu1 %v9758_v3  ;;  %v165_v57 = vld [vmem:[#allocation2 + $0x8] sm:$0xff]  ;;  %v14102_v63 = vld [vmem:[#allocation5 + $0x284] sm:$0xf0]  ;;  %v9790_v1 = vor.u32 %v14120_v55, %v9789_v53  ;;  %v9965_v7 = vld [vmem:[#allocation5 + $0x470] sm:$0xf]  ;;  %v9654_v12 = vor.u32 %v14086_v61, %v9653_v59  ;;  %s15461_s6 = smov [#allocation17]  }
  0x54   :  { %7279 = vmatpush.bf16.msrb.mxu2 %v9822_v4  ;;  %v14136_v58 = vld [vmem:[#allocation5 + $0x394] sm:$0xf0]  ;;  %202 = vst [vmem:[#allocation1 + $0x20] ss:$4 sm:$0xff] %v165_v57  ;;  %v9717_v62 = vld [vmem:[#allocation5 + $0x280] sm:$0xf] }
  0x55   :  { %7292 = vmatpush.bf16.msrb.mxu3 %v9886_v8  ;;  %v9781_v2 = vld [vmem:[#allocation5 + $0x300] sm:$0xf]  ;;  %v14118_v3 = vld [vmem:[#allocation5 + $0x304] sm:$0xf0]  ;;  %v9854_v5 = vor.u32 %v14136_v58, %v9853_v56  ;;  %v14164_v8 = vld [vmem:[#allocation5 + $0x474] sm:$0xf0]  ;;  %v9718_v16 = vor.u32 %v14102_v63, %v9717_v62 }
  0x56   :  { %7254 = vmatpush.bf16.msrb.mxu0 %v9686_v15  ;;  %v9845_v4 = vld [vmem:[#allocation5 + $0x380] sm:$0xf]  ;;  %v14134_v6 = vld [vmem:[#allocation5 + $0x384] sm:$0xf0]  ;;  %v10029_v9 = vld [vmem:[#allocation5 + $0x4f0] sm:$0xf]  ;;  %v9782_v17 = vor.u32 %v14118_v3, %v9781_v2 }
  0x57   :  { %7267 = vmatpush.bf16.msrb.mxu1 %v9750_v21  ;;  %v14180_v10 = vld [vmem:[#allocation5 + $0x4f4] sm:$0xf0]  ;;  %v10093_v11 = vld [vmem:[#allocation5 + $0x570] sm:$0xf]  ;;  %v9957_v18 = vld [vmem:[#allocation5 + $0x460] sm:$0xf]  ;;  %v9846_v21 = vor.u32 %v14134_v6, %v9845_v4 }
  0x58   :  { %7280 = vmatpush.bf16.msrb.mxu2 %v9814_v22  ;;  %v14196_v13 = vld [vmem:[#allocation5 + $0x574] sm:$0xf0]  ;;  %v10157_v14 = vld [vmem:[#allocation5 + $0x5f0] sm:$0xf]  ;;  %v14162_v19 = vld [vmem:[#allocation5 + $0x464] sm:$0xf0]  ;;  %v9966_v22 = vor.u32 %v14164_v8, %v9965_v7  ;;  %v10030_v29 = vor.u32 %v14180_v10, %v10029_v9 }
  0x59   :  { %7293 = vmatpush.bf16.msrb.mxu3 %v9878_v25  ;;  %v14212_v15 = vld [vmem:[#allocation5 + $0x5f4] sm:$0xf0]  ;;  %v167_v20 = vld [vmem:[#allocation2 + $0x18] sm:$0xff]  ;;  %v10021_v23 = vld [vmem:[#allocation5 + $0x4e0] sm:$0xf]  ;;  %v10094_v30 = vor.u32 %v14196_v13, %v10093_v11  ;;  %v9958_v43 = vor.u32 %v14162_v19, %v9957_v18  ;;  %s9379_s8 = sshll.u32 %s15461_s6, 4  ;;  %s9380_s8 = int_to_ptr.vmem [resolvable:$true] %s9379_s8 }
  0x5a   :  { %7255 = vmatpush.bf16.msrb.mxu0 %v9678_v34  ;;  %v14178_v24 = vld [vmem:[#allocation5 + $0x4e4] sm:$0xf0]  ;;  %v10149_v39 = vld [vmem:[#allocation5 + $0x5e0] sm:$0xf]  ;;  %v9949_v47 = vld [vmem:[#allocation5 + $0x450] sm:$0xf] }
  0x5b   :  { %7268 = vmatpush.bf16.msrb.mxu1 %v9742_v35  ;;  %v209_v25 = vld.sshfl [vmem:[#allocation1 + $0x30] sm:$0xff pattern:$0x73625140]  ;;  %v207_v28 = vld.sshfl [vmem:[#allocation1 + $0x20] sm:$0xff pattern:$0x73625140]  ;;  %v10158_v35 = vor.u32 %v14212_v15, %v10157_v14  ;;  %v10022_v45 = vor.u32 %v14178_v24, %v10021_v23 }
  0x5c   :  { %7281 = vmatpush.bf16.msrb.mxu2 %v9806_v36  ;;  %v210_v31 = vld.sshfl [vmem:[#allocation1 + $0x38] sm:$0xff pattern:$0x73625140]  ;;  %v208_v34 = vld.sshfl [vmem:[#allocation1 + $0x28] sm:$0xff pattern:$0x73625140]  ;;  %v15551_v38 = vpack.c.bf16 %v209_v25, %v209_v25  ;;  %v15553_v41 = vpack.c.bf16 %v207_v28, %v207_v28 }
  0x5d   :  { %7294 = vmatpush.bf16.msrb.mxu3 %v9870_v40  ;;  %v10085_v36 = vld [vmem:[#allocation5 + $0x560] sm:$0xf]  ;;  %v14194_v37 = vld [vmem:[#allocation5 + $0x564] sm:$0xf0]  ;;  %212 = vst [vmem:[#allocation1 + $0x20] ss:$4 sm:$0xff] %v167_v20  ;;  %v15555_v42 = vpack.c.bf16 %v210_v31, %v210_v31  ;;  %v15557_v44 = vpack.c.bf16 %v208_v34, %v208_v34 }
  0x5e   :  { %7256 = vmatpush.bf16.msrb.mxu0 %v9670_v46  ;;  %v14210_v40 = vld [vmem:[#allocation5 + $0x5e4] sm:$0xf0]  ;;  %v10086_v46 = vor.u32 %v14194_v37, %v10085_v36  ;;  %v14160_v48 = vld [vmem:[#allocation5 + $0x454] sm:$0xf0]  ;;  %v10077_v52 = vld [vmem:[#allocation5 + $0x550] sm:$0xf] }
  0x5f   :  { %7269 = vmatpush.bf16.msrb.mxu1 %v9734_v49  ;;  %v10013_v49 = vld [vmem:[#allocation5 + $0x4d0] sm:$0xf]  ;;  %v14176_v51 = vld [vmem:[#allocation5 + $0x4d4] sm:$0xf0]  ;;  %v9950_v56 = vor.u32 %v14160_v48, %v9949_v47  ;;  %v9941_v59 = vld [vmem:[#allocation5 + $0x440] sm:$0xf] }
  0x60   :  { %7282 = vmatpush.bf16.msrb.mxu2 %v9798_v50  ;;  %v10150_v50 = vor.u32 %v14210_v40, %v10149_v39  ;;  %v14192_v53 = vld [vmem:[#allocation5 + $0x554] sm:$0xf0]  ;;  %v10014_v57 = vor.u32 %v14176_v51, %v10013_v49  ;;  %v10005_v61 = vld [vmem:[#allocation5 + $0x4c0] sm:$0xf]  ;;  %v14174_v63 = vld [vmem:[#allocation5 + $0x4c4] sm:$0xf0] }
  0x61   :  { %7295 = vmatpush.bf16.msrb.mxu3 %v9862_v54  ;;  %v10141_v54 = vld [vmem:[#allocation5 + $0x5d0] sm:$0xf]  ;;  %v14208_v55 = vld [vmem:[#allocation5 + $0x5d4] sm:$0xf0]  ;;  %v10078_v58 = vor.u32 %v14192_v53, %v10077_v52  ;;  %v10133_v2 = vld [vmem:[#allocation5 + $0x5c0] sm:$0xf] }
  0x62   :  { %7257 = vmatpush.bf16.msrb.mxu0 %v9662_v60  ;;  %v14158_v60 = vld [vmem:[#allocation5 + $0x444] sm:$0xf0]  ;;  %v10142_v62 = vor.u32 %v14208_v55, %v10141_v54  ;;  %v9933_v7 = vld [vmem:[#allocation5 + $0x430] sm:$0xf]  ;;  %v14156_v8 = vld [vmem:[#allocation5 + $0x434] sm:$0xf0] }
  0x63   :  { %7270 = vmatpush.bf16.msrb.mxu1 %v9726_v0  ;;  %v10069_v0 = vld [vmem:[#allocation5 + $0x540] sm:$0xf]  ;;  %v14206_v3 = vld [vmem:[#allocation5 + $0x5c4] sm:$0xf0]  ;;  %v9942_v4 = vor.u32 %v14158_v60, %v9941_v59  ;;  %v9997_v9 = vld [vmem:[#allocation5 + $0x4b0] sm:$0xf] }
  0x64   :  { %7283 = vmatpush.bf16.msrb.mxu2 %v9790_v1  ;;  %v14190_v1 = vld [vmem:[#allocation5 + $0x544] sm:$0xf0]  ;;  %v10134_v10 = vor.u32 %v14206_v3, %v10133_v2  ;;  %v14172_v11 = vld [vmem:[#allocation5 + $0x4b4] sm:$0xf0]  ;;  %v10125_v14 = vld [vmem:[#allocation5 + $0x5b0] sm:$0xf] }
  0x65   :  { %7296 = vmatpush.bf16.msrb.mxu3 %v9854_v5  ;;  %v10006_v5 = vor.u32 %v14174_v63, %v10005_v61  ;;  %v10070_v6 = vor.u32 %v14190_v1, %v10069_v0  ;;  %v14188_v13 = vld [vmem:[#allocation5 + $0x534] sm:$0xf0]  ;;  %v9925_v19 = vld [vmem:[#allocation5 + $0x420] sm:$0xf]  ;;  %v14154_v20 = vld [vmem:[#allocation5 + $0x424] sm:$0xf0] }
  0x66   :  { %7258 = vmatpush.bf16.msrb.mxu0 %v9654_v12  ;;  %v10061_v12 = vld [vmem:[#allocation5 + $0x530] sm:$0xf]  ;;  %v14204_v15 = vld [vmem:[#allocation5 + $0x5b4] sm:$0xf0]  ;;  %v14170_v23 = vld [vmem:[#allocation5 + $0x4a4] sm:$0xf0] }
  0x67   :  { %7271 = vmatpush.bf16.msrb.mxu1 %v9718_v16  ;;  %v9934_v16 = vor.u32 %v14156_v8, %v9933_v7  ;;  %v10062_v18 = vor.u32 %v14188_v13, %v10061_v12  ;;  %v10053_v24 = vld [vmem:[#allocation5 + $0x520] sm:$0xf]  ;;  %v14186_v25 = vld [vmem:[#allocation5 + $0x524] sm:$0xf0]  ;;  %v14152_v36 = vld [vmem:[#allocation5 + $0x414] sm:$0xf0] }
  0x68   :  { %7284 = vmatpush.bf16.msrb.mxu2 %v9782_v17  ;;  %v9998_v17 = vor.u32 %v14172_v11, %v9997_v9  ;;  %v10117_v28 = vld [vmem:[#allocation5 + $0x5a0] sm:$0xf]  ;;  %v10054_v34 = vor.u32 %v14186_v25, %v10053_v24  ;;  %v9981_v37 = vld [vmem:[#allocation5 + $0x490] sm:$0xf]  ;;  %v14168_v40 = vld [vmem:[#allocation5 + $0x494] sm:$0xf0] }
  0x69   :  { %7297 = vmatpush.bf16.msrb.mxu3 %v9846_v21  ;;  %7259 = vmatmul.bf16.vlgmr.msrb.gmra.mxu0 %v15553_v41  ;;  %v9989_v21 = vld [vmem:[#allocation5 + $0x4a0] sm:$0xf]  ;;  %v14200_v47 = vld [vmem:[#allocation5 + $0x594] sm:$0xf0]  ;;  %v14166_v52 = vld [vmem:[#allocation5 + $0x484] sm:$0xf0]  ;;  %v9982_v53 = vor.u32 %v14168_v40, %v9981_v37 }
  0x6a   :  { %7303 = vmatpush.bf16.msra.mxu0 %v9966_v22  ;;  %7272 = vmatmul.bf16.vlgmr.msrb.gmra.mxu1 %v15557_v44  ;;  %v10126_v22 = vor.u32 %v14204_v15, %v10125_v14  ;;  %v9990_v31 = vor.u32 %v14170_v23, %v9989_v21  ;;  %v9909_v48 = vld [vmem:[#allocation5 + $0x400] sm:$0xf]  ;;  %v14198_v59 = vld [vmem:[#allocation5 + $0x584] sm:$0xf0]  ;;  %v10221_v60 = vld [vmem:[#allocation5 + $0x670] sm:$0xf] }
  0x6b   :  { %7316 = vmatpush.bf16.msra.mxu1 %v10030_v29  ;;  %7285 = vmatmul.bf16.vlgmr.msrb.gmra.mxu2 %v15551_v38  ;;  %v14202_v29 = vld [vmem:[#allocation5 + $0x5a4] sm:$0xf0]  ;;  %v9973_v51 = vld [vmem:[#allocation5 + $0x480] sm:$0xf]  ;;  %v14228_v61 = vld [vmem:[#allocation5 + $0x674] sm:$0xf0] }
  0x6c   :  { %7329 = vmatpush.bf16.msra.mxu2 %v10094_v30  ;;  %7298 = vmatmul.bf16.vlgmr.msrb.gmra.mxu3 %v15555_v42  ;;  %v9926_v30 = vor.u32 %v14154_v20, %v9925_v19  ;;  %v10118_v39 = vor.u32 %v14202_v29, %v10117_v28  ;;  %v10037_v55 = vld [vmem:[#allocation5 + $0x500] sm:$0xf]  ;;  %v14244_v63 = vld [vmem:[#allocation5 + $0x6f4] sm:$0xf0]  ;;  %v10349_v0 = vld [vmem:[#allocation5 + $0x770] sm:$0xf] }
  0x6d   :  { %7342 = vmatpush.bf16.msra.mxu3 %v10158_v35  ;;  %v9917_v35 = vld [vmem:[#allocation5 + $0x410] sm:$0xf]  ;;  %v14260_v2 = vld [vmem:[#allocation5 + $0x774] sm:$0xf0]  ;;  %v10213_v15 = vld [vmem:[#allocation5 + $0x660] sm:$0xf] }
  0x6e   :  { %7304 = vmatpush.bf16.msra.mxu0 %v9958_v43  ;;  %v10045_v43 = vld [vmem:[#allocation5 + $0x510] sm:$0xf]  ;;  %v9918_v49 = vor.u32 %v14152_v36, %v9917_v35  ;;  %v215_v8 = vld.sshfl [vmem:[#allocation1 + $0x10] sm:$0xff pattern:$0x73625140]  ;;  %v10350_v14 = vor.u32 %v14260_v2, %v10349_v0  ;;  %s9381_s30 = sshll.u32 %s15929_s9, 4  ;;  %s9382_s30 = int_to_ptr.hbm [resolvable:$true] %s9381_s30 }
  0x6f   :  { %7317 = vmatpush.bf16.msra.mxu1 %v10022_v45  ;;  %v14184_v45 = vld [vmem:[#allocation5 + $0x514] sm:$0xf0]  ;;  %v10413_v3 = vld [vmem:[#allocation5 + $0x7f0] sm:$0xf]  ;;  %v14242_v20 = vld [vmem:[#allocation5 + $0x6e4] sm:$0xf0]  ;;  %v15565_v23 = vpack.c.bf16 %v215_v8, %v215_v8 }
  0x70   :  { %7330 = vmatpush.bf16.msra.mxu2 %v10086_v46  ;;  %v10109_v46 = vld [vmem:[#allocation5 + $0x590] sm:$0xf]  ;;  %v10046_v54 = vor.u32 %v14184_v45, %v10045_v43  ;;  %v216_v12 = vld.sshfl [vmem:[#allocation1 + $0x18] sm:$0xff pattern:$0x73625140] }
  0x71   :  { %7343 = vmatpush.bf16.msra.mxu3 %v10150_v50  ;;  %v14150_v50 = vld [vmem:[#allocation5 + $0x404] sm:$0xf0]  ;;  %v214_v11 = vld.sshfl [vmem:[#allocation1 + $0x8] sm:$0xff pattern:$0x73625140]  ;;  %v15569_v29 = vpack.c.bf16 %v216_v12, %v216_v12 }
  0x72   :  { %7305 = vmatpush.bf16.msra.mxu0 %v9950_v56  ;;  %v14182_v56 = vld [vmem:[#allocation5 + $0x504] sm:$0xf0]  ;;  %v9910_v1 = vor.u32 %v14150_v50, %v9909_v48  ;;  %v10341_v21 = vld [vmem:[#allocation5 + $0x760] sm:$0xf]  ;;  %v15567_v24 = vpack.c.bf16 %v214_v11, %v214_v11  ;;  %v10205_v35 = vld [vmem:[#allocation5 + $0x650] sm:$0xf] }
  0x73   :  { %7318 = vmatpush.bf16.msra.mxu1 %v10014_v57  ;;  %v10101_v57 = vld [vmem:[#allocation5 + $0x580] sm:$0xf]  ;;  %v213_v7 = vld.sshfl [vmem:[#allocation1] sm:$0xff pattern:$0x73625140] }
  0x74   :  { %7331 = vmatpush.bf16.msra.mxu2 %v10078_v58  ;;  %v10110_v58 = vor.u32 %v14200_v47, %v10109_v46  ;;  %v10102_v9 = vor.u32 %v14198_v59, %v10101_v57  ;;  %v15563_v19 = vpack.c.bf16 %v213_v7, %v213_v7  ;;  %v10405_v25 = vld [vmem:[#allocation5 + $0x7e0] sm:$0xf]  ;;  %v14274_v28 = vld [vmem:[#allocation5 + $0x7e4] sm:$0xf0]  ;;  %v14224_v36 = vld [vmem:[#allocation5 + $0x654] sm:$0xf0] }
  0x75   :  { %7344 = vmatpush.bf16.msra.mxu3 %v10142_v62  ;;  %v10285_v62 = vld [vmem:[#allocation5 + $0x6f0] sm:$0xf]  ;;  %v14240_v40 = vld [vmem:[#allocation5 + $0x6d4] sm:$0xf0]  ;;  %v10206_v48 = vor.u32 %v14224_v36, %v10205_v35  ;;  %v14254_v57 = vld [vmem:[#allocation5 + $0x744] sm:$0xf0] }
  0x76   :  { %7306 = vmatpush.bf16.msra.mxu0 %v9942_v4  ;;  %v14276_v4 = vld [vmem:[#allocation5 + $0x7f4] sm:$0xf0]  ;;  %v10286_v13 = vor.u32 %v14244_v63, %v10285_v62  ;;  %v10269_v37 = vld [vmem:[#allocation5 + $0x6d0] sm:$0xf]  ;;  %v14270_v59 = vld [vmem:[#allocation5 + $0x7c4] sm:$0xf0] }
  0x77   :  { %7319 = vmatpush.bf16.msra.mxu1 %v10006_v5  ;;  %v9974_v5 = vor.u32 %v14166_v52, %v9973_v51  ;;  %v10333_v43 = vld [vmem:[#allocation5 + $0x750] sm:$0xf]  ;;  %v14256_v45 = vld [vmem:[#allocation5 + $0x754] sm:$0xf0]  ;;  %v10197_v51 = vld [vmem:[#allocation5 + $0x640] sm:$0xf] }
  0x78   :  { %7332 = vmatpush.bf16.msra.mxu2 %v10070_v6  ;;  %v10038_v6 = vor.u32 %v14182_v56, %v10037_v55  ;;  %v10397_v46 = vld [vmem:[#allocation5 + $0x7d0] sm:$0xf]  ;;  %v14272_v47 = vld [vmem:[#allocation5 + $0x7d4] sm:$0xf0]  ;;  %v10334_v50 = vor.u32 %v14256_v45, %v10333_v43  ;;  %v14222_v52 = vld [vmem:[#allocation5 + $0x644] sm:$0xf0] }
  0x79   :  { %7345 = vmatpush.bf16.msra.mxu3 %v10134_v10  ;;  %v10222_v10 = vor.u32 %v14228_v61, %v10221_v60  ;;  %v14238_v55 = vld [vmem:[#allocation5 + $0x6c4] sm:$0xf0]  ;;  %v10325_v56 = vld [vmem:[#allocation5 + $0x740] sm:$0xf]  ;;  %v10198_v60 = vor.u32 %v14222_v52, %v10197_v51  ;;  %v10189_v63 = vld [vmem:[#allocation5 + $0x630] sm:$0xf] }
  0x7a   :  { %7307 = vmatpush.bf16.msra.mxu0 %v9934_v16  ;;  %v14226_v16 = vld [vmem:[#allocation5 + $0x664] sm:$0xf0]  ;;  %v10326_v62 = vor.u32 %v14254_v57, %v10325_v56  ;;  %v14220_v0 = vld [vmem:[#allocation5 + $0x634] sm:$0xf0]  ;;  %v10181_v11 = vld [vmem:[#allocation5 + $0x620] sm:$0xf] }
  0x7b   :  { %7320 = vmatpush.bf16.msra.mxu1 %v9998_v17  ;;  %v10277_v17 = vld [vmem:[#allocation5 + $0x6e0] sm:$0xf]  ;;  %v14268_v7 = vld [vmem:[#allocation5 + $0x7b4] sm:$0xf0]  ;;  %v10190_v8 = vor.u32 %v14220_v0, %v10189_v63  ;;  %v14218_v12 = vld [vmem:[#allocation5 + $0x624] sm:$0xf0] }
  0x7c   :  { %7333 = vmatpush.bf16.msra.mxu2 %v10062_v18  ;;  %v10414_v18 = vor.u32 %v14276_v4, %v10413_v3  ;;  %v14236_v3 = vld [vmem:[#allocation5 + $0x6b4] sm:$0xf0]  ;;  %v10317_v4 = vld [vmem:[#allocation5 + $0x730] sm:$0xf]  ;;  %v10165_v43 = vld [vmem:[#allocation5 + $0x600] sm:$0xf] }
  0x7d   :  { %7346 = vmatpush.bf16.msra.mxu3 %v10126_v22  ;;  %v14258_v22 = vld [vmem:[#allocation5 + $0x764] sm:$0xf0]  ;;  %v10301_v35 = vld [vmem:[#allocation5 + $0x710] sm:$0xf]  ;;  %v14292_v57 = vld [vmem:[#allocation5 + $0x874] sm:$0xf0] }
  0x7e   :  { %7308 = vmatpush.bf16.msra.mxu0 %v9926_v30  ;;  %v10214_v30 = vor.u32 %v14226_v16, %v10213_v15  ;;  %v14234_v15 = vld [vmem:[#allocation5 + $0x6a4] sm:$0xf0]  ;;  %v10309_v16 = vld [vmem:[#allocation5 + $0x720] sm:$0xf]  ;;  %v10669_v0 = vld [vmem:[#allocation5 + $0x9f0] sm:$0xf] }
  0x7f   :  { %7321 = vmatpush.bf16.msra.mxu1 %v9990_v31  ;;  %v10278_v31 = vor.u32 %v14242_v20, %v10277_v17  ;;  %v14250_v17 = vld [vmem:[#allocation5 + $0x724] sm:$0xf0] }
  0x80   :  { %7334 = vmatpush.bf16.msra.mxu2 %v10054_v34  ;;  %v10342_v34 = vor.u32 %v14258_v22, %v10341_v21  ;;  %v14266_v20 = vld [vmem:[#allocation5 + $0x7a4] sm:$0xf0]  ;;  %v10182_v21 = vor.u32 %v14218_v12, %v10181_v11  ;;  %v10173_v22 = vld [vmem:[#allocation5 + $0x610] sm:$0xf]  ;;  %v10469_v12 = vld [vmem:[#allocation5 + $0x860] sm:$0xf] }
  0x81   :  { %7347 = vmatpush.bf16.msra.mxu3 %v10118_v39  ;;  %v10406_v39 = vor.u32 %v14274_v28, %v10405_v25  ;;  %v14216_v25 = vld [vmem:[#allocation5 + $0x614] sm:$0xf0]  ;;  %v14214_v45 = vld [vmem:[#allocation5 + $0x604] sm:$0xf0] }
  0x82   :  { %7309 = vmatpush.bf16.msra.mxu0 %v9918_v49  ;;  %v10270_v49 = vor.u32 %v14240_v40, %v10269_v37  ;;  %v14248_v37 = vld [vmem:[#allocation5 + $0x714] sm:$0xf0]  ;;  %v10166_v63 = vor.u32 %v14214_v45, %v10165_v43  ;;  %v10589_v45 = vld [vmem:[#allocation5 + $0x950] sm:$0xf] }
  0x83   :  { %7322 = vmatpush.bf16.msra.mxu1 %v9982_v53  ;;  %v10261_v53 = vld [vmem:[#allocation5 + $0x6c0] sm:$0xf]  ;;  %v14264_v40 = vld [vmem:[#allocation5 + $0x794] sm:$0xf0]  ;;  %v10302_v52 = vor.u32 %v14248_v37, %v10301_v35 }
  0x84   :  { %7335 = vmatpush.bf16.msra.mxu2 %v10046_v54  ;;  %v10398_v54 = vor.u32 %v14272_v47, %v10397_v46  ;;  %v10262_v61 = vor.u32 %v14238_v55, %v10261_v53  ;;  %v10174_v46 = vor.u32 %v14216_v25, %v10173_v22  ;;  %v10229_v47 = vld [vmem:[#allocation5 + $0x680] sm:$0xf]  ;;  %v10477_v55 = vld [vmem:[#allocation5 + $0x870] sm:$0xf]  ;;  %v14288_v37 = vld [vmem:[#allocation5 + $0x854] sm:$0xf0] }
  0x85   :  { %7348 = vmatpush.bf16.msra.mxu3 %v10110_v58  ;;  %v10389_v58 = vld [vmem:[#allocation5 + $0x7c0] sm:$0xf]  ;;  %v14304_v43 = vld [vmem:[#allocation5 + $0x8d4] sm:$0xf0] }
  0x86   :  { %7310 = vmatpush.bf16.msra.mxu0 %v9910_v1  ;;  %v10253_v1 = vld [vmem:[#allocation5 + $0x6b0] sm:$0xf]  ;;  %v10390_v2 = vor.u32 %v14270_v59, %v10389_v58  ;;  %v10357_v53 = vld [vmem:[#allocation5 + $0x780] sm:$0xf]  ;;  %v14308_v59 = vld [vmem:[#allocation5 + $0x8f4] sm:$0xf0] }
  0x87   :  { %7323 = vmatpush.bf16.msra.mxu1 %v9974_v5  ;;  %v14252_v5 = vld [vmem:[#allocation5 + $0x734] sm:$0xf0]  ;;  %v10541_v58 = vld [vmem:[#allocation5 + $0x8f0] sm:$0xf]  ;;  %v10661_v25 = vld [vmem:[#allocation5 + $0x9e0] sm:$0xf] }
  0x88   :  { %7336 = vmatpush.bf16.msra.mxu2 %v10038_v6  ;;  %v10381_v6 = vld [vmem:[#allocation5 + $0x7b0] sm:$0xf] }
  0x89   :  { %7349 = vmatpush.bf16.msra.mxu3 %v10102_v9  ;;  %7311 = vmatmul.bf16.vlgmr.msra.gmra.mxu0 %v15563_v19  ;;  %v10254_v9 = vor.u32 %v14236_v3, %v10253_v1  ;;  %v14340_v1 = vld [vmem:[#allocation5 + $0x9f4] sm:$0xf0] }
  0x8a   :  { %7355 = vmatpush.bf16.msrb.mxu0 %v10222_v10  ;;  %7324 = vmatmul.bf16.vlgmr.msra.gmra.mxu1 %v15567_v24  ;;  %v10318_v10 = vor.u32 %v14252_v5, %v10317_v4  ;;  %v217_v4 = vld.sshfl [vmem:[#allocation1 + $0x20] sm:$0xff pattern:$0x73625140]  ;;  %v219_v5 = vld.sshfl [vmem:[#allocation1 + $0x30] sm:$0xff pattern:$0x73625140] }
  0x8b   :  { %7368 = vmatpush.bf16.msrb.mxu1 %v10286_v13  ;;  %7337 = vmatmul.bf16.vlgmr.msra.gmra.mxu2 %v15565_v23  ;;  %v10245_v13 = vld [vmem:[#allocation5 + $0x6a0] sm:$0xf] }
  0x8c   :  { %7381 = vmatpush.bf16.msrb.mxu2 %v10350_v14  ;;  %7350 = vmatmul.bf16.vlgmr.msra.gmra.mxu3 %v15569_v29  ;;  %v10382_v14 = vor.u32 %v14268_v7, %v10381_v6  ;;  %v10246_v28 = vor.u32 %v14234_v15, %v10245_v13  ;;  %v10478_v7 = vor.u32 %v14292_v57, %v10477_v55  ;;  %v14290_v13 = vld [vmem:[#allocation5 + $0x864] sm:$0xf0]  ;;  %v10581_v57 = vld [vmem:[#allocation5 + $0x940] sm:$0xf] }
  0x8d   :  { %7394 = vmatpush.bf16.msrb.mxu3 %v10414_v18  ;;  %v10373_v18 = vld [vmem:[#allocation5 + $0x7a0] sm:$0xf]  ;;  %v10670_v15 = vor.u32 %v14340_v1, %v10669_v0  ;;  %v10445_v0 = vld [vmem:[#allocation5 + $0x830] sm:$0xf]  ;;  %v14284_v1 = vld [vmem:[#allocation5 + $0x834] sm:$0xf0] }
  0x8e   :  { %7356 = vmatpush.bf16.msrb.mxu0 %v10214_v30  ;;  %v10310_v30 = vor.u32 %v14250_v17, %v10309_v16  ;;  %v10374_v36 = vor.u32 %v14266_v20, %v10373_v18  ;;  %v15575_v16 = vpack.c.bf16 %v217_v4, %v217_v4  ;;  %v14306_v17 = vld [vmem:[#allocation5 + $0x8e4] sm:$0xf0]  ;;  %v10597_v18 = vld [vmem:[#allocation5 + $0x960] sm:$0xf]  ;;  %v14300_v4 = vld [vmem:[#allocation5 + $0x8b4] sm:$0xf0] }
  0x8f   :  { %7369 = vmatpush.bf16.msrb.mxu1 %v10278_v31  ;;  %v10237_v31 = vld [vmem:[#allocation5 + $0x690] sm:$0xf]  ;;  %v14322_v20 = vld [vmem:[#allocation5 + $0x964] sm:$0xf0] }
  0x90   :  { %7382 = vmatpush.bf16.msrb.mxu2 %v10342_v34  ;;  %v14232_v34 = vld [vmem:[#allocation5 + $0x694] sm:$0xf0]  ;;  %v10598_v35 = vor.u32 %v14322_v20, %v10597_v18  ;;  %v10565_v18 = vld [vmem:[#allocation5 + $0x920] sm:$0xf]  ;;  %v14314_v20 = vld [vmem:[#allocation5 + $0x924] sm:$0xf0] }
  0x91   :  { %7395 = vmatpush.bf16.msrb.mxu3 %v10406_v39  ;;  %v10365_v39 = vld [vmem:[#allocation5 + $0x790] sm:$0xf]  ;;  %v10238_v51 = vor.u32 %v14232_v34, %v10237_v31  ;;  %v10470_v31 = vor.u32 %v14290_v13, %v10469_v12  ;;  %v10437_v12 = vld [vmem:[#allocation5 + $0x820] sm:$0xf]  ;;  %v14282_v13 = vld [vmem:[#allocation5 + $0x824] sm:$0xf0] }
  0x92   :  { %7357 = vmatpush.bf16.msrb.mxu0 %v10206_v48  ;;  %v14230_v48 = vld [vmem:[#allocation5 + $0x684] sm:$0xf0]  ;;  %v10366_v56 = vor.u32 %v14264_v40, %v10365_v39  ;;  %v10525_v39 = vld [vmem:[#allocation5 + $0x8d0] sm:$0xf] }
  0x93   :  { %7370 = vmatpush.bf16.msrb.mxu1 %v10270_v49  ;;  %v10293_v49 = vld [vmem:[#allocation5 + $0x700] sm:$0xf] }
  0x94   :  { %7383 = vmatpush.bf16.msrb.mxu2 %v10334_v50  ;;  %v14246_v50 = vld [vmem:[#allocation5 + $0x704] sm:$0xf0] }
  0x95   :  { %7396 = vmatpush.bf16.msrb.mxu3 %v10398_v54  ;;  %v14262_v54 = vld [vmem:[#allocation5 + $0x784] sm:$0xf0]  ;;  %v10294_v3 = vor.u32 %v14246_v50, %v10293_v49  ;;  %v10526_v50 = vor.u32 %v14304_v43, %v10525_v39  ;;  %v10493_v39 = vld [vmem:[#allocation5 + $0x890] sm:$0xf] }
  0x96   :  { %7358 = vmatpush.bf16.msrb.mxu0 %v10198_v60  ;;  %v10605_v60 = vld [vmem:[#allocation5 + $0x970] sm:$0xf]  ;;  %v10358_v6 = vor.u32 %v14262_v54, %v10357_v53  ;;  %v14286_v53 = vld [vmem:[#allocation5 + $0x844] sm:$0xf0]  ;;  %v10517_v54 = vld [vmem:[#allocation5 + $0x8c0] sm:$0xf] }
  0x97   :  { %7371 = vmatpush.bf16.msrb.mxu1 %v10262_v61  ;;  %v14324_v61 = vld [vmem:[#allocation5 + $0x974] sm:$0xf0] }
  0x98   :  { %7384 = vmatpush.bf16.msrb.mxu2 %v10326_v62  ;;  %v168_v62 = vld [vmem:[#allocation2 + $0x20] sm:$0xff]  ;;  %v10606_v11 = vor.u32 %v14324_v61, %v10605_v60  ;;  %v14334_v60 = vld [vmem:[#allocation5 + $0x9c4] sm:$0xf0] }
  0x99   :  { %7397 = vmatpush.bf16.msrb.mxu3 %v10390_v2  ;;  %221 = vst [vmem:[#allocation1] ss:$4 sm:$0xff] %v168_v62  ;;  %v10230_v2 = vor.u32 %v14230_v48, %v10229_v47  ;;  %v10653_v47 = vld [vmem:[#allocation5 + $0x9d0] sm:$0xf]  ;;  %v14336_v48 = vld [vmem:[#allocation5 + $0x9d4] sm:$0xf0] }
  0x9a   :  { %7359 = vmatpush.bf16.msrb.mxu0 %v10190_v8  ;;  %v218_v8 = vld.sshfl [vmem:[#allocation1 + $0x28] sm:$0xff pattern:$0x73625140]  ;;  %v10654_v55 = vor.u32 %v14336_v48, %v10653_v47 }
  0x9b   :  { %7372 = vmatpush.bf16.msrb.mxu1 %v10254_v9  ;;  %v220_v9 = vld.sshfl [vmem:[#allocation1 + $0x38] sm:$0xff pattern:$0x73625140]  ;;  %v15579_v22 = vpack.c.bf16 %v218_v8, %v218_v8  ;;  %v14332_v8 = vld [vmem:[#allocation5 + $0x9b4] sm:$0xf0] }
  0x9c   :  { %7385 = vmatpush.bf16.msrb.mxu2 %v10318_v10  ;;  %v10542_v10 = vor.u32 %v14308_v59, %v10541_v58  ;;  %v14318_v58 = vld [vmem:[#allocation5 + $0x944] sm:$0xf0]  ;;  %v10645_v59 = vld [vmem:[#allocation5 + $0x9c0] sm:$0xf]  ;;  %v10621_v47 = vld [vmem:[#allocation5 + $0x990] sm:$0xf] }
  0x9d   :  { %7398 = vmatpush.bf16.msrb.mxu3 %v10382_v14  ;;  %v10533_v14 = vld [vmem:[#allocation5 + $0x8e0] sm:$0xf]  ;;  %v14328_v48 = vld [vmem:[#allocation5 + $0x994] sm:$0xf0] }
  0x9e   :  { %7360 = vmatpush.bf16.msrb.mxu0 %v10182_v21  ;;  %v15577_v21 = vpack.c.bf16 %v219_v5, %v219_v5  ;;  %v10534_v34 = vor.u32 %v14306_v17, %v10533_v14  ;;  %v10573_v5 = vld [vmem:[#allocation5 + $0x930] sm:$0xf]  ;;  %v10501_v14 = vld [vmem:[#allocation5 + $0x8a0] sm:$0xf]  ;;  %v14298_v17 = vld [vmem:[#allocation5 + $0x8a4] sm:$0xf0] }
  0x9f   :  { %7373 = vmatpush.bf16.msrb.mxu1 %v10246_v28  ;;  %v14338_v28 = vld [vmem:[#allocation5 + $0x9e4] sm:$0xf0] }
  0xa0   :  { %7386 = vmatpush.bf16.msrb.mxu2 %v10310_v30  ;;  %v15581_v30 = vpack.c.bf16 %v220_v9, %v220_v9  ;;  %v10662_v40 = vor.u32 %v14338_v28, %v10661_v25  ;;  %v10446_v9 = vor.u32 %v14284_v1, %v10445_v0  ;;  %v10629_v25 = vld [vmem:[#allocation5 + $0x9a0] sm:$0xf]  ;;  %v14330_v28 = vld [vmem:[#allocation5 + $0x9a4] sm:$0xf0]  ;;  %v14372_v0 = vld [vmem:[#allocation5 + $0xaf4] sm:$0xf0] }
  0xa1   :  { %7399 = vmatpush.bf16.msrb.mxu3 %v10374_v36  ;;  %v10461_v36 = vld [vmem:[#allocation5 + $0x850] sm:$0xf]  ;;  %v10630_v43 = vor.u32 %v14330_v28, %v10629_v25  ;;  %v10789_v25 = vld [vmem:[#allocation5 + $0xae0] sm:$0xf] }
  0xa2   :  { %7361 = vmatpush.bf16.msrb.mxu0 %v10174_v46  ;;  %v14320_v46 = vld [vmem:[#allocation5 + $0x954] sm:$0xf0]  ;;  %v10462_v49 = vor.u32 %v14288_v37, %v10461_v36  ;;  %v10566_v36 = vor.u32 %v14314_v20, %v10565_v18  ;;  %v10861_v1 = vld [vmem:[#allocation5 + $0xb70] sm:$0xf]  ;;  %v10725_v18 = vld [vmem:[#allocation5 + $0xa60] sm:$0xf] }
  0xa3   :  { %7374 = vmatpush.bf16.msrb.mxu1 %v10238_v51  ;;  %v10590_v51 = vor.u32 %v14320_v46, %v10589_v45  ;;  %v14280_v37 = vld [vmem:[#allocation5 + $0x814] sm:$0xf0]  ;;  %v10557_v45 = vld [vmem:[#allocation5 + $0x910] sm:$0xf]  ;;  %v14354_v20 = vld [vmem:[#allocation5 + $0xa64] sm:$0xf0] }
  0xa4   :  { %7387 = vmatpush.bf16.msrb.mxu2 %v10302_v52  ;;  %v10453_v52 = vld [vmem:[#allocation5 + $0x840] sm:$0xf]  ;;  %v14312_v46 = vld [vmem:[#allocation5 + $0x914] sm:$0xf0] }
  0xa5   :  { %7400 = vmatpush.bf16.msrb.mxu3 %v10366_v56  ;;  %v14302_v56 = vld [vmem:[#allocation5 + $0x8c4] sm:$0xf0]  ;;  %v10454_v61 = vor.u32 %v14286_v53, %v10453_v52  ;;  %v10485_v52 = vld [vmem:[#allocation5 + $0x880] sm:$0xf] }
  0xa6   :  { %7362 = vmatpush.bf16.msrb.mxu0 %v10166_v63  ;;  %v10518_v62 = vor.u32 %v14302_v56, %v10517_v54  ;;  %v10582_v63 = vor.u32 %v14318_v58, %v10581_v57  ;;  %v14294_v53 = vld [vmem:[#allocation5 + $0x884] sm:$0xf0]  ;;  %v10549_v54 = vld [vmem:[#allocation5 + $0x900] sm:$0xf]  ;;  %v10558_v57 = vor.u32 %v14312_v46, %v10557_v45  ;;  %v10726_v46 = vor.u32 %v14354_v20, %v10725_v18  ;;  %v14396_v18 = vld [vmem:[#allocation5 + $0xbb4] sm:$0xf0] }
  0xa7   :  { %7375 = vmatpush.bf16.msrb.mxu1 %v10230_v2  ;;  %v10509_v2 = vld [vmem:[#allocation5 + $0x8b0] sm:$0xf]  ;;  %v10613_v58 = vld [vmem:[#allocation5 + $0x980] sm:$0xf] }
  0xa8   :  { %7388 = vmatpush.bf16.msrb.mxu2 %v10294_v3  ;;  %v10646_v3 = vor.u32 %v14334_v60, %v10645_v59  ;;  %v14326_v59 = vld [vmem:[#allocation5 + $0x984] sm:$0xf0]  ;;  %v10733_v60 = vld [vmem:[#allocation5 + $0xa70] sm:$0xf] }
  0xa9   :  { %7401 = vmatpush.bf16.msrb.mxu3 %v10358_v6  ;;  %7363 = vmatmul.bf16.vlgmr.msrb.gmra.mxu0 %v15575_v16  ;;  %v14316_v6 = vld [vmem:[#allocation5 + $0x934] sm:$0xf0] }
  0xaa   :  { %7407 = vmatpush.bf16.msra.mxu0 %v10478_v7  ;;  %7376 = vmatmul.bf16.vlgmr.msrb.gmra.mxu1 %v15579_v22  ;;  %v10637_v7 = vld [vmem:[#allocation5 + $0x9b0] sm:$0xf] }
  0xab   :  { %7420 = vmatpush.bf16.msra.mxu1 %v10542_v10  ;;  %7389 = vmatmul.bf16.vlgmr.msrb.gmra.mxu2 %v15577_v21  ;;  %v10510_v10 = vor.u32 %v14300_v4, %v10509_v2  ;;  %v14388_v2 = vld [vmem:[#allocation5 + $0xb74] sm:$0xf0] }
  0xac   :  { %7433 = vmatpush.bf16.msra.mxu2 %v10606_v11  ;;  %7402 = vmatmul.bf16.vlgmr.msrb.gmra.mxu3 %v15581_v30  ;;  %v10574_v11 = vor.u32 %v14316_v6, %v10573_v5  ;;  %v10925_v5 = vld [vmem:[#allocation5 + $0xbf0] sm:$0xf]  ;;  %v14404_v6 = vld [vmem:[#allocation5 + $0xbf4] sm:$0xf0] }
  0xad   :  { %7446 = vmatpush.bf16.msra.mxu3 %v10670_v15  ;;  %v10638_v15 = vor.u32 %v14332_v8, %v10637_v7  ;;  %v10486_v7 = vor.u32 %v14294_v53, %v10485_v52  ;;  %v10926_v28 = vor.u32 %v14404_v6, %v10925_v5  ;;  %v14368_v53 = vld [vmem:[#allocation5 + $0xad4] sm:$0xf0]  ;;  %v14398_v5 = vld [vmem:[#allocation5 + $0xbc4] sm:$0xf0] }
  0xae   :  { %7408 = vmatpush.bf16.msra.mxu0 %v10470_v31  ;;  %v10438_v31 = vor.u32 %v14282_v13, %v10437_v12  ;;  %v224_v13 = vld.sshfl [vmem:[#allocation1 + $0x8] sm:$0xff pattern:$0x73625140] }
  0xaf   :  { %7421 = vmatpush.bf16.msra.mxu1 %v10534_v34  ;;  %v10429_v34 = vld [vmem:[#allocation5 + $0x810] sm:$0xf] }
  0xb0   :  { %7434 = vmatpush.bf16.msra.mxu2 %v10598_v35  ;;  %v10502_v35 = vor.u32 %v14298_v17, %v10501_v14  ;;  %v226_v14 = vld.sshfl [vmem:[#allocation1 + $0x18] sm:$0xff pattern:$0x73625140]  ;;  %v10862_v17 = vor.u32 %v14388_v2, %v10861_v1 }
  0xb1   :  { %7447 = vmatpush.bf16.msra.mxu3 %v10662_v40  ;;  %v14296_v40 = vld [vmem:[#allocation5 + $0x894] sm:$0xf0]  ;;  %v15593_v45 = vpack.c.bf16 %v226_v14, %v226_v14  ;;  %v14366_v1 = vld [vmem:[#allocation5 + $0xac4] sm:$0xf0]  ;;  %v10837_v2 = vld [vmem:[#allocation5 + $0xb40] sm:$0xf] }
  0xb2   :  { %7409 = vmatpush.bf16.msra.mxu0 %v10462_v49  ;;  %v10421_v49 = vld [vmem:[#allocation5 + $0x800] sm:$0xf]  ;;  %v10494_v56 = vor.u32 %v14296_v40, %v10493_v39  ;;  %v15591_v39 = vpack.c.bf16 %v224_v13, %v224_v13  ;;  %v14364_v13 = vld [vmem:[#allocation5 + $0xab4] sm:$0xf0]  ;;  %v10829_v14 = vld [vmem:[#allocation5 + $0xb30] sm:$0xf] }
  0xb3   :  { %7422 = vmatpush.bf16.msra.mxu1 %v10526_v50  ;;  %v14278_v50 = vld [vmem:[#allocation5 + $0x804] sm:$0xf0]  ;;  %v10917_v40 = vld [vmem:[#allocation5 + $0xbe0] sm:$0xf] }
  0xb4   :  { %7435 = vmatpush.bf16.msra.mxu2 %v10590_v51  ;;  %v10430_v51 = vor.u32 %v14280_v37, %v10429_v34  ;;  %v10422_v4 = vor.u32 %v14278_v50, %v10421_v49  ;;  %v14370_v34 = vld [vmem:[#allocation5 + $0xae4] sm:$0xf0]  ;;  %v10717_v49 = vld [vmem:[#allocation5 + $0xa50] sm:$0xf]  ;;  %v14352_v50 = vld [vmem:[#allocation5 + $0xa54] sm:$0xf0] }
  0xb5   :  { %7448 = vmatpush.bf16.msra.mxu3 %v10654_v55  ;;  %v14310_v55 = vld [vmem:[#allocation5 + $0x904] sm:$0xf0] }
  0xb6   :  { %7410 = vmatpush.bf16.msra.mxu0 %v10454_v61  ;;  %v10622_v61 = vor.u32 %v14328_v48, %v10621_v47  ;;  %v10550_v8 = vor.u32 %v14310_v55, %v10549_v54  ;;  %v10790_v47 = vor.u32 %v14370_v34, %v10789_v25  ;;  %v10845_v54 = vld [vmem:[#allocation5 + $0xb50] sm:$0xf]  ;;  %v14384_v55 = vld [vmem:[#allocation5 + $0xb54] sm:$0xf0]  ;;  %v10693_v25 = vld [vmem:[#allocation5 + $0xa20] sm:$0xf] }
  0xb7   :  { %7423 = vmatpush.bf16.msra.mxu1 %v10518_v62  ;;  %v14356_v62 = vld [vmem:[#allocation5 + $0xa74] sm:$0xf0] }
  0xb8   :  { %7436 = vmatpush.bf16.msra.mxu2 %v10582_v63  ;;  %v10797_v63 = vld [vmem:[#allocation5 + $0xaf0] sm:$0xf]  ;;  %v10734_v12 = vor.u32 %v14356_v62, %v10733_v60  ;;  %v10846_v60 = vor.u32 %v14384_v55, %v10845_v54  ;;  %v14350_v62 = vld [vmem:[#allocation5 + $0xa44] sm:$0xf0] }
  0xb9   :  { %7449 = vmatpush.bf16.msra.mxu3 %v10646_v3  ;;  %v169_v3 = vld [vmem:[#allocation2 + $0x28] sm:$0xff] }
  0xba   :  { %7411 = vmatpush.bf16.msra.mxu0 %v10446_v9  ;;  %222 = vst [vmem:[#allocation1 + $0x20] ss:$4 sm:$0xff] %v169_v3  ;;  %v223_v9 = vld.sshfl [vmem:[#allocation1] sm:$0xff pattern:$0x73625140] }
  0xbb   :  { %7424 = vmatpush.bf16.msra.mxu1 %v10510_v10  ;;  %v225_v10 = vld.sshfl [vmem:[#allocation1 + $0x10] sm:$0xff pattern:$0x73625140]  ;;  %v14382_v3 = vld [vmem:[#allocation5 + $0xb44] sm:$0xf0] }
  0xbc   :  { %7437 = vmatpush.bf16.msra.mxu2 %v10574_v11  ;;  %v10614_v11 = vor.u32 %v14326_v59, %v10613_v58  ;;  %v15589_v37 = vpack.c.bf16 %v225_v10, %v225_v10  ;;  %v10718_v58 = vor.u32 %v14352_v50, %v10717_v49  ;;  %v14348_v10 = vld [vmem:[#allocation5 + $0xa34] sm:$0xf0]  ;;  %v10885_v49 = vld [vmem:[#allocation5 + $0xba0] sm:$0xf]  ;;  %v14394_v50 = vld [vmem:[#allocation5 + $0xba4] sm:$0xf0] }
  0xbd   :  { %7450 = vmatpush.bf16.msra.mxu3 %v10638_v15  ;;  %v10798_v15 = vor.u32 %v14372_v0, %v10797_v63  ;;  %v10773_v63 = vld [vmem:[#allocation5 + $0xac0] sm:$0xf] }
  0xbe   :  { %7412 = vmatpush.bf16.msra.mxu0 %v10438_v31  ;;  %v15587_v31 = vpack.c.bf16 %v223_v9, %v223_v9  ;;  %v10701_v9 = vld [vmem:[#allocation5 + $0xa30] sm:$0xf] }
  0xbf   :  { %7425 = vmatpush.bf16.msra.mxu1 %v10502_v35  ;;  %v10853_v35 = vld [vmem:[#allocation5 + $0xb60] sm:$0xf]  ;;  %v10702_v20 = vor.u32 %v14348_v10, %v10701_v9 }
  0xc0   :  { %7438 = vmatpush.bf16.msra.mxu2 %v10566_v36  ;;  %v14386_v36 = vld [vmem:[#allocation5 + $0xb64] sm:$0xf0] }
  0xc1   :  { %7451 = vmatpush.bf16.msra.mxu3 %v10630_v43  ;;  %v14402_v43 = vld [vmem:[#allocation5 + $0xbe4] sm:$0xf0]  ;;  %v10854_v48 = vor.u32 %v14386_v36, %v10853_v35  ;;  %v10757_v36 = vld [vmem:[#allocation5 + $0xaa0] sm:$0xf] }
  0xc2   :  { %7413 = vmatpush.bf16.msra.mxu0 %v10430_v51  ;;  %v10781_v51 = vld [vmem:[#allocation5 + $0xad0] sm:$0xf]  ;;  %v10918_v52 = vor.u32 %v14402_v43, %v10917_v40  ;;  %v14346_v35 = vld [vmem:[#allocation5 + $0xa24] sm:$0xf0] }
  0xc3   :  { %7426 = vmatpush.bf16.msra.mxu1 %v10494_v56  ;;  %v10909_v56 = vld [vmem:[#allocation5 + $0xbd0] sm:$0xf]  ;;  %v10782_v59 = vor.u32 %v14368_v53, %v10781_v51  ;;  %v1557_v40 = vld [vmem:[#allocation7] sm:$0x3]  ;;  %v10694_v51 = vor.u32 %v14346_v35, %v10693_v25 }
  0xc4   :  { %7439 = vmatpush.bf16.msra.mxu2 %v10558_v57  ;;  %v14400_v57 = vld [vmem:[#allocation5 + $0xbd4] sm:$0xf0]  ;;  %v1559_v53 = vperm.slane %v1557_v40, 0 }
  0xc5   :  { %7452 = vmatpush.bf16.msra.mxu3 %v10622_v61  ;;  %v10709_v61 = vld [vmem:[#allocation5 + $0xa40] sm:$0xf]  ;;  %v10910_v0 = vor.u32 %v14400_v57, %v10909_v56  ;;  %v14344_v56 = vld [vmem:[#allocation5 + $0xa14] sm:$0xf0]  ;;  %v10749_v57 = vld [vmem:[#allocation5 + $0xa90] sm:$0xf] }
  0xc6   :  { %7414 = vmatpush.bf16.msra.mxu0 %v10422_v4  ;;  %v10901_v4 = vld [vmem:[#allocation5 + $0xbc0] sm:$0xf]  ;;  %v10710_v6 = vor.u32 %v14350_v62, %v10709_v61  ;;  %v14376_v61 = vld [vmem:[#allocation5 + $0xb14] sm:$0xf0]  ;;  %v10877_v62 = vld [vmem:[#allocation5 + $0xb90] sm:$0xf] }
  0xc7   :  { %7427 = vmatpush.bf16.msra.mxu1 %v10486_v7  ;;  %v10774_v7 = vor.u32 %v14366_v1, %v10773_v63  ;;  %v14392_v63 = vld [vmem:[#allocation5 + $0xb94] sm:$0xf0]  ;;  %v14342_v1 = vld [vmem:[#allocation5 + $0xa04] sm:$0xf0] }
  0xc8   :  { %7440 = vmatpush.bf16.msra.mxu2 %v10550_v8  ;;  %v10838_v8 = vor.u32 %v14382_v3, %v10837_v2 }
  0xc9   :  { %7453 = vmatpush.bf16.msra.mxu3 %v10614_v11  ;;  %7415 = vmatmul.bf16.vlgmr.msra.gmra.mxu0 %v15587_v31  ;;  %v10765_v11 = vld [vmem:[#allocation5 + $0xab0] sm:$0xf] }
  0xca   :  { %7459 = vmatpush.bf16.msrb.mxu0 %v10734_v12  ;;  %7428 = vmatmul.bf16.vlgmr.msra.gmra.mxu1 %v15591_v39  ;;  %v10902_v12 = vor.u32 %v14398_v5, %v10901_v4  ;;  %v10741_v4 = vld [vmem:[#allocation5 + $0xa80] sm:$0xf]  ;;  %v14358_v5 = vld [vmem:[#allocation5 + $0xa84] sm:$0xf0] }
  0xcb   :  { %7472 = vmatpush.bf16.msrb.mxu1 %v10798_v15  ;;  %7441 = vmatmul.bf16.vlgmr.msra.gmra.mxu2 %v15589_v37  ;;  %v14380_v15 = vld [vmem:[#allocation5 + $0xb34] sm:$0xf0] }
  0xcc   :  { %7485 = vmatpush.bf16.msrb.mxu2 %v10862_v17  ;;  %7454 = vmatmul.bf16.vlgmr.msra.gmra.mxu3 %v15593_v45  ;;  %v10893_v17 = vld [vmem:[#allocation5 + $0xbb0] sm:$0xf]  ;;  %v10830_v34 = vor.u32 %v14380_v15, %v10829_v14  ;;  %v10878_v15 = vor.u32 %v14392_v63, %v10877_v62 }
  0xcd   :  { %7498 = vmatpush.bf16.msrb.mxu3 %v10926_v28  ;;  %v10766_v28 = vor.u32 %v14364_v13, %v10765_v11  ;;  %v10894_v43 = vor.u32 %v14396_v18, %v10893_v17  ;;  %v7208_v2 = vpop.f32.mrf.mxu0  ;;  %v14390_v13 = vld [vmem:[#allocation5 + $0xb84] sm:$0xf0]  ;;  %v10989_v14 = vld [vmem:[#allocation5 + $0xc70] sm:$0xf]  ;;  %v14420_v17 = vld [vmem:[#allocation5 + $0xc74] sm:$0xf0] }
  0xce   :  { %7460 = vmatpush.bf16.msrb.mxu0 %v10726_v46  ;;  %v14362_v46 = vld [vmem:[#allocation5 + $0xaa4] sm:$0xf0]  ;;  %v7221_v9 = vpop.f32.mrf.mxu1  ;;  %v11053_v18 = vld [vmem:[#allocation5 + $0xcf0] sm:$0xf] }
  0xcf   :  { %7473 = vmatpush.bf16.msrb.mxu1 %v10790_v47  ;;  %v10821_v47 = vld [vmem:[#allocation5 + $0xb20] sm:$0xf]  ;;  %v10758_v54 = vor.u32 %v14362_v46, %v10757_v36  ;;  %v14468_v46 = vld [vmem:[#allocation5 + $0xdf4] sm:$0xf0] }
  0xd0   :  { %7486 = vmatpush.bf16.msrb.mxu2 %v10854_v48  ;;  %v14378_v48 = vld [vmem:[#allocation5 + $0xb24] sm:$0xf0] }
  0xd1   :  { %7499 = vmatpush.bf16.msrb.mxu3 %v10918_v52  ;;  %v10685_v52 = vld [vmem:[#allocation5 + $0xa10] sm:$0xf]  ;;  %v10822_v55 = vor.u32 %v14378_v48, %v10821_v47  ;;  %v170_v36 = vld [vmem:[#allocation2 + $0x30] sm:$0xff]  ;;  %v10742_v48 = vor.u32 %v14358_v5, %v10741_v4 }
  0xd2   :  { %7461 = vmatpush.bf16.msrb.mxu0 %v10718_v58  ;;  %v14360_v58 = vld [vmem:[#allocation5 + $0xa94] sm:$0xf0]  ;;  %v10686_v3 = vor.u32 %v14344_v56, %v10685_v52  ;;  %v7234_v35 = vpop.f32.mrf.mxu2  ;;  %231 = vst [vmem:[#allocation1] ss:$4 sm:$0xff] %v170_v36  ;;  %v14450_v4 = vld [vmem:[#allocation5 + $0xd64] sm:$0xf0] }
  0xd3   :  { %7474 = vmatpush.bf16.msrb.mxu1 %v10782_v59  ;;  %v10886_v59 = vor.u32 %v14394_v50, %v10885_v49  ;;  %v10750_v10 = vor.u32 %v14360_v58, %v10749_v57  ;;  %v227_v50 = vld.sshfl [vmem:[#allocation1 + $0x20] sm:$0xff pattern:$0x73625140]  ;;  %v14464_v36 = vld [vmem:[#allocation5 + $0xdd4] sm:$0xf0] }
  0xd4   :  { %7487 = vmatpush.bf16.msrb.mxu2 %v10846_v60  ;;  %v10813_v60 = vld [vmem:[#allocation5 + $0xb10] sm:$0xf] }
  0xd5   :  { %7500 = vmatpush.bf16.msrb.mxu3 %v10910_v0  ;;  %v10677_v0 = vld [vmem:[#allocation5 + $0xa00] sm:$0xf]  ;;  %v10814_v11 = vor.u32 %v14376_v61, %v10813_v60  ;;  %v7247_v56 = vpop.f32.mrf.mxu3  ;;  %v14418_v60 = vld [vmem:[#allocation5 + $0xc64] sm:$0xf0]  ;;  %v7210_v63 = vpop.f32.mrf.mxu0 }
  0xd6   :  { %7462 = vmatpush.bf16.msrb.mxu0 %v10710_v6  ;;  %v10805_v6 = vld [vmem:[#allocation5 + $0xb00] sm:$0xf]  ;;  %v10678_v40 = vor.u32 %v14342_v1, %v10677_v0  ;;  %v15601_v1 = vpack.c.bf16 %v227_v50, %v227_v50  ;;  %v7223_v5 = vpop.f32.mrf.mxu1  ;;  %v14412_v63 = vld [vmem:[#allocation5 + $0xc34] sm:$0xf0] }
  0xd7   :  { %7475 = vmatpush.bf16.msrb.mxu1 %v10774_v7  ;;  %v14374_v7 = vld [vmem:[#allocation5 + $0xb04] sm:$0xf0]  ;;  %v11045_v61 = vld [vmem:[#allocation5 + $0xce0] sm:$0xf]  ;;  %v14428_v5 = vld [vmem:[#allocation5 + $0xcb4] sm:$0xf0] }
  0xd8   :  { %7488 = vmatpush.bf16.msrb.mxu2 %v10838_v8  ;;  %v7209_v8 = vadd.f32 %v7208_v2, %v1559_v53  ;;  %v10806_v49 = vor.u32 %v14374_v7, %v10805_v6  ;;  %v10990_v53 = vor.u32 %v14420_v17, %v10989_v14  ;;  %v14434_v2 = vld [vmem:[#allocation5 + $0xce4] sm:$0xf0]  ;;  %v10973_v14 = vld [vmem:[#allocation5 + $0xc50] sm:$0xf]  ;;  %v11029_v50 = vld [vmem:[#allocation5 + $0xcc0] sm:$0xf] }
  0xd9   :  { %7501 = vmatpush.bf16.msrb.mxu3 %v10902_v12  ;;  %v10869_v12 = vld [vmem:[#allocation5 + $0xb80] sm:$0xf]  ;;  %v11037_v17 = vld [vmem:[#allocation5 + $0xcd0] sm:$0xf] }
  0xda   :  { %7463 = vmatpush.bf16.msrb.mxu0 %v10702_v20  ;;  %v14436_v20 = vld [vmem:[#allocation5 + $0xcf4] sm:$0xf0]  ;;  %v7222_v25 = vadd.f32 %v7221_v9, %v7209_v8  ;;  %v10870_v52 = vor.u32 %v14390_v13, %v10869_v12  ;;  %v11173_v8 = vld [vmem:[#allocation5 + $0xde0] sm:$0xf]  ;;  %v14466_v9 = vld [vmem:[#allocation5 + $0xde4] sm:$0xf0]  ;;  %v11046_v12 = vor.u32 %v14434_v2, %v11045_v61 }
  0xdb   :  { %7476 = vmatpush.bf16.msrb.mxu1 %v10766_v28  ;;  %v11117_v28 = vld [vmem:[#allocation5 + $0xd70] sm:$0xf]  ;;  %v11054_v57 = vor.u32 %v14436_v20, %v11053_v18  ;;  %v7236_v18 = vpop.f32.mrf.mxu2  ;;  %v11174_v20 = vor.u32 %v14466_v9, %v11173_v8  ;;  %v14444_v9 = vld [vmem:[#allocation5 + $0xd34] sm:$0xf0] }
  0xdc   :  { %7489 = vmatpush.bf16.msrb.mxu2 %v10830_v34  ;;  %v14452_v34 = vld [vmem:[#allocation5 + $0xd74] sm:$0xf0]  ;;  %v7235_v47 = vadd.f32 %v7234_v35, %v7222_v25  ;;  %v11165_v35 = vld [vmem:[#allocation5 + $0xdd0] sm:$0xf]  ;;  %v10949_v18 = vld [vmem:[#allocation5 + $0xc20] sm:$0xf] }
  0xdd   :  { %7502 = vmatpush.bf16.msrb.mxu3 %v10894_v43  ;;  %v11181_v43 = vld [vmem:[#allocation5 + $0xdf0] sm:$0xf]  ;;  %v11118_v58 = vor.u32 %v14452_v34, %v11117_v28  ;;  %v14432_v25 = vld [vmem:[#allocation5 + $0xcd4] sm:$0xf0] }
  0xde   :  { %7464 = vmatpush.bf16.msrb.mxu0 %v10694_v51  ;;  %v229_v51 = vld.sshfl [vmem:[#allocation1 + $0x30] sm:$0xff pattern:$0x73625140]  ;;  %v15599_v62 = vadd.f32 %v7247_v56, %v7235_v47  ;;  %v11182_v0 = vor.u32 %v14468_v46, %v11181_v43  ;;  %v11101_v28 = vld [vmem:[#allocation5 + $0xd50] sm:$0xf]  ;;  %v7249_v43 = vpop.f32.mrf.mxu3  ;;  %v11038_v46 = vor.u32 %v14432_v25, %v11037_v17 }
  0xdf   :  { %7477 = vmatpush.bf16.msrb.mxu1 %v10758_v54  ;;  %v228_v54 = vld.sshfl [vmem:[#allocation1 + $0x28] sm:$0xff pattern:$0x73625140]  ;;  %v15603_v6 = vpack.c.bf16 %v229_v51, %v229_v51  ;;  %v11166_v51 = vor.u32 %v14464_v36, %v11165_v35  ;;  %v14462_v56 = vld [vmem:[#allocation5 + $0xdc4] sm:$0xf0] }
  0xe0   :  { %7490 = vmatpush.bf16.msrb.mxu2 %v10822_v55  ;;  %v230_v55 = vld.sshfl [vmem:[#allocation1 + $0x38] sm:$0xff pattern:$0x73625140]  ;;  %v15605_v7 = vpack.c.bf16 %v228_v54, %v228_v54  ;;  %v14448_v34 = vld [vmem:[#allocation5 + $0xd54] sm:$0xf0] }
  0xe1   :  { %7503 = vmatpush.bf16.msrb.mxu3 %v10886_v59  ;;  %v10981_v59 = vld [vmem:[#allocation5 + $0xc60] sm:$0xf]  ;;  %v11102_v47 = vor.u32 %v14448_v34, %v11101_v28  ;;  %v14446_v54 = vld [vmem:[#allocation5 + $0xd44] sm:$0xf0]  ;;  %v10957_v61 = vld [vmem:[#allocation5 + $0xc30] sm:$0xf] }
  0xe2   :  { %7465 = vmatpush.bf16.msrb.mxu0 %v10686_v3  ;;  %v11109_v3 = vld [vmem:[#allocation5 + $0xd60] sm:$0xf]  ;;  %v11085_v8 = vld [vmem:[#allocation5 + $0xd30] sm:$0xf]  ;;  %v14426_v34 = vld [vmem:[#allocation5 + $0xca4] sm:$0xf0] }
  0xe3   :  { %7478 = vmatpush.bf16.msrb.mxu1 %v10750_v10  ;;  %v15607_v10 = vpack.c.bf16 %v230_v55, %v230_v55  ;;  %v11110_v13 = vor.u32 %v14450_v4, %v11109_v3  ;;  %v11157_v55 = vld [vmem:[#allocation5 + $0xdc0] sm:$0xf]  ;;  %v11086_v17 = vor.u32 %v14444_v9, %v11085_v8  ;;  %v14442_v36 = vld [vmem:[#allocation5 + $0xd24] sm:$0xf0] }
  0xe4   :  { %7491 = vmatpush.bf16.msrb.mxu2 %v10814_v11  ;;  %v10982_v11 = vor.u32 %v14418_v60, %v10981_v59  ;;  %v11158_v4 = vor.u32 %v14462_v56, %v11157_v55  ;;  %v11013_v25 = vld [vmem:[#allocation5 + $0xca0] sm:$0xf]  ;;  %v11005_v55 = vld [vmem:[#allocation5 + $0xc90] sm:$0xf]  ;;  %v14424_v56 = vld [vmem:[#allocation5 + $0xc94] sm:$0xf0] }
  0xe5   :  { %7504 = vmatpush.bf16.msrb.mxu3 %v10878_v15  ;;  %v14416_v15 = vld [vmem:[#allocation5 + $0xc54] sm:$0xf0]  ;;  %v11077_v35 = vld [vmem:[#allocation5 + $0xd20] sm:$0xf]  ;;  %v14438_v9 = vld [vmem:[#allocation5 + $0xd04] sm:$0xf0] }
  0xe6   :  { %7466 = vmatpush.bf16.msrb.mxu0 %v10678_v40  ;;  %v10974_v40 = vor.u32 %v14416_v15, %v10973_v14  ;;  %v10958_v14 = vor.u32 %v14412_v63, %v10957_v61  ;;  %v11133_v61 = vld [vmem:[#allocation5 + $0xd90] sm:$0xf]  ;;  %v14456_v63 = vld [vmem:[#allocation5 + $0xd94] sm:$0xf0]  ;;  %v11061_v8 = vld [vmem:[#allocation5 + $0xd00] sm:$0xf] }
  0xe7   :  { %7479 = vmatpush.bf16.msrb.mxu1 %v10742_v48  ;;  %v10965_v48 = vld [vmem:[#allocation5 + $0xc40] sm:$0xf]  ;;  %v7273_v3 = vpop.f32.mrf.mxu1 }
  0xe8   :  { %7492 = vmatpush.bf16.msrb.mxu2 %v10806_v49  ;;  %v14414_v49 = vld [vmem:[#allocation5 + $0xc44] sm:$0xf0] }
  0xe9   :  { %7505 = vmatpush.bf16.msrb.mxu3 %v10870_v52  ;;  %7467 = vmatmul.bf16.vlgmr.msrb.gmra.mxu0 %v15601_v1  ;;  %v14430_v52 = vld [vmem:[#allocation5 + $0xcc4] sm:$0xf0] }
  0xea   :  { %7511 = vmatpush.bf16.msra.mxu0 %v10990_v53  ;;  %7480 = vmatmul.bf16.vlgmr.msrb.gmra.mxu1 %v15605_v7  ;;  %v11093_v53 = vld [vmem:[#allocation5 + $0xd40] sm:$0xf]  ;;  %v11030_v59 = vor.u32 %v14430_v52, %v11029_v50  ;;  %v10941_v50 = vld [vmem:[#allocation5 + $0xc10] sm:$0xf]  ;;  %v11014_v52 = vor.u32 %v14426_v34, %v11013_v25 }
  0xeb   :  { %7524 = vmatpush.bf16.msra.mxu1 %v11054_v57  ;;  %7493 = vmatmul.bf16.vlgmr.msrb.gmra.mxu2 %v15603_v6  ;;  %v10966_v57 = vor.u32 %v14414_v49, %v10965_v48  ;;  %v11094_v60 = vor.u32 %v14446_v54, %v11093_v53  ;;  %v11078_v53 = vor.u32 %v14442_v36, %v11077_v35  ;;  %v14408_v54 = vld [vmem:[#allocation5 + $0xc14] sm:$0xf0]  ;;  %v11309_v25 = vld [vmem:[#allocation5 + $0xef0] sm:$0xf] }
  0xec   :  { %7537 = vmatpush.bf16.msra.mxu2 %v11118_v58  ;;  %7506 = vmatmul.bf16.vlgmr.msrb.gmra.mxu3 %v15607_v10  ;;  %v7260_v58 = vpop.f32.mrf.mxu0  ;;  %v11373_v34 = vld [vmem:[#allocation5 + $0xf70] sm:$0xf]  ;;  %v14516_v35 = vld [vmem:[#allocation5 + $0xf74] sm:$0xf0] }
  0xed   :  { %7550 = vmatpush.bf16.msra.mxu3 %v11182_v0  ;;  %v11021_v0 = vld [vmem:[#allocation5 + $0xcb0] sm:$0xf]  ;;  %v7261_v2 = vadd.f32 %v7260_v58, %v15599_v62 }
  0xee   :  { %7512 = vmatpush.bf16.msra.mxu0 %v10982_v11  ;;  %v11149_v11 = vld [vmem:[#allocation5 + $0xdb0] sm:$0xf]  ;;  %v11022_v15 = vor.u32 %v14428_v5, %v11021_v0  ;;  %v7286_v28 = vpop.f32.mrf.mxu2  ;;  %v10933_v0 = vld [vmem:[#allocation5 + $0xc00] sm:$0xf]  ;;  %v14422_v5 = vld [vmem:[#allocation5 + $0xc84] sm:$0xf0] }
  0xef   :  { %7525 = vmatpush.bf16.msra.mxu1 %v11046_v12  ;;  %v14460_v12 = vld [vmem:[#allocation5 + $0xdb4] sm:$0xf0]  ;;  %v7299_v43 = vpop.f32.mrf.mxu3  ;;  %v171_v36 = vld [vmem:[#allocation2 + $0x38] sm:$0xff] }
  0xf0   :  { %7538 = vmatpush.bf16.msra.mxu2 %v11110_v13  ;;  %v7274_v13 = vadd.f32 %v7273_v3, %v7261_v2  ;;  %v11150_v62 = vor.u32 %v14460_v12, %v11149_v11  ;;  %v14406_v2 = vld [vmem:[#allocation5 + $0xc04] sm:$0xf0]  ;;  %v10942_v3 = vor.u32 %v14408_v54, %v10941_v50  ;;  %v11006_v11 = vor.u32 %v14424_v56, %v11005_v55  ;;  %v234_v54 = vld.sshfl [vmem:[#allocation1 + $0x8] sm:$0xff pattern:$0x73625140] }
  0xf1   :  { %7551 = vmatpush.bf16.msra.mxu3 %v11174_v20  ;;  %v14410_v20 = vld [vmem:[#allocation5 + $0xc24] sm:$0xf0]  ;;  %232 = vst [vmem:[#allocation1 + $0x20] ss:$4 sm:$0xff] %v171_v36 }
  0xf2   :  { %7513 = vmatpush.bf16.msra.mxu0 %v10974_v40  ;;  %v7287_v40 = vadd.f32 %v7286_v28, %v7274_v13  ;;  %v10950_v48 = vor.u32 %v14410_v20, %v10949_v18  ;;  %v11125_v13 = vld [vmem:[#allocation5 + $0xd80] sm:$0xf]  ;;  %v11134_v18 = vor.u32 %v14456_v63, %v11133_v61  ;;  %v14484_v20 = vld [vmem:[#allocation5 + $0xe74] sm:$0xf0] }
  0xf3   :  { %7526 = vmatpush.bf16.msra.mxu1 %v11038_v46  ;;  %v11141_v46 = vld [vmem:[#allocation5 + $0xda0] sm:$0xf]  ;;  %v14500_v28 = vld [vmem:[#allocation5 + $0xef4] sm:$0xf0] }
  0xf4   :  { %7539 = vmatpush.bf16.msra.mxu2 %v11102_v47  ;;  %v14458_v47 = vld [vmem:[#allocation5 + $0xda4] sm:$0xf0]  ;;  %v15614_v49 = vadd.f32 %v7299_v43, %v7287_v40  ;;  %v10934_v40 = vor.u32 %v14406_v2, %v10933_v0  ;;  %v11437_v43 = vld [vmem:[#allocation5 + $0xff0] sm:$0xf]  ;;  %v11310_v56 = vor.u32 %v14500_v28, %v11309_v25  ;;  %v11365_v2 = vld [vmem:[#allocation5 + $0xf60] sm:$0xf] }
  0xf5   :  { %7552 = vmatpush.bf16.msra.mxu3 %v11166_v51  ;;  %v7262_v51 = vpop.f32.mrf.mxu0  ;;  %v11142_v58 = vor.u32 %v14458_v47, %v11141_v46  ;;  %v14532_v46 = vld [vmem:[#allocation5 + $0xff4] sm:$0xf0]  ;;  %v233_v50 = vld.sshfl [vmem:[#allocation1] sm:$0xff pattern:$0x73625140] }
  0xf6   :  { %7514 = vmatpush.bf16.msra.mxu0 %v10966_v57  ;;  %v7275_v57 = vpop.f32.mrf.mxu1  ;;  %v235_v51 = vld.sshfl [vmem:[#allocation1 + $0x10] sm:$0xff pattern:$0x73625140]  ;;  %v236_v55 = vld.sshfl [vmem:[#allocation1 + $0x18] sm:$0xff pattern:$0x73625140]  ;;  %v11438_v61 = vor.u32 %v14532_v46, %v11437_v43  ;;  %v15616_v63 = vpack.c.bf16 %v233_v50, %v233_v50 }
  0xf7   :  { %7527 = vmatpush.bf16.msra.mxu1 %v11030_v59  ;;  %v11069_v59 = vld [vmem:[#allocation5 + $0xd10] sm:$0xf]  ;;  %v11374_v57 = vor.u32 %v14516_v35, %v11373_v34  ;;  %v14498_v0 = vld [vmem:[#allocation5 + $0xee4] sm:$0xf0]  ;;  %v14496_v25 = vld [vmem:[#allocation5 + $0xed4] sm:$0xf0] }
  0xf8   :  { %7540 = vmatpush.bf16.msra.mxu2 %v11094_v60  ;;  %v14440_v60 = vld [vmem:[#allocation5 + $0xd14] sm:$0xf0]  ;;  %v11357_v28 = vld [vmem:[#allocation5 + $0xf50] sm:$0xf]  ;;  %v11221_v46 = vld [vmem:[#allocation5 + $0xe40] sm:$0xf] }
  0xf9   :  { %7553 = vmatpush.bf16.msra.mxu3 %v11158_v4  ;;  %v10997_v4 = vld [vmem:[#allocation5 + $0xc80] sm:$0xf]  ;;  %v11070_v12 = vor.u32 %v14440_v60, %v11069_v59  ;;  %v14482_v59 = vld [vmem:[#allocation5 + $0xe64] sm:$0xf0]  ;;  %v11421_v34 = vld [vmem:[#allocation5 + $0xfd0] sm:$0xf] }
  0xfa   :  { %7515 = vmatpush.bf16.msra.mxu0 %v10958_v14  ;;  %v14454_v14 = vld [vmem:[#allocation5 + $0xd84] sm:$0xf0]  ;;  %v10998_v47 = vor.u32 %v14422_v5, %v10997_v4  ;;  %v11301_v60 = vld [vmem:[#allocation5 + $0xee0] sm:$0xf]  ;;  %v15618_v4 = vpack.c.bf16 %v235_v51, %v235_v51  ;;  %v15620_v5 = vpack.c.bf16 %v234_v54, %v234_v54  ;;  %v14528_v35 = vld [vmem:[#allocation5 + $0xfd4] sm:$0xf0] }
  0xfb   :  { %7528 = vmatpush.bf16.msra.mxu1 %v11022_v15  ;;  %v11245_v15 = vld [vmem:[#allocation5 + $0xe70] sm:$0xf]  ;;  %v11422_v50 = vor.u32 %v14528_v35, %v11421_v34  ;;  %v14494_v51 = vld [vmem:[#allocation5 + $0xec4] sm:$0xf0] }
  0xfc   :  { %7541 = vmatpush.bf16.msra.mxu2 %v11086_v17  ;;  %v7288_v17 = vpop.f32.mrf.mxu2 }
  0xfd   :  { %7554 = vmatpush.bf16.msra.mxu3 %v11150_v62  ;;  %v7301_v62 = vpop.f32.mrf.mxu3  ;;  %v14480_v17 = vld [vmem:[#allocation5 + $0xe54] sm:$0xf0] }
  0xfe   :  { %7516 = vmatpush.bf16.msra.mxu0 %v10950_v48  ;;  %v11062_v48 = vor.u32 %v14438_v9, %v11061_v8  ;;  %v11429_v8 = vld [vmem:[#allocation5 + $0xfe0] sm:$0xf]  ;;  %v14530_v9 = vld [vmem:[#allocation5 + $0xfe4] sm:$0xf0]  ;;  %v14512_v62 = vld [vmem:[#allocation5 + $0xf54] sm:$0xf0] }
  0xff   :  { %7529 = vmatpush.bf16.msra.mxu1 %v11014_v52  ;;  %v11126_v52 = vor.u32 %v14454_v14, %v11125_v13  ;;  %v11302_v13 = vor.u32 %v14498_v0, %v11301_v60  ;;  %v11358_v43 = vor.u32 %v14512_v62, %v11357_v28  ;;  %v11213_v0 = vld [vmem:[#allocation5 + $0xe30] sm:$0xf]  ;;  %v14474_v28 = vld [vmem:[#allocation5 + $0xe24] sm:$0xf0]  ;;  %v11269_v62 = vld [vmem:[#allocation5 + $0xea0] sm:$0xf] }
 0x100   :  { %7542 = vmatpush.bf16.msra.mxu2 %v11078_v53  ;;  %v11246_v53 = vor.u32 %v14484_v20, %v11245_v15  ;;  %v11229_v15 = vld [vmem:[#allocation5 + $0xe50] sm:$0xf]  ;;  %v11430_v20 = vor.u32 %v14530_v9, %v11429_v8 }
 0x101   :  { %7555 = vmatpush.bf16.msra.mxu3 %v11142_v58  ;;  %v11237_v58 = vld [vmem:[#allocation5 + $0xe60] sm:$0xf]  ;;  %v11230_v36 = vor.u32 %v14480_v17, %v11229_v15  ;;  %v11405_v15 = vld [vmem:[#allocation5 + $0xfb0] sm:$0xf]  ;;  %v14524_v17 = vld [vmem:[#allocation5 + $0xfb4] sm:$0xf0] }
 0x102   :  { %7517 = vmatpush.bf16.msra.mxu0 %v10942_v3  ;;  %v14514_v3 = vld [vmem:[#allocation5 + $0xf64] sm:$0xf0]  ;;  %v11406_v34 = vor.u32 %v14524_v17, %v11405_v15  ;;  %v11317_v17 = vld [vmem:[#allocation5 + $0xf00] sm:$0xf] }
 0x103   :  { %7530 = vmatpush.bf16.msra.mxu1 %v11006_v11  ;;  %v15622_v11 = vpack.c.bf16 %v236_v55, %v236_v55  ;;  %v11366_v14 = vor.u32 %v14514_v3, %v11365_v2  ;;  %v11413_v55 = vld [vmem:[#allocation5 + $0xfc0] sm:$0xf]  ;;  %v14476_v2 = vld [vmem:[#allocation5 + $0xe34] sm:$0xf0]  ;;  %v11277_v3 = vld [vmem:[#allocation5 + $0xeb0] sm:$0xf] }
 0x104   :  { %7543 = vmatpush.bf16.msra.mxu2 %v11070_v12  ;;  %v11238_v12 = vor.u32 %v14482_v59, %v11237_v58  ;;  %v14486_v15 = vld [vmem:[#allocation5 + $0xe84] sm:$0xf0] }
 0x105   :  { %7556 = vmatpush.bf16.msra.mxu3 %v11134_v18  ;;  %v11293_v18 = vld [vmem:[#allocation5 + $0xed0] sm:$0xf] }
 0x106   :  { %7518 = vmatpush.bf16.msra.mxu0 %v10934_v40  ;;  %v11294_v40 = vor.u32 %v14496_v25, %v11293_v18  ;;  %v7312_v54 = vpop.f32.mrf.mxu0  ;;  %v11214_v18 = vor.u32 %v14476_v2, %v11213_v0  ;;  %v11205_v25 = vld [vmem:[#allocation5 + $0xe20] sm:$0xf]  ;;  %v11325_v0 = vld [vmem:[#allocation5 + $0xf10] sm:$0xf]  ;;  %v14504_v2 = vld [vmem:[#allocation5 + $0xf14] sm:$0xf0] }
 0x107   :  { %7531 = vmatpush.bf16.msra.mxu1 %v10998_v47  ;;  %v14478_v47 = vld [vmem:[#allocation5 + $0xe44] sm:$0xf0]  ;;  %v7325_v59 = vpop.f32.mrf.mxu1 }
 0x108   :  { %7544 = vmatpush.bf16.msra.mxu2 %v11062_v48  ;;  %v11285_v48 = vld [vmem:[#allocation5 + $0xec0] sm:$0xf]  ;;  %v11222_v58 = vor.u32 %v14478_v47, %v11221_v46 }
 0x109   :  { %7557 = vmatpush.bf16.msra.mxu3 %v11126_v52  ;;  %7519 = vmatmul.bf16.vlgmr.msra.gmra.mxu0 %v15616_v63  ;;  %v11349_v52 = vld [vmem:[#allocation5 + $0xf40] sm:$0xf]  ;;  %v11286_v60 = vor.u32 %v14494_v51, %v11285_v48 }
 0x10a   :  { %7563 = vmatpush.bf16.msrb.mxu0 %v11246_v53  ;;  %7532 = vmatmul.bf16.vlgmr.msra.gmra.mxu1 %v15620_v5  ;;  %v14510_v53 = vld [vmem:[#allocation5 + $0xf44] sm:$0xf0]  ;;  %v11397_v48 = vld [vmem:[#allocation5 + $0xfa0] sm:$0xf] }
 0x10b   :  { %7576 = vmatpush.bf16.msrb.mxu1 %v11310_v56  ;;  %7545 = vmatmul.bf16.vlgmr.msra.gmra.mxu2 %v15618_v4  ;;  %v14526_v56 = vld [vmem:[#allocation5 + $0xfc4] sm:$0xf0] }
 0x10c   :  { %7589 = vmatpush.bf16.msrb.mxu2 %v11374_v57  ;;  %7558 = vmatmul.bf16.vlgmr.msra.gmra.mxu3 %v15622_v11  ;;  %v7313_v57 = vadd.f32 %v7312_v54, %v15614_v49  ;;  %v11414_v8 = vor.u32 %v14526_v56, %v11413_v55 }
 0x10d   :  { %7602 = vmatpush.bf16.msrb.mxu3 %v11438_v61  ;;  %v11350_v61 = vor.u32 %v14510_v53, %v11349_v52  ;;  %v11206_v52 = vor.u32 %v14474_v28, %v11205_v25  ;;  %v11197_v53 = vld [vmem:[#allocation5 + $0xe10] sm:$0xf]  ;;  %v11381_v25 = vld [vmem:[#allocation5 + $0xf80] sm:$0xf]  ;;  %v14518_v28 = vld [vmem:[#allocation5 + $0xf84] sm:$0xf0] }
 0x10e   :  { %7564 = vmatpush.bf16.msrb.mxu0 %v11238_v12  ;;  %v7326_v9 = vadd.f32 %v7325_v59, %v7313_v57  ;;  %v14492_v12 = vld [vmem:[#allocation5 + $0xeb4] sm:$0xf0]  ;;  %v7338_v35 = vpop.f32.mrf.mxu2  ;;  %v7314_v51 = vpop.f32.mrf.mxu0  ;;  %v11261_v59 = vld [vmem:[#allocation5 + $0xe90] sm:$0xf] }
 0x10f   :  { %7577 = vmatpush.bf16.msrb.mxu1 %v11302_v13  ;;  %v11341_v13 = vld [vmem:[#allocation5 + $0xf30] sm:$0xf]  ;;  %v11278_v49 = vor.u32 %v14492_v12, %v11277_v3  ;;  %v7351_v47 = vpop.f32.mrf.mxu3  ;;  %v7327_v54 = vpop.f32.mrf.mxu1  ;;  %v14470_v12 = vld [vmem:[#allocation5 + $0xe04] sm:$0xf0] }
 0x110   :  { %7590 = vmatpush.bf16.msrb.mxu2 %v11366_v14  ;;  %v14508_v14 = vld [vmem:[#allocation5 + $0xf34] sm:$0xf0]  ;;  %v7339_v46 = vadd.f32 %v7338_v35, %v7326_v9  ;;  %v11389_v3 = vld [vmem:[#allocation5 + $0xf90] sm:$0xf]  ;;  %v11189_v9 = vld [vmem:[#allocation5 + $0xe00] sm:$0xf] }
 0x111   :  { %7603 = vmatpush.bf16.msrb.mxu3 %v11430_v20  ;;  %v11342_v20 = vor.u32 %v14508_v14, %v11341_v13  ;;  %v11253_v14 = vld [vmem:[#allocation5 + $0xe80] sm:$0xf]  ;;  %v14548_v35 = vld [vmem:[#allocation5 + $0x1074] sm:$0xf0]  ;;  %v11190_v51 = vor.u32 %v14470_v12, %v11189_v9 }
 0x112   :  { %7565 = vmatpush.bf16.msrb.mxu0 %v11230_v36  ;;  %v14490_v36 = vld [vmem:[#allocation5 + $0xea4] sm:$0xf0]  ;;  %v15629_v55 = vadd.f32 %v7351_v47, %v7339_v46  ;;  %v11629_v46 = vld [vmem:[#allocation5 + $0x1170] sm:$0xf]  ;;  %v14580_v47 = vld [vmem:[#allocation5 + $0x1174] sm:$0xf0]  ;;  %v11254_v54 = vor.u32 %v14486_v15, %v11253_v14 }
 0x113   :  { %7578 = vmatpush.bf16.msrb.mxu1 %v11294_v40  ;;  %v11333_v40 = vld [vmem:[#allocation5 + $0xf20] sm:$0xf]  ;;  %v11270_v56 = vor.u32 %v14490_v36, %v11269_v62  ;;  %v11501_v62 = vld [vmem:[#allocation5 + $0x1070] sm:$0xf]  ;;  %v14578_v14 = vld [vmem:[#allocation5 + $0x1164] sm:$0xf0] }
 0x114   :  { %7591 = vmatpush.bf16.msrb.mxu2 %v11358_v43  ;;  %v14506_v43 = vld [vmem:[#allocation5 + $0xf24] sm:$0xf0]  ;;  %v11565_v36 = vld [vmem:[#allocation5 + $0x10f0] sm:$0xf] }
 0x115   :  { %7604 = vmatpush.bf16.msrb.mxu3 %v11422_v50  ;;  %v14522_v50 = vld [vmem:[#allocation5 + $0xfa4] sm:$0xf0]  ;;  %v11334_v57 = vor.u32 %v14506_v43, %v11333_v40  ;;  %v14564_v40 = vld [vmem:[#allocation5 + $0x10f4] sm:$0xf0] }
 0x116   :  { %7566 = vmatpush.bf16.msrb.mxu0 %v11222_v58  ;;  %v14472_v58 = vld [vmem:[#allocation5 + $0xe14] sm:$0xf0]  ;;  %v7340_v43 = vpop.f32.mrf.mxu2 }
 0x117   :  { %7579 = vmatpush.bf16.msrb.mxu1 %v11286_v60  ;;  %v14488_v60 = vld [vmem:[#allocation5 + $0xe94] sm:$0xf0]  ;;  %v11198_v13 = vor.u32 %v14472_v58, %v11197_v53  ;;  %v14546_v43 = vld [vmem:[#allocation5 + $0x1064] sm:$0xf0] }
 0x118   :  { %7592 = vmatpush.bf16.msrb.mxu2 %v11350_v61  ;;  %v11398_v61 = vor.u32 %v14522_v50, %v11397_v48  ;;  %v7353_v48 = vpop.f32.mrf.mxu3  ;;  %v172_v50 = vld [vmem:[#allocation2 + $0x40] sm:$0xff]  ;;  %v239_v58 = vld.sshfl [vmem:[#allocation1 + $0x30] sm:$0xff pattern:$0x73625140] }
 0x119   :  { %7605 = vmatpush.bf16.msrb.mxu3 %v11414_v8  ;;  %v14520_v8 = vld [vmem:[#allocation5 + $0xf94] sm:$0xf0]  ;;  %241 = vst [vmem:[#allocation1] ss:$4 sm:$0xff] %v172_v50  ;;  %v15633_v15 = vpack.c.bf16 %v239_v58, %v239_v58  ;;  %v11613_v50 = vld [vmem:[#allocation5 + $0x1150] sm:$0xf] }
 0x11a   :  { %7567 = vmatpush.bf16.msrb.mxu0 %v11214_v18  ;;  %v14502_v18 = vld [vmem:[#allocation5 + $0xf04] sm:$0xf0]  ;;  %v14596_v53 = vld [vmem:[#allocation5 + $0x11f4] sm:$0xf0]  ;;  %v11477_v58 = vld [vmem:[#allocation5 + $0x1040] sm:$0xf] }
 0x11b   :  { %7580 = vmatpush.bf16.msrb.mxu1 %v11278_v49  ;;  %v11262_v49 = vor.u32 %v14488_v60, %v11261_v59  ;;  %v11382_v59 = vor.u32 %v14518_v28, %v11381_v25  ;;  %v11502_v60 = vor.u32 %v14548_v35, %v11501_v62  ;;  %15967 = vst [vmem:[#allocation24_spill] sm:$0xff] %v15633_v15  ;;  %v14594_v25 = vld [vmem:[#allocation5 + $0x11e4] sm:$0xf0]  ;;  %v14560_v48 = vld [vmem:[#allocation5 + $0x10d4] sm:$0xf0] }
 0x11c   :  { %7593 = vmatpush.bf16.msrb.mxu2 %v11342_v20  ;;  %v11326_v20 = vor.u32 %v14504_v2, %v11325_v0  ;;  %v240_v0 = vld.sshfl [vmem:[#allocation1 + $0x38] sm:$0xff pattern:$0x73625140]  ;;  %v11566_v2 = vor.u32 %v14564_v40, %v11565_v36  ;;  %v11485_v36 = vld [vmem:[#allocation5 + $0x1050] sm:$0xf] }
 0x11d   :  { %7606 = vmatpush.bf16.msrb.mxu3 %v11406_v34  ;;  %v11390_v34 = vor.u32 %v14520_v8, %v11389_v3  ;;  %v11630_v3 = vor.u32 %v14580_v47, %v11629_v46  ;;  %v11493_v8 = vld [vmem:[#allocation5 + $0x1060] sm:$0xf]  ;;  %v15637_v28 = vpack.c.bf16 %v240_v0, %v240_v0  ;;  %v14544_v40 = vld [vmem:[#allocation5 + $0x1054] sm:$0xf0]  ;;  %v11549_v46 = vld [vmem:[#allocation5 + $0x10d0] sm:$0xf] }
 0x11e   :  { %7568 = vmatpush.bf16.msrb.mxu0 %v11206_v52  ;;  %v11693_v52 = vld [vmem:[#allocation5 + $0x11f0] sm:$0xf]  ;;  %v11494_v62 = vor.u32 %v14546_v43, %v11493_v8  ;;  %v14558_v0 = vld [vmem:[#allocation5 + $0x10c4] sm:$0xf0]  ;;  %v11669_v43 = vld [vmem:[#allocation5 + $0x11c0] sm:$0xf] }
 0x11f   :  { %7581 = vmatpush.bf16.msrb.mxu1 %v11270_v56  ;;  %v11318_v56 = vor.u32 %v14502_v18, %v11317_v17  ;;  %v11694_v9 = vor.u32 %v14596_v53, %v11693_v52  ;;  %v11685_v18 = vld [vmem:[#allocation5 + $0x11e0] sm:$0xf]  ;;  %15969 = vst [vmem:[#allocation26_spill] sm:$0xff] %v15637_v28  ;;  %v11677_v52 = vld [vmem:[#allocation5 + $0x11d0] sm:$0xf] }
 0x120   :  { %7594 = vmatpush.bf16.msrb.mxu2 %v11334_v57  ;;  %v237_v57 = vld.sshfl [vmem:[#allocation1 + $0x20] sm:$0xff pattern:$0x73625140]  ;;  %v11686_v47 = vor.u32 %v14594_v25, %v11685_v18  ;;  %v14592_v53 = vld [vmem:[#allocation5 + $0x11d4] sm:$0xf0] }
 0x121   :  { %7607 = vmatpush.bf16.msrb.mxu3 %v11398_v61  ;;  %v238_v61 = vld.sshfl [vmem:[#allocation1 + $0x28] sm:$0xff pattern:$0x73625140]  ;;  %v15631_v12 = vpack.c.bf16 %v237_v57, %v237_v57 }
 0x122   :  { %7569 = vmatpush.bf16.msrb.mxu0 %v11198_v13  ;;  %v11557_v13 = vld [vmem:[#allocation5 + $0x10e0] sm:$0xf]  ;;  %v15635_v17 = vpack.c.bf16 %v238_v61, %v238_v61  ;;  %v11678_v61 = vor.u32 %v14592_v53, %v11677_v52  ;;  %v11469_v25 = vld [vmem:[#allocation5 + $0x1030] sm:$0xf] }
 0x123   :  { %7582 = vmatpush.bf16.msrb.mxu1 %v11262_v49  ;;  %v14562_v49 = vld [vmem:[#allocation5 + $0x10e4] sm:$0xf0]  ;;  %v11461_v53 = vld [vmem:[#allocation5 + $0x1020] sm:$0xf] }
 0x124   :  { %7595 = vmatpush.bf16.msrb.mxu2 %v11326_v20  ;;  %v11621_v20 = vld [vmem:[#allocation5 + $0x1160] sm:$0xf]  ;;  %15968 = vst [vmem:[#allocation25_spill] sm:$0xff] %v15635_v17 }
 0x125   :  { %7608 = vmatpush.bf16.msrb.mxu3 %v11390_v34  ;;  %v11558_v34 = vor.u32 %v14562_v49, %v11557_v13  ;;  %v11622_v35 = vor.u32 %v14578_v14, %v11621_v20  ;;  %v14590_v13 = vld [vmem:[#allocation5 + $0x11c4] sm:$0xf0] }
 0x126   :  { %7570 = vmatpush.bf16.msrb.mxu0 %v11190_v51  ;;  %v14576_v51 = vld [vmem:[#allocation5 + $0x1154] sm:$0xf0]  ;;  %v7364_v8 = vpop.f32.mrf.mxu0 }
 0x127   :  { %7583 = vmatpush.bf16.msrb.mxu1 %v11254_v54  ;;  %v11486_v54 = vor.u32 %v14544_v40, %v11485_v36  ;;  %v11614_v57 = vor.u32 %v14576_v51, %v11613_v50  ;;  %v7377_v20 = vpop.f32.mrf.mxu1  ;;  %v14556_v40 = vld [vmem:[#allocation5 + $0x10b4] sm:$0xf0] }
 0x128   :  { %7596 = vmatpush.bf16.msrb.mxu2 %v11318_v56  ;;  %v11550_v56 = vor.u32 %v14560_v48, %v11549_v46  ;;  %v11597_v46 = vld [vmem:[#allocation5 + $0x1130] sm:$0xf]  ;;  %v14588_v50 = vld [vmem:[#allocation5 + $0x11b4] sm:$0xf0] }
 0x129   :  { %7609 = vmatpush.bf16.msrb.mxu3 %v11382_v59  ;;  %7571 = vmatmul.bf16.vlgmr.msrb.gmra.mxu0 %v15631_v12  ;;  %v14542_v59 = vld [vmem:[#allocation5 + $0x1044] sm:$0xf0]  ;;  %v11661_v48 = vld [vmem:[#allocation5 + $0x11b0] sm:$0xf] }
 0x12a   :  { %7615 = vmatpush.bf16.msra.mxu0 %v11502_v60  ;;  %7584 = vmatmul.bf16.vlgmr.msrb.gmra.mxu1 %v15635_v17  ;;  %v11541_v60 = vld [vmem:[#allocation5 + $0x10c0] sm:$0xf]  ;;  %v11478_v49 = vor.u32 %v14542_v59, %v11477_v58  ;;  %v14554_v59 = vld [vmem:[#allocation5 + $0x10a4] sm:$0xf0] }
 0x12b   :  { %7628 = vmatpush.bf16.msra.mxu1 %v11566_v2  ;;  %7597 = vmatmul.bf16.vlgmr.msrb.gmra.mxu2 %v15633_v15  ;;  %v11605_v2 = vld [vmem:[#allocation5 + $0x1140] sm:$0xf]  ;;  %v11542_v14 = vor.u32 %v14558_v0, %v11541_v60  ;;  %v14610_v17 = vld [vmem:[#allocation5 + $0x1264] sm:$0xf0] }
 0x12c   :  { %7641 = vmatpush.bf16.msra.mxu2 %v11630_v3  ;;  %7610 = vmatmul.bf16.vlgmr.msrb.gmra.mxu3 %v15637_v28  ;;  %v14574_v3 = vld [vmem:[#allocation5 + $0x1144] sm:$0xf0]  ;;  %v11589_v60 = vld [vmem:[#allocation5 + $0x1120] sm:$0xf]  ;;  %v11949_v28 = vld [vmem:[#allocation5 + $0x13f0] sm:$0xf] }
 0x12d   :  { %7654 = vmatpush.bf16.msra.mxu3 %v11694_v9  ;;  %v7365_v9 = vadd.f32 %v7364_v8, %v15629_v55  ;;  %v11606_v18 = vor.u32 %v14574_v3, %v11605_v2  ;;  %v11653_v3 = vld [vmem:[#allocation5 + $0x11a0] sm:$0xf]  ;;  %v14586_v8 = vld [vmem:[#allocation5 + $0x11a4] sm:$0xf0] }
 0x12e   :  { %7616 = vmatpush.bf16.msra.mxu0 %v11494_v62  ;;  %v14540_v62 = vld [vmem:[#allocation5 + $0x1034] sm:$0xf0]  ;;  %v7390_v58 = vpop.f32.mrf.mxu2 }
 0x12f   :  { %7629 = vmatpush.bf16.msra.mxu1 %v11558_v34  ;;  %v11533_v34 = vld [vmem:[#allocation5 + $0x10b0] sm:$0xf]  ;;  %v7378_v36 = vadd.f32 %v7377_v20, %v7365_v9  ;;  %v11470_v51 = vor.u32 %v14540_v62, %v11469_v25  ;;  %v7403_v2 = vpop.f32.mrf.mxu3  ;;  %v14536_v25 = vld [vmem:[#allocation5 + $0x1014] sm:$0xf0] }
 0x130   :  { %7642 = vmatpush.bf16.msra.mxu2 %v11622_v35  ;;  %v11670_v35 = vor.u32 %v14590_v13, %v11669_v43  ;;  %v11534_v55 = vor.u32 %v14556_v40, %v11533_v34  ;;  %v7366_v43 = vpop.f32.mrf.mxu0  ;;  %v11453_v9 = vld [vmem:[#allocation5 + $0x1010] sm:$0xf]  ;;  %v14552_v34 = vld [vmem:[#allocation5 + $0x1094] sm:$0xf0] }
 0x131   :  { %7655 = vmatpush.bf16.msra.mxu3 %v11686_v47  ;;  %v14572_v47 = vld [vmem:[#allocation5 + $0x1134] sm:$0xf0]  ;;  %v7391_v0 = vadd.f32 %v7390_v58, %v7378_v36  ;;  %v11517_v62 = vld [vmem:[#allocation5 + $0x1090] sm:$0xf] }
 0x132   :  { %7617 = vmatpush.bf16.msra.mxu0 %v11486_v54  ;;  %v11598_v52 = vor.u32 %v14572_v47, %v11597_v46  ;;  %v14538_v54 = vld [vmem:[#allocation5 + $0x1024] sm:$0xf0]  ;;  %v11581_v36 = vld [vmem:[#allocation5 + $0x1110] sm:$0xf]  ;;  %v14568_v40 = vld [vmem:[#allocation5 + $0x1114] sm:$0xf0] }
 0x133   :  { %7630 = vmatpush.bf16.msra.mxu1 %v11550_v56  ;;  %v11525_v56 = vld [vmem:[#allocation5 + $0x10a0] sm:$0xf]  ;;  %v11462_v13 = vor.u32 %v14538_v54, %v11461_v53  ;;  %v15644_v20 = vadd.f32 %v7403_v2, %v7391_v0  ;;  %v11645_v46 = vld [vmem:[#allocation5 + $0x1190] sm:$0xf]  ;;  %v14584_v47 = vld [vmem:[#allocation5 + $0x1194] sm:$0xf0]  ;;  %v11582_v58 = vor.u32 %v14568_v40, %v11581_v36 }
 0x134   :  { %7643 = vmatpush.bf16.msra.mxu2 %v11614_v57  ;;  %v11662_v57 = vor.u32 %v14588_v50, %v11661_v48  ;;  %v11445_v48 = vld [vmem:[#allocation5 + $0x1000] sm:$0xf]  ;;  %v14534_v50 = vld [vmem:[#allocation5 + $0x1004] sm:$0xf0]  ;;  %v14612_v0 = vld [vmem:[#allocation5 + $0x1274] sm:$0xf0] }
 0x135   :  { %7656 = vmatpush.bf16.msra.mxu3 %v11678_v61  ;;  %v14570_v61 = vld [vmem:[#allocation5 + $0x1124] sm:$0xf0]  ;;  %v11509_v53 = vld [vmem:[#allocation5 + $0x1080] sm:$0xf]  ;;  %v11821_v2 = vld [vmem:[#allocation5 + $0x12f0] sm:$0xf] }
 0x136   :  { %7618 = vmatpush.bf16.msra.mxu0 %v11478_v49  ;;  %v7379_v49 = vpop.f32.mrf.mxu1  ;;  %v14566_v54 = vld [vmem:[#allocation5 + $0x1104] sm:$0xf0]  ;;  %v11885_v43 = vld [vmem:[#allocation5 + $0x1370] sm:$0xf] }
 0x137   :  { %7631 = vmatpush.bf16.msra.mxu1 %v11542_v14  ;;  %v11526_v14 = vor.u32 %v14554_v59, %v11525_v56  ;;  %v11518_v56 = vor.u32 %v14552_v34, %v11517_v62  ;;  %v11637_v59 = vld [vmem:[#allocation5 + $0x1180] sm:$0xf]  ;;  %v243_v34 = vld.sshfl [vmem:[#allocation1] sm:$0xff pattern:$0x73625140] }
 0x138   :  { %7644 = vmatpush.bf16.msra.mxu2 %v11606_v18  ;;  %v11590_v18 = vor.u32 %v14570_v61, %v11589_v60  ;;  %v14582_v60 = vld [vmem:[#allocation5 + $0x1184] sm:$0xf0]  ;;  %v11646_v61 = vor.u32 %v14584_v47, %v11645_v46  ;;  %v173_v49 = vld [vmem:[#allocation2 + $0x48] sm:$0xff]  ;;  %v244_v46 = vld.sshfl [vmem:[#allocation1 + $0x8] sm:$0xff pattern:$0x73625140] }
 0x139   :  { %7657 = vmatpush.bf16.msra.mxu3 %v11670_v35  ;;  %v11654_v35 = vor.u32 %v14586_v8, %v11653_v3  ;;  %v14628_v3 = vld [vmem:[#allocation5 + $0x12f4] sm:$0xf0]  ;;  %v7392_v8 = vpop.f32.mrf.mxu2  ;;  %242 = vst [vmem:[#allocation1 + $0x20] ss:$4 sm:$0xff] %v173_v49  ;;  %v11638_v36 = vor.u32 %v14582_v60, %v11637_v59  ;;  %v14658_v59 = vld [vmem:[#allocation5 + $0x13e4] sm:$0xf0] }
 0x13a   :  { %7619 = vmatpush.bf16.msra.mxu0 %v11470_v51  ;;  %v11454_v51 = vor.u32 %v14536_v25, %v11453_v9  ;;  %v7405_v9 = vpop.f32.mrf.mxu3  ;;  %v11446_v25 = vor.u32 %v14534_v50, %v11445_v48  ;;  %v246_v47 = vld.sshfl [vmem:[#allocation1 + $0x18] sm:$0xff pattern:$0x73625140]  ;;  %v11822_v8 = vor.u32 %v14628_v3, %v11821_v2  ;;  %v15646_v50 = vpack.c.bf16 %v243_v34, %v243_v34  ;;  %v14608_v2 = vld [vmem:[#allocation5 + $0x1254] sm:$0xf0] }
 0x13b   :  { %7632 = vmatpush.bf16.msra.mxu1 %v11534_v55  ;;  %v14550_v55 = vld [vmem:[#allocation5 + $0x1084] sm:$0xf0]  ;;  %v11749_v9 = vld [vmem:[#allocation5 + $0x1260] sm:$0xf]  ;;  %v15652_v60 = vpack.c.bf16 %v246_v47, %v246_v47  ;;  %v11805_v3 = vld [vmem:[#allocation5 + $0x12d0] sm:$0xf] }
 0x13c   :  { %7645 = vmatpush.bf16.msra.mxu2 %v11598_v52  ;;  %v11573_v52 = vld [vmem:[#allocation5 + $0x1100] sm:$0xf]  ;;  %15970 = vst [vmem:[#allocation27_spill] sm:$0xff] %v15646_v50  ;;  %v11869_v49 = vld [vmem:[#allocation5 + $0x1350] sm:$0xf] }
 0x13d   :  { %7658 = vmatpush.bf16.msra.mxu3 %v11662_v57  ;;  %v11757_v57 = vld [vmem:[#allocation5 + $0x1270] sm:$0xf]  ;;  %v11574_v62 = vor.u32 %v14566_v54, %v11573_v52  ;;  %v15650_v52 = vpack.c.bf16 %v244_v46, %v244_v46  ;;  %v11941_v54 = vld [vmem:[#allocation5 + $0x13e0] sm:$0xf]  ;;  %15973 = vst [vmem:[#allocation30_spill] sm:$0xff] %v15652_v60 }
 0x13e   :  { %7620 = vmatpush.bf16.msra.mxu0 %v11462_v13  ;;  %v14644_v13 = vld [vmem:[#allocation5 + $0x1374] sm:$0xf0]  ;;  %v11758_v40 = vor.u32 %v14612_v0, %v11757_v57  ;;  %v11750_v57 = vor.u32 %v14610_v17, %v11749_v9  ;;  %v11741_v0 = vld [vmem:[#allocation5 + $0x1250] sm:$0xf]  ;;  %v11733_v34 = vld [vmem:[#allocation5 + $0x1240] sm:$0xf] }
 0x13f   :  { %7633 = vmatpush.bf16.msra.mxu1 %v11526_v14  ;;  %v14660_v14 = vld [vmem:[#allocation5 + $0x13f4] sm:$0xf0]  ;;  %v11886_v15 = vor.u32 %v14644_v13, %v11885_v43  ;;  %15972 = vst [vmem:[#allocation29_spill] sm:$0xff] %v15650_v52  ;;  %v11942_v43 = vor.u32 %v14658_v59, %v11941_v54  ;;  %v14622_v46 = vld [vmem:[#allocation5 + $0x12c4] sm:$0xf0] }
 0x140   :  { %7646 = vmatpush.bf16.msra.mxu2 %v11590_v18  ;;  %v11510_v18 = vor.u32 %v14550_v55, %v11509_v53  ;;  %v11950_v48 = vor.u32 %v14660_v14, %v11949_v28  ;;  %v14642_v53 = vld [vmem:[#allocation5 + $0x1364] sm:$0xf0]  ;;  %v14624_v13 = vld [vmem:[#allocation5 + $0x12d4] sm:$0xf0]  ;;  %v11933_v14 = vld [vmem:[#allocation5 + $0x13d0] sm:$0xf] }
 0x141   :  { %7659 = vmatpush.bf16.msra.mxu3 %v11654_v35  ;;  %v245_v35 = vld.sshfl [vmem:[#allocation1 + $0x10] sm:$0xff pattern:$0x73625140] }
 0x142   :  { %7621 = vmatpush.bf16.msra.mxu0 %v11454_v51  ;;  %v11813_v51 = vld [vmem:[#allocation5 + $0x12e0] sm:$0xf]  ;;  %v15648_v55 = vpack.c.bf16 %v245_v35, %v245_v35  ;;  %v14656_v17 = vld [vmem:[#allocation5 + $0x13d4] sm:$0xf0]  ;;  %v14606_v35 = vld [vmem:[#allocation5 + $0x1244] sm:$0xf0] }
 0x143   :  { %7634 = vmatpush.bf16.msra.mxu1 %v11518_v56  ;;  %v14626_v56 = vld [vmem:[#allocation5 + $0x12e4] sm:$0xf0]  ;;  %v11861_v47 = vld [vmem:[#allocation5 + $0x1340] sm:$0xf] }
 0x144   :  { %7647 = vmatpush.bf16.msra.mxu2 %v11582_v58  ;;  %v11877_v58 = vld [vmem:[#allocation5 + $0x1360] sm:$0xf]  ;;  %15971 = vst [vmem:[#allocation28_spill] sm:$0xff] %v15648_v55  ;;  %v11814_v28 = vor.u32 %v14626_v56, %v11813_v51 }
 0x145   :  { %7660 = vmatpush.bf16.msra.mxu3 %v11646_v61  ;;  %v11878_v61 = vor.u32 %v14642_v53, %v11877_v58  ;;  %v11925_v51 = vld [vmem:[#allocation5 + $0x13c0] sm:$0xf]  ;;  %v11734_v58 = vor.u32 %v14606_v35, %v11733_v34 }
 0x146   :  { %7622 = vmatpush.bf16.msra.mxu0 %v11446_v25  ;;  %v14640_v25 = vld [vmem:[#allocation5 + $0x1354] sm:$0xf0]  ;;  %v7416_v9 = vpop.f32.mrf.mxu0 }
 0x147   :  { %7635 = vmatpush.bf16.msra.mxu1 %v11510_v18  ;;  %v11806_v18 = vor.u32 %v14624_v13, %v11805_v3  ;;  %v7417_v56 = vadd.f32 %v7416_v9, %v15644_v20  ;;  %v7429_v53 = vpop.f32.mrf.mxu1  ;;  %v14620_v3 = vld [vmem:[#allocation5 + $0x12b4] sm:$0xf0]  ;;  %v11909_v9 = vld [vmem:[#allocation5 + $0x13a0] sm:$0xf] }
 0x148   :  { %7648 = vmatpush.bf16.msra.mxu2 %v11574_v62  ;;  %v11870_v62 = vor.u32 %v14640_v25, %v11869_v49  ;;  %v14636_v13 = vld [vmem:[#allocation5 + $0x1334] sm:$0xf0]  ;;  %v11917_v49 = vld [vmem:[#allocation5 + $0x13b0] sm:$0xf] }
 0x149   :  { %7661 = vmatpush.bf16.msra.mxu3 %v11638_v36  ;;  %7623 = vmatmul.bf16.vlgmr.msra.gmra.mxu0 %v15646_v50  ;;  %v11797_v36 = vld [vmem:[#allocation5 + $0x12c0] sm:$0xf]  ;;  %v14652_v25 = vld [vmem:[#allocation5 + $0x13b4] sm:$0xf0]  ;;  %v14674_v50 = vld [vmem:[#allocation5 + $0x1464] sm:$0xf0] }
 0x14a   :  { %7667 = vmatpush.bf16.msrb.mxu0 %v11758_v40  ;;  %7636 = vmatmul.bf16.vlgmr.msra.gmra.mxu1 %v15650_v52  ;;  %v11934_v40 = vor.u32 %v14656_v17, %v11933_v14  ;;  %v11798_v54 = vor.u32 %v14622_v46, %v11797_v36  ;;  %v11918_v34 = vor.u32 %v14652_v25, %v11917_v49  ;;  %v14618_v36 = vld [vmem:[#allocation5 + $0x12a4] sm:$0xf0]  ;;  %v14648_v49 = vld [vmem:[#allocation5 + $0x1394] sm:$0xf0]  ;;  %v11701_v25 = vld [vmem:[#allocation5 + $0x1200] sm:$0xf] }
 0x14b   :  { %7680 = vmatpush.bf16.msrb.mxu1 %v11822_v8  ;;  %7649 = vmatmul.bf16.vlgmr.msra.gmra.mxu2 %v15648_v55  ;;  %v14638_v8 = vld [vmem:[#allocation5 + $0x1344] sm:$0xf0]  ;;  %v12205_v55 = vld [vmem:[#allocation5 + $0x15f0] sm:$0xf] }
 0x14c   :  { %7693 = vmatpush.bf16.msrb.mxu2 %v11886_v15  ;;  %7662 = vmatmul.bf16.vlgmr.msra.gmra.mxu3 %v15652_v60  ;;  %v11742_v15 = vor.u32 %v14608_v2, %v11741_v0  ;;  %v11862_v59 = vor.u32 %v14638_v8, %v11861_v47  ;;  %v7430_v2 = vadd.f32 %v7429_v53, %v7417_v56  ;;  %v14634_v46 = vld [vmem:[#allocation5 + $0x1324] sm:$0xf0] }
 0x14d   :  { %7706 = vmatpush.bf16.msrb.mxu3 %v11950_v48  ;;  %v14654_v48 = vld [vmem:[#allocation5 + $0x13c4] sm:$0xf0] }
 0x14e   :  { %7668 = vmatpush.bf16.msrb.mxu0 %v11750_v57  ;;  %v11725_v57 = vld [vmem:[#allocation5 + $0x1230] sm:$0xf]  ;;  %v11926_v0 = vor.u32 %v14654_v48, %v11925_v51  ;;  %v7442_v35 = vpop.f32.mrf.mxu2  ;;  %v14650_v51 = vld [vmem:[#allocation5 + $0x13a4] sm:$0xf0]  ;;  %v7418_v48 = vpop.f32.mrf.mxu0 }
 0x14f   :  { %7681 = vmatpush.bf16.msrb.mxu1 %v11814_v28  ;;  %v14604_v28 = vld [vmem:[#allocation5 + $0x1234] sm:$0xf0]  ;;  %v7443_v47 = vadd.f32 %v7442_v35, %v7430_v2  ;;  %v7455_v8 = vpop.f32.mrf.mxu3  ;;  %v7431_v53 = vpop.f32.mrf.mxu1  ;;  %v11837_v2 = vld [vmem:[#allocation5 + $0x1310] sm:$0xf]  ;;  %v14630_v35 = vld [vmem:[#allocation5 + $0x1304] sm:$0xf0] }
 0x150   :  { %7694 = vmatpush.bf16.msrb.mxu2 %v11878_v61  ;;  %v11789_v61 = vld [vmem:[#allocation5 + $0x12b0] sm:$0xf]  ;;  %v11726_v14 = vor.u32 %v14604_v28, %v11725_v57  ;;  %v14600_v28 = vld [vmem:[#allocation5 + $0x1214] sm:$0xf0] }
 0x151   :  { %7707 = vmatpush.bf16.msrb.mxu3 %v11942_v43  ;;  %v11853_v43 = vld [vmem:[#allocation5 + $0x1330] sm:$0xf]  ;;  %v11790_v20 = vor.u32 %v14620_v3, %v11789_v61  ;;  %v11910_v3 = vor.u32 %v14650_v51, %v11909_v9  ;;  %v14692_v51 = vld [vmem:[#allocation5 + $0x14f4] sm:$0xf0] }
 0x152   :  { %7669 = vmatpush.bf16.msrb.mxu0 %v11742_v15  ;;  %v11854_v17 = vor.u32 %v14636_v13, %v11853_v43  ;;  %v11717_v15 = vld [vmem:[#allocation5 + $0x1220] sm:$0xf]  ;;  %v11773_v61 = vld [vmem:[#allocation5 + $0x1290] sm:$0xf]  ;;  %v14632_v43 = vld [vmem:[#allocation5 + $0x1314] sm:$0xf0] }
 0x153   :  { %7682 = vmatpush.bf16.msrb.mxu1 %v11806_v18  ;;  %v14602_v18 = vld [vmem:[#allocation5 + $0x1224] sm:$0xf0]  ;;  %v11901_v13 = vld [vmem:[#allocation5 + $0x1390] sm:$0xf] }
 0x154   :  { %7695 = vmatpush.bf16.msrb.mxu2 %v11870_v62  ;;  %v11781_v62 = vld [vmem:[#allocation5 + $0x12a0] sm:$0xf]  ;;  %v11718_v56 = vor.u32 %v14602_v18, %v11717_v15  ;;  %v12077_v9 = vld [vmem:[#allocation5 + $0x14f0] sm:$0xf] }
 0x155   :  { %7708 = vmatpush.bf16.msrb.mxu3 %v11934_v40  ;;  %v11845_v40 = vld [vmem:[#allocation5 + $0x1320] sm:$0xf]  ;;  %v12141_v53 = vld [vmem:[#allocation5 + $0x1570] sm:$0xf] }
 0x156   :  { %7670 = vmatpush.bf16.msrb.mxu0 %v11734_v58  ;;  %v11709_v58 = vld [vmem:[#allocation5 + $0x1210] sm:$0xf]  ;;  %v11846_v57 = vor.u32 %v14634_v46, %v11845_v40  ;;  %v11765_v18 = vld [vmem:[#allocation5 + $0x1280] sm:$0xf]  ;;  %v14646_v46 = vld [vmem:[#allocation5 + $0x1384] sm:$0xf0]  ;;  %v7444_v48 = vpop.f32.mrf.mxu2 }
 0x157   :  { %7683 = vmatpush.bf16.msrb.mxu1 %v11798_v54  ;;  %v15659_v54 = vadd.f32 %v7455_v8, %v7443_v47  ;;  %v11710_v15 = vor.u32 %v14600_v28, %v11709_v58  ;;  %v11893_v40 = vld [vmem:[#allocation5 + $0x1380] sm:$0xf]  ;;  %v11902_v47 = vor.u32 %v14648_v49, %v11901_v13  ;;  %v14676_v8 = vld [vmem:[#allocation5 + $0x1474] sm:$0xf0]  ;;  %v7457_v58 = vpop.f32.mrf.mxu3  ;;  %v12078_v48 = vor.u32 %v14692_v51, %v12077_v9  ;;  %v12061_v9 = vld [vmem:[#allocation5 + $0x14d0] sm:$0xf] }
 0x158   :  { %7696 = vmatpush.bf16.msrb.mxu2 %v11862_v59  ;;  %v11782_v59 = vor.u32 %v14618_v36, %v11781_v62  ;;  %v11838_v36 = vor.u32 %v14632_v43, %v11837_v2  ;;  %v174_v28 = vld [vmem:[#allocation2 + $0x50] sm:$0xff]  ;;  %v11894_v2 = vor.u32 %v14646_v46, %v11893_v40  ;;  %v248_v13 = vld.sshfl [vmem:[#allocation1 + $0x28] sm:$0xff pattern:$0x73625140] }
 0x159   :  { %7709 = vmatpush.bf16.msrb.mxu3 %v11926_v0  ;;  %v14616_v0 = vld [vmem:[#allocation5 + $0x1294] sm:$0xf0]  ;;  %251 = vst [vmem:[#allocation1] ss:$4 sm:$0xff] %v174_v28  ;;  %v12005_v58 = vld [vmem:[#allocation5 + $0x1460] sm:$0xf] }
 0x15a   :  { %7671 = vmatpush.bf16.msrb.mxu0 %v11726_v14  ;;  %v14598_v14 = vld [vmem:[#allocation5 + $0x1204] sm:$0xf0]  ;;  %v11774_v62 = vor.u32 %v14616_v0, %v11773_v61  ;;  %v14704_v28 = vld [vmem:[#allocation5 + $0x1554] sm:$0xf0] }
 0x15b   :  { %7684 = vmatpush.bf16.msrb.mxu1 %v11790_v20  ;;  %v14614_v20 = vld [vmem:[#allocation5 + $0x1284] sm:$0xf0]  ;;  %v11702_v60 = vor.u32 %v14598_v14, %v11701_v25 }
 0x15c   :  { %7697 = vmatpush.bf16.msrb.mxu2 %v11854_v17  ;;  %v11829_v17 = vld [vmem:[#allocation5 + $0x1300] sm:$0xf]  ;;  %v247_v0 = vld.sshfl [vmem:[#allocation1 + $0x20] sm:$0xff pattern:$0x73625140] }
 0x15d   :  { %7710 = vmatpush.bf16.msrb.mxu3 %v11918_v34  ;;  %v12013_v34 = vld [vmem:[#allocation5 + $0x1470] sm:$0xf]  ;;  %v11830_v61 = vor.u32 %v14630_v35, %v11829_v17  ;;  %v250_v49 = vld.sshfl [vmem:[#allocation1 + $0x38] sm:$0xff pattern:$0x73625140]  ;;  %v15661_v14 = vpack.c.bf16 %v247_v0, %v247_v0  ;;  %v15665_v17 = vpack.c.bf16 %v248_v13, %v248_v13 }
 0x15e   :  { %7672 = vmatpush.bf16.msrb.mxu0 %v11718_v56  ;;  %v14708_v56 = vld [vmem:[#allocation5 + $0x1574] sm:$0xf0]  ;;  %v12014_v43 = vor.u32 %v14676_v8, %v12013_v34  ;;  %v12197_v35 = vld [vmem:[#allocation5 + $0x15e0] sm:$0xf]  ;;  %v14722_v40 = vld [vmem:[#allocation5 + $0x15e4] sm:$0xf0]  ;;  %v15667_v46 = vpack.c.bf16 %v250_v49, %v250_v49  ;;  %v12006_v34 = vor.u32 %v14674_v50, %v12005_v58 }
 0x15f   :  { %7685 = vmatpush.bf16.msrb.mxu1 %v11782_v59  ;;  %v14724_v59 = vld [vmem:[#allocation5 + $0x15f4] sm:$0xf0]  ;;  %v12142_v52 = vor.u32 %v14708_v56, %v12141_v53  ;;  %15974 = vst [vmem:[#allocation31_spill] sm:$0xff] %v15661_v14  ;;  %v12198_v51 = vor.u32 %v14722_v40, %v12197_v35  ;;  %v12125_v56 = vld [vmem:[#allocation5 + $0x1550] sm:$0xf] }
 0x160   :  { %7698 = vmatpush.bf16.msrb.mxu2 %v11846_v57  ;;  %v11766_v57 = vor.u32 %v14614_v20, %v11765_v18  ;;  %v12206_v25 = vor.u32 %v14724_v59, %v12205_v55  ;;  %v14706_v18 = vld [vmem:[#allocation5 + $0x1564] sm:$0xf0]  ;;  %15976 = vst [vmem:[#allocation33_spill] sm:$0xff] %v15665_v17  ;;  %v14672_v8 = vld [vmem:[#allocation5 + $0x1454] sm:$0xf0] }
 0x161   :  { %7711 = vmatpush.bf16.msrb.mxu3 %v11910_v3  ;;  %v249_v3 = vld.sshfl [vmem:[#allocation1 + $0x30] sm:$0xff pattern:$0x73625140]  ;;  %15977 = vst [vmem:[#allocation34_spill] sm:$0xff] %v15667_v46  ;;  %v12189_v59 = vld [vmem:[#allocation5 + $0x15d0] sm:$0xf] }
 0x162   :  { %7673 = vmatpush.bf16.msrb.mxu0 %v11710_v15  ;;  %v12069_v15 = vld [vmem:[#allocation5 + $0x14e0] sm:$0xf]  ;;  %v15663_v20 = vpack.c.bf16 %v249_v3, %v249_v3  ;;  %v14688_v53 = vld [vmem:[#allocation5 + $0x14d4] sm:$0xf0]  ;;  %v14670_v3 = vld [vmem:[#allocation5 + $0x1444] sm:$0xf0] }
 0x163   :  { %7686 = vmatpush.bf16.msrb.mxu1 %v11774_v62  ;;  %v14690_v62 = vld [vmem:[#allocation5 + $0x14e4] sm:$0xf0]  ;;  %v14720_v50 = vld [vmem:[#allocation5 + $0x15d4] sm:$0xf0]  ;;  %v11989_v0 = vld [vmem:[#allocation5 + $0x1440] sm:$0xf] }
 0x164   :  { %7699 = vmatpush.bf16.msrb.mxu2 %v11838_v36  ;;  %v12133_v36 = vld [vmem:[#allocation5 + $0x1560] sm:$0xf]  ;;  %15975 = vst [vmem:[#allocation32_spill] sm:$0xff] %v15663_v20  ;;  %v12070_v55 = vor.u32 %v14690_v62, %v12069_v15  ;;  %v14686_v13 = vld [vmem:[#allocation5 + $0x14c4] sm:$0xf0] }
 0x165   :  { %7712 = vmatpush.bf16.msrb.mxu3 %v11902_v47  ;;  %v11997_v47 = vld [vmem:[#allocation5 + $0x1450] sm:$0xf]  ;;  %v12117_v49 = vld [vmem:[#allocation5 + $0x1540] sm:$0xf] }
 0x166   :  { %7674 = vmatpush.bf16.msrb.mxu0 %v11702_v60  ;;  %v12134_v60 = vor.u32 %v14706_v18, %v12133_v36  ;;  %v7468_v58 = vpop.f32.mrf.mxu0  ;;  %v12181_v15 = vld [vmem:[#allocation5 + $0x15c0] sm:$0xf]  ;;  %v11990_v36 = vor.u32 %v14670_v3, %v11989_v0 }
 0x167   :  { %7687 = vmatpush.bf16.msrb.mxu1 %v11766_v57  ;;  %v12062_v57 = vor.u32 %v14688_v53, %v12061_v9  ;;  %v7469_v62 = vadd.f32 %v7468_v58, %v15659_v54  ;;  %v7481_v18 = vpop.f32.mrf.mxu1  ;;  %v14684_v9 = vld [vmem:[#allocation5 + $0x14b4] sm:$0xf0]  ;;  %v12165_v58 = vld [vmem:[#allocation5 + $0x15a0] sm:$0xf] }
 0x168   :  { %7700 = vmatpush.bf16.msrb.mxu2 %v11830_v61  ;;  %v12126_v61 = vor.u32 %v14704_v28, %v12125_v56  ;;  %v14700_v53 = vld [vmem:[#allocation5 + $0x1534] sm:$0xf0]  ;;  %v12173_v56 = vld [vmem:[#allocation5 + $0x15b0] sm:$0xf] }
 0x169   :  { %7713 = vmatpush.bf16.msrb.mxu3 %v11894_v2  ;;  %7675 = vmatmul.bf16.vlgmr.msrb.gmra.mxu0 %v15661_v14  ;;  %v12053_v2 = vld [vmem:[#allocation5 + $0x14c0] sm:$0xf]  ;;  %v14716_v28 = vld [vmem:[#allocation5 + $0x15b4] sm:$0xf0]  ;;  %v14738_v14 = vld [vmem:[#allocation5 + $0x1664] sm:$0xf0] }
 0x16a   :  { %7719 = vmatpush.bf16.msra.mxu0 %v12014_v43  ;;  %7688 = vmatmul.bf16.vlgmr.msrb.gmra.mxu1 %v15665_v17  ;;  %v12190_v43 = vor.u32 %v14720_v50, %v12189_v59  ;;  %v12054_v35 = vor.u32 %v14686_v13, %v12053_v2  ;;  %v12174_v0 = vor.u32 %v14716_v28, %v12173_v56  ;;  %v14682_v2 = vld [vmem:[#allocation5 + $0x14a4] sm:$0xf0]  ;;  %v14712_v56 = vld [vmem:[#allocation5 + $0x1594] sm:$0xf0]  ;;  %v11957_v28 = vld [vmem:[#allocation5 + $0x1400] sm:$0xf] }
 0x16b   :  { %7732 = vmatpush.bf16.msra.mxu1 %v12078_v48  ;;  %7701 = vmatmul.bf16.vlgmr.msrb.gmra.mxu2 %v15663_v20  ;;  %v14702_v48 = vld [vmem:[#allocation5 + $0x1544] sm:$0xf0]  ;;  %v12461_v20 = vld [vmem:[#allocation5 + $0x17f0] sm:$0xf] }
 0x16c   :  { %7745 = vmatpush.bf16.msra.mxu2 %v12142_v52  ;;  %7714 = vmatmul.bf16.vlgmr.msrb.gmra.mxu3 %v15667_v46  ;;  %v11998_v52 = vor.u32 %v14672_v8, %v11997_v47  ;;  %v12118_v40 = vor.u32 %v14702_v48, %v12117_v49  ;;  %v7482_v8 = vadd.f32 %v7481_v18, %v7469_v62  ;;  %v14698_v13 = vld [vmem:[#allocation5 + $0x1524] sm:$0xf0] }
 0x16d   :  { %7758 = vmatpush.bf16.msra.mxu3 %v12206_v25  ;;  %v14718_v25 = vld [vmem:[#allocation5 + $0x15c4] sm:$0xf0] }
 0x16e   :  { %7720 = vmatpush.bf16.msra.mxu0 %v12006_v34  ;;  %v11981_v34 = vld [vmem:[#allocation5 + $0x1430] sm:$0xf]  ;;  %v12182_v47 = vor.u32 %v14718_v25, %v12181_v15  ;;  %v7494_v3 = vpop.f32.mrf.mxu2  ;;  %v14714_v15 = vld [vmem:[#allocation5 + $0x15a4] sm:$0xf0]  ;;  %v7470_v25 = vpop.f32.mrf.mxu0 }
 0x16f   :  { %7733 = vmatpush.bf16.msra.mxu1 %v12070_v55  ;;  %v14668_v55 = vld [vmem:[#allocation5 + $0x1434] sm:$0xf0]  ;;  %v7495_v49 = vadd.f32 %v7494_v3, %v7482_v8  ;;  %v7507_v48 = vpop.f32.mrf.mxu3  ;;  %v7483_v18 = vpop.f32.mrf.mxu1  ;;  %v12093_v8 = vld [vmem:[#allocation5 + $0x1510] sm:$0xf]  ;;  %v14694_v3 = vld [vmem:[#allocation5 + $0x1504] sm:$0xf0] }
 0x170   :  { %7746 = vmatpush.bf16.msra.mxu2 %v12134_v60  ;;  %v12045_v60 = vld [vmem:[#allocation5 + $0x14b0] sm:$0xf]  ;;  %v11982_v59 = vor.u32 %v14668_v55, %v11981_v34  ;;  %v14664_v55 = vld [vmem:[#allocation5 + $0x1414] sm:$0xf0] }
 0x171   :  { %7759 = vmatpush.bf16.msra.mxu3 %v12198_v51  ;;  %v12109_v51 = vld [vmem:[#allocation5 + $0x1530] sm:$0xf]  ;;  %v12046_v54 = vor.u32 %v14684_v9, %v12045_v60  ;;  %v12166_v9 = vor.u32 %v14714_v15, %v12165_v58  ;;  %v14756_v15 = vld [vmem:[#allocation5 + $0x16f4] sm:$0xf0] }
 0x172   :  { %7721 = vmatpush.bf16.msra.mxu0 %v11998_v52  ;;  %v12110_v50 = vor.u32 %v14700_v53, %v12109_v51  ;;  %v11973_v52 = vld [vmem:[#allocation5 + $0x1420] sm:$0xf]  ;;  %v12029_v60 = vld [vmem:[#allocation5 + $0x1490] sm:$0xf]  ;;  %v14696_v51 = vld [vmem:[#allocation5 + $0x1514] sm:$0xf0] }
 0x173   :  { %7734 = vmatpush.bf16.msra.mxu1 %v12062_v57  ;;  %v14666_v57 = vld [vmem:[#allocation5 + $0x1424] sm:$0xf0]  ;;  %v12157_v53 = vld [vmem:[#allocation5 + $0x1590] sm:$0xf] }
 0x174   :  { %7747 = vmatpush.bf16.msra.mxu2 %v12126_v61  ;;  %v12037_v61 = vld [vmem:[#allocation5 + $0x14a0] sm:$0xf]  ;;  %v11974_v62 = vor.u32 %v14666_v57, %v11973_v52  ;;  %v12333_v58 = vld [vmem:[#allocation5 + $0x16f0] sm:$0xf] }
 0x175   :  { %7760 = vmatpush.bf16.msra.mxu3 %v12190_v43  ;;  %v12101_v43 = vld [vmem:[#allocation5 + $0x1520] sm:$0xf]  ;;  %v12397_v18 = vld [vmem:[#allocation5 + $0x1770] sm:$0xf] }
 0x176   :  { %7722 = vmatpush.bf16.msra.mxu0 %v11990_v36  ;;  %v11965_v36 = vld [vmem:[#allocation5 + $0x1410] sm:$0xf]  ;;  %v12102_v34 = vor.u32 %v14698_v13, %v12101_v43  ;;  %v12021_v57 = vld [vmem:[#allocation5 + $0x1480] sm:$0xf]  ;;  %v14710_v13 = vld [vmem:[#allocation5 + $0x1584] sm:$0xf0]  ;;  %v7496_v25 = vpop.f32.mrf.mxu2 }
 0x177   :  { %7735 = vmatpush.bf16.msra.mxu1 %v12054_v35  ;;  %v15674_v35 = vadd.f32 %v7507_v48, %v7495_v49  ;;  %v11966_v52 = vor.u32 %v14664_v55, %v11965_v36  ;;  %v12149_v43 = vld [vmem:[#allocation5 + $0x1580] sm:$0xf]  ;;  %v12158_v49 = vor.u32 %v14712_v56, %v12157_v53  ;;  %v14740_v48 = vld [vmem:[#allocation5 + $0x1674] sm:$0xf0]  ;;  %v7509_v36 = vpop.f32.mrf.mxu3  ;;  %v175_v55 = vld [vmem:[#allocation2 + $0x58] sm:$0xff]  ;;  %v12334_v25 = vor.u32 %v14756_v15, %v12333_v58 }
 0x178   :  { %7748 = vmatpush.bf16.msra.mxu2 %v12118_v40  ;;  %v12038_v40 = vor.u32 %v14682_v2, %v12037_v61  ;;  %v12094_v2 = vor.u32 %v14696_v51, %v12093_v8  ;;  %252 = vst [vmem:[#allocation1 + $0x20] ss:$4 sm:$0xff] %v175_v55  ;;  %v12150_v8 = vor.u32 %v14710_v13, %v12149_v43  ;;  %v254_v53 = vld.sshfl [vmem:[#allocation1 + $0x8] sm:$0xff pattern:$0x73625140] }
 0x179   :  { %7761 = vmatpush.bf16.msra.mxu3 %v12182_v47  ;;  %v14680_v47 = vld [vmem:[#allocation5 + $0x1494] sm:$0xf0]  ;;  %v256_v56 = vld.sshfl [vmem:[#allocation1 + $0x18] sm:$0xff pattern:$0x73625140] }
 0x17a   :  { %7723 = vmatpush.bf16.msra.mxu0 %v11982_v59  ;;  %v14662_v59 = vld [vmem:[#allocation5 + $0x1404] sm:$0xf0]  ;;  %v12030_v61 = vor.u32 %v14680_v47, %v12029_v60  ;;  %v12261_v36 = vld [vmem:[#allocation5 + $0x1660] sm:$0xf]  ;;  %v15682_v13 = vpack.c.bf16 %v256_v56, %v256_v56  ;;  %v12317_v58 = vld [vmem:[#allocation5 + $0x16d0] sm:$0xf] }
 0x17b   :  { %7736 = vmatpush.bf16.msra.mxu1 %v12046_v54  ;;  %v14678_v54 = vld [vmem:[#allocation5 + $0x1484] sm:$0xf0]  ;;  %v11958_v46 = vor.u32 %v14662_v59, %v11957_v28  ;;  %v14768_v55 = vld [vmem:[#allocation5 + $0x1754] sm:$0xf0]  ;;  %v12373_v56 = vld [vmem:[#allocation5 + $0x1740] sm:$0xf] }
 0x17c   :  { %7749 = vmatpush.bf16.msra.mxu2 %v12110_v50  ;;  %v12085_v50 = vld [vmem:[#allocation5 + $0x1500] sm:$0xf]  ;;  %v253_v47 = vld.sshfl [vmem:[#allocation1] sm:$0xff pattern:$0x73625140]  ;;  %15981 = vst [vmem:[#allocation38_spill] sm:$0xff] %v15682_v13 }
 0x17d   :  { %7762 = vmatpush.bf16.msra.mxu3 %v12174_v0  ;;  %v12269_v0 = vld [vmem:[#allocation5 + $0x1670] sm:$0xf]  ;;  %v12086_v60 = vor.u32 %v14694_v3, %v12085_v50  ;;  %v15676_v59 = vpack.c.bf16 %v253_v47, %v253_v47  ;;  %v15680_v50 = vpack.c.bf16 %v254_v53, %v254_v53  ;;  %v12453_v3 = vld [vmem:[#allocation5 + $0x17e0] sm:$0xf]  ;;  %v14786_v43 = vld [vmem:[#allocation5 + $0x17e4] sm:$0xf0] }
 0x17e   :  { %7724 = vmatpush.bf16.msra.mxu0 %v11974_v62  ;;  %v14772_v62 = vld [vmem:[#allocation5 + $0x1774] sm:$0xf0]  ;;  %v12270_v51 = vor.u32 %v14740_v48, %v12269_v0  ;;  %v12262_v0 = vor.u32 %v14738_v14, %v12261_v36  ;;  %v12454_v15 = vor.u32 %v14786_v43, %v12453_v3  ;;  %v12245_v47 = vld [vmem:[#allocation5 + $0x1640] sm:$0xf]  ;;  %v14750_v53 = vld [vmem:[#allocation5 + $0x16c4] sm:$0xf0] }
 0x17f   :  { %7737 = vmatpush.bf16.msra.mxu1 %v12038_v40  ;;  %v14788_v40 = vld [vmem:[#allocation5 + $0x17f4] sm:$0xf0]  ;;  %v12398_v17 = vor.u32 %v14772_v62, %v12397_v18  ;;  %15978 = vst [vmem:[#allocation35_spill] sm:$0xff] %v15676_v59  ;;  %v12381_v62 = vld [vmem:[#allocation5 + $0x1750] sm:$0xf] }
 0x180   :  { %7750 = vmatpush.bf16.msra.mxu2 %v12102_v34  ;;  %v12022_v34 = vor.u32 %v14678_v54, %v12021_v57  ;;  %v12462_v28 = vor.u32 %v14788_v40, %v12461_v20  ;;  %v14770_v57 = vld [vmem:[#allocation5 + $0x1764] sm:$0xf0]  ;;  %15980 = vst [vmem:[#allocation37_spill] sm:$0xff] %v15680_v50  ;;  %v14736_v48 = vld [vmem:[#allocation5 + $0x1654] sm:$0xf0] }
 0x181   :  { %7763 = vmatpush.bf16.msra.mxu3 %v12166_v9  ;;  %v255_v9 = vld.sshfl [vmem:[#allocation1 + $0x10] sm:$0xff pattern:$0x73625140]  ;;  %v12445_v40 = vld [vmem:[#allocation5 + $0x17d0] sm:$0xf] }
 0x182   :  { %7725 = vmatpush.bf16.msra.mxu0 %v11966_v52  ;;  %v12325_v52 = vld [vmem:[#allocation5 + $0x16e0] sm:$0xf]  ;;  %v15678_v54 = vpack.c.bf16 %v255_v9, %v255_v9  ;;  %v14752_v18 = vld [vmem:[#allocation5 + $0x16d4] sm:$0xf0]  ;;  %v14734_v9 = vld [vmem:[#allocation5 + $0x1644] sm:$0xf0] }
 0x183   :  { %7738 = vmatpush.bf16.msra.mxu1 %v12030_v61  ;;  %v14754_v61 = vld [vmem:[#allocation5 + $0x16e4] sm:$0xf0]  ;;  %v14784_v14 = vld [vmem:[#allocation5 + $0x17d4] sm:$0xf0] }
 0x184   :  { %7751 = vmatpush.bf16.msra.mxu2 %v12094_v2  ;;  %v12389_v2 = vld [vmem:[#allocation5 + $0x1760] sm:$0xf]  ;;  %15979 = vst [vmem:[#allocation36_spill] sm:$0xff] %v15678_v54  ;;  %v12326_v20 = vor.u32 %v14754_v61, %v12325_v52 }
 0x185   :  { %7764 = vmatpush.bf16.msra.mxu3 %v12158_v49  ;;  %v12253_v49 = vld [vmem:[#allocation5 + $0x1650] sm:$0xf]  ;;  %v12437_v52 = vld [vmem:[#allocation5 + $0x17c0] sm:$0xf] }
 0x186   :  { %7726 = vmatpush.bf16.msra.mxu0 %v11958_v46  ;;  %v12390_v46 = vor.u32 %v14770_v57, %v12389_v2  ;;  %v7520_v36 = vpop.f32.mrf.mxu0  ;;  %v12246_v2 = vor.u32 %v14734_v9, %v12245_v47 }
 0x187   :  { %7739 = vmatpush.bf16.msra.mxu1 %v12022_v34  ;;  %v12318_v34 = vor.u32 %v14752_v18, %v12317_v58  ;;  %v7521_v61 = vadd.f32 %v7520_v36, %v15674_v35  ;;  %v7533_v57 = vpop.f32.mrf.mxu1  ;;  %v14748_v58 = vld [vmem:[#allocation5 + $0x16b4] sm:$0xf0]  ;;  %v12421_v36 = vld [vmem:[#allocation5 + $0x17a0] sm:$0xf] }
 0x188   :  { %7752 = vmatpush.bf16.msra.mxu2 %v12086_v60  ;;  %v12382_v60 = vor.u32 %v14768_v55, %v12381_v62  ;;  %v14764_v18 = vld [vmem:[#allocation5 + $0x1734] sm:$0xf0]  ;;  %v12429_v62 = vld [vmem:[#allocation5 + $0x17b0] sm:$0xf] }
 0x189   :  { %7765 = vmatpush.bf16.msra.mxu3 %v12150_v8  ;;  %7727 = vmatmul.bf16.vlgmr.msra.gmra.mxu0 %v15676_v59  ;;  %v12309_v8 = vld [vmem:[#allocation5 + $0x16c0] sm:$0xf]  ;;  %v14780_v55 = vld [vmem:[#allocation5 + $0x17b4] sm:$0xf0]  ;;  %v14802_v59 = vld [vmem:[#allocation5 + $0x1864] sm:$0xf0] }
 0x18a   :  { %7771 = vmatpush.bf16.msrb.mxu0 %v12270_v51  ;;  %7740 = vmatmul.bf16.vlgmr.msra.gmra.mxu1 %v15680_v50  ;;  %v12446_v51 = vor.u32 %v14784_v14, %v12445_v40  ;;  %v12310_v3 = vor.u32 %v14750_v53, %v12309_v8  ;;  %v12430_v47 = vor.u32 %v14780_v55, %v12429_v62  ;;  %v14746_v8 = vld [vmem:[#allocation5 + $0x16a4] sm:$0xf0]  ;;  %v14776_v62 = vld [vmem:[#allocation5 + $0x1794] sm:$0xf0]  ;;  %v12213_v55 = vld [vmem:[#allocation5 + $0x1600] sm:$0xf] }
 0x18b   :  { %7784 = vmatpush.bf16.msrb.mxu1 %v12334_v25  ;;  %7753 = vmatmul.bf16.vlgmr.msra.gmra.mxu2 %v15678_v54  ;;  %v14766_v25 = vld [vmem:[#allocation5 + $0x1744] sm:$0xf0]  ;;  %v12717_v54 = vld [vmem:[#allocation5 + $0x19f0] sm:$0xf] }
 0x18c   :  { %7797 = vmatpush.bf16.msrb.mxu2 %v12398_v17  ;;  %7766 = vmatmul.bf16.vlgmr.msra.gmra.mxu3 %v15682_v13  ;;  %v12254_v17 = vor.u32 %v14736_v48, %v12253_v49  ;;  %v12374_v43 = vor.u32 %v14766_v25, %v12373_v56  ;;  %v7534_v48 = vadd.f32 %v7533_v57, %v7521_v61  ;;  %v14762_v53 = vld [vmem:[#allocation5 + $0x1724] sm:$0xf0] }
 0x18d   :  { %7810 = vmatpush.bf16.msrb.mxu3 %v12462_v28  ;;  %v14782_v28 = vld [vmem:[#allocation5 + $0x17c4] sm:$0xf0] }
 0x18e   :  { %7772 = vmatpush.bf16.msrb.mxu0 %v12262_v0  ;;  %v12237_v0 = vld [vmem:[#allocation5 + $0x1630] sm:$0xf]  ;;  %v12438_v49 = vor.u32 %v14782_v28, %v12437_v52  ;;  %v7546_v9 = vpop.f32.mrf.mxu2  ;;  %v14778_v52 = vld [vmem:[#allocation5 + $0x17a4] sm:$0xf0]  ;;  %v7522_v28 = vpop.f32.mrf.mxu0 }
 0x18f   :  { %7785 = vmatpush.bf16.msrb.mxu1 %v12326_v20  ;;  %v14732_v20 = vld [vmem:[#allocation5 + $0x1634] sm:$0xf0]  ;;  %v7547_v56 = vadd.f32 %v7546_v9, %v7534_v48  ;;  %v7559_v25 = vpop.f32.mrf.mxu3  ;;  %v7535_v57 = vpop.f32.mrf.mxu1  ;;  %v12349_v48 = vld [vmem:[#allocation5 + $0x1710] sm:$0xf]  ;;  %v14758_v9 = vld [vmem:[#allocation5 + $0x1704] sm:$0xf0] }
 0x190   :  { %7798 = vmatpush.bf16.msrb.mxu2 %v12390_v46  ;;  %v12301_v46 = vld [vmem:[#allocation5 + $0x16b0] sm:$0xf]  ;;  %v12238_v40 = vor.u32 %v14732_v20, %v12237_v0  ;;  %v14728_v20 = vld [vmem:[#allocation5 + $0x1614] sm:$0xf0] }
 0x191   :  { %7811 = vmatpush.bf16.msrb.mxu3 %v12454_v15  ;;  %v12365_v15 = vld [vmem:[#allocation5 + $0x1730] sm:$0xf]  ;;  %v12302_v35 = vor.u32 %v14748_v58, %v12301_v46  ;;  %v12422_v58 = vor.u32 %v14778_v52, %v12421_v36  ;;  %v14820_v52 = vld [vmem:[#allocation5 + $0x18f4] sm:$0xf0] }
 0x192   :  { %7773 = vmatpush.bf16.msrb.mxu0 %v12254_v17  ;;  %v12366_v14 = vor.u32 %v14764_v18, %v12365_v15  ;;  %v12229_v17 = vld [vmem:[#allocation5 + $0x1620] sm:$0xf]  ;;  %v12285_v46 = vld [vmem:[#allocation5 + $0x1690] sm:$0xf]  ;;  %v14760_v15 = vld [vmem:[#allocation5 + $0x1714] sm:$0xf0] }
 0x193   :  { %7786 = vmatpush.bf16.msrb.mxu1 %v12318_v34  ;;  %v14730_v34 = vld [vmem:[#allocation5 + $0x1624] sm:$0xf0]  ;;  %v12413_v18 = vld [vmem:[#allocation5 + $0x1790] sm:$0xf] }
 0x194   :  { %7799 = vmatpush.bf16.msrb.mxu2 %v12382_v60  ;;  %v12293_v60 = vld [vmem:[#allocation5 + $0x16a0] sm:$0xf]  ;;  %v12230_v61 = vor.u32 %v14730_v34, %v12229_v17  ;;  %v12589_v36 = vld [vmem:[#allocation5 + $0x18f0] sm:$0xf] }
 0x195   :  { %7812 = vmatpush.bf16.msrb.mxu3 %v12446_v51  ;;  %v12357_v51 = vld [vmem:[#allocation5 + $0x1720] sm:$0xf]  ;;  %v12653_v57 = vld [vmem:[#allocation5 + $0x1970] sm:$0xf] }
 0x196   :  { %7774 = vmatpush.bf16.msrb.mxu0 %v12246_v2  ;;  %v12221_v2 = vld [vmem:[#allocation5 + $0x1610] sm:$0xf]  ;;  %v12358_v0 = vor.u32 %v14762_v53, %v12357_v51  ;;  %v12277_v34 = vld [vmem:[#allocation5 + $0x1680] sm:$0xf]  ;;  %v14774_v53 = vld [vmem:[#allocation5 + $0x1784] sm:$0xf0]  ;;  %v7548_v28 = vpop.f32.mrf.mxu2 }
 0x197   :  { %7787 = vmatpush.bf16.msrb.mxu1 %v12310_v3  ;;  %v15689_v3 = vadd.f32 %v7559_v25, %v7547_v56  ;;  %v12222_v17 = vor.u32 %v14728_v20, %v12221_v2  ;;  %v12405_v51 = vld [vmem:[#allocation5 + $0x1780] sm:$0xf]  ;;  %v12414_v56 = vor.u32 %v14776_v62, %v12413_v18  ;;  %v14804_v25 = vld [vmem:[#allocation5 + $0x1874] sm:$0xf0]  ;;  %v7561_v2 = vpop.f32.mrf.mxu3  ;;  %v12590_v28 = vor.u32 %v14820_v52, %v12589_v36  ;;  %v12573_v36 = vld [vmem:[#allocation5 + $0x18d0] sm:$0xf] }
 0x198   :  { %7800 = vmatpush.bf16.msrb.mxu2 %v12374_v43  ;;  %v12294_v43 = vor.u32 %v14746_v8, %v12293_v60  ;;  %v12350_v8 = vor.u32 %v14760_v15, %v12349_v48  ;;  %v176_v20 = vld [vmem:[#allocation2 + $0x60] sm:$0xff]  ;;  %v12406_v48 = vor.u32 %v14774_v53, %v12405_v51  ;;  %v260_v62 = vld.sshfl [vmem:[#allocation1 + $0x38] sm:$0xff pattern:$0x73625140] }
 0x199   :  { %7813 = vmatpush.bf16.msrb.mxu3 %v12438_v49  ;;  %v14744_v49 = vld [vmem:[#allocation5 + $0x1694] sm:$0xf0]  ;;  %261 = vst [vmem:[#allocation1] ss:$4 sm:$0xff] %v176_v20  ;;  %v12517_v2 = vld [vmem:[#allocation5 + $0x1860] sm:$0xf]  ;;  %v15697_v53 = vpack.c.bf16 %v260_v62, %v260_v62 }
 0x19a   :  { %7775 = vmatpush.bf16.msrb.mxu0 %v12238_v40  ;;  %v14726_v40 = vld [vmem:[#allocation5 + $0x1604] sm:$0xf0]  ;;  %v12286_v60 = vor.u32 %v14744_v49, %v12285_v46  ;;  %v258_v18 = vld.sshfl [vmem:[#allocation1 + $0x28] sm:$0xff pattern:$0x73625140] }
 0x19b   :  { %7788 = vmatpush.bf16.msrb.mxu1 %v12302_v35  ;;  %v14742_v35 = vld [vmem:[#allocation5 + $0x1684] sm:$0xf0]  ;;  %v12214_v13 = vor.u32 %v14726_v40, %v12213_v55  ;;  %15985 = vst [vmem:[#allocation42_spill] sm:$0xff] %v15697_v53  ;;  %v14832_v20 = vld [vmem:[#allocation5 + $0x1954] sm:$0xf0] }
 0x19c   :  { %7801 = vmatpush.bf16.msrb.mxu2 %v12366_v14  ;;  %v12341_v14 = vld [vmem:[#allocation5 + $0x1700] sm:$0xf]  ;;  %v257_v49 = vld.sshfl [vmem:[#allocation1 + $0x20] sm:$0xff pattern:$0x73625140] }
 0x19d   :  { %7814 = vmatpush.bf16.msrb.mxu3 %v12430_v47  ;;  %v12525_v47 = vld [vmem:[#allocation5 + $0x1870] sm:$0xf]  ;;  %v12342_v46 = vor.u32 %v14758_v9, %v12341_v14  ;;  %v15691_v40 = vpack.c.bf16 %v257_v49, %v257_v49  ;;  %v15695_v14 = vpack.c.bf16 %v258_v18, %v258_v18  ;;  %v12709_v9 = vld [vmem:[#allocation5 + $0x19e0] sm:$0xf]  ;;  %v14850_v51 = vld [vmem:[#allocation5 + $0x19e4] sm:$0xf0] }
 0x19e   :  { %7776 = vmatpush.bf16.msrb.mxu0 %v12230_v61  ;;  %v14836_v61 = vld [vmem:[#allocation5 + $0x1974] sm:$0xf0]  ;;  %v12526_v15 = vor.u32 %v14804_v25, %v12525_v47  ;;  %v12518_v47 = vor.u32 %v14802_v59, %v12517_v2  ;;  %v12710_v52 = vor.u32 %v14850_v51, %v12709_v9  ;;  %v12501_v49 = vld [vmem:[#allocation5 + $0x1840] sm:$0xf]  ;;  %v14814_v18 = vld [vmem:[#allocation5 + $0x18c4] sm:$0xf0] }
 0x19f   :  { %7789 = vmatpush.bf16.msrb.mxu1 %v12294_v43  ;;  %v14852_v43 = vld [vmem:[#allocation5 + $0x19f4] sm:$0xf0]  ;;  %v12654_v50 = vor.u32 %v14836_v61, %v12653_v57  ;;  %15982 = vst [vmem:[#allocation39_spill] sm:$0xff] %v15691_v40  ;;  %v12637_v61 = vld [vmem:[#allocation5 + $0x1950] sm:$0xf] }
 0x1a0   :  { %7802 = vmatpush.bf16.msrb.mxu2 %v12358_v0  ;;  %v12278_v0 = vor.u32 %v14742_v35, %v12277_v34  ;;  %v12718_v55 = vor.u32 %v14852_v43, %v12717_v54  ;;  %v14834_v34 = vld [vmem:[#allocation5 + $0x1964] sm:$0xf0]  ;;  %15984 = vst [vmem:[#allocation41_spill] sm:$0xff] %v15695_v14  ;;  %v14800_v25 = vld [vmem:[#allocation5 + $0x1854] sm:$0xf0] }
 0x1a1   :  { %7815 = vmatpush.bf16.msrb.mxu3 %v12422_v58  ;;  %v259_v58 = vld.sshfl [vmem:[#allocation1 + $0x30] sm:$0xff pattern:$0x73625140]  ;;  %v12701_v43 = vld [vmem:[#allocation5 + $0x19d0] sm:$0xf] }
 0x1a2   :  { %7777 = vmatpush.bf16.msrb.mxu0 %v12222_v17  ;;  %v12581_v17 = vld [vmem:[#allocation5 + $0x18e0] sm:$0xf]  ;;  %v15693_v35 = vpack.c.bf16 %v259_v58, %v259_v58  ;;  %v14816_v57 = vld [vmem:[#allocation5 + $0x18d4] sm:$0xf0]  ;;  %v14798_v58 = vld [vmem:[#allocation5 + $0x1844] sm:$0xf0] }
 0x1a3   :  { %7790 = vmatpush.bf16.msrb.mxu1 %v12286_v60  ;;  %v14818_v60 = vld [vmem:[#allocation5 + $0x18e4] sm:$0xf0]  ;;  %v14848_v59 = vld [vmem:[#allocation5 + $0x19d4] sm:$0xf0]  ;;  %v12629_v62 = vld [vmem:[#allocation5 + $0x1940] sm:$0xf] }
 0x1a4   :  { %7803 = vmatpush.bf16.msrb.mxu2 %v12350_v8  ;;  %v12645_v8 = vld [vmem:[#allocation5 + $0x1960] sm:$0xf]  ;;  %15983 = vst [vmem:[#allocation40_spill] sm:$0xff] %v15693_v35  ;;  %v12582_v54 = vor.u32 %v14818_v60, %v12581_v17 }
 0x1a5   :  { %7816 = vmatpush.bf16.msrb.mxu3 %v12414_v56  ;;  %v12509_v56 = vld [vmem:[#allocation5 + $0x1850] sm:$0xf]  ;;  %v12693_v17 = vld [vmem:[#allocation5 + $0x19c0] sm:$0xf] }
 0x1a6   :  { %7778 = vmatpush.bf16.msrb.mxu0 %v12214_v13  ;;  %v12646_v13 = vor.u32 %v14834_v34, %v12645_v8  ;;  %v7572_v2 = vpop.f32.mrf.mxu0  ;;  %v12502_v8 = vor.u32 %v14798_v58, %v12501_v49 }
 0x1a7   :  { %7791 = vmatpush.bf16.msrb.mxu1 %v12278_v0  ;;  %v12574_v0 = vor.u32 %v14816_v57, %v12573_v36  ;;  %v7573_v60 = vadd.f32 %v7572_v2, %v15689_v3  ;;  %v7585_v34 = vpop.f32.mrf.mxu1  ;;  %v14812_v36 = vld [vmem:[#allocation5 + $0x18b4] sm:$0xf0]  ;;  %v12677_v2 = vld [vmem:[#allocation5 + $0x19a0] sm:$0xf] }
 0x1a8   :  { %7804 = vmatpush.bf16.msrb.mxu2 %v12342_v46  ;;  %v12638_v46 = vor.u32 %v14832_v20, %v12637_v61  ;;  %v14828_v57 = vld [vmem:[#allocation5 + $0x1934] sm:$0xf0]  ;;  %v12685_v61 = vld [vmem:[#allocation5 + $0x19b0] sm:$0xf] }
 0x1a9   :  { %7817 = vmatpush.bf16.msrb.mxu3 %v12406_v48  ;;  %7779 = vmatmul.bf16.vlgmr.msrb.gmra.mxu0 %v15691_v40  ;;  %v12565_v48 = vld [vmem:[#allocation5 + $0x18c0] sm:$0xf]  ;;  %v14844_v20 = vld [vmem:[#allocation5 + $0x19b4] sm:$0xf0]  ;;  %v14866_v40 = vld [vmem:[#allocation5 + $0x1a64] sm:$0xf0] }
 0x1aa   :  { %7823 = vmatpush.bf16.msra.mxu0 %v12526_v15  ;;  %7792 = vmatmul.bf16.vlgmr.msrb.gmra.mxu1 %v15695_v14  ;;  %v12702_v15 = vor.u32 %v14848_v59, %v12701_v43  ;;  %v12566_v9 = vor.u32 %v14814_v18, %v12565_v48  ;;  %v12686_v49 = vor.u32 %v14844_v20, %v12685_v61  ;;  %v14810_v48 = vld [vmem:[#allocation5 + $0x18a4] sm:$0xf0]  ;;  %v14840_v61 = vld [vmem:[#allocation5 + $0x1994] sm:$0xf0]  ;;  %v12469_v20 = vld [vmem:[#allocation5 + $0x1800] sm:$0xf] }
 0x1ab   :  { %7836 = vmatpush.bf16.msra.mxu1 %v12590_v28  ;;  %7805 = vmatmul.bf16.vlgmr.msrb.gmra.mxu2 %v15693_v35  ;;  %v14830_v28 = vld [vmem:[#allocation5 + $0x1944] sm:$0xf0]  ;;  %v12973_v35 = vld [vmem:[#allocation5 + $0x1bf0] sm:$0xf] }
 0x1ac   :  { %7849 = vmatpush.bf16.msra.mxu2 %v12654_v50  ;;  %7818 = vmatmul.bf16.vlgmr.msrb.gmra.mxu3 %v15697_v53  ;;  %v12510_v50 = vor.u32 %v14800_v25, %v12509_v56  ;;  %v12630_v51 = vor.u32 %v14830_v28, %v12629_v62  ;;  %v7586_v25 = vadd.f32 %v7585_v34, %v7573_v60  ;;  %v14826_v18 = vld [vmem:[#allocation5 + $0x1924] sm:$0xf0] }
 0x1ad   :  { %7862 = vmatpush.bf16.msra.mxu3 %v12718_v55  ;;  %v14846_v55 = vld [vmem:[#allocation5 + $0x19c4] sm:$0xf0] }
 0x1ae   :  { %7824 = vmatpush.bf16.msra.mxu0 %v12518_v47  ;;  %v12493_v47 = vld [vmem:[#allocation5 + $0x1830] sm:$0xf]  ;;  %v12694_v56 = vor.u32 %v14846_v55, %v12693_v17  ;;  %v7598_v58 = vpop.f32.mrf.mxu2  ;;  %v14842_v17 = vld [vmem:[#allocation5 + $0x19a4] sm:$0xf0]  ;;  %v7574_v55 = vpop.f32.mrf.mxu0 }
 0x1af   :  { %7837 = vmatpush.bf16.msra.mxu1 %v12582_v54  ;;  %v14796_v54 = vld [vmem:[#allocation5 + $0x1834] sm:$0xf0]  ;;  %v7599_v62 = vadd.f32 %v7598_v58, %v7586_v25  ;;  %v7611_v28 = vpop.f32.mrf.mxu3  ;;  %v7587_v34 = vpop.f32.mrf.mxu1  ;;  %v12605_v25 = vld [vmem:[#allocation5 + $0x1910] sm:$0xf]  ;;  %v14822_v58 = vld [vmem:[#allocation5 + $0x1904] sm:$0xf0] }
 0x1b0   :  { %7850 = vmatpush.bf16.msra.mxu2 %v12646_v13  ;;  %v12557_v13 = vld [vmem:[#allocation5 + $0x18b0] sm:$0xf]  ;;  %v12494_v43 = vor.u32 %v14796_v54, %v12493_v47  ;;  %v14792_v54 = vld [vmem:[#allocation5 + $0x1814] sm:$0xf0] }
 0x1b1   :  { %7863 = vmatpush.bf16.msra.mxu3 %v12710_v52  ;;  %v12621_v52 = vld [vmem:[#allocation5 + $0x1930] sm:$0xf]  ;;  %v12558_v3 = vor.u32 %v14812_v36, %v12557_v13  ;;  %v12678_v36 = vor.u32 %v14842_v17, %v12677_v2  ;;  %v14884_v17 = vld [vmem:[#allocation5 + $0x1af4] sm:$0xf0] }
 0x1b2   :  { %7825 = vmatpush.bf16.msra.mxu0 %v12510_v50  ;;  %v12622_v59 = vor.u32 %v14828_v57, %v12621_v52  ;;  %v12485_v50 = vld [vmem:[#allocation5 + $0x1820] sm:$0xf]  ;;  %v12541_v13 = vld [vmem:[#allocation5 + $0x1890] sm:$0xf]  ;;  %v14824_v52 = vld [vmem:[#allocation5 + $0x1914] sm:$0xf0] }
 0x1b3   :  { %7838 = vmatpush.bf16.msra.mxu1 %v12574_v0  ;;  %v14794_v0 = vld [vmem:[#allocation5 + $0x1824] sm:$0xf0]  ;;  %v12669_v57 = vld [vmem:[#allocation5 + $0x1990] sm:$0xf] }
 0x1b4   :  { %7851 = vmatpush.bf16.msra.mxu2 %v12638_v46  ;;  %v12549_v46 = vld [vmem:[#allocation5 + $0x18a0] sm:$0xf]  ;;  %v12486_v60 = vor.u32 %v14794_v0, %v12485_v50  ;;  %v12845_v2 = vld [vmem:[#allocation5 + $0x1af0] sm:$0xf] }
 0x1b5   :  { %7864 = vmatpush.bf16.msra.mxu3 %v12702_v15  ;;  %v12613_v15 = vld [vmem:[#allocation5 + $0x1920] sm:$0xf]  ;;  %v12909_v34 = vld [vmem:[#allocation5 + $0x1b70] sm:$0xf] }
 0x1b6   :  { %7826 = vmatpush.bf16.msra.mxu0 %v12502_v8  ;;  %v12477_v8 = vld [vmem:[#allocation5 + $0x1810] sm:$0xf]  ;;  %v12614_v47 = vor.u32 %v14826_v18, %v12613_v15  ;;  %v12533_v0 = vld [vmem:[#allocation5 + $0x1880] sm:$0xf]  ;;  %v14838_v18 = vld [vmem:[#allocation5 + $0x1984] sm:$0xf0]  ;;  %v7600_v55 = vpop.f32.mrf.mxu2 }
 0x1b7   :  { %7839 = vmatpush.bf16.msra.mxu1 %v12566_v9  ;;  %v15704_v9 = vadd.f32 %v7611_v28, %v7599_v62  ;;  %v12478_v50 = vor.u32 %v14792_v54, %v12477_v8  ;;  %v12661_v15 = vld [vmem:[#allocation5 + $0x1980] sm:$0xf]  ;;  %v12670_v62 = vor.u32 %v14840_v61, %v12669_v57  ;;  %v14868_v28 = vld [vmem:[#allocation5 + $0x1a74] sm:$0xf0]  ;;  %v7613_v8 = vpop.f32.mrf.mxu3  ;;  %v12846_v55 = vor.u32 %v14884_v17, %v12845_v2  ;;  %v12829_v2 = vld [vmem:[#allocation5 + $0x1ad0] sm:$0xf] }
 0x1b8   :  { %7852 = vmatpush.bf16.msra.mxu2 %v12630_v51  ;;  %v12550_v51 = vor.u32 %v14810_v48, %v12549_v46  ;;  %v12606_v48 = vor.u32 %v14824_v52, %v12605_v25  ;;  %v177_v54 = vld [vmem:[#allocation2 + $0x68] sm:$0xff]  ;;  %v12662_v25 = vor.u32 %v14838_v18, %v12661_v15  ;;  %v264_v57 = vld.sshfl [vmem:[#allocation1 + $0x8] sm:$0xff pattern:$0x73625140]  ;;  %v14914_v15 = vld [vmem:[#allocation5 + $0x1be4] sm:$0xf0] }
 0x1b9   :  { %7865 = vmatpush.bf16.msra.mxu3 %v12694_v56  ;;  %v14808_v56 = vld [vmem:[#allocation5 + $0x1894] sm:$0xf0]  ;;  %262 = vst [vmem:[#allocation1 + $0x20] ss:$4 sm:$0xff] %v177_v54  ;;  %v12773_v8 = vld [vmem:[#allocation5 + $0x1a60] sm:$0xf] }
 0x1ba   :  { %7827 = vmatpush.bf16.msra.mxu0 %v12494_v43  ;;  %v14790_v43 = vld [vmem:[#allocation5 + $0x1804] sm:$0xf0]  ;;  %v12542_v46 = vor.u32 %v14808_v56, %v12541_v13  ;;  %v14896_v54 = vld [vmem:[#allocation5 + $0x1b54] sm:$0xf0] }
 0x1bb   :  { %7840 = vmatpush.bf16.msra.mxu1 %v12558_v3  ;;  %v14806_v3 = vld [vmem:[#allocation5 + $0x1884] sm:$0xf0]  ;;  %v12470_v53 = vor.u32 %v14790_v43, %v12469_v20 }
 0x1bc   :  { %7853 = vmatpush.bf16.msra.mxu2 %v12622_v59  ;;  %v12597_v59 = vld [vmem:[#allocation5 + $0x1900] sm:$0xf]  ;;  %v263_v56 = vld.sshfl [vmem:[#allocation1] sm:$0xff pattern:$0x73625140] }
 0x1bd   :  { %7866 = vmatpush.bf16.msra.mxu3 %v12686_v49  ;;  %v12781_v49 = vld [vmem:[#allocation5 + $0x1a70] sm:$0xf]  ;;  %v12598_v13 = vor.u32 %v14822_v58, %v12597_v59  ;;  %v266_v61 = vld.sshfl [vmem:[#allocation1 + $0x18] sm:$0xff pattern:$0x73625140]  ;;  %v15706_v43 = vpack.c.bf16 %v263_v56, %v263_v56  ;;  %v15710_v59 = vpack.c.bf16 %v264_v57, %v264_v57 }
 0x1be   :  { %7828 = vmatpush.bf16.msra.mxu0 %v12486_v60  ;;  %v14900_v60 = vld [vmem:[#allocation5 + $0x1b74] sm:$0xf0]  ;;  %v12782_v52 = vor.u32 %v14868_v28, %v12781_v49  ;;  %v12965_v58 = vld [vmem:[#allocation5 + $0x1be0] sm:$0xf]  ;;  %v15712_v18 = vpack.c.bf16 %v266_v61, %v266_v61  ;;  %v12774_v49 = vor.u32 %v14866_v40, %v12773_v8  ;;  %v14878_v57 = vld [vmem:[#allocation5 + $0x1ac4] sm:$0xf0] }
 0x1bf   :  { %7841 = vmatpush.bf16.msra.mxu1 %v12550_v51  ;;  %v14916_v51 = vld [vmem:[#allocation5 + $0x1bf4] sm:$0xf0]  ;;  %v12910_v14 = vor.u32 %v14900_v60, %v12909_v34  ;;  %15986 = vst [vmem:[#allocation43_spill] sm:$0xff] %v15706_v43  ;;  %v12966_v17 = vor.u32 %v14914_v15, %v12965_v58  ;;  %v12893_v60 = vld [vmem:[#allocation5 + $0x1b50] sm:$0xf] }
 0x1c0   :  { %7854 = vmatpush.bf16.msra.mxu2 %v12614_v47  ;;  %v12534_v47 = vor.u32 %v14806_v3, %v12533_v0  ;;  %v12974_v20 = vor.u32 %v14916_v51, %v12973_v35  ;;  %v14898_v0 = vld [vmem:[#allocation5 + $0x1b64] sm:$0xf0]  ;;  %15988 = vst [vmem:[#allocation45_spill] sm:$0xff] %v15710_v59  ;;  %v14864_v28 = vld [vmem:[#allocation5 + $0x1a54] sm:$0xf0] }
 0x1c1   :  { %7867 = vmatpush.bf16.msra.mxu3 %v12678_v36  ;;  %v265_v36 = vld.sshfl [vmem:[#allocation1 + $0x10] sm:$0xff pattern:$0x73625140]  ;;  %15989 = vst [vmem:[#allocation46_spill] sm:$0xff] %v15712_v18  ;;  %v12957_v51 = vld [vmem:[#allocation5 + $0x1bd0] sm:$0xf] }
 0x1c2   :  { %7829 = vmatpush.bf16.msra.mxu0 %v12478_v50  ;;  %v12837_v50 = vld [vmem:[#allocation5 + $0x1ae0] sm:$0xf]  ;;  %v15708_v3 = vpack.c.bf16 %v265_v36, %v265_v36  ;;  %v14880_v34 = vld [vmem:[#allocation5 + $0x1ad4] sm:$0xf0]  ;;  %v14862_v36 = vld [vmem:[#allocation5 + $0x1a44] sm:$0xf0] }
 0x1c3   :  { %7842 = vmatpush.bf16.msra.mxu1 %v12542_v46  ;;  %v14882_v46 = vld [vmem:[#allocation5 + $0x1ae4] sm:$0xf0]  ;;  %v14912_v40 = vld [vmem:[#allocation5 + $0x1bd4] sm:$0xf0]  ;;  %v12757_v56 = vld [vmem:[#allocation5 + $0x1a40] sm:$0xf] }
 0x1c4   :  { %7855 = vmatpush.bf16.msra.mxu2 %v12606_v48  ;;  %v12901_v48 = vld [vmem:[#allocation5 + $0x1b60] sm:$0xf]  ;;  %15987 = vst [vmem:[#allocation44_spill] sm:$0xff] %v15708_v3  ;;  %v12838_v35 = vor.u32 %v14882_v46, %v12837_v50 }
 0x1c5   :  { %7868 = vmatpush.bf16.msra.mxu3 %v12670_v62  ;;  %v12765_v62 = vld [vmem:[#allocation5 + $0x1a50] sm:$0xf]  ;;  %v12885_v61 = vld [vmem:[#allocation5 + $0x1b40] sm:$0xf] }
 0x1c6   :  { %7830 = vmatpush.bf16.msra.mxu0 %v12470_v53  ;;  %v12902_v53 = vor.u32 %v14898_v0, %v12901_v48  ;;  %v7624_v8 = vpop.f32.mrf.mxu0  ;;  %v12949_v50 = vld [vmem:[#allocation5 + $0x1bc0] sm:$0xf]  ;;  %v12758_v48 = vor.u32 %v14862_v36, %v12757_v56 }
 0x1c7   :  { %7843 = vmatpush.bf16.msra.mxu1 %v12534_v47  ;;  %v12830_v47 = vor.u32 %v14880_v34, %v12829_v2  ;;  %v7625_v46 = vadd.f32 %v7624_v8, %v15704_v9  ;;  %v7637_v0 = vpop.f32.mrf.mxu1  ;;  %v14876_v2 = vld [vmem:[#allocation5 + $0x1ab4] sm:$0xf0]  ;;  %v12933_v8 = vld [vmem:[#allocation5 + $0x1ba0] sm:$0xf] }
 0x1c8   :  { %7856 = vmatpush.bf16.msra.mxu2 %v12598_v13  ;;  %v12894_v13 = vor.u32 %v14896_v54, %v12893_v60  ;;  %v14892_v34 = vld [vmem:[#allocation5 + $0x1b34] sm:$0xf0]  ;;  %v12941_v60 = vld [vmem:[#allocation5 + $0x1bb0] sm:$0xf] }
 0x1c9   :  { %7869 = vmatpush.bf16.msra.mxu3 %v12662_v25  ;;  %7831 = vmatmul.bf16.vlgmr.msra.gmra.mxu0 %v15706_v43  ;;  %v12821_v25 = vld [vmem:[#allocation5 + $0x1ac0] sm:$0xf]  ;;  %v14908_v54 = vld [vmem:[#allocation5 + $0x1bb4] sm:$0xf0]  ;;  %v14930_v43 = vld [vmem:[#allocation5 + $0x1c64] sm:$0xf0] }
 0x1ca   :  { %7875 = vmatpush.bf16.msrb.mxu0 %v12782_v52  ;;  %7844 = vmatmul.bf16.vlgmr.msra.gmra.mxu1 %v15710_v59  ;;  %v12958_v52 = vor.u32 %v14912_v40, %v12957_v51  ;;  %v12822_v58 = vor.u32 %v14878_v57, %v12821_v25  ;;  %v12942_v56 = vor.u32 %v14908_v54, %v12941_v60  ;;  %v14874_v25 = vld [vmem:[#allocation5 + $0x1aa4] sm:$0xf0]  ;;  %v14904_v60 = vld [vmem:[#allocation5 + $0x1b94] sm:$0xf0]  ;;  %v12725_v54 = vld [vmem:[#allocation5 + $0x1a00] sm:$0xf] }
 0x1cb   :  { %7888 = vmatpush.bf16.msrb.mxu1 %v12846_v55  ;;  %7857 = vmatmul.bf16.vlgmr.msra.gmra.mxu2 %v15708_v3  ;;  %v14894_v55 = vld [vmem:[#allocation5 + $0x1b44] sm:$0xf0]  ;;  %v13229_v3 = vld [vmem:[#allocation5 + $0x1df0] sm:$0xf] }
 0x1cc   :  { %7901 = vmatpush.bf16.msrb.mxu2 %v12910_v14  ;;  %7870 = vmatmul.bf16.vlgmr.msra.gmra.mxu3 %v15712_v18  ;;  %v12766_v14 = vor.u32 %v14864_v28, %v12765_v62  ;;  %v12886_v15 = vor.u32 %v14894_v55, %v12885_v61  ;;  %v7638_v28 = vadd.f32 %v7637_v0, %v7625_v46  ;;  %v14890_v57 = vld [vmem:[#allocation5 + $0x1b24] sm:$0xf0] }
 0x1cd   :  { %7914 = vmatpush.bf16.msrb.mxu3 %v12974_v20  ;;  %v14910_v20 = vld [vmem:[#allocation5 + $0x1bc4] sm:$0xf0] }
 0x1ce   :  { %7876 = vmatpush.bf16.msrb.mxu0 %v12774_v49  ;;  %v12749_v49 = vld [vmem:[#allocation5 + $0x1a30] sm:$0xf]  ;;  %v12950_v62 = vor.u32 %v14910_v20, %v12949_v50  ;;  %v7650_v36 = vpop.f32.mrf.mxu2  ;;  %v14906_v50 = vld [vmem:[#allocation5 + $0x1ba4] sm:$0xf0]  ;;  %v7626_v20 = vpop.f32.mrf.mxu0 }
 0x1cf   :  { %7889 = vmatpush.bf16.msrb.mxu1 %v12838_v35  ;;  %v14860_v35 = vld [vmem:[#allocation5 + $0x1a34] sm:$0xf0]  ;;  %v7651_v61 = vadd.f32 %v7650_v36, %v7638_v28  ;;  %v7663_v55 = vpop.f32.mrf.mxu3  ;;  %v7639_v0 = vpop.f32.mrf.mxu1  ;;  %v12861_v28 = vld [vmem:[#allocation5 + $0x1b10] sm:$0xf]  ;;  %v14886_v36 = vld [vmem:[#allocation5 + $0x1b04] sm:$0xf0] }
 0x1d0   :  { %7902 = vmatpush.bf16.msrb.mxu2 %v12902_v53  ;;  %v12813_v53 = vld [vmem:[#allocation5 + $0x1ab0] sm:$0xf]  ;;  %v12750_v51 = vor.u32 %v14860_v35, %v12749_v49  ;;  %v14856_v35 = vld [vmem:[#allocation5 + $0x1a14] sm:$0xf0] }
 0x1d1   :  { %7915 = vmatpush.bf16.msrb.mxu3 %v12966_v17  ;;  %v12877_v17 = vld [vmem:[#allocation5 + $0x1b30] sm:$0xf]  ;;  %v12814_v9 = vor.u32 %v14876_v2, %v12813_v53  ;;  %v12934_v2 = vor.u32 %v14906_v50, %v12933_v8  ;;  %v14948_v50 = vld [vmem:[#allocation5 + $0x1cf4] sm:$0xf0] }
 0x1d2   :  { %7877 = vmatpush.bf16.msrb.mxu0 %v12766_v14  ;;  %v12878_v40 = vor.u32 %v14892_v34, %v12877_v17  ;;  %v12741_v14 = vld [vmem:[#allocation5 + $0x1a20] sm:$0xf]  ;;  %v12797_v53 = vld [vmem:[#allocation5 + $0x1a90] sm:$0xf]  ;;  %v14888_v17 = vld [vmem:[#allocation5 + $0x1b14] sm:$0xf0] }
 0x1d3   :  { %7890 = vmatpush.bf16.msrb.mxu1 %v12830_v47  ;;  %v14858_v47 = vld [vmem:[#allocation5 + $0x1a24] sm:$0xf0]  ;;  %v12925_v34 = vld [vmem:[#allocation5 + $0x1b90] sm:$0xf] }
 0x1d4   :  { %7903 = vmatpush.bf16.msrb.mxu2 %v12894_v13  ;;  %v12805_v13 = vld [vmem:[#allocation5 + $0x1aa0] sm:$0xf]  ;;  %v12742_v46 = vor.u32 %v14858_v47, %v12741_v14  ;;  %v13101_v8 = vld [vmem:[#allocation5 + $0x1cf0] sm:$0xf] }
 0x1d5   :  { %7916 = vmatpush.bf16.msrb.mxu3 %v12958_v52  ;;  %v12869_v52 = vld [vmem:[#allocation5 + $0x1b20] sm:$0xf]  ;;  %v13165_v0 = vld [vmem:[#allocation5 + $0x1d70] sm:$0xf] }
 0x1d6   :  { %7878 = vmatpush.bf16.msrb.mxu0 %v12758_v48  ;;  %v12733_v48 = vld [vmem:[#allocation5 + $0x1a10] sm:$0xf]  ;;  %v12870_v49 = vor.u32 %v14890_v57, %v12869_v52  ;;  %v12789_v47 = vld [vmem:[#allocation5 + $0x1a80] sm:$0xf]  ;;  %v14902_v57 = vld [vmem:[#allocation5 + $0x1b84] sm:$0xf0]  ;;  %v7652_v20 = vpop.f32.mrf.mxu2 }
 0x1d7   :  { %7891 = vmatpush.bf16.msrb.mxu1 %v12822_v58  ;;  %v15719_v58 = vadd.f32 %v7663_v55, %v7651_v61  ;;  %v12734_v14 = vor.u32 %v14856_v35, %v12733_v48  ;;  %v12917_v52 = vld [vmem:[#allocation5 + $0x1b80] sm:$0xf]  ;;  %v12926_v61 = vor.u32 %v14904_v60, %v12925_v34  ;;  %v14932_v55 = vld [vmem:[#allocation5 + $0x1c74] sm:$0xf0]  ;;  %v7665_v48 = vpop.f32.mrf.mxu3  ;;  %v13102_v20 = vor.u32 %v14948_v50, %v13101_v8  ;;  %v13085_v8 = vld [vmem:[#allocation5 + $0x1cd0] sm:$0xf] }
 0x1d8   :  { %7904 = vmatpush.bf16.msrb.mxu2 %v12886_v15  ;;  %v12806_v15 = vor.u32 %v14874_v25, %v12805_v13  ;;  %v12862_v25 = vor.u32 %v14888_v17, %v12861_v28  ;;  %v178_v35 = vld [vmem:[#allocation2 + $0x70] sm:$0xff]  ;;  %v12918_v28 = vor.u32 %v14902_v57, %v12917_v52  ;;  %v268_v34 = vld.sshfl [vmem:[#allocation1 + $0x28] sm:$0xff pattern:$0x73625140] }
 0x1d9   :  { %7917 = vmatpush.bf16.msrb.mxu3 %v12950_v62  ;;  %v14872_v62 = vld [vmem:[#allocation5 + $0x1a94] sm:$0xf0]  ;;  %271 = vst [vmem:[#allocation1] ss:$4 sm:$0xff] %v178_v35  ;;  %v13029_v48 = vld [vmem:[#allocation5 + $0x1c60] sm:$0xf] }
 0x1da   :  { %7879 = vmatpush.bf16.msrb.mxu0 %v12750_v51  ;;  %v14854_v51 = vld [vmem:[#allocation5 + $0x1a04] sm:$0xf0]  ;;  %v12798_v13 = vor.u32 %v14872_v62, %v12797_v53  ;;  %v14960_v35 = vld [vmem:[#allocation5 + $0x1d54] sm:$0xf0] }
 0x1db   :  { %7892 = vmatpush.bf16.msrb.mxu1 %v12814_v9  ;;  %v14870_v9 = vld [vmem:[#allocation5 + $0x1a84] sm:$0xf0]  ;;  %v12726_v18 = vor.u32 %v14854_v51, %v12725_v54 }
 0x1dc   :  { %7905 = vmatpush.bf16.msrb.mxu2 %v12878_v40  ;;  %v12853_v40 = vld [vmem:[#allocation5 + $0x1b00] sm:$0xf]  ;;  %v267_v62 = vld.sshfl [vmem:[#allocation1 + $0x20] sm:$0xff pattern:$0x73625140] }
 0x1dd   :  { %7918 = vmatpush.bf16.msrb.mxu3 %v12942_v56  ;;  %v13037_v56 = vld [vmem:[#allocation5 + $0x1c70] sm:$0xf]  ;;  %v12854_v53 = vor.u32 %v14886_v36, %v12853_v40  ;;  %v270_v60 = vld.sshfl [vmem:[#allocation1 + $0x38] sm:$0xff pattern:$0x73625140]  ;;  %v15721_v51 = vpack.c.bf16 %v267_v62, %v267_v62  ;;  %v15725_v40 = vpack.c.bf16 %v268_v34, %v268_v34 }
 0x1de   :  { %7880 = vmatpush.bf16.msrb.mxu0 %v12742_v46  ;;  %v14964_v46 = vld [vmem:[#allocation5 + $0x1d74] sm:$0xf0]  ;;  %v13038_v17 = vor.u32 %v14932_v55, %v13037_v56  ;;  %v13221_v36 = vld [vmem:[#allocation5 + $0x1de0] sm:$0xf]  ;;  %v14978_v52 = vld [vmem:[#allocation5 + $0x1de4] sm:$0xf0]  ;;  %v15727_v57 = vpack.c.bf16 %v270_v60, %v270_v60  ;;  %v13030_v56 = vor.u32 %v14930_v43, %v13029_v48 }
 0x1df   :  { %7893 = vmatpush.bf16.msrb.mxu1 %v12806_v15  ;;  %v14980_v15 = vld [vmem:[#allocation5 + $0x1df4] sm:$0xf0]  ;;  %v13166_v59 = vor.u32 %v14964_v46, %v13165_v0  ;;  %15990 = vst [vmem:[#allocation47_spill] sm:$0xff] %v15721_v51  ;;  %v13222_v50 = vor.u32 %v14978_v52, %v13221_v36  ;;  %v13149_v46 = vld [vmem:[#allocation5 + $0x1d50] sm:$0xf] }
 0x1e0   :  { %7906 = vmatpush.bf16.msrb.mxu2 %v12870_v49  ;;  %v12790_v49 = vor.u32 %v14870_v9, %v12789_v47  ;;  %v13230_v54 = vor.u32 %v14980_v15, %v13229_v3  ;;  %v14962_v47 = vld [vmem:[#allocation5 + $0x1d64] sm:$0xf0]  ;;  %15992 = vst [vmem:[#allocation49_spill] sm:$0xff] %v15725_v40  ;;  %v14928_v55 = vld [vmem:[#allocation5 + $0x1c54] sm:$0xf0] }
 0x1e1   :  { %7919 = vmatpush.bf16.msrb.mxu3 %v12934_v2  ;;  %v269_v2 = vld.sshfl [vmem:[#allocation1 + $0x30] sm:$0xff pattern:$0x73625140]  ;;  %15993 = vst [vmem:[#allocation50_spill] sm:$0xff] %v15727_v57  ;;  %v13213_v15 = vld [vmem:[#allocation5 + $0x1dd0] sm:$0xf] }
 0x1e2   :  { %7881 = vmatpush.bf16.msrb.mxu0 %v12734_v14  ;;  %v13093_v14 = vld [vmem:[#allocation5 + $0x1ce0] sm:$0xf]  ;;  %v15723_v9 = vpack.c.bf16 %v269_v2, %v269_v2  ;;  %v14944_v0 = vld [vmem:[#allocation5 + $0x1cd4] sm:$0xf0]  ;;  %v14926_v2 = vld [vmem:[#allocation5 + $0x1c44] sm:$0xf0] }
 0x1e3   :  { %7894 = vmatpush.bf16.msrb.mxu1 %v12798_v13  ;;  %v14946_v13 = vld [vmem:[#allocation5 + $0x1ce4] sm:$0xf0]  ;;  %v14976_v43 = vld [vmem:[#allocation5 + $0x1dd4] sm:$0xf0]  ;;  %v13013_v62 = vld [vmem:[#allocation5 + $0x1c40] sm:$0xf] }
 0x1e4   :  { %7907 = vmatpush.bf16.msrb.mxu2 %v12862_v25  ;;  %v13157_v25 = vld [vmem:[#allocation5 + $0x1d60] sm:$0xf]  ;;  %15991 = vst [vmem:[#allocation48_spill] sm:$0xff] %v15723_v9  ;;  %v13094_v3 = vor.u32 %v14946_v13, %v13093_v14  ;;  %v14942_v34 = vld [vmem:[#allocation5 + $0x1cc4] sm:$0xf0] }
 0x1e5   :  { %7920 = vmatpush.bf16.msrb.mxu3 %v12926_v61  ;;  %v13021_v61 = vld [vmem:[#allocation5 + $0x1c50] sm:$0xf]  ;;  %v13141_v60 = vld [vmem:[#allocation5 + $0x1d40] sm:$0xf] }
 0x1e6   :  { %7882 = vmatpush.bf16.msrb.mxu0 %v12726_v18  ;;  %v13158_v18 = vor.u32 %v14962_v47, %v13157_v25  ;;  %v7676_v48 = vpop.f32.mrf.mxu0  ;;  %v13205_v14 = vld [vmem:[#allocation5 + $0x1dc0] sm:$0xf]  ;;  %v13014_v25 = vor.u32 %v14926_v2, %v13013_v62 }
 0x1e7   :  { %7895 = vmatpush.bf16.msrb.mxu1 %v12790_v49  ;;  %v13086_v49 = vor.u32 %v14944_v0, %v13085_v8  ;;  %v7677_v13 = vadd.f32 %v7676_v48, %v15719_v58  ;;  %v7689_v47 = vpop.f32.mrf.mxu1  ;;  %v14940_v8 = vld [vmem:[#allocation5 + $0x1cb4] sm:$0xf0]  ;;  %v13189_v48 = vld [vmem:[#allocation5 + $0x1da0] sm:$0xf] }
 0x1e8   :  { %7908 = vmatpush.bf16.msrb.mxu2 %v12854_v53  ;;  %v13150_v53 = vor.u32 %v14960_v35, %v13149_v46  ;;  %v14956_v0 = vld [vmem:[#allocation5 + $0x1d34] sm:$0xf0]  ;;  %v13197_v46 = vld [vmem:[#allocation5 + $0x1db0] sm:$0xf] }
 0x1e9   :  { %7921 = vmatpush.bf16.msrb.mxu3 %v12918_v28  ;;  %7883 = vmatmul.bf16.vlgmr.msrb.gmra.mxu0 %v15721_v51  ;;  %v13077_v28 = vld [vmem:[#allocation5 + $0x1cc0] sm:$0xf]  ;;  %v14972_v35 = vld [vmem:[#allocation5 + $0x1db4] sm:$0xf0]  ;;  %v14994_v51 = vld [vmem:[#allocation5 + $0x1e64] sm:$0xf0] }
 0x1ea   :  { %7927 = vmatpush.bf16.msra.mxu0 %v13038_v17  ;;  %7896 = vmatmul.bf16.vlgmr.msrb.gmra.mxu1 %v15725_v40  ;;  %v13214_v17 = vor.u32 %v14976_v43, %v13213_v15  ;;  %v13078_v36 = vor.u32 %v14942_v34, %v13077_v28  ;;  %v13198_v62 = vor.u32 %v14972_v35, %v13197_v46  ;;  %v14938_v28 = vld [vmem:[#allocation5 + $0x1ca4] sm:$0xf0]  ;;  %v14968_v46 = vld [vmem:[#allocation5 + $0x1d94] sm:$0xf0]  ;;  %v12981_v35 = vld [vmem:[#allocation5 + $0x1c00] sm:$0xf] }
 0x1eb   :  { %7940 = vmatpush.bf16.msra.mxu1 %v13102_v20  ;;  %7909 = vmatmul.bf16.vlgmr.msrb.gmra.mxu2 %v15723_v9  ;;  %v14958_v20 = vld [vmem:[#allocation5 + $0x1d44] sm:$0xf0]  ;;  %v13485_v9 = vld [vmem:[#allocation5 + $0x1ff0] sm:$0xf] }
 0x1ec   :  { %7953 = vmatpush.bf16.msra.mxu2 %v13166_v59  ;;  %7922 = vmatmul.bf16.vlgmr.msrb.gmra.mxu3 %v15727_v57  ;;  %v13022_v59 = vor.u32 %v14928_v55, %v13021_v61  ;;  %v13142_v52 = vor.u32 %v14958_v20, %v13141_v60  ;;  %v7690_v55 = vadd.f32 %v7689_v47, %v7677_v13  ;;  %v14954_v34 = vld [vmem:[#allocation5 + $0x1d24] sm:$0xf0] }
 0x1ed   :  { %7966 = vmatpush.bf16.msra.mxu3 %v13230_v54  ;;  %v14974_v54 = vld [vmem:[#allocation5 + $0x1dc4] sm:$0xf0] }
 0x1ee   :  { %7928 = vmatpush.bf16.msra.mxu0 %v13030_v56  ;;  %v13005_v56 = vld [vmem:[#allocation5 + $0x1c30] sm:$0xf]  ;;  %v13206_v61 = vor.u32 %v14974_v54, %v13205_v14  ;;  %v7702_v2 = vpop.f32.mrf.mxu2  ;;  %v14970_v14 = vld [vmem:[#allocation5 + $0x1da4] sm:$0xf0]  ;;  %v7678_v54 = vpop.f32.mrf.mxu0 }
 0x1ef   :  { %7941 = vmatpush.bf16.msra.mxu1 %v13094_v3  ;;  %v14924_v3 = vld [vmem:[#allocation5 + $0x1c34] sm:$0xf0]  ;;  %v7703_v60 = vadd.f32 %v7702_v2, %v7690_v55  ;;  %v7715_v20 = vpop.f32.mrf.mxu3  ;;  %v7691_v47 = vpop.f32.mrf.mxu1  ;;  %v13117_v55 = vld [vmem:[#allocation5 + $0x1d10] sm:$0xf]  ;;  %v14950_v2 = vld [vmem:[#allocation5 + $0x1d04] sm:$0xf0] }
 0x1f0   :  { %7954 = vmatpush.bf16.msra.mxu2 %v13158_v18  ;;  %v13069_v18 = vld [vmem:[#allocation5 + $0x1cb0] sm:$0xf]  ;;  %v13006_v15 = vor.u32 %v14924_v3, %v13005_v56  ;;  %v14920_v3 = vld [vmem:[#allocation5 + $0x1c14] sm:$0xf0] }
 0x1f1   :  { %7967 = vmatpush.bf16.msra.mxu3 %v13222_v50  ;;  %v13133_v50 = vld [vmem:[#allocation5 + $0x1d30] sm:$0xf]  ;;  %v13070_v58 = vor.u32 %v14940_v8, %v13069_v18  ;;  %v13190_v8 = vor.u32 %v14970_v14, %v13189_v48  ;;  %v15012_v14 = vld [vmem:[#allocation5 + $0x1ef4] sm:$0xf0] }
 0x1f2   :  { %7929 = vmatpush.bf16.msra.mxu0 %v13022_v59  ;;  %v13134_v43 = vor.u32 %v14956_v0, %v13133_v50  ;;  %v12997_v59 = vld [vmem:[#allocation5 + $0x1c20] sm:$0xf]  ;;  %v13053_v18 = vld [vmem:[#allocation5 + $0x1c90] sm:$0xf]  ;;  %v14952_v50 = vld [vmem:[#allocation5 + $0x1d14] sm:$0xf0] }
 0x1f3   :  { %7942 = vmatpush.bf16.msra.mxu1 %v13086_v49  ;;  %v14922_v49 = vld [vmem:[#allocation5 + $0x1c24] sm:$0xf0]  ;;  %v13181_v0 = vld [vmem:[#allocation5 + $0x1d90] sm:$0xf] }
 0x1f4   :  { %7955 = vmatpush.bf16.msra.mxu2 %v13150_v53  ;;  %v13061_v53 = vld [vmem:[#allocation5 + $0x1ca0] sm:$0xf]  ;;  %v12998_v13 = vor.u32 %v14922_v49, %v12997_v59  ;;  %v13357_v48 = vld [vmem:[#allocation5 + $0x1ef0] sm:$0xf] }
 0x1f5   :  { %7968 = vmatpush.bf16.msra.mxu3 %v13214_v17  ;;  %v13125_v17 = vld [vmem:[#allocation5 + $0x1d20] sm:$0xf]  ;;  %v13421_v47 = vld [vmem:[#allocation5 + $0x1f70] sm:$0xf] }
 0x1f6   :  { %7930 = vmatpush.bf16.msra.mxu0 %v13014_v25  ;;  %v12989_v25 = vld [vmem:[#allocation5 + $0x1c10] sm:$0xf]  ;;  %v13126_v56 = vor.u32 %v14954_v34, %v13125_v17  ;;  %v13045_v49 = vld [vmem:[#allocation5 + $0x1c80] sm:$0xf]  ;;  %v14966_v34 = vld [vmem:[#allocation5 + $0x1d84] sm:$0xf0]  ;;  %v7704_v54 = vpop.f32.mrf.mxu2 }
 0x1f7   :  { %7943 = vmatpush.bf16.msra.mxu1 %v13078_v36  ;;  %v15734_v36 = vadd.f32 %v7715_v20, %v7703_v60  ;;  %v12990_v59 = vor.u32 %v14920_v3, %v12989_v25  ;;  %v13173_v17 = vld [vmem:[#allocation5 + $0x1d80] sm:$0xf]  ;;  %v13182_v60 = vor.u32 %v14968_v46, %v13181_v0  ;;  %v14996_v20 = vld [vmem:[#allocation5 + $0x1e74] sm:$0xf0]  ;;  %v7717_v25 = vpop.f32.mrf.mxu3  ;;  %v179_v3 = vld [vmem:[#allocation2 + $0x78] sm:$0xff]  ;;  %v13358_v54 = vor.u32 %v15012_v14, %v13357_v48 }
 0x1f8   :  { %7956 = vmatpush.bf16.msra.mxu2 %v13142_v52  ;;  %v13062_v52 = vor.u32 %v14938_v28, %v13061_v53  ;;  %v13118_v28 = vor.u32 %v14952_v50, %v13117_v55  ;;  %272 = vst [vmem:[#allocation1 + $0x20] ss:$4 sm:$0xff] %v179_v3  ;;  %v13174_v55 = vor.u32 %v14966_v34, %v13173_v17  ;;  %v274_v0 = vld.sshfl [vmem:[#allocation1 + $0x8] sm:$0xff pattern:$0x73625140] }
 0x1f9   :  { %7969 = vmatpush.bf16.msra.mxu3 %v13206_v61  ;;  %v14936_v61 = vld [vmem:[#allocation5 + $0x1c94] sm:$0xf0]  ;;  %v276_v46 = vld.sshfl [vmem:[#allocation1 + $0x18] sm:$0xff pattern:$0x73625140] }
 0x1fa   :  { %7931 = vmatpush.bf16.msra.mxu0 %v13006_v15  ;;  %v14918_v15 = vld [vmem:[#allocation5 + $0x1c04] sm:$0xf0]  ;;  %v13054_v53 = vor.u32 %v14936_v61, %v13053_v18  ;;  %v13285_v25 = vld [vmem:[#allocation5 + $0x1e60] sm:$0xf]  ;;  %v15742_v34 = vpack.c.bf16 %v276_v46, %v276_v46  ;;  %v13341_v48 = vld [vmem:[#allocation5 + $0x1ed0] sm:$0xf] }
 0x1fb   :  { %7944 = vmatpush.bf16.msra.mxu1 %v13070_v58  ;;  %v14934_v58 = vld [vmem:[#allocation5 + $0x1c84] sm:$0xf0]  ;;  %v12982_v57 = vor.u32 %v14918_v15, %v12981_v35  ;;  %v15024_v3 = vld [vmem:[#allocation5 + $0x1f54] sm:$0xf0]  ;;  %v13397_v46 = vld [vmem:[#allocation5 + $0x1f40] sm:$0xf] }
 0x1fc   :  { %7957 = vmatpush.bf16.msra.mxu2 %v13134_v43  ;;  %v13109_v43 = vld [vmem:[#allocation5 + $0x1d00] sm:$0xf]  ;;  %v273_v61 = vld.sshfl [vmem:[#allocation1] sm:$0xff pattern:$0x73625140]  ;;  %15997 = vst [vmem:[#allocation54_spill] sm:$0xff] %v15742_v34 }
 0x1fd   :  { %7970 = vmatpush.bf16.msra.mxu3 %v13198_v62  ;;  %v13293_v62 = vld [vmem:[#allocation5 + $0x1e70] sm:$0xf]  ;;  %v13110_v18 = vor.u32 %v14950_v2, %v13109_v43  ;;  %v15736_v15 = vpack.c.bf16 %v273_v61, %v273_v61  ;;  %v15740_v43 = vpack.c.bf16 %v274_v0, %v274_v0  ;;  %v13477_v2 = vld [vmem:[#allocation5 + $0x1fe0] sm:$0xf]  ;;  %v15042_v17 = vld [vmem:[#allocation5 + $0x1fe4] sm:$0xf0] }
 0x1fe   :  { %7932 = vmatpush.bf16.msra.mxu0 %v12998_v13  ;;  %v15028_v13 = vld [vmem:[#allocation5 + $0x1f74] sm:$0xf0]  ;;  %v13294_v50 = vor.u32 %v14996_v20, %v13293_v62  ;;  %v13286_v62 = vor.u32 %v14994_v51, %v13285_v25  ;;  %v13478_v14 = vor.u32 %v15042_v17, %v13477_v2  ;;  %v13269_v61 = vld [vmem:[#allocation5 + $0x1e40] sm:$0xf]  ;;  %v15006_v0 = vld [vmem:[#allocation5 + $0x1ec4] sm:$0xf0] }
 0x1ff   :  { %7945 = vmatpush.bf16.msra.mxu1 %v13062_v52  ;;  %v15044_v52 = vld [vmem:[#allocation5 + $0x1ff4] sm:$0xf0]  ;;  %v13422_v40 = vor.u32 %v15028_v13, %v13421_v47  ;;  %15994 = vst [vmem:[#allocation51_spill] sm:$0xff] %v15736_v15  ;;  %v13405_v13 = vld [vmem:[#allocation5 + $0x1f50] sm:$0xf] }
 0x200   :  { %7958 = vmatpush.bf16.msra.mxu2 %v13126_v56  ;;  %v13046_v56 = vor.u32 %v14934_v58, %v13045_v49  ;;  %v13486_v35 = vor.u32 %v15044_v52, %v13485_v9  ;;  %v15026_v49 = vld [vmem:[#allocation5 + $0x1f64] sm:$0xf0]  ;;  %15996 = vst [vmem:[#allocation53_spill] sm:$0xff] %v15740_v43  ;;  %v14992_v20 = vld [vmem:[#allocation5 + $0x1e54] sm:$0xf0] }
 0x201   :  { %7971 = vmatpush.bf16.msra.mxu3 %v13190_v8  ;;  %v275_v8 = vld.sshfl [vmem:[#allocation1 + $0x10] sm:$0xff pattern:$0x73625140]  ;;  %v13469_v52 = vld [vmem:[#allocation5 + $0x1fd0] sm:$0xf] }
 0x202   :  { %7933 = vmatpush.bf16.msra.mxu0 %v12990_v59  ;;  %v13349_v59 = vld [vmem:[#allocation5 + $0x1ee0] sm:$0xf]  ;;  %v15738_v58 = vpack.c.bf16 %v275_v8, %v275_v8  ;;  %v15008_v47 = vld [vmem:[#allocation5 + $0x1ed4] sm:$0xf0]  ;;  %v14990_v8 = vld [vmem:[#allocation5 + $0x1e44] sm:$0xf0] }
 0x203   :  { %7946 = vmatpush.bf16.msra.mxu1 %v13054_v53  ;;  %v15010_v53 = vld [vmem:[#allocation5 + $0x1ee4] sm:$0xf0]  ;;  %v15040_v51 = vld [vmem:[#allocation5 + $0x1fd4] sm:$0xf0] }
 0x204   :  { %7959 = vmatpush.bf16.msra.mxu2 %v13118_v28  ;;  %v13413_v28 = vld [vmem:[#allocation5 + $0x1f60] sm:$0xf]  ;;  %15995 = vst [vmem:[#allocation52_spill] sm:$0xff] %v15738_v58  ;;  %v13350_v9 = vor.u32 %v15010_v53, %v13349_v59 }
 0x205   :  { %7972 = vmatpush.bf16.msra.mxu3 %v13182_v60  ;;  %v13277_v60 = vld [vmem:[#allocation5 + $0x1e50] sm:$0xf]  ;;  %v13461_v59 = vld [vmem:[#allocation5 + $0x1fc0] sm:$0xf] }
 0x206   :  { %7934 = vmatpush.bf16.msra.mxu0 %v12982_v57  ;;  %v13414_v57 = vor.u32 %v15026_v49, %v13413_v28  ;;  %v7728_v25 = vpop.f32.mrf.mxu0  ;;  %v13270_v28 = vor.u32 %v14990_v8, %v13269_v61 }
 0x207   :  { %7947 = vmatpush.bf16.msra.mxu1 %v13046_v56  ;;  %v13342_v56 = vor.u32 %v15008_v47, %v13341_v48  ;;  %v7729_v53 = vadd.f32 %v7728_v25, %v15734_v36  ;;  %v7741_v49 = vpop.f32.mrf.mxu1  ;;  %v15004_v48 = vld [vmem:[#allocation5 + $0x1eb4] sm:$0xf0]  ;;  %v13445_v25 = vld [vmem:[#allocation5 + $0x1fa0] sm:$0xf] }
 0x208   :  { %7960 = vmatpush.bf16.msra.mxu2 %v13110_v18  ;;  %v13406_v18 = vor.u32 %v15024_v3, %v13405_v13  ;;  %v15020_v47 = vld [vmem:[#allocation5 + $0x1f34] sm:$0xf0]  ;;  %v13453_v13 = vld [vmem:[#allocation5 + $0x1fb0] sm:$0xf] }
 0x209   :  { %7973 = vmatpush.bf16.msra.mxu3 %v13174_v55  ;;  %7935 = vmatmul.bf16.vlgmr.msra.gmra.mxu0 %v15736_v15  ;;  %v13333_v55 = vld [vmem:[#allocation5 + $0x1ec0] sm:$0xf]  ;;  %v15036_v3 = vld [vmem:[#allocation5 + $0x1fb4] sm:$0xf0]  ;;  %v15058_v15 = vld [vmem:[#allocation5 + $0x2064] sm:$0xf0] }
 0x20a   :  { %7979 = vmatpush.bf16.msrb.mxu0 %v13294_v50  ;;  %7948 = vmatmul.bf16.vlgmr.msra.gmra.mxu1 %v15740_v43  ;;  %v13470_v50 = vor.u32 %v15040_v51, %v13469_v52  ;;  %v13334_v2 = vor.u32 %v15006_v0, %v13333_v55  ;;  %v13454_v61 = vor.u32 %v15036_v3, %v13453_v13  ;;  %v15002_v55 = vld [vmem:[#allocation5 + $0x1ea4] sm:$0xf0]  ;;  %v15032_v13 = vld [vmem:[#allocation5 + $0x1f94] sm:$0xf0]  ;;  %v13237_v3 = vld [vmem:[#allocation5 + $0x1e00] sm:$0xf] }
 0x20b   :  { %7992 = vmatpush.bf16.msrb.mxu1 %v13358_v54  ;;  %7961 = vmatmul.bf16.vlgmr.msra.gmra.mxu2 %v15738_v58  ;;  %v15022_v54 = vld [vmem:[#allocation5 + $0x1f44] sm:$0xf0]  ;;  %v13741_v58 = vld [vmem:[#allocation5 + $0x21f0] sm:$0xf] }
 0x20c   :  { %8005 = vmatpush.bf16.msrb.mxu2 %v13422_v40  ;;  %7974 = vmatmul.bf16.vlgmr.msra.gmra.mxu3 %v15742_v34  ;;  %v13278_v40 = vor.u32 %v14992_v20, %v13277_v60  ;;  %v13398_v17 = vor.u32 %v15022_v54, %v13397_v46  ;;  %v7742_v20 = vadd.f32 %v7741_v49, %v7729_v53  ;;  %v15018_v0 = vld [vmem:[#allocation5 + $0x1f24] sm:$0xf0] }
 0x20d   :  { %8018 = vmatpush.bf16.msrb.mxu3 %v13486_v35  ;;  %v15038_v35 = vld [vmem:[#allocation5 + $0x1fc4] sm:$0xf0] }
 0x20e   :  { %7980 = vmatpush.bf16.msrb.mxu0 %v13286_v62  ;;  %v13261_v62 = vld [vmem:[#allocation5 + $0x1e30] sm:$0xf]  ;;  %v13462_v60 = vor.u32 %v15038_v35, %v13461_v59  ;;  %v7754_v8 = vpop.f32.mrf.mxu2  ;;  %v15034_v59 = vld [vmem:[#allocation5 + $0x1fa4] sm:$0xf0]  ;;  %v7730_v35 = vpop.f32.mrf.mxu0 }
 0x20f   :  { %7993 = vmatpush.bf16.msrb.mxu1 %v13350_v9  ;;  %v14988_v9 = vld [vmem:[#allocation5 + $0x1e34] sm:$0xf0]  ;;  %v7755_v46 = vadd.f32 %v7754_v8, %v7742_v20  ;;  %v7767_v54 = vpop.f32.mrf.mxu3  ;;  %v7743_v49 = vpop.f32.mrf.mxu1  ;;  %v13373_v20 = vld [vmem:[#allocation5 + $0x1f10] sm:$0xf]  ;;  %v15014_v8 = vld [vmem:[#allocation5 + $0x1f04] sm:$0xf0] }
 0x210   :  { %8006 = vmatpush.bf16.msrb.mxu2 %v13414_v57  ;;  %v13325_v57 = vld [vmem:[#allocation5 + $0x1eb0] sm:$0xf]  ;;  %v13262_v52 = vor.u32 %v14988_v9, %v13261_v62  ;;  %v14984_v9 = vld [vmem:[#allocation5 + $0x1e14] sm:$0xf0] }
 0x211   :  { %8019 = vmatpush.bf16.msrb.mxu3 %v13478_v14  ;;  %v13389_v14 = vld [vmem:[#allocation5 + $0x1f30] sm:$0xf]  ;;  %v13326_v36 = vor.u32 %v15004_v48, %v13325_v57  ;;  %v13446_v48 = vor.u32 %v15034_v59, %v13445_v25  ;;  %v15076_v59 = vld [vmem:[#allocation5 + $0x20f4] sm:$0xf0] }
 0x212   :  { %7981 = vmatpush.bf16.msrb.mxu0 %v13278_v40  ;;  %v13390_v51 = vor.u32 %v15020_v47, %v13389_v14  ;;  %v13253_v40 = vld [vmem:[#allocation5 + $0x1e20] sm:$0xf]  ;;  %v13309_v57 = vld [vmem:[#allocation5 + $0x1e90] sm:$0xf]  ;;  %v15016_v14 = vld [vmem:[#allocation5 + $0x1f14] sm:$0xf0] }
 0x213   :  { %7994 = vmatpush.bf16.msrb.mxu1 %v13342_v56  ;;  %v14986_v56 = vld [vmem:[#allocation5 + $0x1e24] sm:$0xf0]  ;;  %v13437_v47 = vld [vmem:[#allocation5 + $0x1f90] sm:$0xf] }
 0x214   :  { %8007 = vmatpush.bf16.msrb.mxu2 %v13406_v18  ;;  %v13317_v18 = vld [vmem:[#allocation5 + $0x1ea0] sm:$0xf]  ;;  %v13254_v53 = vor.u32 %v14986_v56, %v13253_v40  ;;  %v13613_v25 = vld [vmem:[#allocation5 + $0x20f0] sm:$0xf] }
 0x215   :  { %8020 = vmatpush.bf16.msrb.mxu3 %v13470_v50  ;;  %v13381_v50 = vld [vmem:[#allocation5 + $0x1f20] sm:$0xf]  ;;  %v13677_v49 = vld [vmem:[#allocation5 + $0x2170] sm:$0xf] }
 0x216   :  { %7982 = vmatpush.bf16.msrb.mxu0 %v13270_v28  ;;  %v13245_v28 = vld [vmem:[#allocation5 + $0x1e10] sm:$0xf]  ;;  %v13382_v62 = vor.u32 %v15018_v0, %v13381_v50  ;;  %v13301_v56 = vld [vmem:[#allocation5 + $0x1e80] sm:$0xf]  ;;  %v15030_v0 = vld [vmem:[#allocation5 + $0x1f84] sm:$0xf0]  ;;  %v7756_v35 = vpop.f32.mrf.mxu2 }
 0x217   :  { %7995 = vmatpush.bf16.msrb.mxu1 %v13334_v2  ;;  %v15749_v2 = vadd.f32 %v7767_v54, %v7755_v46  ;;  %v13246_v40 = vor.u32 %v14984_v9, %v13245_v28  ;;  %v13429_v50 = vld [vmem:[#allocation5 + $0x1f80] sm:$0xf]  ;;  %v13438_v46 = vor.u32 %v15032_v13, %v13437_v47  ;;  %v15060_v54 = vld [vmem:[#allocation5 + $0x2074] sm:$0xf0]  ;;  %v7769_v28 = vpop.f32.mrf.mxu3  ;;  %v13614_v35 = vor.u32 %v15076_v59, %v13613_v25  ;;  %v13597_v25 = vld [vmem:[#allocation5 + $0x20d0] sm:$0xf] }
 0x218   :  { %8008 = vmatpush.bf16.msrb.mxu2 %v13398_v17  ;;  %v13318_v17 = vor.u32 %v15002_v55, %v13317_v18  ;;  %v13374_v55 = vor.u32 %v15016_v14, %v13373_v20  ;;  %v180_v9 = vld [vmem:[#allocation2 + $0x80] sm:$0xff]  ;;  %v13430_v20 = vor.u32 %v15030_v0, %v13429_v50  ;;  %v280_v13 = vld.sshfl [vmem:[#allocation1 + $0x38] sm:$0xff pattern:$0x73625140] }
 0x219   :  { %8021 = vmatpush.bf16.msrb.mxu3 %v13462_v60  ;;  %v15000_v60 = vld [vmem:[#allocation5 + $0x1e94] sm:$0xf0]  ;;  %281 = vst [vmem:[#allocation1] ss:$4 sm:$0xff] %v180_v9  ;;  %v13541_v28 = vld [vmem:[#allocation5 + $0x2060] sm:$0xf]  ;;  %v15757_v0 = vpack.c.bf16 %v280_v13, %v280_v13 }
 0x21a   :  { %7983 = vmatpush.bf16.msrb.mxu0 %v13262_v52  ;;  %v14982_v52 = vld [vmem:[#allocation5 + $0x1e04] sm:$0xf0]  ;;  %v13310_v18 = vor.u32 %v15000_v60, %v13309_v57  ;;  %v278_v47 = vld.sshfl [vmem:[#allocation1 + $0x28] sm:$0xff pattern:$0x73625140] }
 0x21b   :  { %7996 = vmatpush.bf16.msrb.mxu1 %v13326_v36  ;;  %v14998_v36 = vld [vmem:[#allocation5 + $0x1e84] sm:$0xf0]  ;;  %v13238_v34 = vor.u32 %v14982_v52, %v13237_v3  ;;  %15999 = vst [vmem:[#allocation56_spill] sm:$0xff] %v15757_v0  ;;  %v15088_v9 = vld [vmem:[#allocation5 + $0x2154] sm:$0xf0] }
 0x21c   :  { %8009 = vmatpush.bf16.msrb.mxu2 %v13390_v51  ;;  %v13365_v51 = vld [vmem:[#allocation5 + $0x1f00] sm:$0xf]  ;;  %v277_v60 = vld.sshfl [vmem:[#allocation1 + $0x20] sm:$0xff pattern:$0x73625140] }
 0x21d   :  { %8022 = vmatpush.bf16.msrb.mxu3 %v13454_v61  ;;  %v13549_v61 = vld [vmem:[#allocation5 + $0x2070] sm:$0xf]  ;;  %v13366_v57 = vor.u32 %v15014_v8, %v13365_v51  ;;  %v15751_v52 = vpack.c.bf16 %v277_v60, %v277_v60  ;;  %v15755_v51 = vpack.c.bf16 %v278_v47, %v278_v47  ;;  %v13733_v8 = vld [vmem:[#allocation5 + $0x21e0] sm:$0xf]  ;;  %v15106_v50 = vld [vmem:[#allocation5 + $0x21e4] sm:$0xf0] }
 0x21e   :  { %7984 = vmatpush.bf16.msrb.mxu0 %v13254_v53  ;;  %v15092_v53 = vld [vmem:[#allocation5 + $0x2174] sm:$0xf0]  ;;  %v13550_v14 = vor.u32 %v15060_v54, %v13549_v61  ;;  %v13542_v61 = vor.u32 %v15058_v15, %v13541_v28  ;;  %v13734_v59 = vor.u32 %v15106_v50, %v13733_v8  ;;  %v13525_v60 = vld [vmem:[#allocation5 + $0x2040] sm:$0xf]  ;;  %v15070_v47 = vld [vmem:[#allocation5 + $0x20c4] sm:$0xf0] }
 0x21f   :  { %7997 = vmatpush.bf16.msrb.mxu1 %v13318_v17  ;;  %v15108_v17 = vld [vmem:[#allocation5 + $0x21f4] sm:$0xf0]  ;;  %v13678_v43 = vor.u32 %v15092_v53, %v13677_v49  ;;  %v13661_v53 = vld [vmem:[#allocation5 + $0x2150] sm:$0xf]  ;;  %v13653_v13 = vld [vmem:[#allocation5 + $0x2140] sm:$0xf] }
 0x220   :  { %8010 = vmatpush.bf16.msrb.mxu2 %v13382_v62  ;;  %v13302_v62 = vor.u32 %v14998_v36, %v13301_v56  ;;  %v13742_v3 = vor.u32 %v15108_v17, %v13741_v58  ;;  %v15090_v56 = vld [vmem:[#allocation5 + $0x2164] sm:$0xf0]  ;;  %v15056_v54 = vld [vmem:[#allocation5 + $0x2054] sm:$0xf0]  ;;  %v13725_v17 = vld [vmem:[#allocation5 + $0x21d0] sm:$0xf] }
 0x221   :  { %8023 = vmatpush.bf16.msrb.mxu3 %v13446_v48  ;;  %v279_v48 = vld.sshfl [vmem:[#allocation1 + $0x30] sm:$0xff pattern:$0x73625140] }
 0x222   :  { %7985 = vmatpush.bf16.msrb.mxu0 %v13246_v40  ;;  %v13605_v40 = vld [vmem:[#allocation5 + $0x20e0] sm:$0xf]  ;;  %v15753_v36 = vpack.c.bf16 %v279_v48, %v279_v48  ;;  %v15072_v49 = vld [vmem:[#allocation5 + $0x20d4] sm:$0xf0]  ;;  %v15054_v48 = vld [vmem:[#allocation5 + $0x2044] sm:$0xf0] }
 0x223   :  { %7998 = vmatpush.bf16.msrb.mxu1 %v13310_v18  ;;  %v15074_v18 = vld [vmem:[#allocation5 + $0x20e4] sm:$0xf0]  ;;  %v15104_v15 = vld [vmem:[#allocation5 + $0x21d4] sm:$0xf0] }
 0x224   :  { %8011 = vmatpush.bf16.msrb.mxu2 %v13374_v55  ;;  %v13669_v55 = vld [vmem:[#allocation5 + $0x2160] sm:$0xf]  ;;  %15998 = vst [vmem:[#allocation55_spill] sm:$0xff] %v15753_v36  ;;  %v13606_v58 = vor.u32 %v15074_v18, %v13605_v40 }
 0x225   :  { %8024 = vmatpush.bf16.msrb.mxu3 %v13438_v46  ;;  %v13533_v46 = vld [vmem:[#allocation5 + $0x2050] sm:$0xf]  ;;  %v13717_v40 = vld [vmem:[#allocation5 + $0x21c0] sm:$0xf] }
 0x226   :  { %7986 = vmatpush.bf16.msrb.mxu0 %v13238_v34  ;;  %v13670_v34 = vor.u32 %v15090_v56, %v13669_v55  ;;  %v7780_v28 = vpop.f32.mrf.mxu0  ;;  %v13526_v55 = vor.u32 %v15054_v48, %v13525_v60  ;;  %v1556_v60 = vld [vmem:[#allocation5 + $0x2320] sm:$0xff] }
 0x227   :  { %7999 = vmatpush.bf16.msrb.mxu1 %v13302_v62  ;;  %v13598_v62 = vor.u32 %v15072_v49, %v13597_v25  ;;  %v7781_v18 = vadd.f32 %v7780_v28, %v15749_v2  ;;  %v7793_v56 = vpop.f32.mrf.mxu1  ;;  %v15068_v25 = vld [vmem:[#allocation5 + $0x20b4] sm:$0xf0]  ;;  %v13509_v2 = vld [vmem:[#allocation5 + $0x2020] sm:$0xf] }
 0x228   :  { %8012 = vmatpush.bf16.msrb.mxu2 %v13366_v57  ;;  %v13662_v57 = vor.u32 %v15088_v9, %v13661_v53  ;;  %v15084_v49 = vld [vmem:[#allocation5 + $0x2134] sm:$0xf0]  ;;  %v13709_v53 = vld [vmem:[#allocation5 + $0x21b0] sm:$0xf] }
 0x229   :  { %8025 = vmatpush.bf16.msrb.mxu3 %v13430_v20  ;;  %7987 = vmatmul.bf16.vlgmr.msrb.gmra.mxu0 %v15751_v52  ;;  %v13589_v20 = vld [vmem:[#allocation5 + $0x20c0] sm:$0xf]  ;;  %v15100_v9 = vld [vmem:[#allocation5 + $0x21b4] sm:$0xf0] }
 0x22a   :  { %8031 = vmatpush.bf16.msra.mxu0 %v13550_v14  ;;  %8000 = vmatmul.bf16.vlgmr.msrb.gmra.mxu1 %v15755_v51  ;;  %v13726_v14 = vor.u32 %v15104_v15, %v13725_v17  ;;  %v13590_v8 = vor.u32 %v15070_v47, %v13589_v20  ;;  %v13710_v48 = vor.u32 %v15100_v9, %v13709_v53  ;;  %v13637_v47 = vld [vmem:[#allocation5 + $0x2120] sm:$0xf]  ;;  %v15080_v53 = vld [vmem:[#allocation5 + $0x2114] sm:$0xf0]  ;;  %v13693_v9 = vld [vmem:[#allocation5 + $0x2190] sm:$0xf] }
 0x22b   :  { %8044 = vmatpush.bf16.msra.mxu1 %v13614_v35  ;;  %8013 = vmatmul.bf16.vlgmr.msrb.gmra.mxu2 %v15753_v36  ;;  %v15086_v35 = vld [vmem:[#allocation5 + $0x2144] sm:$0xf0]  ;;  %v13797_v36 = vld [vmem:[#allocation5 + $0x2260] sm:$0xf] }
 0x22c   :  { %8057 = vmatpush.bf16.msra.mxu2 %v13678_v43  ;;  %8026 = vmatmul.bf16.vlgmr.msrb.gmra.mxu3 %v15757_v0  ;;  %v13534_v43 = vor.u32 %v15056_v54, %v13533_v46  ;;  %v13654_v50 = vor.u32 %v15086_v35, %v13653_v13  ;;  %v7794_v54 = vadd.f32 %v7793_v56, %v7781_v18  ;;  %v15082_v13 = vld [vmem:[#allocation5 + $0x2124] sm:$0xf0]  ;;  %v13501_v56 = vld [vmem:[#allocation5 + $0x2010] sm:$0xf] }
 0x22d   :  { %8070 = vmatpush.bf16.msra.mxu3 %v13742_v3  ;;  %v15102_v3 = vld [vmem:[#allocation5 + $0x21c4] sm:$0xf0] }
 0x22e   :  { %8032 = vmatpush.bf16.msra.mxu0 %v13542_v61  ;;  %v13517_v61 = vld [vmem:[#allocation5 + $0x2030] sm:$0xf]  ;;  %v13718_v46 = vor.u32 %v15102_v3, %v13717_v40  ;;  %v7806_v20 = vpop.f32.mrf.mxu2  ;;  %v13701_v40 = vld [vmem:[#allocation5 + $0x21a0] sm:$0xf]  ;;  %v15098_v3 = vld [vmem:[#allocation5 + $0x21a4] sm:$0xf0]  ;;  %v7782_v18 = vpop.f32.mrf.mxu0 }
 0x22f   :  { %8045 = vmatpush.bf16.msra.mxu1 %v13606_v58  ;;  %v15052_v58 = vld [vmem:[#allocation5 + $0x2034] sm:$0xf0]  ;;  %v7807_v35 = vadd.f32 %v7806_v20, %v7794_v54  ;;  %v7819_v28 = vpop.f32.mrf.mxu3  ;;  %v13702_v54 = vor.u32 %v15098_v3, %v13701_v40  ;;  %v13557_v18 = vld [vmem:[#allocation5 + $0x2080] sm:$0xf]  ;;  %v13805_v40 = vld [vmem:[#allocation5 + $0x2270] sm:$0xf] }
 0x230   :  { %8058 = vmatpush.bf16.msra.mxu2 %v13670_v34  ;;  %v13581_v34 = vld [vmem:[#allocation5 + $0x20b0] sm:$0xf]  ;;  %v13518_v17 = vor.u32 %v15052_v58, %v13517_v61  ;;  %v7795_v61 = vpop.f32.mrf.mxu1  ;;  %v15096_v20 = vld [vmem:[#allocation5 + $0x2194] sm:$0xf0] }
 0x231   :  { %8071 = vmatpush.bf16.msra.mxu3 %v13734_v59  ;;  %v13645_v59 = vld [vmem:[#allocation5 + $0x2130] sm:$0xf]  ;;  %v13582_v15 = vor.u32 %v15068_v25, %v13581_v34  ;;  %v15764_v58 = vadd.f32 %v7819_v28, %v7807_v35  ;;  %v13685_v35 = vld [vmem:[#allocation5 + $0x2180] sm:$0xf]  ;;  %v15094_v28 = vld [vmem:[#allocation5 + $0x2184] sm:$0xf0] }
 0x232   :  { %8033 = vmatpush.bf16.msra.mxu0 %v13534_v43  ;;  %v13646_v43 = vor.u32 %v15084_v49, %v13645_v59  ;;  %v13565_v25 = vld [vmem:[#allocation5 + $0x2090] sm:$0xf]  ;;  %v15064_v59 = vld [vmem:[#allocation5 + $0x2094] sm:$0xf0] }
 0x233   :  { %8046 = vmatpush.bf16.msra.mxu1 %v13598_v62  ;;  %v15050_v62 = vld [vmem:[#allocation5 + $0x2024] sm:$0xf0]  ;;  %v13629_v49 = vld [vmem:[#allocation5 + $0x2110] sm:$0xf]  ;;  %v15124_v61 = vld [vmem:[#allocation5 + $0x2274] sm:$0xf0] }
 0x234   :  { %8059 = vmatpush.bf16.msra.mxu2 %v13662_v57  ;;  %v13573_v57 = vld [vmem:[#allocation5 + $0x20a0] sm:$0xf] }
 0x235   :  { %8072 = vmatpush.bf16.msra.mxu3 %v13726_v14  ;;  %v15066_v14 = vld [vmem:[#allocation5 + $0x20a4] sm:$0xf0] }
 0x236   :  { %8034 = vmatpush.bf16.msra.mxu0 %v13526_v55  ;;  %v13510_v55 = vor.u32 %v15050_v62, %v13509_v2  ;;  %v13574_v34 = vor.u32 %v15066_v14, %v13573_v57  ;;  %v15046_v2 = vld [vmem:[#allocation5 + $0x2004] sm:$0xf0]  ;;  %v181_v62 = vld [vmem:[#allocation2 + $0x88] sm:$0x3f]  ;;  %v13566_v57 = vor.u32 %v15064_v59, %v13565_v25  ;;  %v13630_v14 = vor.u32 %v15080_v53, %v13629_v49  ;;  %v7808_v3 = vpop.f32.mrf.mxu2 }
 0x237   :  { %8047 = vmatpush.bf16.msra.mxu1 %v13590_v8  ;;  %v15048_v8 = vld [vmem:[#allocation5 + $0x2014] sm:$0xf0]  ;;  %282 = vst [vmem:[#allocation1 + $0x20] ss:$4 sm:$0xff] %v181_v62  ;;  %v9455_v25 = vld [vmem:[#allocation5 + $0x78] sm:$0xf0] }
 0x238   :  { %8060 = vmatpush.bf16.msra.mxu2 %v13654_v50  ;;  %v4936_v50 = vunpack.c.l.b16 %v1556_v60  ;;  %v13502_v60 = vor.u32 %v15048_v8, %v13501_v56  ;;  %v15140_v56 = vld [vmem:[#allocation5 + $0x22f4] sm:$0xf0]  ;;  %v7821_v8 = vpop.f32.mrf.mxu3  ;;  %v286_v3 = vld.sshfl [vmem:[#allocation1 + $0x18] sm:$0xff pattern:$0x73625140] }
 0x239   :  { %8073 = vmatpush.bf16.msra.mxu3 %v13718_v46  ;;  %v13638_v46 = vor.u32 %v15082_v13, %v13637_v47  ;;  %v13621_v47 = vld [vmem:[#allocation5 + $0x2100] sm:$0xf]  ;;  %v15078_v13 = vld [vmem:[#allocation5 + $0x2104] sm:$0xf0] }
 0x23a   :  { %8035 = vmatpush.bf16.msra.mxu0 %v13518_v17  ;;  %v13493_v17 = vld [vmem:[#allocation5 + $0x2000] sm:$0xf]  ;;  %v13622_v49 = vor.u32 %v15078_v13, %v13621_v47  ;;  %v284_v62 = vld.sshfl [vmem:[#allocation1 + $0x8] sm:$0xff pattern:$0x73625140] }
 0x23b   :  { %8048 = vmatpush.bf16.msra.mxu1 %v13582_v15  ;;  %v15062_v15 = vld [vmem:[#allocation5 + $0x2084] sm:$0xf0]  ;;  %v285_v53 = vld.sshfl [vmem:[#allocation1 + $0x10] sm:$0xff pattern:$0x73625140] }
 0x23c   :  { %8061 = vmatpush.bf16.msra.mxu2 %v13646_v43  ;;  %v6062_v43 = vpack.c.b16 %v4936_v50, %v4936_v50  ;;  %v13494_v50 = vor.u32 %v15046_v2, %v13493_v17  ;;  %v13558_v59 = vor.u32 %v15062_v15, %v13557_v18  ;;  %v15122_v8 = vld [vmem:[#allocation5 + $0x2264] sm:$0xf0]  ;;  %v15769_v18 = vpack.c.bf16 %v285_v53, %v285_v53  ;;  %v14033_v47 = vld [vmem:[#allocation5 + $0x64] sm:$0xf]  ;;  %v9447_v13 = vld [vmem:[#allocation5 + $0x68] sm:$0xf0] }
 0x23d   :  { %8074 = vmatpush.bf16.msra.mxu3 %v13710_v48  ;;  %v13694_v48 = vor.u32 %v15096_v20, %v13693_v9  ;;  %v13686_v9 = vor.u32 %v15094_v28, %v13685_v35  ;;  %v13806_v20 = vor.u32 %v15124_v61, %v13805_v40  ;;  %v15771_v15 = vpack.c.bf16 %v284_v62, %v284_v62  ;;  %v13789_v28 = vld [vmem:[#allocation5 + $0x2250] sm:$0xf]  ;;  %v15118_v62 = vld [vmem:[#allocation5 + $0x2244] sm:$0xf0] }
 0x23e   :  { %8036 = vmatpush.bf16.msra.mxu0 %v13510_v55  ;;  %v13869_v55 = vld [vmem:[#allocation5 + $0x22f0] sm:$0xf]  ;;  %16000 = vst [vmem:[#allocation57_spill] sm:$0xff] %v15769_v18  ;;  %v13798_v35 = vor.u32 %v15122_v8, %v13797_v36  ;;  %v9439_v36 = vld [vmem:[#allocation5 + $0x58] sm:$0xf0] }
 0x23f   :  { %8049 = vmatpush.bf16.msra.mxu1 %v13574_v34  ;;  %v7194_v34 = vsel %vm7192_vm0, %v6062_v43, 0  ;;  %v13870_v0 = vor.u32 %v15140_v56, %v13869_v55  ;;  %v15138_v43 = vld [vmem:[#allocation5 + $0x22e4] sm:$0xf0]  ;;  %16001 = vst [vmem:[#allocation58_spill] sm:$0xff] %v15771_v15  ;;  %v15120_v55 = vld [vmem:[#allocation5 + $0x2254] sm:$0xf0] }
 0x240   :  { %8062 = vmatpush.bf16.msra.mxu2 %v13638_v46  ;;  %v14035_v46 = vld [vmem:[#allocation5 + $0x74] sm:$0xf]  ;;  %v13853_v56 = vld [vmem:[#allocation5 + $0x22d0] sm:$0xf] }
 0x241   :  { %8075 = vmatpush.bf16.msra.mxu3 %v13702_v54  ;;  %v283_v54 = vld.sshfl [vmem:[#allocation1] sm:$0xff pattern:$0x73625140]  ;;  %v9458_v17 = vor.u32 %v14035_v46, %v9455_v25  ;;  %v9450_v46 = vor.u32 %v14033_v47, %v9447_v13  ;;  %v13877_v25 = vld [vmem:[#allocation5 + $0x2300] sm:$0xf] }
 0x242   :  { %8037 = vmatpush.bf16.msra.mxu0 %v13502_v60  ;;  %v13861_v60 = vld [vmem:[#allocation5 + $0x22e0] sm:$0xf]  ;;  %v15767_v2 = vpack.c.bf16 %v283_v54, %v283_v54  ;;  %v14051_v54 = vld [vmem:[#allocation5 + $0xf4] sm:$0xf]  ;;  %v14049_v47 = vld [vmem:[#allocation5 + $0xe4] sm:$0xf] }
 0x243   :  { %8050 = vmatpush.bf16.msra.mxu1 %v13566_v57  ;;  %v13885_v57 = vld [vmem:[#allocation5 + $0x2310] sm:$0xf]  ;;  %v13862_v40 = vor.u32 %v15138_v43, %v13861_v60  ;;  %v13845_v60 = vld [vmem:[#allocation5 + $0x22c0] sm:$0xf]  ;;  %v14029_v43 = vld [vmem:[#allocation5 + $0x44] sm:$0xf] }
 0x244   :  { %8063 = vmatpush.bf16.msra.mxu2 %v13630_v14  ;;  %v15144_v14 = vld [vmem:[#allocation5 + $0x2314] sm:$0xf0]  ;;  %v9511_v13 = vld [vmem:[#allocation5 + $0xe8] sm:$0xf0] }
 0x245   :  { %8076 = vmatpush.bf16.msra.mxu3 %v13694_v48  ;;  %v15773_v48 = vpack.c.bf16 %v286_v3, %v286_v3  ;;  %v13886_v61 = vor.u32 %v15144_v14, %v13885_v57  ;;  %v9431_v14 = vld [vmem:[#allocation5 + $0x48] sm:$0xf0] }
 0x246   :  { %8038 = vmatpush.bf16.msra.mxu0 %v13494_v50  ;;  %v15136_v50 = vld [vmem:[#allocation5 + $0x22d4] sm:$0xf0]  ;;  %v7832_v57 = vpop.f32.mrf.mxu0 }
 0x247   :  { %8051 = vmatpush.bf16.msra.mxu1 %v13558_v59  ;;  %16002 = vst [vmem:[#allocation59_spill] sm:$0xff] %v15773_v48  ;;  %v15142_v59 = vld [vmem:[#allocation5 + $0x2304] sm:$0xf0]  ;;  %v13854_v53 = vor.u32 %v15136_v50, %v13853_v56  ;;  %v15116_v56 = vld [vmem:[#allocation5 + $0x2234] sm:$0xf0]  ;;  %v9434_v50 = vor.u32 %v14029_v43, %v9431_v14 }
 0x248   :  { %8064 = vmatpush.bf16.msra.mxu2 %v13622_v49  ;;  %v14031_v49 = vld [vmem:[#allocation5 + $0x54] sm:$0xf]  ;;  %v15130_v43 = vld [vmem:[#allocation5 + $0x22a4] sm:$0xf0] }
 0x249   :  { %8077 = vmatpush.bf16.msra.mxu3 %v13686_v9  ;;  %8039 = vmatmul.bf16.vlgmr.msra.gmra.mxu0 %v15767_v2  ;;  %v13878_v9 = vor.u32 %v15142_v59, %v13877_v25  ;;  %v9442_v3 = vor.u32 %v14031_v49, %v9439_v36  ;;  %v9514_v25 = vor.u32 %v14049_v47, %v9511_v13  ;;  %v13837_v59 = vld [vmem:[#allocation5 + $0x22b0] sm:$0xf]  ;;  %v15132_v49 = vld [vmem:[#allocation5 + $0x22b4] sm:$0xf0]  ;;  %v14027_v36 = vld [vmem:[#allocation5 + $0x34] sm:$0xf] }
 0x24a   :  { %8083 = vmatpush.bf16.msrb.mxu0 %v13806_v20  ;;  %8052 = vmatmul.bf16.vlgmr.msra.gmra.mxu1 %v15771_v15  ;;  %v13781_v20 = vld [vmem:[#allocation5 + $0x2240] sm:$0xf]  ;;  %v9415_v13 = vld [vmem:[#allocation5 + $0x28] sm:$0xf0]  ;;  %v14039_v15 = vld [vmem:[#allocation5 + $0x94] sm:$0xf] }
 0x24b   :  { %8096 = vmatpush.bf16.msrb.mxu1 %v13870_v0  ;;  %8065 = vmatmul.bf16.vlgmr.msra.gmra.mxu2 %v15769_v18  ;;  %v9519_v0 = vld [vmem:[#allocation5 + $0xf8] sm:$0xf0] }
 0x24c   :  { %8114 = vmatpush.bf16.msrb.mxu2 %v7194_v34  ;;  %8078 = vmatmul.bf16.vlgmr.msra.gmra.mxu3 %v15773_v48  ;;  %v13790_v34 = vor.u32 %v15120_v55, %v13789_v28  ;;  %v9522_v8 = vor.u32 %v14051_v54, %v9519_v0  ;;  %v13782_v28 = vor.u32 %v15118_v62, %v13781_v20  ;;  %v13773_v55 = vld [vmem:[#allocation5 + $0x2230] sm:$0xf]  ;;  %v9423_v54 = vld [vmem:[#allocation5 + $0x38] sm:$0xf0]  ;;  %v14047_v0 = vld [vmem:[#allocation5 + $0xd4] sm:$0xf] }
 0x24d   :  { %8122 = vmatpush.bf16.msrb.mxu3 %v9458_v17  ;;  %v15134_v17 = vld [vmem:[#allocation5 + $0x22c4] sm:$0xf0]  ;;  %v289_v20 = vld.sshfl [vmem:[#allocation1 + $0x30] sm:$0xff pattern:$0x73625140] }
 0x24e   :  { %8084 = vmatpush.bf16.msrb.mxu0 %v13798_v35  ;;  %v7833_v35 = vadd.f32 %v7832_v57, %v15764_v58  ;;  %v13774_v58 = vor.u32 %v15116_v56, %v13773_v55  ;;  %v15114_v62 = vld [vmem:[#allocation5 + $0x2224] sm:$0xf0]  ;;  %v14025_v57 = vld [vmem:[#allocation5 + $0x24] sm:$0xf]  ;;  %v7834_v55 = vpop.f32.mrf.mxu0 }
 0x24f   :  { %8097 = vmatpush.bf16.msrb.mxu1 %v13862_v40  ;;  %v7845_v40 = vpop.f32.mrf.mxu1  ;;  %v7871_v47 = vpop.f32.mrf.mxu3  ;;  %v9487_v55 = vld [vmem:[#allocation5 + $0xb8] sm:$0xf0] }
 0x250   :  { %8115 = vmatpush.bf16.msrb.mxu2 %v13886_v61  ;;  %v13846_v61 = vor.u32 %v15134_v17, %v13845_v60  ;;  %v13829_v17 = vld [vmem:[#allocation5 + $0x22a0] sm:$0xf] }
 0x251   :  { %8123 = vmatpush.bf16.msrb.mxu3 %v9450_v46  ;;  %v7846_v46 = vadd.f32 %v7845_v40, %v7833_v35  ;;  %v14045_v35 = vld [vmem:[#allocation5 + $0xc4] sm:$0xf]  ;;  %v9495_v40 = vld [vmem:[#allocation5 + $0xc8] sm:$0xf0] }
 0x252   :  { %8085 = vmatpush.bf16.msrb.mxu0 %v13790_v34  ;;  %v9503_v34 = vld [vmem:[#allocation5 + $0xd8] sm:$0xf0] }
 0x253   :  { %8098 = vmatpush.bf16.msrb.mxu1 %v13854_v53  ;;  %v13838_v53 = vor.u32 %v15132_v49, %v13837_v59  ;;  %v9506_v60 = vor.u32 %v14047_v0, %v9503_v34  ;;  %v13757_v59 = vld [vmem:[#allocation5 + $0x2210] sm:$0xf]  ;;  %v15112_v49 = vld [vmem:[#allocation5 + $0x2214] sm:$0xf0]  ;;  %v14023_v34 = vld [vmem:[#allocation5 + $0x14] sm:$0xf] }
 0x254   :  { %8116 = vmatpush.bf16.msrb.mxu2 %v13878_v9  ;;  %v13765_v9 = vld [vmem:[#allocation5 + $0x2220] sm:$0xf]  ;;  %v15128_v0 = vld [vmem:[#allocation5 + $0x2294] sm:$0xf0] }
 0x255   :  { %8124 = vmatpush.bf16.msrb.mxu3 %v9442_v3  ;;  %v9426_v3 = vor.u32 %v14027_v36, %v9423_v54  ;;  %v9498_v36 = vor.u32 %v14045_v35, %v9495_v40  ;;  %v13821_v54 = vld [vmem:[#allocation5 + $0x2290] sm:$0xf]  ;;  %v14041_v40 = vld [vmem:[#allocation5 + $0xa4] sm:$0xf] }
 0x256   :  { %8086 = vmatpush.bf16.msrb.mxu0 %v13782_v28  ;;  %v15780_v28 = vpack.c.bf16 %v289_v20, %v289_v20  ;;  %v9407_v20 = vld [vmem:[#allocation5 + $0x18] sm:$0xf0] }
 0x257   :  { %8099 = vmatpush.bf16.msrb.mxu1 %v13846_v61  ;;  %v13766_v61 = vor.u32 %v15114_v62, %v13765_v9  ;;  %v7847_v56 = vpop.f32.mrf.mxu1  ;;  %v15110_v9 = vld [vmem:[#allocation5 + $0x2204] sm:$0xf0]  ;;  %v13822_v62 = vor.u32 %v15128_v0, %v13821_v54  ;;  %v9711_v54 = vld [vmem:[#allocation5 + $0x278] sm:$0xf0] }
 0x258   :  { %8135 = vmatpush.bf16.msra.mxu2 %v9522_v8  ;;  %v7858_v8 = vpop.f32.mrf.mxu2  ;;  %16003 = vst [vmem:[#allocation60_spill] sm:$0xff] %v15780_v28  ;;  %v9479_v56 = vld [vmem:[#allocation5 + $0xa8] sm:$0xf0] }
 0x259   :  { %8125 = vmatpush.bf16.msrb.mxu3 %v9434_v50  ;;  %v7859_v14 = vadd.f32 %v7858_v8, %v7846_v46  ;;  %v9418_v46 = vor.u32 %v14025_v57, %v9415_v13  ;;  %v14043_v8 = vld [vmem:[#allocation5 + $0xb4] sm:$0xf]  ;;  %v9583_v13 = vld [vmem:[#allocation5 + $0x178] sm:$0xf0] }
 0x25a   :  { %8087 = vmatpush.bf16.msrb.mxu0 %v13774_v58  ;;  %v13758_v58 = vor.u32 %v15112_v49, %v13757_v59  ;;  %v9490_v57 = vor.u32 %v14043_v8, %v9487_v55  ;;  %v9647_v49 = vld [vmem:[#allocation5 + $0x1f8] sm:$0xf0]  ;;  %v14065_v8 = vld [vmem:[#allocation5 + $0x164] sm:$0xf]  ;;  %v9575_v55 = vld [vmem:[#allocation5 + $0x168] sm:$0xf0] }
 0x25b   :  { %8100 = vmatpush.bf16.msrb.mxu1 %v13838_v53  ;;  %v15782_v50 = vadd.f32 %v7871_v47, %v7859_v14  ;;  %13891 = vmatmul.msk.bf16.vlgmr.msrb.gmra.mxu2 %vm7188_vm1, %v15780_v28  ;;  %v13749_v53 = vld [vmem:[#allocation5 + $0x2200] sm:$0xf]  ;;  %v9399_v14 = vld [vmem:[#allocation5 + $0x8] sm:$0xf0]  ;;  %v14067_v47 = vld [vmem:[#allocation5 + $0x174] sm:$0xf] }
 0x25c   :  { %8136 = vmatpush.bf16.msra.mxu2 %v9514_v25  ;;  %v13830_v25 = vor.u32 %v15130_v43, %v13829_v17  ;;  %v13813_v17 = vld [vmem:[#allocation5 + $0x2280] sm:$0xf]  ;;  %v9410_v43 = vor.u32 %v14023_v34, %v9407_v20  ;;  %v14083_v28 = vld [vmem:[#allocation5 + $0x1f4] sm:$0xf]  ;;  %v13750_v59 = vor.u32 %v15110_v9, %v13749_v53  ;;  %v9586_v48 = vor.u32 %v14067_v47, %v9583_v13  ;;  %v14037_v13 = vld [vmem:[#allocation5 + $0x84] sm:$0xf] }
 0x25d   :  { %8126 = vmatpush.bf16.msrb.mxu3 %v9426_v3  ;;  %v15126_v3 = vld [vmem:[#allocation5 + $0x2284] sm:$0xf0]  ;;  %v9482_v20 = vor.u32 %v14041_v40, %v9479_v56  ;;  %v9463_v40 = vld [vmem:[#allocation5 + $0x88] sm:$0xf0]  ;;  %v14079_v56 = vld [vmem:[#allocation5 + $0x1d4] sm:$0xf] }
 0x25e   :  { %8088 = vmatpush.bf16.msrb.mxu0 %v13766_v61  ;;  %v7873_v61 = vpop.f32.mrf.mxu3  ;;  %v13814_v0 = vor.u32 %v15126_v3, %v13813_v17  ;;  %v14097_v17 = vld [vmem:[#allocation5 + $0x264] sm:$0xf]  ;;  %v9703_v3 = vld [vmem:[#allocation5 + $0x268] sm:$0xf0] }
 0x25f   :  { %8101 = vmatpush.bf16.msrb.mxu1 %v13830_v25  ;;  %v14099_v25 = vld [vmem:[#allocation5 + $0x274] sm:$0xf]  ;;  %v9471_v61 = vld [vmem:[#allocation5 + $0x98] sm:$0xf0]  ;;  %v9706_v47 = vor.u32 %v14097_v17, %v9703_v3  ;;  %v14113_v17 = vld [vmem:[#allocation5 + $0x2e4] sm:$0xf] }
 0x260   :  { %8137 = vmatpush.bf16.msra.mxu2 %v9506_v60  ;;  %v14021_v60 = vld [vmem:[#allocation5 + $0x4] sm:$0xf]  ;;  %v7860_v35 = vpop.f32.mrf.mxu2  ;;  %v9714_v18 = vor.u32 %v14099_v25, %v9711_v54  ;;  %v14115_v54 = vld [vmem:[#allocation5 + $0x2f4] sm:$0xf]  ;;  %v9767_v3 = vld [vmem:[#allocation5 + $0x2e8] sm:$0xf0] }
 0x261   :  { %8127 = vmatpush.bf16.msrb.mxu3 %v9418_v46  ;;  %v287_v46 = vld.sshfl [vmem:[#allocation1 + $0x20] sm:$0xff pattern:$0x73625140]  ;;  %v9402_v34 = vor.u32 %v14021_v60, %v9399_v14  ;;  %v9650_v35 = vor.u32 %v14083_v28, %v9647_v49  ;;  %v9474_v60 = vor.u32 %v14039_v15, %v9471_v61  ;;  %v9567_v28 = vld [vmem:[#allocation5 + $0x158] sm:$0xf0] }
 0x262   :  { %8089 = vmatpush.bf16.msrb.mxu0 %v13758_v58  ;;  %v14081_v58 = vld [vmem:[#allocation5 + $0x1e4] sm:$0xf]  ;;  %v15786_v53 = vpack.c.bf16 %v287_v46, %v287_v46  ;;  %v14095_v49 = vld [vmem:[#allocation5 + $0x254] sm:$0xf]  ;;  %v9775_v15 = vld [vmem:[#allocation5 + $0x2f8] sm:$0xf0] }
 0x263   :  { %8102 = vmatpush.bf16.msrb.mxu1 %v13822_v62  ;;  %v9639_v62 = vld [vmem:[#allocation5 + $0x1e8] sm:$0xf0] }
 0x264   :  { %8138 = vmatpush.bf16.msra.mxu2 %v9498_v36  ;;  %v288_v36 = vld.sshfl [vmem:[#allocation1 + $0x28] sm:$0xff pattern:$0x73625140]  ;;  %v9642_v14 = vor.u32 %v14081_v58, %v9639_v62  ;;  %v9559_v46 = vld [vmem:[#allocation5 + $0x148] sm:$0xf0] }
 0x265   :  { %8128 = vmatpush.bf16.msrb.mxu3 %v9410_v43  ;;  %v15788_v9 = vpack.c.bf16 %v288_v36, %v288_v36  ;;  %v9578_v43 = vor.u32 %v14065_v8, %v9575_v55  ;;  %v9778_v8 = vor.u32 %v14115_v54, %v9775_v15  ;;  %v9623_v55 = vld [vmem:[#allocation5 + $0x1c8] sm:$0xf0]  ;;  %v9759_v54 = vld [vmem:[#allocation5 + $0x2d8] sm:$0xf0] }
 0x266   :  { %8090 = vmatpush.bf16.msrb.mxu0 %v13750_v59  ;;  %v9631_v59 = vld [vmem:[#allocation5 + $0x1d8] sm:$0xf0]  ;;  %v9687_v61 = vld [vmem:[#allocation5 + $0x248] sm:$0xf0]  ;;  %v7884_v58 = vpop.f32.mrf.mxu0 }
 0x267   :  { %8103 = vmatpush.bf16.msrb.mxu1 %v13814_v0  ;;  %v14061_v0 = vld [vmem:[#allocation5 + $0x144] sm:$0xf]  ;;  %v9634_v36 = vor.u32 %v14079_v56, %v9631_v59  ;;  %v9615_v56 = vld [vmem:[#allocation5 + $0x1b8] sm:$0xf0]  ;;  %v14091_v59 = vld [vmem:[#allocation5 + $0x234] sm:$0xf] }
 0x268   :  { %8139 = vmatpush.bf16.msra.mxu2 %v9490_v57  ;;  %v14063_v57 = vld [vmem:[#allocation5 + $0x154] sm:$0xf]  ;;  %v9562_v62 = vor.u32 %v14061_v0, %v9559_v46  ;;  %v9543_v15 = vld [vmem:[#allocation5 + $0x128] sm:$0xf0]  ;;  %v14073_v46 = vld [vmem:[#allocation5 + $0x1a4] sm:$0xf] }
 0x269   :  { %8129 = vmatpush.bf16.msrb.mxu3 %v9402_v34  ;;  %8091 = vmatmul.bf16.vlgmr.msrb.gmra.mxu0 %v15786_v53  ;;  %v9570_v25 = vor.u32 %v14063_v57, %v9567_v28  ;;  %v9551_v57 = vld [vmem:[#allocation5 + $0x138] sm:$0xf0] }
 0x26a   :  { %8148 = vmatpush.bf16.msra.mxu0 %v9586_v48  ;;  %8104 = vmatmul.bf16.vlgmr.msrb.gmra.mxu1 %v15788_v9  ;;  %v9695_v48 = vld [vmem:[#allocation5 + $0x258] sm:$0xf0] }
 0x26b   :  { %8161 = vmatpush.bf16.msra.mxu1 %v9650_v35  ;;  %v9698_v34 = vor.u32 %v14095_v49, %v9695_v48  ;;  %v14093_v35 = vld [vmem:[#allocation5 + $0x244] sm:$0xf]  ;;  %v9679_v49 = vld [vmem:[#allocation5 + $0x238] sm:$0xf0] }
 0x26c   :  { %8140 = vmatpush.bf16.msra.mxu2 %v9482_v20  ;;  %8130 = vmatmul.bf16.vlgmr.msrb.gmra.mxu3 %v15541_v27  ;;  %v14077_v20 = vld [vmem:[#allocation5 + $0x1c4] sm:$0xf]  ;;  %v7885_v27 = vadd.f32 %v7884_v58, %v15782_v50  ;;  %v9682_v0 = vor.u32 %v14091_v59, %v9679_v49  ;;  %v14107_v49 = vld [vmem:[#allocation5 + $0x2b4] sm:$0xf] }
 0x26d   :  { %8174 = vmatpush.bf16.msra.mxu3 %v9714_v18  ;;  %v9466_v18 = vor.u32 %v14037_v13, %v9463_v40  ;;  %v9626_v28 = vor.u32 %v14077_v20, %v9623_v55  ;;  %v9770_v40 = vor.u32 %v14113_v17, %v9767_v3  ;;  %v14057_v50 = vld [vmem:[#allocation5 + $0x124] sm:$0xf]  ;;  %v9607_v20 = vld [vmem:[#allocation5 + $0x1a8] sm:$0xf0]  ;;  %v14055_v3 = vld [vmem:[#allocation5 + $0x114] sm:$0xf] }
 0x26e   :  { %8149 = vmatpush.bf16.msra.mxu0 %v9578_v43  ;;  %v7897_v43 = vpop.f32.mrf.mxu1  ;;  %v9671_v55 = vld [vmem:[#allocation5 + $0x228] sm:$0xf0]  ;;  %v9546_v58 = vor.u32 %v14057_v50, %v9543_v15  ;;  %v14069_v50 = vld [vmem:[#allocation5 + $0x184] sm:$0xf] }
 0x26f   :  { %8162 = vmatpush.bf16.msra.mxu1 %v9642_v14  ;;  %v9690_v14 = vor.u32 %v14093_v35, %v9687_v61  ;;  %v7898_v13 = vadd.f32 %v7897_v43, %v7885_v27  ;;  %v7923_v61 = vpop.f32.mrf.mxu3  ;;  %v9751_v17 = vld [vmem:[#allocation5 + $0x2c8] sm:$0xf0]  ;;  %v9535_v27 = vld [vmem:[#allocation5 + $0x118] sm:$0xf0] }
 0x270   :  { %8141 = vmatpush.bf16.msra.mxu2 %v9474_v60  ;;  %v14059_v60 = vld [vmem:[#allocation5 + $0x134] sm:$0xf]  ;;  %v9538_v59 = vor.u32 %v14055_v3, %v9535_v27 }
 0x271   :  { %8175 = vmatpush.bf16.msra.mxu3 %v9706_v47  ;;  %v14075_v47 = vld [vmem:[#allocation5 + $0x1b4] sm:$0xf]  ;;  %v9554_v48 = vor.u32 %v14059_v60, %v9551_v57  ;;  %v9610_v57 = vor.u32 %v14073_v46, %v9607_v20  ;;  %v14085_v20 = vld [vmem:[#allocation5 + $0x204] sm:$0xf] }
 0x272   :  { %8150 = vmatpush.bf16.msra.mxu0 %v9570_v25  ;;  %v14111_v25 = vld [vmem:[#allocation5 + $0x2d4] sm:$0xf] }
 0x273   :  { %8163 = vmatpush.bf16.msra.mxu1 %v9634_v36  ;;  %v7910_v36 = vpop.f32.mrf.mxu2  ;;  %v14131_v46 = vld [vmem:[#allocation5 + $0x374] sm:$0xf] }
 0x274   :  { %8142 = vmatpush.bf16.msra.mxu2 %v9466_v18  ;;  %v9618_v18 = vor.u32 %v14075_v47, %v9615_v56  ;;  %v7911_v35 = vadd.f32 %v7910_v36, %v7898_v13  ;;  %v14087_v56 = vld [vmem:[#allocation5 + $0x214] sm:$0xf]  ;;  %v9663_v13 = vld [vmem:[#allocation5 + $0x218] sm:$0xf0] }
 0x275   :  { %8176 = vmatpush.bf16.msra.mxu3 %v9698_v34  ;;  %v9762_v34 = vor.u32 %v14111_v25, %v9759_v54  ;;  %v14053_v25 = vld [vmem:[#allocation5 + $0x104] sm:$0xf]  ;;  %v9527_v54 = vld [vmem:[#allocation5 + $0x108] sm:$0xf0]  ;;  %v9839_v36 = vld [vmem:[#allocation5 + $0x378] sm:$0xf0] }
 0x276   :  { %8151 = vmatpush.bf16.msra.mxu0 %v9562_v62  ;;  %v14109_v62 = vld [vmem:[#allocation5 + $0x2c4] sm:$0xf]  ;;  %v7899_v43 = vpop.f32.mrf.mxu1  ;;  %v15795_v60 = vadd.f32 %v7923_v61, %v7911_v35  ;;  %v9530_v61 = vor.u32 %v14053_v25, %v9527_v54  ;;  %v9842_v3 = vor.u32 %v14131_v46, %v9839_v36  ;;  %v14163_v27 = vld [vmem:[#allocation5 + $0x474] sm:$0xf]  ;;  %v9895_v25 = vld [vmem:[#allocation5 + $0x3e8] sm:$0xf0] }
 0x277   :  { %8143 = vmatmul.bf16.vlgmr.msra.gmra.mxu2 %v15545_v33  ;;  %8164 = vmatpush.bf16.msra.mxu1 %v9626_v28  ;;  %v7886_v33 = vpop.f32.mrf.mxu0  ;;  %v9754_v47 = vor.u32 %v14109_v62, %v9751_v17  ;;  %v14147_v62 = vld [vmem:[#allocation5 + $0x3f4] sm:$0xf]  ;;  %v9903_v17 = vld [vmem:[#allocation5 + $0x3f8] sm:$0xf0]  ;;  %v14161_v46 = vld [vmem:[#allocation5 + $0x464] sm:$0xf] }
 0x278   :  { %8187 = vmatpush.bf16.msrb.mxu2 %v9778_v8  ;;  %v14089_v8 = vld [vmem:[#allocation5 + $0x224] sm:$0xf]  ;;  %v7925_v33 = vpop.f32.mrf.mxu3  ;;  %v9967_v43 = vld [vmem:[#allocation5 + $0x478] sm:$0xf0]  ;;  %v9959_v36 = vld [vmem:[#allocation5 + $0x468] sm:$0xf0] }
 0x279   :  { %8177 = vmatpush.bf16.msra.mxu3 %v9690_v14  ;;  %v9674_v28 = vor.u32 %v14089_v8, %v9671_v55  ;;  %v14071_v14 = vld [vmem:[#allocation5 + $0x194] sm:$0xf]  ;;  %v9655_v8 = vld [vmem:[#allocation5 + $0x208] sm:$0xf0]  ;;  %v14105_v55 = vld [vmem:[#allocation5 + $0x2a4] sm:$0xf] }
 0x27a   :  { %8152 = vmatpush.bf16.msra.mxu0 %v9554_v48  ;;  %v9743_v48 = vld [vmem:[#allocation5 + $0x2b8] sm:$0xf0] }
 0x27b   :  { %8165 = vmatpush.bf16.msra.mxu1 %v9618_v18  ;;  %v9666_v18 = vor.u32 %v14087_v56, %v9663_v13  ;;  %v7912_v35 = vpop.f32.mrf.mxu2  ;;  %v9906_v56 = vor.u32 %v14147_v62, %v9903_v17  ;;  %v14103_v13 = vld [vmem:[#allocation5 + $0x294] sm:$0xf]  ;;  %v9951_v62 = vld [vmem:[#allocation5 + $0x458] sm:$0xf0] }
 0x27c   :  { %8188 = vmatpush.bf16.msrb.mxu2 %v9770_v40  ;;  %v9599_v40 = vld [vmem:[#allocation5 + $0x198] sm:$0xf0]  ;;  %v14179_v17 = vld [vmem:[#allocation5 + $0x4f4] sm:$0xf] }
 0x27d   :  { %8178 = vmatpush.bf16.msra.mxu3 %v9682_v0  ;;  %v9602_v15 = vor.u32 %v14071_v14, %v9599_v40  ;;  %v9591_v0 = vld [vmem:[#allocation5 + $0x188] sm:$0xf0]  ;;  %v14129_v14 = vld [vmem:[#allocation5 + $0x364] sm:$0xf]  ;;  %v9887_v35 = vld [vmem:[#allocation5 + $0x3d8] sm:$0xf0] }
 0x27e   :  { %8153 = vmatpush.bf16.msra.mxu0 %v9546_v58  ;;  %v9735_v58 = vld [vmem:[#allocation5 + $0x2a8] sm:$0xf0]  ;;  %v10031_v33 = vld [vmem:[#allocation5 + $0x4f8] sm:$0xf0] }
 0x27f   :  { %8166 = vmatpush.bf16.msra.mxu1 %v9610_v57  ;;  %v9594_v57 = vor.u32 %v14069_v50, %v9591_v0  ;;  %v9738_v40 = vor.u32 %v14105_v55, %v9735_v58  ;;  %v9823_v50 = vld [vmem:[#allocation5 + $0x358] sm:$0xf0]  ;;  %v14143_v55 = vld [vmem:[#allocation5 + $0x3d4] sm:$0xf] }
 0x280   :  { %8189 = vmatpush.bf16.msrb.mxu2 %v9762_v34  ;;  %v9746_v34 = vor.u32 %v14107_v49, %v9743_v48  ;;  %v9727_v49 = vld [vmem:[#allocation5 + $0x298] sm:$0xf0]  ;;  %v14145_v48 = vld [vmem:[#allocation5 + $0x3e4] sm:$0xf] }
 0x281   :  { %8179 = vmatpush.bf16.msra.mxu3 %v9674_v28  ;;  %v9658_v28 = vor.u32 %v14085_v20, %v9655_v8  ;;  %v9898_v0 = vor.u32 %v14145_v48, %v9895_v25  ;;  %v9719_v20 = vld [vmem:[#allocation5 + $0x288] sm:$0xf0]  ;;  %v9962_v8 = vor.u32 %v14161_v46, %v9959_v36  ;;  %v14123_v48 = vld [vmem:[#allocation5 + $0x334] sm:$0xf]  ;;  %v9807_v25 = vld [vmem:[#allocation5 + $0x338] sm:$0xf0] }
 0x282   :  { %8154 = vmatpush.bf16.msra.mxu0 %v9538_v59  ;;  %v9970_v59 = vor.u32 %v14163_v27, %v9967_v43  ;;  %v9815_v27 = vld [vmem:[#allocation5 + $0x348] sm:$0xf0] }
 0x283   :  { %8167 = vmatpush.bf16.msra.mxu1 %v9602_v15  ;;  %v14127_v15 = vld [vmem:[#allocation5 + $0x354] sm:$0xf] }
 0x284   :  { %8190 = vmatpush.bf16.msrb.mxu2 %v9754_v47  ;;  %v9831_v47 = vld [vmem:[#allocation5 + $0x368] sm:$0xf0]  ;;  %v9826_v58 = vor.u32 %v14127_v15, %v9823_v50  ;;  %v14139_v50 = vld [vmem:[#allocation5 + $0x3b4] sm:$0xf] }
 0x285   :  { %8180 = vmatpush.bf16.msra.mxu3 %v9666_v18  ;;  %v9834_v54 = vor.u32 %v14129_v14, %v9831_v47  ;;  %v9730_v18 = vor.u32 %v14103_v13, %v9727_v49  ;;  %v10034_v14 = vor.u32 %v14179_v17, %v10031_v33  ;;  %v14141_v47 = vld [vmem:[#allocation5 + $0x3c4] sm:$0xf]  ;;  %v9943_v13 = vld [vmem:[#allocation5 + $0x448] sm:$0xf0] }
 0x286   :  { %8155 = vmatpush.bf16.msra.mxu0 %v9530_v61  ;;  %v14159_v61 = vld [vmem:[#allocation5 + $0x454] sm:$0xf]  ;;  %v10023_v49 = vld [vmem:[#allocation5 + $0x4e8] sm:$0xf0]  ;;  %v14137_v33 = vld [vmem:[#allocation5 + $0x3a4] sm:$0xf] }
 0x287   :  { %8168 = vmatpush.bf16.msra.mxu1 %v9594_v57  ;;  %v9890_v57 = vor.u32 %v14143_v55, %v9887_v35  ;;  %v7949_v46 = vpop.f32.mrf.mxu1  ;;  %v14175_v55 = vld [vmem:[#allocation5 + $0x4d4] sm:$0xf]  ;;  %v10015_v35 = vld [vmem:[#allocation5 + $0x4d8] sm:$0xf0] }
 0x288   :  { %8191 = vmatpush.bf16.msrb.mxu2 %v9746_v34  ;;  %v14101_v34 = vld [vmem:[#allocation5 + $0x284] sm:$0xf]  ;;  %v10018_v17 = vor.u32 %v14175_v55, %v10015_v35  ;;  %v14195_v55 = vld [vmem:[#allocation5 + $0x574] sm:$0xf]  ;;  %v10095_v35 = vld [vmem:[#allocation5 + $0x578] sm:$0xf0] }
 0x289   :  { %8181 = vmatpush.bf16.msra.mxu3 %v9658_v28  ;;  %8156 = vmatmul.bf16.vlgmr.msra.gmra.mxu0 %v15539_v26  ;;  %v9722_v43 = vor.u32 %v14101_v34, %v9719_v20  ;;  %v9954_v28 = vor.u32 %v14159_v61, %v9951_v62  ;;  %v9879_v26 = vld [vmem:[#allocation5 + $0x3c8] sm:$0xf0]  ;;  %v9810_v20 = vor.u32 %v14123_v48, %v9807_v25  ;;  %v14121_v61 = vld [vmem:[#allocation5 + $0x324] sm:$0xf] }
 0x28a   :  { %8200 = vmatpush.bf16.msrb.mxu0 %v9842_v3  ;;  %v14125_v3 = vld [vmem:[#allocation5 + $0x344] sm:$0xf]  ;;  %8169 = vmatmul.bf16.vlgmr.msra.gmra.mxu1 %v15543_v32 }
 0x28b   :  { %8213 = vmatpush.bf16.msrb.mxu1 %v9906_v56  ;;  %v9818_v56 = vor.u32 %v14125_v3, %v9815_v27  ;;  %v9863_v3 = vld [vmem:[#allocation5 + $0x3a8] sm:$0xf0]  ;;  %v14153_v27 = vld [vmem:[#allocation5 + $0x424] sm:$0xf] }
 0x28c   :  { %8192 = vmatpush.bf16.msrb.mxu2 %v9738_v40  ;;  %8182 = vmatmul.bf16.vlgmr.msra.gmra.mxu3 %v15553_v41  ;;  %v14157_v40 = vld [vmem:[#allocation5 + $0x444] sm:$0xf]  ;;  %v7936_v41 = vpop.f32.mrf.mxu0 }
 0x28d   :  { %8226 = vmatpush.bf16.msrb.mxu3 %v9970_v59  ;;  %v14177_v59 = vld [vmem:[#allocation5 + $0x4e4] sm:$0xf]  ;;  %v7937_v32 = vadd.f32 %v7936_v41, %v15795_v60  ;;  %v9946_v36 = vor.u32 %v14157_v40, %v9943_v13 }
 0x28e   :  { %8201 = vmatpush.bf16.msrb.mxu0 %v9834_v54  ;;  %v9882_v54 = vor.u32 %v14141_v47, %v9879_v26  ;;  %v10026_v15 = vor.u32 %v14177_v59, %v10023_v49  ;;  %v10007_v47 = vld [vmem:[#allocation5 + $0x4c8] sm:$0xf0]  ;;  %v9866_v59 = vor.u32 %v14137_v33, %v9863_v3  ;;  %v14169_v3 = vld [vmem:[#allocation5 + $0x4a4] sm:$0xf] }
 0x28f   :  { %8214 = vmatpush.bf16.msrb.mxu1 %v9898_v0  ;;  %v14155_v0 = vld [vmem:[#allocation5 + $0x434] sm:$0xf]  ;;  %v7950_v34 = vadd.f32 %v7949_v46, %v7937_v32  ;;  %v7975_v40 = vpop.f32.mrf.mxu3  ;;  %v7951_v49 = vpop.f32.mrf.mxu1 }
 0x290   :  { %8193 = vmatpush.bf16.msrb.mxu2 %v9730_v18  ;;  %v9871_v18 = vld [vmem:[#allocation5 + $0x3b8] sm:$0xf0]  ;;  %v14135_v32 = vld [vmem:[#allocation5 + $0x394] sm:$0xf]  ;;  %v10087_v49 = vld [vmem:[#allocation5 + $0x568] sm:$0xf0] }
 0x291   :  { %8227 = vmatpush.bf16.msrb.mxu3 %v9962_v8  ;;  %v9935_v8 = vld [vmem:[#allocation5 + $0x438] sm:$0xf0]  ;;  %v9874_v60 = vor.u32 %v14139_v50, %v9871_v18  ;;  %v14151_v46 = vld [vmem:[#allocation5 + $0x414] sm:$0xf] }
 0x292   :  { %8202 = vmatpush.bf16.msrb.mxu0 %v9826_v58  ;;  %v9799_v58 = vld [vmem:[#allocation5 + $0x328] sm:$0xf0]  ;;  %v9938_v62 = vor.u32 %v14155_v0, %v9935_v8  ;;  %v14171_v50 = vld [vmem:[#allocation5 + $0x4b4] sm:$0xf]  ;;  %v9999_v18 = vld [vmem:[#allocation5 + $0x4b8] sm:$0xf0] }
 0x293   :  { %8215 = vmatpush.bf16.msrb.mxu1 %v9890_v57  ;;  %v9802_v57 = vor.u32 %v14121_v61, %v9799_v58  ;;  %v14117_v0 = vld [vmem:[#allocation5 + $0x304] sm:$0xf]  ;;  %v10002_v58 = vor.u32 %v14171_v50, %v9999_v18  ;;  %v10215_v50 = vld [vmem:[#allocation5 + $0x668] sm:$0xf0] }
 0x294   :  { %8194 = vmatpush.bf16.msrb.mxu2 %v9722_v43  ;;  %v7962_v43 = vpop.f32.mrf.mxu2  ;;  %v7938_v13 = vpop.f32.mrf.mxu0  ;;  %v14133_v8 = vld [vmem:[#allocation5 + $0x384] sm:$0xf] }
 0x295   :  { %8228 = vmatpush.bf16.msrb.mxu3 %v9954_v28  ;;  %v9927_v28 = vld [vmem:[#allocation5 + $0x428] sm:$0xf0]  ;;  %v7963_v26 = vadd.f32 %v7962_v43, %v7950_v34  ;;  %v14211_v43 = vld [vmem:[#allocation5 + $0x5f4] sm:$0xf] }
 0x296   :  { %8203 = vmatpush.bf16.msrb.mxu0 %v9818_v56  ;;  %v9791_v56 = vld [vmem:[#allocation5 + $0x318] sm:$0xf0]  ;;  %v9930_v48 = vor.u32 %v14153_v27, %v9927_v28  ;;  %v9783_v34 = vld [vmem:[#allocation5 + $0x308] sm:$0xf0]  ;;  %v10098_v28 = vor.u32 %v14195_v55, %v10095_v35  ;;  %v14165_v35 = vld [vmem:[#allocation5 + $0x484] sm:$0xf] }
 0x297   :  { %8195 = vmatmul.bf16.vlgmr.msrb.gmra.mxu2 %v15557_v44  ;;  %8216 = vmatpush.bf16.msrb.mxu1 %v9882_v54  ;;  %v14119_v44 = vld [vmem:[#allocation5 + $0x314] sm:$0xf]  ;;  %v15802_v41 = vadd.f32 %v7975_v40, %v7963_v26  ;;  %v9855_v54 = vld [vmem:[#allocation5 + $0x398] sm:$0xf0]  ;;  %v9786_v33 = vor.u32 %v14117_v0, %v9783_v34  ;;  %v9991_v27 = vld [vmem:[#allocation5 + $0x4a8] sm:$0xf0]  ;;  %v7977_v40 = vpop.f32.mrf.mxu3 }
 0x298   :  { %8239 = vmatpush.bf16.msra.mxu2 %v10034_v14  ;;  %v14173_v14 = vld [vmem:[#allocation5 + $0x4c4] sm:$0xf]  ;;  %v10223_v26 = vld [vmem:[#allocation5 + $0x678] sm:$0xf0]  ;;  %v9994_v13 = vor.u32 %v14169_v3, %v9991_v27  ;;  %v14191_v34 = vld [vmem:[#allocation5 + $0x554] sm:$0xf] }
 0x299   :  { %8229 = vmatpush.bf16.msrb.mxu3 %v9946_v36  ;;  %v10010_v25 = vor.u32 %v14173_v14, %v10007_v47  ;;  %v9794_v36 = vor.u32 %v14119_v44, %v9791_v56  ;;  %v10159_v14 = vld [vmem:[#allocation5 + $0x5f8] sm:$0xf0]  ;;  %v14227_v47 = vld [vmem:[#allocation5 + $0x674] sm:$0xf]  ;;  %v14221_v40 = vld [vmem:[#allocation5 + $0x644] sm:$0xf] }
 0x29a   :  { %8204 = vmatpush.bf16.msrb.mxu0 %v9810_v20  ;;  %v9858_v20 = vor.u32 %v14135_v32, %v9855_v54  ;;  %v14167_v32 = vld [vmem:[#allocation5 + $0x494] sm:$0xf]  ;;  %v9983_v54 = vld [vmem:[#allocation5 + $0x498] sm:$0xf0] }
 0x29b   :  { %8217 = vmatpush.bf16.msrb.mxu1 %v9874_v60  ;;  %v9847_v60 = vld [vmem:[#allocation5 + $0x388] sm:$0xf0]  ;;  %v9986_v0 = vor.u32 %v14167_v32, %v9983_v54  ;;  %v14243_v3 = vld [vmem:[#allocation5 + $0x6f4] sm:$0xf]  ;;  %v10287_v27 = vld [vmem:[#allocation5 + $0x6f8] sm:$0xf0] }
 0x29c   :  { %8240 = vmatpush.bf16.msra.mxu2 %v10026_v15  ;;  %v9919_v15 = vld [vmem:[#allocation5 + $0x418] sm:$0xf0]  ;;  %v9850_v44 = vor.u32 %v14133_v8, %v9847_v60 }
 0x29d   :  { %8230 = vmatpush.bf16.msrb.mxu3 %v9938_v62  ;;  %v9922_v61 = vor.u32 %v14151_v46, %v9919_v15  ;;  %v14149_v62 = vld [vmem:[#allocation5 + $0x404] sm:$0xf]  ;;  %v10143_v60 = vld [vmem:[#allocation5 + $0x5d8] sm:$0xf0] }
 0x29e   :  { %8205 = vmatpush.bf16.msrb.mxu0 %v9802_v57  ;;  %v7964_v57 = vpop.f32.mrf.mxu2  ;;  %v14209_v46 = vld [vmem:[#allocation5 + $0x5e4] sm:$0xf] }
 0x29f   :  { %8218 = vmatpush.bf16.msrb.mxu1 %v9866_v59  ;;  %v14193_v59 = vld [vmem:[#allocation5 + $0x564] sm:$0xf] }
 0x2a0   :  { %8241 = vmatpush.bf16.msra.mxu2 %v10018_v17  ;;  %v9911_v17 = vld [vmem:[#allocation5 + $0x408] sm:$0xf0]  ;;  %v14225_v15 = vld [vmem:[#allocation5 + $0x664] sm:$0xf]  ;;  %v10090_v18 = vor.u32 %v14193_v59, %v10087_v49  ;;  %v14187_v49 = vld [vmem:[#allocation5 + $0x534] sm:$0xf] }
 0x2a1   :  { %8231 = vmatpush.bf16.msrb.mxu3 %v9930_v48  ;;  %v9914_v56 = vor.u32 %v14149_v62, %v9911_v17  ;;  %v10162_v48 = vor.u32 %v14211_v43, %v10159_v14  ;;  %v10218_v55 = vor.u32 %v14225_v15, %v10215_v50  ;;  %v14223_v62 = vld [vmem:[#allocation5 + $0x654] sm:$0xf]  ;;  %v10207_v17 = vld [vmem:[#allocation5 + $0x658] sm:$0xf0]  ;;  %v14189_v57 = vld [vmem:[#allocation5 + $0x544] sm:$0xf] }
 0x2a2   :  { %8206 = vmatpush.bf16.msrb.mxu0 %v9794_v36  ;;  %v10151_v36 = vld [vmem:[#allocation5 + $0x5e8] sm:$0xf0]  ;;  %v10127_v50 = vld [vmem:[#allocation5 + $0x5b8] sm:$0xf0] }
 0x2a3   :  { %8219 = vmatpush.bf16.msrb.mxu1 %v9858_v20  ;;  %v10079_v20 = vld [vmem:[#allocation5 + $0x558] sm:$0xf0]  ;;  %v10154_v8 = vor.u32 %v14209_v46, %v10151_v36  ;;  %v14203_v36 = vld [vmem:[#allocation5 + $0x5b4] sm:$0xf] }
 0x2a4   :  { %8242 = vmatpush.bf16.msra.mxu2 %v10010_v25  ;;  %v10226_v25 = vor.u32 %v14227_v47, %v10223_v26  ;;  %v10210_v47 = vor.u32 %v14223_v62, %v10207_v17  ;;  %v10290_v26 = vor.u32 %v14243_v3, %v10287_v27  ;;  %v10119_v17 = vld [vmem:[#allocation5 + $0x5a8] sm:$0xf0] }
 0x2a5   :  { %8232 = vmatpush.bf16.msrb.mxu3 %v9922_v61  ;;  %v9975_v61 = vld [vmem:[#allocation5 + $0x488] sm:$0xf0] }
 0x2a6   :  { %8207 = vmatpush.bf16.msrb.mxu0 %v9786_v33  ;;  %v10082_v33 = vor.u32 %v14191_v34, %v10079_v20  ;;  %v9978_v43 = vor.u32 %v14165_v35, %v9975_v61  ;;  %v7988_v59 = vpop.f32.mrf.mxu0  ;;  %v14185_v35 = vld [vmem:[#allocation5 + $0x524] sm:$0xf]  ;;  %v10055_v61 = vld [vmem:[#allocation5 + $0x528] sm:$0xf0] }
 0x2a7   :  { %8220 = vmatpush.bf16.msrb.mxu1 %v9850_v44  ;;  %v10199_v44 = vld [vmem:[#allocation5 + $0x648] sm:$0xf0]  ;;  %v8001_v46 = vpop.f32.mrf.mxu1 }
 0x2a8   :  { %8243 = vmatpush.bf16.msra.mxu2 %v10002_v58  ;;  %v14207_v58 = vld [vmem:[#allocation5 + $0x5d4] sm:$0xf]  ;;  %v10202_v54 = vor.u32 %v14221_v40, %v10199_v44  ;;  %v10183_v3 = vld [vmem:[#allocation5 + $0x628] sm:$0xf0] }
 0x2a9   :  { %8233 = vmatpush.bf16.msrb.mxu3 %v9914_v56  ;;  %8208 = vmatmul.bf16.vlgmr.msrb.gmra.mxu0 %v15551_v38  ;;  %v10146_v14 = vor.u32 %v14207_v58, %v10143_v60  ;;  %v14205_v38 = vld [vmem:[#allocation5 + $0x5c4] sm:$0xf]  ;;  %v14199_v44 = vld [vmem:[#allocation5 + $0x594] sm:$0xf] }
 0x2aa   :  { %8252 = vmatpush.bf16.msra.mxu0 %v10098_v28  ;;  %8221 = vmatmul.bf16.vlgmr.msrb.gmra.mxu1 %v15555_v42  ;;  %v10071_v28 = vld [vmem:[#allocation5 + $0x548] sm:$0xf0]  ;;  %v14201_v60 = vld [vmem:[#allocation5 + $0x5a4] sm:$0xf] }
 0x2ab   :  { %8265 = vmatpush.bf16.msra.mxu1 %v10162_v48  ;;  %v10135_v42 = vld [vmem:[#allocation5 + $0x5c8] sm:$0xf0]  ;;  %v10074_v56 = vor.u32 %v14189_v57, %v10071_v28  ;;  %v10063_v48 = vld [vmem:[#allocation5 + $0x538] sm:$0xf0] }
 0x2ac   :  { %8244 = vmatpush.bf16.msra.mxu2 %v9994_v13  ;;  %8234 = vmatmul.bf16.vlgmr.msrb.gmra.mxu3 %v15563_v19  ;;  %v14241_v19 = vld [vmem:[#allocation5 + $0x6e4] sm:$0xf]  ;;  %v10279_v13 = vld [vmem:[#allocation5 + $0x6e8] sm:$0xf0]  ;;  %v10138_v32 = vor.u32 %v14205_v38, %v10135_v42  ;;  %v10066_v20 = vor.u32 %v14187_v49, %v10063_v48  ;;  %v10047_v38 = vld [vmem:[#allocation5 + $0x518] sm:$0xf0]  ;;  %v10122_v42 = vor.u32 %v14201_v60, %v10119_v17 }
 0x2ad   :  { %8278 = vmatpush.bf16.msra.mxu3 %v10226_v25  ;;  %v7989_v25 = vadd.f32 %v7988_v59, %v15802_v41  ;;  %v10282_v15 = vor.u32 %v14241_v19, %v10279_v13  ;;  %v10130_v41 = vor.u32 %v14203_v36, %v10127_v50  ;;  %v10263_v57 = vld [vmem:[#allocation5 + $0x6c8] sm:$0xf0]  ;;  %v10111_v59 = vld [vmem:[#allocation5 + $0x598] sm:$0xf0]  ;;  %v14215_v49 = vld [vmem:[#allocation5 + $0x614] sm:$0xf] }
 0x2ae   :  { %8253 = vmatpush.bf16.msra.mxu0 %v10090_v18  ;;  %v14219_v18 = vld [vmem:[#allocation5 + $0x634] sm:$0xf]  ;;  %v8014_v27 = vpop.f32.mrf.mxu2  ;;  %v10175_v48 = vld [vmem:[#allocation5 + $0x618] sm:$0xf0]  ;;  %v10039_v36 = vld [vmem:[#allocation5 + $0x508] sm:$0xf0]  ;;  %v10114_v50 = vor.u32 %v14199_v44, %v10111_v59 }
 0x2af   :  { %8266 = vmatpush.bf16.msra.mxu1 %v10154_v8  ;;  %v8002_v34 = vadd.f32 %v8001_v46, %v7989_v25  ;;  %v14239_v8 = vld [vmem:[#allocation5 + $0x6d4] sm:$0xf]  ;;  %v14181_v46 = vld [vmem:[#allocation5 + $0x504] sm:$0xf]  ;;  %v10471_v59 = vld [vmem:[#allocation5 + $0x868] sm:$0xf0] }
 0x2b0   :  { %8245 = vmatpush.bf16.msra.mxu2 %v9986_v0  ;;  %v10191_v0 = vld [vmem:[#allocation5 + $0x638] sm:$0xf0]  ;;  %v14275_v60 = vld [vmem:[#allocation5 + $0x7f4] sm:$0xf]  ;;  %v14273_v44 = vld [vmem:[#allocation5 + $0x7e4] sm:$0xf] }
 0x2b1   :  { %8279 = vmatpush.bf16.msra.mxu3 %v10218_v55  ;;  %v10271_v55 = vld [vmem:[#allocation5 + $0x6d8] sm:$0xf0]  ;;  %v10194_v58 = vor.u32 %v14219_v18, %v10191_v0  ;;  %v8015_v28 = vadd.f32 %v8014_v27, %v8002_v34  ;;  %v10178_v18 = vor.u32 %v14215_v49, %v10175_v48  ;;  %v10103_v0 = vld [vmem:[#allocation5 + $0x588] sm:$0xf0]  ;;  %v14259_v34 = vld [vmem:[#allocation5 + $0x774] sm:$0xf] }
 0x2b2   :  { %8254 = vmatpush.bf16.msra.mxu0 %v10082_v33  ;;  %v10274_v62 = vor.u32 %v14239_v8, %v10271_v55  ;;  %v14217_v33 = vld [vmem:[#allocation5 + $0x624] sm:$0xf]  ;;  %v10479_v27 = vld [vmem:[#allocation5 + $0x878] sm:$0xf0] }
 0x2b3   :  { %8267 = vmatpush.bf16.msra.mxu1 %v10146_v14  ;;  %v8027_v14 = vpop.f32.mrf.mxu3  ;;  %v10186_v40 = vor.u32 %v14217_v33, %v10183_v3  ;;  %v14213_v55 = vld [vmem:[#allocation5 + $0x604] sm:$0xf]  ;;  %v14291_v3 = vld [vmem:[#allocation5 + $0x874] sm:$0xf] }
 0x2b4   :  { %8246 = vmatpush.bf16.msra.mxu2 %v9978_v43  ;;  %v14237_v43 = vld [vmem:[#allocation5 + $0x6c4] sm:$0xf]  ;;  %v15809_v19 = vadd.f32 %v8027_v14, %v8015_v28 }
 0x2b5   :  { %8280 = vmatpush.bf16.msra.mxu3 %v10210_v47  ;;  %v14183_v47 = vld [vmem:[#allocation5 + $0x514] sm:$0xf]  ;;  %v10266_v13 = vor.u32 %v14237_v43, %v10263_v57  ;;  %v14229_v48 = vld [vmem:[#allocation5 + $0x684] sm:$0xf] }
 0x2b6   :  { %8255 = vmatpush.bf16.msra.mxu0 %v10074_v56  ;;  %v8003_v56 = vpop.f32.mrf.mxu1  ;;  %v10050_v25 = vor.u32 %v14183_v47, %v10047_v38  ;;  %v8016_v17 = vpop.f32.mrf.mxu2  ;;  %v14231_v47 = vld [vmem:[#allocation5 + $0x694] sm:$0xf]  ;;  %v14257_v38 = vld [vmem:[#allocation5 + $0x764] sm:$0xf] }
 0x2b7   :  { %8247 = vmatmul.bf16.vlgmr.msra.gmra.mxu2 %v15567_v24  ;;  %8268 = vmatpush.bf16.msra.mxu1 %v10138_v32  ;;  %v10058_v24 = vor.u32 %v14185_v35, %v10055_v61  ;;  %v14235_v32 = vld [vmem:[#allocation5 + $0x6b4] sm:$0xf]  ;;  %v10167_v35 = vld [vmem:[#allocation5 + $0x608] sm:$0xf0]  ;;  %v14233_v61 = vld [vmem:[#allocation5 + $0x6a4] sm:$0xf] }
 0x2b8   :  { %8291 = vmatpush.bf16.msrb.mxu2 %v10290_v26  ;;  %v7990_v26 = vpop.f32.mrf.mxu0  ;;  %v10170_v57 = vor.u32 %v14213_v55, %v10167_v35  ;;  %v10407_v56 = vld [vmem:[#allocation5 + $0x7e8] sm:$0xf0] }
 0x2b9   :  { %8281 = vmatpush.bf16.msra.mxu3 %v10202_v54  ;;  %v10255_v54 = vld [vmem:[#allocation5 + $0x6b8] sm:$0xf0]  ;;  %v10343_v26 = vld [vmem:[#allocation5 + $0x768] sm:$0xf0] }
 0x2ba   :  { %8256 = vmatpush.bf16.msra.mxu0 %v10066_v20  ;;  %v10351_v20 = vld [vmem:[#allocation5 + $0x778] sm:$0xf0]  ;;  %v10258_v8 = vor.u32 %v14235_v32, %v10255_v54  ;;  %v10346_v49 = vor.u32 %v14257_v38, %v10343_v26  ;;  %v10410_v32 = vor.u32 %v14273_v44, %v10407_v56  ;;  %v10231_v54 = vld [vmem:[#allocation5 + $0x688] sm:$0xf0]  ;;  %v14283_v44 = vld [vmem:[#allocation5 + $0x834] sm:$0xf] }
 0x2bb   :  { %8269 = vmatpush.bf16.msra.mxu1 %v10130_v41  ;;  %v10042_v41 = vor.u32 %v14181_v46, %v10039_v36  ;;  %v10354_v33 = vor.u32 %v14259_v34, %v10351_v20  ;;  %v14255_v46 = vld [vmem:[#allocation5 + $0x754] sm:$0xf]  ;;  %v10335_v36 = vld [vmem:[#allocation5 + $0x758] sm:$0xf0]  ;;  %v10234_v35 = vor.u32 %v14229_v48, %v10231_v54  ;;  %v10391_v17 = vld [vmem:[#allocation5 + $0x7c8] sm:$0xf0] }
 0x2bc   :  { %8292 = vmatpush.bf16.msrb.mxu2 %v10282_v15  ;;  %v14197_v15 = vld [vmem:[#allocation5 + $0x584] sm:$0xf]  ;;  %v10463_v34 = vld [vmem:[#allocation5 + $0x858] sm:$0xf0]  ;;  %v14307_v20 = vld [vmem:[#allocation5 + $0x8f4] sm:$0xf]  ;;  %v10338_v55 = vor.u32 %v14255_v46, %v10335_v36 }
 0x2bd   :  { %8282 = vmatpush.bf16.msra.mxu3 %v10194_v58  ;;  %v10247_v58 = vld [vmem:[#allocation5 + $0x6a8] sm:$0xf0]  ;;  %v10106_v43 = vor.u32 %v14197_v15, %v10103_v0  ;;  %v14287_v0 = vld [vmem:[#allocation5 + $0x854] sm:$0xf]  ;;  %v10447_v56 = vld [vmem:[#allocation5 + $0x838] sm:$0xf0] }
 0x2be   :  { %8257 = vmatpush.bf16.msra.mxu0 %v10058_v24  ;;  %v8029_v24 = vpop.f32.mrf.mxu3  ;;  %v10250_v28 = vor.u32 %v14233_v61, %v10247_v58  ;;  %v10327_v58 = vld [vmem:[#allocation5 + $0x748] sm:$0xf0]  ;;  %v14265_v36 = vld [vmem:[#allocation5 + $0x7a4] sm:$0xf] }
 0x2bf   :  { %8270 = vmatpush.bf16.msra.mxu1 %v10122_v42  ;;  %v10482_v42 = vor.u32 %v14291_v3, %v10479_v27  ;;  %v14305_v3 = vld [vmem:[#allocation5 + $0x8e4] sm:$0xf]  ;;  %v10311_v54 = vld [vmem:[#allocation5 + $0x728] sm:$0xf0] }
 0x2c0   :  { %8293 = vmatpush.bf16.msrb.mxu2 %v10274_v62  ;;  %v10415_v62 = vld [vmem:[#allocation5 + $0x7f8] sm:$0xf0] }
 0x2c1   :  { %8283 = vmatpush.bf16.msra.mxu3 %v10186_v40  ;;  %v10418_v14 = vor.u32 %v14275_v60, %v10415_v62  ;;  %v10239_v40 = vld [vmem:[#allocation5 + $0x698] sm:$0xf0]  ;;  %v14269_v62 = vld [vmem:[#allocation5 + $0x7c4] sm:$0xf] }
 0x2c2   :  { %8258 = vmatpush.bf16.msra.mxu0 %v10050_v25  ;;  %v10242_v25 = vor.u32 %v14231_v47, %v10239_v40  ;;  %v10383_v40 = vld [vmem:[#allocation5 + $0x7b8] sm:$0xf0] }
 0x2c3   :  { %8271 = vmatpush.bf16.msra.mxu1 %v10114_v50  ;;  %v14271_v50 = vld [vmem:[#allocation5 + $0x7d4] sm:$0xf] }
 0x2c4   :  { %8294 = vmatpush.bf16.msrb.mxu2 %v10266_v13  ;;  %v14289_v13 = vld [vmem:[#allocation5 + $0x864] sm:$0xf] }
 0x2c5   :  { %8284 = vmatpush.bf16.msra.mxu3 %v10178_v18  ;;  %v10474_v15 = vor.u32 %v14289_v13, %v10471_v59  ;;  %v10399_v18 = vld [vmem:[#allocation5 + $0x7d8] sm:$0xf0]  ;;  %v14303_v13 = vld [vmem:[#allocation5 + $0x8d4] sm:$0xf] }
 0x2c6   :  { %8259 = vmatpush.bf16.msra.mxu0 %v10042_v41  ;;  %v10402_v61 = vor.u32 %v14271_v50, %v10399_v18  ;;  %v14253_v41 = vld [vmem:[#allocation5 + $0x744] sm:$0xf]  ;;  %v8040_v24 = vpop.f32.mrf.mxu0  ;;  %v10527_v59 = vld [vmem:[#allocation5 + $0x8d8] sm:$0xf0]  ;;  %v10439_v18 = vld [vmem:[#allocation5 + $0x828] sm:$0xf0] }
 0x2c7   :  { %8272 = vmatpush.bf16.msra.mxu1 %v10106_v43  ;;  %v10330_v27 = vor.u32 %v14253_v41, %v10327_v58  ;;  %v10394_v43 = vor.u32 %v14269_v62, %v10391_v17  ;;  %v8053_v38 = vpop.f32.mrf.mxu1  ;;  %v10530_v46 = vor.u32 %v14303_v13, %v10527_v59  ;;  %v14281_v50 = vld [vmem:[#allocation5 + $0x824] sm:$0xf]  ;;  %v10303_v41 = vld [vmem:[#allocation5 + $0x718] sm:$0xf0]  ;;  %v14263_v62 = vld [vmem:[#allocation5 + $0x794] sm:$0xf] }
 0x2c8   :  { %8295 = vmatpush.bf16.msrb.mxu2 %v10258_v8  ;;  %v10543_v8 = vld [vmem:[#allocation5 + $0x8f8] sm:$0xf0]  ;;  %v14297_v59 = vld [vmem:[#allocation5 + $0x8a4] sm:$0xf] }
 0x2c9   :  { %8285 = vmatpush.bf16.msra.mxu3 %v10170_v57  ;;  %8260 = vmatmul.bf16.vlgmr.msra.gmra.mxu0 %v15565_v23  ;;  %v10466_v23 = vor.u32 %v14287_v0, %v10463_v34  ;;  %v10546_v60 = vor.u32 %v14307_v20, %v10543_v8  ;;  %v14251_v57 = vld [vmem:[#allocation5 + $0x734] sm:$0xf]  ;;  %v14301_v0 = vld [vmem:[#allocation5 + $0x8c4] sm:$0xf]  ;;  %v10519_v34 = vld [vmem:[#allocation5 + $0x8c8] sm:$0xf0] }
 0x2ca   :  { %8304 = vmatpush.bf16.msrb.mxu0 %v10354_v33  ;;  %8273 = vmatmul.bf16.vlgmr.msra.gmra.mxu1 %v15569_v29  ;;  %v14285_v33 = vld [vmem:[#allocation5 + $0x844] sm:$0xf]  ;;  %v10535_v29 = vld [vmem:[#allocation5 + $0x8e8] sm:$0xf0]  ;;  %v10367_v17 = vld [vmem:[#allocation5 + $0x798] sm:$0xf0] }
 0x2cb   :  { %8317 = vmatpush.bf16.msrb.mxu1 %v10418_v14  ;;  %v8041_v14 = vadd.f32 %v8040_v24, %v15809_v19  ;;  %v10538_v26 = vor.u32 %v14305_v3, %v10535_v29  ;;  %v10450_v19 = vor.u32 %v14283_v44, %v10447_v56  ;;  %v10431_v29 = vld [vmem:[#allocation5 + $0x818] sm:$0xf0]  ;;  %v10423_v44 = vld [vmem:[#allocation5 + $0x808] sm:$0xf0]  ;;  %v14323_v56 = vld [vmem:[#allocation5 + $0x974] sm:$0xf] }
 0x2cc   :  { %8296 = vmatpush.bf16.msrb.mxu2 %v10250_v28  ;;  %8286 = vmatmul.bf16.vlgmr.msra.gmra.mxu3 %v15575_v16  ;;  %v10455_v16 = vld [vmem:[#allocation5 + $0x848] sm:$0xf0]  ;;  %v10319_v28 = vld [vmem:[#allocation5 + $0x738] sm:$0xf0] }
 0x2cd   :  { %8330 = vmatpush.bf16.msrb.mxu3 %v10482_v42  ;;  %v10458_v47 = vor.u32 %v14285_v33, %v10455_v16  ;;  %v14267_v42 = vld [vmem:[#allocation5 + $0x7b4] sm:$0xf]  ;;  %v10322_v48 = vor.u32 %v14251_v57, %v10319_v28  ;;  %v10511_v24 = vld [vmem:[#allocation5 + $0x8b8] sm:$0xf0]  ;;  %v14245_v57 = vld [vmem:[#allocation5 + $0x704] sm:$0xf] }
 0x2ce   :  { %8305 = vmatpush.bf16.msrb.mxu0 %v10346_v49  ;;  %v8054_v49 = vadd.f32 %v8053_v38, %v8041_v14  ;;  %v8066_v20 = vpop.f32.mrf.mxu2  ;;  %v8042_v58 = vpop.f32.mrf.mxu0  ;;  %v14279_v33 = vld [vmem:[#allocation5 + $0x814] sm:$0xf]  ;;  %v10295_v28 = vld [vmem:[#allocation5 + $0x708] sm:$0xf0]  ;;  %v10370_v14 = vor.u32 %v14263_v62, %v10367_v17  ;;  %v10607_v13 = vld [vmem:[#allocation5 + $0x978] sm:$0xf0] }
 0x2cf   :  { %8318 = vmatpush.bf16.msrb.mxu1 %v10410_v32  ;;  %v14249_v32 = vld [vmem:[#allocation5 + $0x724] sm:$0xf]  ;;  %v8055_v16 = vpop.f32.mrf.mxu1  ;;  %v10359_v38 = vld [vmem:[#allocation5 + $0x788] sm:$0xf0]  ;;  %v14319_v17 = vld [vmem:[#allocation5 + $0x954] sm:$0xf] }
 0x2d0   :  { %8297 = vmatpush.bf16.msrb.mxu2 %v10242_v25  ;;  %v10386_v25 = vor.u32 %v14267_v42, %v10383_v40  ;;  %v8067_v8 = vadd.f32 %v8066_v20, %v8054_v49  ;;  %v10434_v42 = vor.u32 %v14279_v33, %v10431_v29  ;;  %v10503_v49 = vld [vmem:[#allocation5 + $0x8a8] sm:$0xf0]  ;;  %v14353_v58 = vld [vmem:[#allocation5 + $0xa64] sm:$0xf]  ;;  %v10591_v33 = vld [vmem:[#allocation5 + $0x958] sm:$0xf0] }
 0x2d1   :  { %8331 = vmatpush.bf16.msrb.mxu3 %v10474_v15  ;;  %v10375_v15 = vld [vmem:[#allocation5 + $0x7a8] sm:$0xf0] }
 0x2d2   :  { %8306 = vmatpush.bf16.msrb.mxu0 %v10338_v55  ;;  %v8079_v55 = vpop.f32.mrf.mxu3  ;;  %v10599_v20 = vld [vmem:[#allocation5 + $0x968] sm:$0xf0] }
 0x2d3   :  { %8319 = vmatpush.bf16.msrb.mxu1 %v10402_v61  ;;  %v14247_v61 = vld [vmem:[#allocation5 + $0x714] sm:$0xf]  ;;  %v15816_v3 = vadd.f32 %v8079_v55, %v8067_v8 }
 0x2d4   :  { %8298 = vmatpush.bf16.msrb.mxu2 %v10234_v35  ;;  %v10378_v35 = vor.u32 %v14265_v36, %v10375_v15  ;;  %v10610_v15 = vor.u32 %v14323_v56, %v10607_v13  ;;  %v14295_v55 = vld [vmem:[#allocation5 + $0x894] sm:$0xf]  ;;  %v10583_v56 = vld [vmem:[#allocation5 + $0x948] sm:$0xf0] }
 0x2d5   :  { %8332 = vmatpush.bf16.msrb.mxu3 %v10466_v23  ;;  %v10442_v23 = vor.u32 %v14281_v50, %v10439_v18 }
 0x2d6   :  { %8307 = vmatpush.bf16.msrb.mxu0 %v10330_v27  ;;  %v14299_v27 = vld [vmem:[#allocation5 + $0x8b4] sm:$0xf] }
 0x2d7   :  { %8299 = vmatmul.bf16.vlgmr.msrb.gmra.mxu2 %v15579_v22  ;;  %8320 = vmatpush.bf16.msrb.mxu1 %v10394_v43  ;;  %v10314_v22 = vor.u32 %v14249_v32, %v10311_v54  ;;  %v10306_v43 = vor.u32 %v14247_v61, %v10303_v41  ;;  %v10514_v40 = vor.u32 %v14299_v27, %v10511_v24  ;;  %v10671_v54 = vld [vmem:[#allocation5 + $0x9f8] sm:$0xf0]  ;;  %v14337_v61 = vld [vmem:[#allocation5 + $0x9e4] sm:$0xf]  ;;  %v10663_v41 = vld [vmem:[#allocation5 + $0x9e8] sm:$0xf0] }
 0x2d8   :  { %8343 = vmatpush.bf16.msra.mxu2 %v10546_v60  ;;  %v10522_v60 = vor.u32 %v14301_v0, %v10519_v34  ;;  %v10298_v32 = vor.u32 %v14245_v57, %v10295_v28  ;;  %v10506_v0 = vor.u32 %v14297_v59, %v10503_v49  ;;  %v14321_v34 = vld [vmem:[#allocation5 + $0x964] sm:$0xf]  ;;  %v10666_v16 = vor.u32 %v14337_v61, %v10663_v41  ;;  %v10487_v24 = vld [vmem:[#allocation5 + $0x888] sm:$0xf0]  ;;  %v10655_v57 = vld [vmem:[#allocation5 + $0x9d8] sm:$0xf0] }
 0x2d9   :  { %8333 = vmatpush.bf16.msrb.mxu3 %v10458_v47  ;;  %v14261_v47 = vld [vmem:[#allocation5 + $0x784] sm:$0xf]  ;;  %v14351_v28 = vld [vmem:[#allocation5 + $0xa54] sm:$0xf]  ;;  %v10647_v49 = vld [vmem:[#allocation5 + $0x9c8] sm:$0xf0] }
 0x2da   :  { %8308 = vmatpush.bf16.msrb.mxu0 %v10322_v48  ;;  %v14339_v48 = vld [vmem:[#allocation5 + $0x9f4] sm:$0xf]  ;;  %v10362_v36 = vor.u32 %v14261_v47, %v10359_v38  ;;  %v8081_v50 = vpop.f32.mrf.mxu3  ;;  %v14293_v27 = vld [vmem:[#allocation5 + $0x884] sm:$0xf]  ;;  %v10594_v38 = vor.u32 %v14319_v17, %v10591_v33 }
 0x2db   :  { %8321 = vmatpush.bf16.msrb.mxu1 %v10386_v25  ;;  %v8068_v25 = vpop.f32.mrf.mxu2  ;;  %v14333_v59 = vld [vmem:[#allocation5 + $0x9c4] sm:$0xf]  ;;  %v14367_v41 = vld [vmem:[#allocation5 + $0xad4] sm:$0xf] }
 0x2dc   :  { %8344 = vmatpush.bf16.msra.mxu2 %v10538_v26  ;;  %v14277_v26 = vld [vmem:[#allocation5 + $0x804] sm:$0xf]  ;;  %v10711_v25 = vld [vmem:[#allocation5 + $0xa48] sm:$0xf0] }
 0x2dd   :  { %8334 = vmatpush.bf16.msrb.mxu3 %v10450_v19  ;;  %v14355_v19 = vld [vmem:[#allocation5 + $0xa74] sm:$0xf]  ;;  %v10426_v18 = vor.u32 %v14277_v26, %v10423_v44  ;;  %v14317_v44 = vld [vmem:[#allocation5 + $0x944] sm:$0xf] }
 0x2de   :  { %8309 = vmatpush.bf16.msrb.mxu0 %v10314_v22  ;;  %v10674_v22 = vor.u32 %v14339_v48, %v10671_v54  ;;  %v14371_v26 = vld [vmem:[#allocation5 + $0xaf4] sm:$0xf]  ;;  %v14349_v48 = vld [vmem:[#allocation5 + $0xa44] sm:$0xf]  ;;  %v10791_v54 = vld [vmem:[#allocation5 + $0xae8] sm:$0xf0] }
 0x2df   :  { %8322 = vmatpush.bf16.msrb.mxu1 %v10378_v35  ;;  %v10495_v35 = vld [vmem:[#allocation5 + $0x898] sm:$0xf0]  ;;  %v10714_v50 = vor.u32 %v14349_v48, %v10711_v25 }
 0x2e0   :  { %8345 = vmatpush.bf16.msra.mxu2 %v10530_v46  ;;  %v10735_v46 = vld [vmem:[#allocation5 + $0xa78] sm:$0xf0]  ;;  %v10498_v62 = vor.u32 %v14295_v55, %v10495_v35 }
 0x2e1   :  { %8335 = vmatpush.bf16.msrb.mxu3 %v10442_v23  ;;  %v10738_v8 = vor.u32 %v14355_v19, %v10735_v46  ;;  %v10727_v23 = vld [vmem:[#allocation5 + $0xa68] sm:$0xf0]  ;;  %v14315_v19 = vld [vmem:[#allocation5 + $0x934] sm:$0xf]  ;;  %v10575_v46 = vld [vmem:[#allocation5 + $0x938] sm:$0xf0] }
 0x2e2   :  { %8310 = vmatpush.bf16.msrb.mxu0 %v10306_v43  ;;  %v10730_v29 = vor.u32 %v14353_v58, %v10727_v23  ;;  %v14335_v43 = vld [vmem:[#allocation5 + $0x9d4] sm:$0xf]  ;;  %v10703_v55 = vld [vmem:[#allocation5 + $0xa38] sm:$0xf0]  ;;  %v10578_v61 = vor.u32 %v14315_v19, %v10575_v46  ;;  %v10551_v19 = vld [vmem:[#allocation5 + $0x908] sm:$0xf0] }
 0x2e3   :  { %8323 = vmatpush.bf16.msrb.mxu1 %v10370_v14  ;;  %v10719_v14 = vld [vmem:[#allocation5 + $0xa58] sm:$0xf0]  ;;  %v8118_v47 = vpop.f32.mrf.mxu2  ;;  %v10658_v13 = vor.u32 %v14335_v43, %v10655_v57  ;;  %v10695_v43 = vld [vmem:[#allocation5 + $0xa28] sm:$0xf0]  ;;  %v14365_v57 = vld [vmem:[#allocation5 + $0xac4] sm:$0xf] }
 0x2e4   :  { %8346 = vmatpush.bf16.msra.mxu2 %v10522_v60  ;;  %v10602_v60 = vor.u32 %v14321_v34, %v10599_v20  ;;  %v10783_v58 = vld [vmem:[#allocation5 + $0xad8] sm:$0xf0]  ;;  %v14325_v46 = vld [vmem:[#allocation5 + $0x984] sm:$0xf] }
 0x2e5   :  { %8336 = vmatpush.bf16.msrb.mxu3 %v10434_v42  ;;  %v10799_v42 = vld [vmem:[#allocation5 + $0xaf8] sm:$0xf0] }
 0x2e6   :  { %8311 = vmatpush.bf16.msrb.mxu0 %v10298_v32  ;;  %v10586_v32 = vor.u32 %v14317_v44, %v10583_v56  ;;  %v14327_v44 = vld [vmem:[#allocation5 + $0x994] sm:$0xf]  ;;  %v10687_v48 = vld [vmem:[#allocation5 + $0xa18] sm:$0xf0] }
 0x2e7   :  { %8324 = vmatpush.bf16.msrb.mxu1 %v10362_v36  ;;  %v8092_v36 = vpop.f32.mrf.mxu0 }
 0x2e8   :  { %8347 = vmatpush.bf16.msra.mxu2 %v10514_v40  ;;  %v10490_v40 = vor.u32 %v14293_v27, %v10487_v24  ;;  %v8093_v34 = vadd.f32 %v8092_v36, %v15816_v3  ;;  %v10631_v27 = vld [vmem:[#allocation5 + $0x9a8] sm:$0xf0]  ;;  %v14345_v24 = vld [vmem:[#allocation5 + $0xa24] sm:$0xf] }
 0x2e9   :  { %8337 = vmatpush.bf16.msrb.mxu3 %v10426_v18  ;;  %8312 = vmatmul.bf16.vlgmr.msrb.gmra.mxu0 %v15577_v21  ;;  %v10722_v21 = vor.u32 %v14351_v28, %v10719_v14  ;;  %v8105_v18 = vpop.f32.mrf.mxu1  ;;  %v10775_v28 = vld [vmem:[#allocation5 + $0xac8] sm:$0xf0]  ;;  %v14311_v14 = vld [vmem:[#allocation5 + $0x914] sm:$0xf] }
 0x2ea   :  { %8356 = vmatpush.bf16.msra.mxu0 %v10610_v15  ;;  %8325 = vmatmul.bf16.vlgmr.msrb.gmra.mxu1 %v15581_v30  ;;  %v10802_v30 = vor.u32 %v14371_v26, %v10799_v42  ;;  %v10650_v15 = vor.u32 %v14333_v59, %v10647_v49  ;;  %v8106_v23 = vadd.f32 %v8105_v18, %v8093_v34  ;;  %v14343_v49 = vld [vmem:[#allocation5 + $0xa14] sm:$0xf] }
 0x2eb   :  { %8369 = vmatpush.bf16.msra.mxu1 %v10674_v22  ;;  %v10639_v22 = vld [vmem:[#allocation5 + $0x9b8] sm:$0xf0]  ;;  %v8120_v35 = vpop.f32.mrf.mxu2  ;;  %v10778_v59 = vor.u32 %v14365_v57, %v10775_v28  ;;  %v14387_v18 = vld [vmem:[#allocation5 + $0xb74] sm:$0xf]  ;;  %v14385_v57 = vld [vmem:[#allocation5 + $0xb64] sm:$0xf] }
 0x2ec   :  { %8348 = vmatpush.bf16.msra.mxu2 %v10506_v0  ;;  %8338 = vmatmul.bf16.vlgmr.msrb.gmra.mxu3 %v15587_v31  ;;  %v14369_v31 = vld [vmem:[#allocation5 + $0xae4] sm:$0xf]  ;;  %v14331_v0 = vld [vmem:[#allocation5 + $0x9b4] sm:$0xf]  ;;  %v15823_v3 = vadd.f32 %v8118_v47, %v8106_v23  ;;  %v10855_v28 = vld [vmem:[#allocation5 + $0xb68] sm:$0xf0] }
 0x2ed   :  { %8382 = vmatpush.bf16.msra.mxu3 %v10738_v8  ;;  %v10794_v20 = vor.u32 %v14369_v31, %v10791_v54  ;;  %v14347_v8 = vld [vmem:[#allocation5 + $0xa34] sm:$0xf]  ;;  %v10642_v17 = vor.u32 %v14331_v0, %v10639_v22  ;;  %v10767_v31 = vld [vmem:[#allocation5 + $0xab8] sm:$0xf0]  ;;  %v14309_v54 = vld [vmem:[#allocation5 + $0x904] sm:$0xf] }
 0x2ee   :  { %8357 = vmatpush.bf16.msra.mxu0 %v10602_v60  ;;  %v14313_v60 = vld [vmem:[#allocation5 + $0x924] sm:$0xf]  ;;  %v10706_v33 = vor.u32 %v14347_v8, %v10703_v55  ;;  %v10863_v0 = vld [vmem:[#allocation5 + $0xb78] sm:$0xf0]  ;;  %v10679_v8 = vld [vmem:[#allocation5 + $0xa08] sm:$0xf0]  ;;  %v10554_v35 = vor.u32 %v14309_v54, %v10551_v19 }
 0x2ef   :  { %8370 = vmatpush.bf16.msra.mxu1 %v10666_v16  ;;  %v14329_v16 = vld [vmem:[#allocation5 + $0x9a4] sm:$0xf]  ;;  %v8131_v26 = vpop.f32.mrf.mxu3  ;;  %v8094_v56 = vpop.f32.mrf.mxu0  ;;  %v10866_v23 = vor.u32 %v14387_v18, %v10863_v0  ;;  %v10975_v54 = vld [vmem:[#allocation5 + $0xc58] sm:$0xf0]  ;;  %v14435_v19 = vld [vmem:[#allocation5 + $0xcf4] sm:$0xf] }
 0x2f0   :  { %8349 = vmatpush.bf16.msra.mxu2 %v10498_v62  ;;  %v10567_v62 = vld [vmem:[#allocation5 + $0x928] sm:$0xf0]  ;;  %v10634_v42 = vor.u32 %v14329_v16, %v10631_v27  ;;  %v14341_v22 = vld [vmem:[#allocation5 + $0xa04] sm:$0xf]  ;;  %v10858_v56 = vor.u32 %v14385_v57, %v10855_v28  ;;  %v11039_v57 = vld [vmem:[#allocation5 + $0xcd8] sm:$0xf0] }
 0x2f1   :  { %8383 = vmatpush.bf16.msra.mxu3 %v10730_v29  ;;  %v10786_v29 = vor.u32 %v14367_v41, %v10783_v58  ;;  %v14361_v55 = vld [vmem:[#allocation5 + $0xaa4] sm:$0xf]  ;;  %v14403_v41 = vld [vmem:[#allocation5 + $0xbf4] sm:$0xf]  ;;  %v10927_v58 = vld [vmem:[#allocation5 + $0xbf8] sm:$0xf0] }
 0x2f2   :  { %8358 = vmatpush.bf16.msra.mxu0 %v10594_v38  ;;  %v10559_v38 = vld [vmem:[#allocation5 + $0x918] sm:$0xf0]  ;;  %v14381_v0 = vld [vmem:[#allocation5 + $0xb44] sm:$0xf] }
 0x2f3   :  { %8371 = vmatpush.bf16.msra.mxu1 %v10658_v13  ;;  %v15194_v13 = vld [vmem:[#allocation7] sm:$0x3]  ;;  %v10562_v25 = vor.u32 %v14311_v14, %v10559_v38  ;;  %v10751_v38 = vld [vmem:[#allocation5 + $0xa98] sm:$0xf0] }
 0x2f4   :  { %8350 = vmatpush.bf16.msra.mxu2 %v10490_v40  ;;  %v10698_v40 = vor.u32 %v14345_v24, %v10695_v43  ;;  %v1560_v47 = vperm.slane %v15194_v13, 1  ;;  %v10930_v43 = vor.u32 %v14403_v41, %v10927_v58  ;;  %v14357_v13 = vld [vmem:[#allocation5 + $0xa84] sm:$0xf]  ;;  %v14379_v58 = vld [vmem:[#allocation5 + $0xb34] sm:$0xf] }
 0x2f5   :  { %8384 = vmatpush.bf16.msra.mxu3 %v10722_v21  ;;  %v8107_v21 = vpop.f32.mrf.mxu1 }
 0x2f6   :  { %8359 = vmatpush.bf16.msra.mxu0 %v10586_v32  ;;  %v14363_v32 = vld [vmem:[#allocation5 + $0xab4] sm:$0xf]  ;;  %v8132_v34 = vadd.f32 %v8131_v26, %v1560_v47  ;;  %v14401_v26 = vld [vmem:[#allocation5 + $0xbe4] sm:$0xf] }
 0x2f7   :  { %8351 = vmatmul.bf16.vlgmr.msra.gmra.mxu2 %v15591_v39  ;;  %8372 = vmatpush.bf16.msra.mxu1 %v10650_v15  ;;  %v10570_v39 = vor.u32 %v14313_v60, %v10567_v62  ;;  %v10690_v15 = vor.u32 %v14343_v49, %v10687_v48  ;;  %v14419_v60 = vld [vmem:[#allocation5 + $0xc74] sm:$0xf]  ;;  %v10991_v62 = vld [vmem:[#allocation5 + $0xc78] sm:$0xf0] }
 0x2f8   :  { %8395 = vmatpush.bf16.msrb.mxu2 %v10802_v30  ;;  %v10623_v30 = vld [vmem:[#allocation5 + $0x998] sm:$0xf0]  ;;  %v10994_v14 = vor.u32 %v14419_v60, %v10991_v62 }
 0x2f9   :  { %8385 = vmatpush.bf16.msra.mxu3 %v10714_v50  ;;  %v10626_v36 = vor.u32 %v14327_v44, %v10623_v30  ;;  %v10615_v50 = vld [vmem:[#allocation5 + $0x988] sm:$0xf0]  ;;  %v14383_v30 = vld [vmem:[#allocation5 + $0xb54] sm:$0xf]  ;;  %v10847_v49 = vld [vmem:[#allocation5 + $0xb58] sm:$0xf0] }
 0x2fa   :  { %8360 = vmatpush.bf16.msra.mxu0 %v10578_v61  ;;  %v10759_v61 = vld [vmem:[#allocation5 + $0xaa8] sm:$0xf0]  ;;  %v10618_v16 = vor.u32 %v14325_v46, %v10615_v50  ;;  %v11055_v46 = vld [vmem:[#allocation5 + $0xcf8] sm:$0xf0] }
 0x2fb   :  { %8373 = vmatpush.bf16.msra.mxu1 %v10642_v17  ;;  %v8144_v17 = vpop.f32.mrf.mxu2  ;;  %v10762_v24 = vor.u32 %v14361_v55, %v10759_v61  ;;  %v10983_v44 = vld [vmem:[#allocation5 + $0xc68] sm:$0xf0] }
 0x2fc   :  { %8396 = vmatpush.bf16.msrb.mxu2 %v10794_v20  ;;  %v10770_v20 = vor.u32 %v14363_v32, %v10767_v31  ;;  %v15825_v27 = vadd.f32 %v8144_v17, %v8132_v34  ;;  %v10911_v32 = vld [vmem:[#allocation5 + $0xbd8] sm:$0xf0]  ;;  %v14415_v31 = vld [vmem:[#allocation5 + $0xc54] sm:$0xf]  ;;  %v10967_v55 = vld [vmem:[#allocation5 + $0xc48] sm:$0xf0] }
 0x2fd   :  { %8386 = vmatpush.bf16.msra.mxu3 %v10706_v33  ;;  %v8133_v33 = vpop.f32.mrf.mxu3  ;;  %v10978_v34 = vor.u32 %v14415_v31, %v10975_v54 }
 0x2fe   :  { %8361 = vmatpush.bf16.msra.mxu0 %v10570_v39  ;;  %v14359_v39 = vld [vmem:[#allocation5 + $0xa94] sm:$0xf] }
 0x2ff   :  { %8374 = vmatpush.bf16.msra.mxu1 %v10634_v42  ;;  %v10919_v42 = vld [vmem:[#allocation5 + $0xbe8] sm:$0xf0]  ;;  %v10754_v47 = vor.u32 %v14359_v39, %v10751_v38  ;;  %v14395_v33 = vld [vmem:[#allocation5 + $0xbb4] sm:$0xf] }
 0x300   :  { %8397 = vmatpush.bf16.msrb.mxu2 %v10786_v29  ;;  %v10682_v29 = vor.u32 %v14341_v22, %v10679_v8  ;;  %v10922_v21 = vor.u32 %v14401_v26, %v10919_v42  ;;  %v14397_v22 = vld [vmem:[#allocation5 + $0xbc4] sm:$0xf]  ;;  %v10903_v8 = vld [vmem:[#allocation5 + $0xbc8] sm:$0xf0]  ;;  %v14431_v39 = vld [vmem:[#allocation5 + $0xcd4] sm:$0xf] }
 0x301   :  { %8387 = vmatpush.bf16.msra.mxu3 %v10698_v40  ;;  %v14417_v40 = vld [vmem:[#allocation5 + $0xc64] sm:$0xf]  ;;  %v10906_v41 = vor.u32 %v14397_v22, %v10903_v8  ;;  %v10807_v8 = vld [vmem:[#allocation5 + $0xb08] sm:$0xf0] }
 0x302   :  { %8362 = vmatpush.bf16.msra.mxu0 %v10562_v25  ;;  %v10986_v48 = vor.u32 %v14417_v40, %v10983_v44  ;;  %v14399_v25 = vld [vmem:[#allocation5 + $0xbd4] sm:$0xf]  ;;  %v14377_v42 = vld [vmem:[#allocation5 + $0xb24] sm:$0xf]  ;;  %v10823_v40 = vld [vmem:[#allocation5 + $0xb28] sm:$0xf0] }
 0x303   :  { %8375 = vmatpush.bf16.msra.mxu1 %v10626_v36  ;;  %v8146_v36 = vpop.f32.mrf.mxu2  ;;  %v10914_v18 = vor.u32 %v14399_v25, %v10911_v32  ;;  %v14375_v25 = vld [vmem:[#allocation5 + $0xb14] sm:$0xf]  ;;  %v10815_v32 = vld [vmem:[#allocation5 + $0xb18] sm:$0xf0]  ;;  %v14373_v22 = vld [vmem:[#allocation5 + $0xb04] sm:$0xf] }
 0x304   :  { %8398 = vmatpush.bf16.msrb.mxu2 %v10778_v59  ;;  %v10743_v59 = vld [vmem:[#allocation5 + $0xa88] sm:$0xf0]  ;;  %v14391_v36 = vld [vmem:[#allocation5 + $0xb94] sm:$0xf] }
 0x305   :  { %8388 = vmatpush.bf16.msra.mxu3 %v10690_v15  ;;  %v10850_v15 = vor.u32 %v14383_v30, %v10847_v49  ;;  %v10746_v50 = vor.u32 %v14357_v13, %v10743_v59  ;;  %v14393_v13 = vld [vmem:[#allocation5 + $0xba4] sm:$0xf]  ;;  %v11031_v30 = vld [vmem:[#allocation5 + $0xcc8] sm:$0xf0]  ;;  %v10826_v49 = vor.u32 %v14377_v42, %v10823_v40 }
 0x306   :  { %8363 = vmatpush.bf16.msra.mxu0 %v10554_v35  ;;  %v11047_v35 = vld [vmem:[#allocation5 + $0xce8] sm:$0xf0]  ;;  %v8157_v60 = vpop.f32.mrf.mxu0  ;;  %v14429_v59 = vld [vmem:[#allocation5 + $0xcc4] sm:$0xf] }
 0x307   :  { %8376 = vmatpush.bf16.msra.mxu1 %v10618_v16  ;;  %v10895_v16 = vld [vmem:[#allocation5 + $0xbb8] sm:$0xf0]  ;;  %v8170_v28 = vpop.f32.mrf.mxu1  ;;  %v14449_v40 = vld [vmem:[#allocation5 + $0xd64] sm:$0xf] }
 0x308   :  { %8399 = vmatpush.bf16.msrb.mxu2 %v10770_v20  ;;  %v11058_v20 = vor.u32 %v14435_v19, %v11055_v46  ;;  %v10898_v26 = vor.u32 %v14395_v33, %v10895_v16  ;;  %v11034_v46 = vor.u32 %v14429_v59, %v11031_v30  ;;  %v14467_v33 = vld [vmem:[#allocation5 + $0xdf4] sm:$0xf]  ;;  %v10810_v16 = vor.u32 %v14373_v22, %v10807_v8  ;;  %v11175_v59 = vld [vmem:[#allocation5 + $0xde8] sm:$0xf0]  ;;  %v14481_v30 = vld [vmem:[#allocation5 + $0xe64] sm:$0xf] }
 0x309   :  { %8389 = vmatpush.bf16.msra.mxu3 %v10682_v29  ;;  %8364 = vmatmul.bf16.vlgmr.msra.gmra.mxu0 %v15589_v37  ;;  %v10839_v37 = vld [vmem:[#allocation5 + $0xb48] sm:$0xf0]  ;;  %v14411_v29 = vld [vmem:[#allocation5 + $0xc34] sm:$0xf]  ;;  %v14445_v8 = vld [vmem:[#allocation5 + $0xd44] sm:$0xf] }
 0x30a   :  { %8408 = vmatpush.bf16.msrb.mxu0 %v10866_v23  ;;  %8377 = vmatmul.bf16.vlgmr.msra.gmra.mxu1 %v15593_v45  ;;  %v14433_v45 = vld [vmem:[#allocation5 + $0xce4] sm:$0xf]  ;;  %v10842_v61 = vor.u32 %v14381_v0, %v10839_v37  ;;  %v10831_v23 = vld [vmem:[#allocation5 + $0xb38] sm:$0xf0]  ;;  %v14427_v0 = vld [vmem:[#allocation5 + $0xcb4] sm:$0xf] }
 0x30b   :  { %8421 = vmatpush.bf16.msrb.mxu1 %v10930_v43  ;;  %v11050_v17 = vor.u32 %v14433_v45, %v11047_v35  ;;  %v10959_v43 = vld [vmem:[#allocation5 + $0xc38] sm:$0xf0]  ;;  %v10871_v45 = vld [vmem:[#allocation5 + $0xb88] sm:$0xf0]  ;;  %v14405_v35 = vld [vmem:[#allocation5 + $0xc04] sm:$0xf] }
 0x30c   :  { %8400 = vmatpush.bf16.msrb.mxu2 %v10762_v24  ;;  %8390 = vmatmul.bf16.vlgmr.msra.gmra.mxu3 %v15601_v1  ;;  %v14413_v1 = vld [vmem:[#allocation5 + $0xc44] sm:$0xf]  ;;  %v8158_v24 = vadd.f32 %v8157_v60, %v15825_v27  ;;  %v10962_v44 = vor.u32 %v14411_v29, %v10959_v43  ;;  %v11023_v37 = vld [vmem:[#allocation5 + $0xcb8] sm:$0xf0] }
 0x30d   :  { %8434 = vmatpush.bf16.msrb.mxu3 %v10994_v14  ;;  %v10970_v62 = vor.u32 %v14413_v1, %v10967_v55  ;;  %v10834_v14 = vor.u32 %v14379_v58, %v10831_v23  ;;  %v14409_v27 = vld [vmem:[#allocation5 + $0xc24] sm:$0xf]  ;;  %v10935_v58 = vld [vmem:[#allocation5 + $0xc08] sm:$0xf0]  ;;  %v14451_v23 = vld [vmem:[#allocation5 + $0xd74] sm:$0xf] }
 0x30e   :  { %8409 = vmatpush.bf16.msrb.mxu0 %v10858_v56  ;;  %v8171_v38 = vadd.f32 %v8170_v28, %v8158_v24  ;;  %v11042_v56 = vor.u32 %v14431_v39, %v11039_v57  ;;  %v8159_v54 = vpop.f32.mrf.mxu0  ;;  %v14389_v55 = vld [vmem:[#allocation5 + $0xb84] sm:$0xf]  ;;  %v11119_v60 = vld [vmem:[#allocation5 + $0xd78] sm:$0xf0]  ;;  %v14483_v24 = vld [vmem:[#allocation5 + $0xe74] sm:$0xf] }
 0x30f   :  { %8422 = vmatpush.bf16.msrb.mxu1 %v10922_v21  ;;  %v10951_v21 = vld [vmem:[#allocation5 + $0xc28] sm:$0xf0]  ;;  %v11183_v29 = vld [vmem:[#allocation5 + $0xdf8] sm:$0xf0]  ;;  %v10874_v57 = vor.u32 %v14389_v55, %v10871_v45  ;;  %v11122_v28 = vor.u32 %v14451_v23, %v11119_v60  ;;  %v14461_v45 = vld [vmem:[#allocation5 + $0xdc4] sm:$0xf] }
 0x310   :  { %8401 = vmatpush.bf16.msrb.mxu2 %v10754_v47  ;;  %v10887_v47 = vld [vmem:[#allocation5 + $0xba8] sm:$0xf0]  ;;  %v10954_v19 = vor.u32 %v14409_v27, %v10951_v21  ;;  %v11247_v43 = vld [vmem:[#allocation5 + $0xe78] sm:$0xf0]  ;;  %v14465_v21 = vld [vmem:[#allocation5 + $0xde4] sm:$0xf] }
 0x311   :  { %8435 = vmatpush.bf16.msrb.mxu3 %v10986_v48  ;;  %v10890_v48 = vor.u32 %v14393_v13, %v10887_v47  ;;  %v11250_v13 = vor.u32 %v14483_v24, %v11247_v43  ;;  %v14423_v47 = vld [vmem:[#allocation5 + $0xc94] sm:$0xf]  ;;  %v11007_v27 = vld [vmem:[#allocation5 + $0xc98] sm:$0xf0]  ;;  %v11303_v23 = vld [vmem:[#allocation5 + $0xee8] sm:$0xf0] }
 0x312   :  { %8410 = vmatpush.bf16.msrb.mxu0 %v10850_v15  ;;  %v10879_v15 = vld [vmem:[#allocation5 + $0xb98] sm:$0xf0]  ;;  %v14443_v60 = vld [vmem:[#allocation5 + $0xd34] sm:$0xf] }
 0x313   :  { %8423 = vmatpush.bf16.msrb.mxu1 %v10914_v18  ;;  %v10943_v18 = vld [vmem:[#allocation5 + $0xc18] sm:$0xf0]  ;;  %v10882_v1 = vor.u32 %v14391_v36, %v10879_v15  ;;  %v14463_v36 = vld [vmem:[#allocation5 + $0xdd4] sm:$0xf] }
 0x314   :  { %8402 = vmatpush.bf16.msrb.mxu2 %v10746_v50  ;;  %v14407_v50 = vld [vmem:[#allocation5 + $0xc14] sm:$0xf]  ;;  %v11167_v15 = vld [vmem:[#allocation5 + $0xdd8] sm:$0xf0] }
 0x315   :  { %8436 = vmatpush.bf16.msrb.mxu3 %v10978_v34  ;;  %v8172_v34 = vpop.f32.mrf.mxu1  ;;  %v11170_v55 = vor.u32 %v14463_v36, %v11167_v15  ;;  %v14459_v24 = vld [vmem:[#allocation5 + $0xdb4] sm:$0xf] }
 0x316   :  { %8411 = vmatpush.bf16.msrb.mxu0 %v10842_v61  ;;  %v10946_v61 = vor.u32 %v14407_v50, %v10943_v18  ;;  %v14479_v50 = vld [vmem:[#allocation5 + $0xe54] sm:$0xf]  ;;  %v11231_v18 = vld [vmem:[#allocation5 + $0xe58] sm:$0xf0] }
 0x317   :  { %8403 = vmatmul.bf16.vlgmr.msrb.gmra.mxu2 %v15605_v7  ;;  %8424 = vmatpush.bf16.msrb.mxu1 %v10906_v41  ;;  %v8183_v7 = vpop.f32.mrf.mxu3  ;;  %v11026_v41 = vor.u32 %v14427_v0, %v11023_v37  ;;  %v14499_v37 = vld [vmem:[#allocation5 + $0xef4] sm:$0xf]  ;;  %v11311_v34 = vld [vmem:[#allocation5 + $0xef8] sm:$0xf0] }
 0x318   :  { %8447 = vmatpush.bf16.msra.mxu2 %v11058_v20  ;;  %v8184_v31 = vadd.f32 %v8183_v7, %v8171_v38  ;;  %v10818_v20 = vor.u32 %v14375_v25, %v10815_v32  ;;  %v10938_v38 = vor.u32 %v14405_v35, %v10935_v58  ;;  %v14447_v25 = vld [vmem:[#allocation5 + $0xd54] sm:$0xf]  ;;  %v11103_v32 = vld [vmem:[#allocation5 + $0xd58] sm:$0xf0]  ;;  %v11159_v35 = vld [vmem:[#allocation5 + $0xdc8] sm:$0xf0] }
 0x319   :  { %8437 = vmatpush.bf16.msrb.mxu3 %v10970_v62  ;;  %v14425_v62 = vld [vmem:[#allocation5 + $0xca4] sm:$0xf]  ;;  %v11106_v0 = vor.u32 %v14447_v25, %v11103_v32  ;;  %v14439_v32 = vld [vmem:[#allocation5 + $0xd14] sm:$0xf] }
 0x31a   :  { %8412 = vmatpush.bf16.msrb.mxu0 %v10834_v14  ;;  %v8196_v14 = vpop.f32.mrf.mxu2  ;;  %v14497_v58 = vld [vmem:[#allocation5 + $0xee4] sm:$0xf]  ;;  %v14455_v36 = vld [vmem:[#allocation5 + $0xd94] sm:$0xf] }
 0x31b   :  { %8425 = vmatpush.bf16.msrb.mxu1 %v10898_v26  ;;  %v15832_v42 = vadd.f32 %v8196_v14, %v8184_v31  ;;  %v11178_v31 = vor.u32 %v14465_v21, %v11175_v59  ;;  %v11215_v14 = vld [vmem:[#allocation5 + $0xe38] sm:$0xf0]  ;;  %v14457_v21 = vld [vmem:[#allocation5 + $0xda4] sm:$0xf]  ;;  %v11143_v59 = vld [vmem:[#allocation5 + $0xda8] sm:$0xf0] }
 0x31c   :  { %8448 = vmatpush.bf16.msra.mxu2 %v11050_v17  ;;  %v11015_v17 = vld [vmem:[#allocation5 + $0xca8] sm:$0xf0] }
 0x31d   :  { %8438 = vmatpush.bf16.msrb.mxu3 %v10962_v44  ;;  %v11018_v26 = vor.u32 %v14425_v62, %v11015_v17  ;;  %v11111_v44 = vld [vmem:[#allocation5 + $0xd68] sm:$0xf0]  ;;  %v11087_v62 = vld [vmem:[#allocation5 + $0xd38] sm:$0xf0] }
 0x31e   :  { %8413 = vmatpush.bf16.msrb.mxu0 %v10826_v49  ;;  %v11239_v49 = vld [vmem:[#allocation5 + $0xe68] sm:$0xf0]  ;;  %v11114_v7 = vor.u32 %v14449_v40, %v11111_v44  ;;  %v11295_v40 = vld [vmem:[#allocation5 + $0xed8] sm:$0xf0] }
 0x31f   :  { %8426 = vmatpush.bf16.msrb.mxu1 %v10890_v48  ;;  %v8185_v39 = vpop.f32.mrf.mxu3  ;;  %v11010_v48 = vor.u32 %v14423_v47, %v11007_v27  ;;  %v11242_v54 = vor.u32 %v14481_v30, %v11239_v49  ;;  %v14473_v30 = vld [vmem:[#allocation5 + $0xe24] sm:$0xf]  ;;  %v11207_v49 = vld [vmem:[#allocation5 + $0xe28] sm:$0xf0] }
 0x320   :  { %8449 = vmatpush.bf16.msra.mxu2 %v11042_v56  ;;  %v11186_v56 = vor.u32 %v14467_v33, %v11183_v29  ;;  %v11162_v33 = vor.u32 %v14461_v45, %v11159_v35  ;;  %v11306_v39 = vor.u32 %v14497_v58, %v11303_v23  ;;  %v11127_v35 = vld [vmem:[#allocation5 + $0xd88] sm:$0xf0]  ;;  %v14469_v58 = vld [vmem:[#allocation5 + $0xe04] sm:$0xf] }
 0x321   :  { %8439 = vmatpush.bf16.msrb.mxu3 %v10954_v19  ;;  %v14421_v19 = vld [vmem:[#allocation5 + $0xc84] sm:$0xf]  ;;  %v11191_v23 = vld [vmem:[#allocation5 + $0xe08] sm:$0xf0] }
 0x322   :  { %8414 = vmatpush.bf16.msrb.mxu0 %v10818_v20  ;;  %v8198_v20 = vpop.f32.mrf.mxu2 }
 0x323   :  { %8427 = vmatpush.bf16.msrb.mxu1 %v10882_v1  ;;  %v11095_v1 = vld [vmem:[#allocation5 + $0xd48] sm:$0xf0] }
 0x324   :  { %8450 = vmatpush.bf16.msra.mxu2 %v11034_v46  ;;  %v10999_v46 = vld [vmem:[#allocation5 + $0xc88] sm:$0xf0] }
 0x325   :  { %8440 = vmatpush.bf16.msrb.mxu3 %v10946_v61  ;;  %v11002_v22 = vor.u32 %v14421_v19, %v10999_v46  ;;  %v14477_v61 = vld [vmem:[#allocation5 + $0xe44] sm:$0xf]  ;;  %v11146_v19 = vor.u32 %v14457_v21, %v11143_v59  ;;  %v11210_v46 = vor.u32 %v14473_v30, %v11207_v49  ;;  %v11495_v30 = vld [vmem:[#allocation5 + $0x1068] sm:$0xf0] }
 0x326   :  { %8415 = vmatpush.bf16.msrb.mxu0 %v10810_v16  ;;  %v8209_v17 = vpop.f32.mrf.mxu0  ;;  %v14529_v21 = vld [vmem:[#allocation5 + $0xfe4] sm:$0xf] }
 0x327   :  { %8428 = vmatpush.bf16.msrb.mxu1 %v10874_v57  ;;  %v8222_v29 = vpop.f32.mrf.mxu1  ;;  %v8210_v43 = vadd.f32 %v8209_v17, %v15832_v42  ;;  %v11151_v57 = vld [vmem:[#allocation5 + $0xdb8] sm:$0xf0]  ;;  %v11271_v17 = vld [vmem:[#allocation5 + $0xea8] sm:$0xf0]  ;;  %v14545_v59 = vld [vmem:[#allocation5 + $0x1064] sm:$0xf] }
 0x328   :  { %8451 = vmatpush.bf16.msra.mxu2 %v11026_v41  ;;  %v11223_v41 = vld [vmem:[#allocation5 + $0xe48] sm:$0xf0]  ;;  %v11154_v47 = vor.u32 %v14459_v24, %v11151_v57 }
 0x329   :  { %8441 = vmatpush.bf16.msrb.mxu3 %v10938_v38  ;;  %8416 = vmatmul.bf16.vlgmr.msrb.gmra.mxu0 %v15603_v6  ;;  %v11234_v6 = vor.u32 %v14479_v50, %v11231_v18  ;;  %v11226_v16 = vor.u32 %v14477_v61, %v11223_v41  ;;  %v11090_v38 = vor.u32 %v14443_v60, %v11087_v62  ;;  %v14515_v61 = vld [vmem:[#allocation5 + $0xf74] sm:$0xf]  ;;  %v11375_v41 = vld [vmem:[#allocation5 + $0xf78] sm:$0xf0]  ;;  %v14489_v60 = vld [vmem:[#allocation5 + $0xea4] sm:$0xf] }
 0x32a   :  { %8460 = vmatpush.bf16.msra.mxu0 %v11122_v28  ;;  %8429 = vmatmul.bf16.vlgmr.msrb.gmra.mxu1 %v15607_v10  ;;  %v11314_v10 = vor.u32 %v14499_v37, %v11311_v34  ;;  %v14475_v28 = vld [vmem:[#allocation5 + $0xe34] sm:$0xf]  ;;  %v8223_v44 = vadd.f32 %v8222_v29, %v8210_v43  ;;  %v11199_v34 = vld [vmem:[#allocation5 + $0xe18] sm:$0xf0]  ;;  %v11378_v24 = vor.u32 %v14515_v61, %v11375_v41 }
 0x32b   :  { %8473 = vmatpush.bf16.msra.mxu1 %v11186_v56  ;;  %v14441_v56 = vld [vmem:[#allocation5 + $0xd24] sm:$0xf]  ;;  %v11218_v27 = vor.u32 %v14475_v28, %v11215_v14  ;;  %v14471_v37 = vld [vmem:[#allocation5 + $0xe14] sm:$0xf] }
 0x32c   :  { %8452 = vmatpush.bf16.msra.mxu2 %v11018_v26  ;;  %8442 = vmatmul.bf16.vlgmr.msrb.gmra.mxu3 %v15616_v63  ;;  %v11098_v63 = vor.u32 %v14445_v8, %v11095_v1  ;;  %v14495_v26 = vld [vmem:[#allocation5 + $0xed4] sm:$0xf]  ;;  %v11279_v8 = vld [vmem:[#allocation5 + $0xeb8] sm:$0xf0]  ;;  %v14437_v1 = vld [vmem:[#allocation5 + $0xd04] sm:$0xf] }
 0x32d   :  { %8486 = vmatpush.bf16.msra.mxu3 %v11250_v13  ;;  %v11079_v13 = vld [vmem:[#allocation5 + $0xd28] sm:$0xf0]  ;;  %v11298_v42 = vor.u32 %v14495_v26, %v11295_v40  ;;  %v14547_v43 = vld [vmem:[#allocation5 + $0x1074] sm:$0xf]  ;;  %v11274_v26 = vor.u32 %v14489_v60, %v11271_v17 }
 0x32e   :  { %8461 = vmatpush.bf16.msra.mxu0 %v11114_v7  ;;  %v11082_v7 = vor.u32 %v14441_v56, %v11079_v13  ;;  %v8211_v15 = vpop.f32.mrf.mxu0  ;;  %v14513_v56 = vld [vmem:[#allocation5 + $0xf64] sm:$0xf]  ;;  %v11367_v13 = vld [vmem:[#allocation5 + $0xf68] sm:$0xf0] }
 0x32f   :  { %8474 = vmatpush.bf16.msra.mxu1 %v11178_v31  ;;  %v8235_v25 = vpop.f32.mrf.mxu3  ;;  %v11071_v31 = vld [vmem:[#allocation5 + $0xd18] sm:$0xf0]  ;;  %v8224_v50 = vpop.f32.mrf.mxu1  ;;  %v11370_v49 = vor.u32 %v14513_v56, %v11367_v13  ;;  %v14521_v13 = vld [vmem:[#allocation5 + $0xfa4] sm:$0xf] }
 0x330   :  { %8453 = vmatpush.bf16.msra.mxu2 %v11010_v48  ;;  %v11287_v48 = vld [vmem:[#allocation5 + $0xec8] sm:$0xf0]  ;;  %v11074_v20 = vor.u32 %v14439_v32, %v11071_v31  ;;  %v14511_v32 = vld [vmem:[#allocation5 + $0xf54] sm:$0xf]  ;;  %v11359_v31 = vld [vmem:[#allocation5 + $0xf58] sm:$0xf0] }
 0x331   :  { %8487 = vmatpush.bf16.msra.mxu3 %v11242_v54  ;;  %v8236_v54 = vadd.f32 %v8235_v25, %v8223_v44  ;;  %v14487_v44 = vld [vmem:[#allocation5 + $0xe94] sm:$0xf]  ;;  %v11255_v25 = vld [vmem:[#allocation5 + $0xe88] sm:$0xf0]  ;;  %v11487_v15 = vld [vmem:[#allocation5 + $0x1058] sm:$0xf0] }
 0x332   :  { %8462 = vmatpush.bf16.msra.mxu0 %v11106_v0  ;;  %v11135_v0 = vld [vmem:[#allocation5 + $0xd98] sm:$0xf0]  ;;  %v14563_v50 = vld [vmem:[#allocation5 + $0x10f4] sm:$0xf] }
 0x333   :  { %8475 = vmatpush.bf16.msra.mxu1 %v11170_v55  ;;  %v11063_v55 = vld [vmem:[#allocation5 + $0xd08] sm:$0xf0]  ;;  %v11138_v45 = vor.u32 %v14455_v36, %v11135_v0  ;;  %v14543_v36 = vld [vmem:[#allocation5 + $0x1054] sm:$0xf] }
 0x334   :  { %8454 = vmatpush.bf16.msra.mxu2 %v11002_v22  ;;  %v14491_v22 = vld [vmem:[#allocation5 + $0xeb4] sm:$0xf]  ;;  %v11066_v62 = vor.u32 %v14437_v1, %v11063_v55  ;;  %v14525_v55 = vld [vmem:[#allocation5 + $0xfc4] sm:$0xf] }
 0x335   :  { %8488 = vmatpush.bf16.msra.mxu3 %v11234_v6  ;;  %v14453_v6 = vld [vmem:[#allocation5 + $0xd84] sm:$0xf] }
 0x336   :  { %8463 = vmatpush.bf16.msra.mxu0 %v11098_v63  ;;  %v11282_v63 = vor.u32 %v14491_v22, %v11279_v8  ;;  %v11130_v14 = vor.u32 %v14453_v6, %v11127_v35  ;;  %v14509_v22 = vld [vmem:[#allocation5 + $0xf44] sm:$0xf]  ;;  %v11490_v8 = vor.u32 %v14543_v36, %v11487_v15  ;;  %v11415_v6 = vld [vmem:[#allocation5 + $0xfc8] sm:$0xf0]  ;;  %v14535_v36 = vld [vmem:[#allocation5 + $0x1014] sm:$0xf] }
 0x337   :  { %8455 = vmatmul.bf16.vlgmr.msra.gmra.mxu2 %v15620_v5  ;;  %8476 = vmatpush.bf16.msra.mxu1 %v11162_v33  ;;  %v14493_v5 = vld [vmem:[#allocation5 + $0xec4] sm:$0xf]  ;;  %v14531_v33 = vld [vmem:[#allocation5 + $0xff4] sm:$0xf]  ;;  %v8237_v57 = vpop.f32.mrf.mxu3  ;;  %v11418_v41 = vor.u32 %v14525_v55, %v11415_v6 }
 0x338   :  { %8499 = vmatpush.bf16.msrb.mxu2 %v11314_v10  ;;  %v11290_v18 = vor.u32 %v14493_v5, %v11287_v48  ;;  %v11202_v10 = vor.u32 %v14471_v37, %v11199_v34  ;;  %v11362_v37 = vor.u32 %v14511_v32, %v11359_v31  ;;  %v16004_v57 = vld [vmem:[#allocation25_spill] sm:$0xff] }
 0x339   :  { %8489 = vmatpush.bf16.msra.mxu3 %v11226_v16  ;;  %v11439_v16 = vld [vmem:[#allocation5 + $0xff8] sm:$0xf0] }
 0x33a   :  { %8464 = vmatpush.bf16.msra.mxu0 %v11090_v38  ;;  %v8248_v29 = vpop.f32.mrf.mxu2  ;;  %v11194_v38 = vor.u32 %v14469_v58, %v11191_v23  ;;  %v11442_v40 = vor.u32 %v14531_v33, %v11439_v16  ;;  %v11343_v58 = vld [vmem:[#allocation5 + $0xf38] sm:$0xf0]  ;;  %v14523_v33 = vld [vmem:[#allocation5 + $0xfb4] sm:$0xf] }
 0x33b   :  { %8477 = vmatpush.bf16.msra.mxu1 %v11154_v47  ;;  %v15839_v28 = vadd.f32 %v8248_v29, %v8236_v54  ;;  %v11498_v54 = vor.u32 %v14545_v59, %v11495_v30  ;;  %v11407_v16 = vld [vmem:[#allocation5 + $0xfb8] sm:$0xf0]  ;;  %v14539_v29 = vld [vmem:[#allocation5 + $0x1034] sm:$0xf]  ;;  %v11543_v59 = vld [vmem:[#allocation5 + $0x10c8] sm:$0xf0] }
 0x33c   :  { %8500 = vmatpush.bf16.msrb.mxu2 %v11306_v39  ;;  %v11503_v39 = vld [vmem:[#allocation5 + $0x1078] sm:$0xf0] }
 0x33d   :  { %8490 = vmatpush.bf16.msra.mxu3 %v11218_v27  ;;  %v11506_v47 = vor.u32 %v14547_v43, %v11503_v39  ;;  %v11263_v27 = vld [vmem:[#allocation5 + $0xe98] sm:$0xf0]  ;;  %v14559_v43 = vld [vmem:[#allocation5 + $0x10d4] sm:$0xf] }
 0x33e   :  { %8465 = vmatpush.bf16.msra.mxu0 %v11082_v7  ;;  %v14485_v7 = vld [vmem:[#allocation5 + $0xe84] sm:$0xf]  ;;  %v11266_v5 = vor.u32 %v14487_v44, %v11263_v27  ;;  %v11551_v39 = vld [vmem:[#allocation5 + $0x10d8] sm:$0xf0]  ;;  %v11335_v44 = vld [vmem:[#allocation5 + $0xf28] sm:$0xf0] }
 0x33f   :  { %8478 = vmatpush.bf16.msra.mxu1 %v11146_v19  ;;  %v14527_v19 = vld [vmem:[#allocation5 + $0xfd4] sm:$0xf]  ;;  %v11258_v34 = vor.u32 %v14485_v7, %v11255_v25  ;;  %v11554_v56 = vor.u32 %v14559_v43, %v11551_v39  ;;  %v14537_v27 = vld [vmem:[#allocation5 + $0x1024] sm:$0xf]  ;;  %v11327_v25 = vld [vmem:[#allocation5 + $0xf18] sm:$0xf0] }
 0x340   :  { %8501 = vmatpush.bf16.msrb.mxu2 %v11298_v42  ;;  %v11431_v42 = vld [vmem:[#allocation5 + $0xfe8] sm:$0xf0]  ;;  %v14577_v43 = vld [vmem:[#allocation5 + $0x1164] sm:$0xf] }
 0x341   :  { %8491 = vmatpush.bf16.msra.mxu3 %v11210_v46  ;;  %v11434_v48 = vor.u32 %v14529_v21, %v11431_v42  ;;  %v11423_v46 = vld [vmem:[#allocation5 + $0xfd8] sm:$0xf0]  ;;  %v11463_v21 = vld [vmem:[#allocation5 + $0x1028] sm:$0xf0]  ;;  %v14557_v42 = vld [vmem:[#allocation5 + $0x10c4] sm:$0xf] }
 0x342   :  { %8466 = vmatpush.bf16.msra.mxu0 %v11074_v20  ;;  %v8250_v0 = vpop.f32.mrf.mxu2  ;;  %v11426_v20 = vor.u32 %v14527_v19, %v11423_v46  ;;  %v11466_v31 = vor.u32 %v14537_v27, %v11463_v21  ;;  %v14519_v19 = vld [vmem:[#allocation5 + $0xf94] sm:$0xf]  ;;  %v11391_v46 = vld [vmem:[#allocation5 + $0xf98] sm:$0xf0]  ;;  %v11623_v39 = vld [vmem:[#allocation5 + $0x1168] sm:$0xf0] }
 0x343   :  { %8479 = vmatpush.bf16.msra.mxu1 %v11138_v45  ;;  %v11479_v45 = vld [vmem:[#allocation5 + $0x1048] sm:$0xf0]  ;;  %v11535_v0 = vld [vmem:[#allocation5 + $0x10b8] sm:$0xf0]  ;;  %v14575_v27 = vld [vmem:[#allocation5 + $0x1154] sm:$0xf] }
 0x344   :  { %8502 = vmatpush.bf16.msrb.mxu2 %v11290_v18  ;;  %v11567_v18 = vld [vmem:[#allocation5 + $0x10f8] sm:$0xf0] }
 0x345   :  { %8492 = vmatpush.bf16.msra.mxu3 %v11202_v10  ;;  %v11570_v1 = vor.u32 %v14563_v50, %v11567_v18  ;;  %v11559_v10 = vld [vmem:[#allocation5 + $0x10e8] sm:$0xf0]  ;;  %v11455_v50 = vld [vmem:[#allocation5 + $0x1018] sm:$0xf0]  ;;  %v14555_v18 = vld [vmem:[#allocation5 + $0x10b4] sm:$0xf] }
 0x346   :  { %8467 = vmatpush.bf16.msra.mxu0 %v11066_v62  ;;  %v8261_v61 = vpop.f32.mrf.mxu0  ;;  %v11458_v55 = vor.u32 %v14535_v36, %v11455_v50  ;;  %v11538_v6 = vor.u32 %v14555_v18, %v11535_v0  ;;  %v11615_v21 = vld [vmem:[#allocation5 + $0x1158] sm:$0xf0]  ;;  %v14573_v18 = vld [vmem:[#allocation5 + $0x1144] sm:$0xf]  ;;  %v11607_v0 = vld [vmem:[#allocation5 + $0x1148] sm:$0xf0] }
 0x347   :  { %8480 = vmatpush.bf16.msra.mxu1 %v11130_v14  ;;  %v8262_v23 = vadd.f32 %v8261_v61, %v15839_v28  ;;  %v8274_v62 = vpop.f32.mrf.mxu1  ;;  %v14595_v61 = vld [vmem:[#allocation5 + $0x11f4] sm:$0xf]  ;;  %v11823_v36 = vld [vmem:[#allocation5 + $0x12f8] sm:$0xf0] }
 0x348   :  { %8503 = vmatpush.bf16.msrb.mxu2 %v11282_v63  ;;  %v14507_v63 = vld [vmem:[#allocation5 + $0xf34] sm:$0xf] }
 0x349   :  { %8493 = vmatpush.bf16.msra.mxu3 %v11194_v38  ;;  %8468 = vmatmul.bf16.vlgmr.msra.gmra.mxu0 %v15618_v4  ;;  %v11351_v4 = vld [vmem:[#allocation5 + $0xf48] sm:$0xf0]  ;;  %v8275_v14 = vadd.f32 %v8274_v62, %v8262_v23  ;;  %v11346_v38 = vor.u32 %v14507_v63, %v11343_v58  ;;  %v11695_v63 = vld [vmem:[#allocation5 + $0x11f8] sm:$0xf0]  ;;  %v14611_v58 = vld [vmem:[#allocation5 + $0x1274] sm:$0xf] }
 0x34a   :  { %8512 = vmatpush.bf16.msrb.mxu0 %v11378_v24  ;;  %8481 = vmatmul.bf16.vlgmr.msra.gmra.mxu1 %v15622_v11  ;;  %v14561_v11 = vld [vmem:[#allocation5 + $0x10e4] sm:$0xf]  ;;  %v11354_v35 = vor.u32 %v14509_v22, %v11351_v4  ;;  %v11471_v24 = vld [vmem:[#allocation5 + $0x1038] sm:$0xf0]  ;;  %v11394_v22 = vor.u32 %v14519_v19, %v11391_v46  ;;  %v11618_v19 = vor.u32 %v14575_v27, %v11615_v21  ;;  %v14627_v46 = vld [vmem:[#allocation5 + $0x12f4] sm:$0xf] }
 0x34b   :  { %8525 = vmatpush.bf16.msrb.mxu1 %v11442_v40  ;;  %v11562_v17 = vor.u32 %v14561_v11, %v11559_v10  ;;  %v14505_v40 = vld [vmem:[#allocation5 + $0xf24] sm:$0xf]  ;;  %v11474_v28 = vor.u32 %v14539_v29, %v11471_v24  ;;  %v11631_v11 = vld [vmem:[#allocation5 + $0x1178] sm:$0xf0]  ;;  %v11799_v27 = vld [vmem:[#allocation5 + $0x12c8] sm:$0xf0] }
 0x34c   :  { %8504 = vmatpush.bf16.msrb.mxu2 %v11274_v26  ;;  %8494 = vmatmul.bf16.vlgmr.msra.gmra.mxu3 %v15631_v12  ;;  %v14541_v12 = vld [vmem:[#allocation5 + $0x1044] sm:$0xf]  ;;  %v11410_v26 = vor.u32 %v14523_v33, %v11407_v16  ;;  %v11759_v23 = vld [vmem:[#allocation5 + $0x1278] sm:$0xf0] }
 0x34d   :  { %8538 = vmatpush.bf16.msrb.mxu3 %v11506_v47  ;;  %v11482_v60 = vor.u32 %v14541_v12, %v11479_v45  ;;  %v11399_v47 = vld [vmem:[#allocation5 + $0xfa8] sm:$0xf0]  ;;  %v14517_v4 = vld [vmem:[#allocation5 + $0xf84] sm:$0xf]  ;;  %v14579_v45 = vld [vmem:[#allocation5 + $0x1174] sm:$0xf] }
 0x34e   :  { %8513 = vmatpush.bf16.msrb.mxu0 %v11370_v49  ;;  %v11338_v49 = vor.u32 %v14505_v40, %v11335_v44  ;;  %v8263_v32 = vpop.f32.mrf.mxu0  ;;  %v11447_v12 = vld [vmem:[#allocation5 + $0x1008] sm:$0xf0]  ;;  %v14553_v10 = vld [vmem:[#allocation5 + $0x10a4] sm:$0xf]  ;;  %v11634_v33 = vor.u32 %v14579_v45, %v11631_v11  ;;  %v14571_v45 = vld [vmem:[#allocation5 + $0x1134] sm:$0xf] }
 0x34f   :  { %8526 = vmatpush.bf16.msrb.mxu1 %v11434_v48  ;;  %v8287_v30 = vpop.f32.mrf.mxu3  ;;  %v14503_v48 = vld [vmem:[#allocation5 + $0xf14] sm:$0xf]  ;;  %v8276_v15 = vpop.f32.mrf.mxu1  ;;  %v14593_v40 = vld [vmem:[#allocation5 + $0x11e4] sm:$0xf]  ;;  %v11687_v44 = vld [vmem:[#allocation5 + $0x11e8] sm:$0xf0] }
 0x350   :  { %8505 = vmatpush.bf16.msrb.mxu2 %v11266_v5  ;;  %v8288_v7 = vadd.f32 %v8287_v30, %v8275_v14  ;;  %v11402_v5 = vor.u32 %v14521_v13, %v11399_v47  ;;  %v11762_v14 = vor.u32 %v14611_v58, %v11759_v23  ;;  %v11626_v13 = vor.u32 %v14577_v43, %v11623_v39  ;;  %v14549_v30 = vld [vmem:[#allocation5 + $0x1084] sm:$0xf]  ;;  %v14607_v32 = vld [vmem:[#allocation5 + $0x1254] sm:$0xf]  ;;  %v11599_v11 = vld [vmem:[#allocation5 + $0x1138] sm:$0xf0] }
 0x351   :  { %8539 = vmatpush.bf16.msrb.mxu3 %v11498_v54  ;;  %v11546_v54 = vor.u32 %v14557_v42, %v11543_v59  ;;  %v11690_v42 = vor.u32 %v14593_v40, %v11687_v44  ;;  %v11807_v43 = vld [vmem:[#allocation5 + $0x12d8] sm:$0xf0]  ;;  %v14585_v40 = vld [vmem:[#allocation5 + $0x11a4] sm:$0xf]  ;;  %v11655_v44 = vld [vmem:[#allocation5 + $0x11a8] sm:$0xf0] }
 0x352   :  { %8514 = vmatpush.bf16.msrb.mxu0 %v11362_v37  ;;  %v11330_v37 = vor.u32 %v14503_v48, %v11327_v25  ;;  %v16006_v48 = vld [vmem:[#allocation26_spill] sm:$0xff]  ;;  %v11679_v25 = vld [vmem:[#allocation5 + $0x11d8] sm:$0xf0] }
 0x353   :  { %8527 = vmatpush.bf16.msrb.mxu1 %v11426_v20  ;;  %v11319_v20 = vld [vmem:[#allocation5 + $0xf08] sm:$0xf0] }
 0x354   :  { %8506 = vmatpush.bf16.msrb.mxu2 %v11258_v34  ;;  %v14501_v34 = vld [vmem:[#allocation5 + $0xf04] sm:$0xf] }
 0x355   :  { %8540 = vmatpush.bf16.msrb.mxu3 %v11490_v8  ;;  %v11383_v8 = vld [vmem:[#allocation5 + $0xf88] sm:$0xf0] }
 0x356   :  { %8515 = vmatpush.bf16.msrb.mxu0 %v11354_v35  ;;  %v11527_v35 = vld [vmem:[#allocation5 + $0x10a8] sm:$0xf0] }
 0x357   :  { %8507 = vmatmul.bf16.vlgmr.msrb.gmra.mxu2 %v16004_v57  ;;  %8528 = vmatpush.bf16.msrb.mxu1 %v11418_v41  ;;  %v11322_v41 = vor.u32 %v14501_v34, %v11319_v20  ;;  %v11530_v24 = vor.u32 %v14553_v10, %v11527_v35  ;;  %v11698_v57 = vor.u32 %v14595_v61, %v11695_v63  ;;  %v14589_v20 = vld [vmem:[#allocation5 + $0x11c4] sm:$0xf]  ;;  %v14587_v63 = vld [vmem:[#allocation5 + $0x11b4] sm:$0xf] }
 0x358   :  { %8551 = vmatpush.bf16.msra.mxu2 %v11570_v1  ;;  %v14533_v1 = vld [vmem:[#allocation5 + $0x1004] sm:$0xf] }
 0x359   :  { %8541 = vmatpush.bf16.msrb.mxu3 %v11482_v60  ;;  %v8289_v60 = vpop.f32.mrf.mxu3  ;;  %v11450_v29 = vor.u32 %v14533_v1, %v11447_v12  ;;  %v11735_v1 = vld [vmem:[#allocation5 + $0x1248] sm:$0xf0] }
 0x35a   :  { %8516 = vmatpush.bf16.msrb.mxu0 %v11346_v38  ;;  %v8300_v62 = vpop.f32.mrf.mxu2  ;;  %v14551_v38 = vld [vmem:[#allocation5 + $0x1094] sm:$0xf]  ;;  %v11815_v12 = vld [vmem:[#allocation5 + $0x12e8] sm:$0xf0]  ;;  %v11663_v60 = vld [vmem:[#allocation5 + $0x11b8] sm:$0xf0] }
 0x35b   :  { %8529 = vmatpush.bf16.msrb.mxu1 %v11410_v26  ;;  %v15846_v16 = vadd.f32 %v8300_v62, %v8288_v7  ;;  %v11519_v26 = vld [vmem:[#allocation5 + $0x1098] sm:$0xf0]  ;;  %v14591_v7 = vld [vmem:[#allocation5 + $0x11d4] sm:$0xf] }
 0x35c   :  { %8552 = vmatpush.bf16.msra.mxu2 %v11562_v17  ;;  %v11386_v17 = vor.u32 %v14517_v4, %v11383_v8  ;;  %v11522_v47 = vor.u32 %v14551_v38, %v11519_v26  ;;  %v11671_v4 = vld [vmem:[#allocation5 + $0x11c8] sm:$0xf0]  ;;  %v14605_v8 = vld [vmem:[#allocation5 + $0x1244] sm:$0xf]  ;;  %v14603_v62 = vld [vmem:[#allocation5 + $0x1234] sm:$0xf]  ;;  %v11666_v38 = vor.u32 %v14587_v63, %v11663_v60 }
 0x35d   :  { %8542 = vmatpush.bf16.msrb.mxu3 %v11474_v28  ;;  %v14609_v28 = vld [vmem:[#allocation5 + $0x1264] sm:$0xf]  ;;  %v11674_v35 = vor.u32 %v14589_v20, %v11671_v4  ;;  %v11738_v61 = vor.u32 %v14605_v8, %v11735_v1  ;;  %v11639_v20 = vld [vmem:[#allocation5 + $0x1188] sm:$0xf0]  ;;  %v11887_v4 = vld [vmem:[#allocation5 + $0x1378] sm:$0xf0] }
 0x35e   :  { %8517 = vmatpush.bf16.msrb.mxu0 %v11338_v49  ;;  %v11511_v49 = vld [vmem:[#allocation5 + $0x1088] sm:$0xf0]  ;;  %v14597_v1 = vld [vmem:[#allocation5 + $0x1204] sm:$0xf]  ;;  %v12015_v63 = vld [vmem:[#allocation5 + $0x1478] sm:$0xf0] }
 0x35f   :  { %8530 = vmatpush.bf16.msrb.mxu1 %v11402_v5  ;;  %v16005_v5 = vld [vmem:[#allocation24_spill] sm:$0xff]  ;;  %v11514_v50 = vor.u32 %v14549_v30, %v11511_v49  ;;  %v11658_v49 = vor.u32 %v14585_v40, %v11655_v44  ;;  %v12007_v40 = vld [vmem:[#allocation5 + $0x1468] sm:$0xf0]  ;;  %v14613_v44 = vld [vmem:[#allocation5 + $0x1284] sm:$0xf] }
 0x360   :  { %8553 = vmatpush.bf16.msra.mxu2 %v11554_v56  ;;  %v11751_v56 = vld [vmem:[#allocation5 + $0x1268] sm:$0xf0] }
 0x361   :  { %8543 = vmatpush.bf16.msrb.mxu3 %v11466_v31  ;;  %v11754_v59 = vor.u32 %v14609_v28, %v11751_v56  ;;  %v11743_v31 = vld [vmem:[#allocation5 + $0x1258] sm:$0xf0]  ;;  %v14601_v28 = vld [vmem:[#allocation5 + $0x1224] sm:$0xf]  ;;  %v11719_v56 = vld [vmem:[#allocation5 + $0x1228] sm:$0xf0] }
 0x362   :  { %8518 = vmatpush.bf16.msrb.mxu0 %v11330_v37  ;;  %v8302_v15 = vpop.f32.mrf.mxu2  ;;  %v11682_v37 = vor.u32 %v14591_v7, %v11679_v25  ;;  %v11746_v34 = vor.u32 %v14607_v32, %v11743_v31  ;;  %v11722_v7 = vor.u32 %v14601_v28, %v11719_v56  ;;  %v11647_v31 = vld [vmem:[#allocation5 + $0x1198] sm:$0xf0] }
 0x363   :  { %8531 = vmatpush.bf16.msrb.mxu1 %v11394_v22  ;;  %v11826_v22 = vor.u32 %v14627_v46, %v11823_v36  ;;  %v14619_v36 = vld [vmem:[#allocation5 + $0x12b4] sm:$0xf]  ;;  %v11791_v15 = vld [vmem:[#allocation5 + $0x12b8] sm:$0xf0] }
 0x364   :  { %8554 = vmatpush.bf16.msra.mxu2 %v11546_v54  ;;  %v16007_v54 = vld [vmem:[#allocation27_spill] sm:$0xff]  ;;  %v11794_v8 = vor.u32 %v14619_v36, %v11791_v15  ;;  %v14637_v36 = vld [vmem:[#allocation5 + $0x1344] sm:$0xf] }
 0x365   :  { %8544 = vmatpush.bf16.msrb.mxu3 %v11458_v55  ;;  %v11610_v55 = vor.u32 %v14573_v18, %v11607_v0  ;;  %v11575_v18 = vld [vmem:[#allocation5 + $0x1108] sm:$0xf0]  ;;  %v14581_v0 = vld [vmem:[#allocation5 + $0x1184] sm:$0xf] }
 0x366   :  { %8519 = vmatpush.bf16.msrb.mxu0 %v11322_v41  ;;  %v8313_v10 = vpop.f32.mrf.mxu0  ;;  %v11642_v60 = vor.u32 %v14581_v0, %v11639_v20  ;;  %v11863_v15 = vld [vmem:[#allocation5 + $0x1348] sm:$0xf0]  ;;  %v14653_v0 = vld [vmem:[#allocation5 + $0x13c4] sm:$0xf] }
 0x367   :  { %8532 = vmatpush.bf16.msrb.mxu1 %v11386_v17  ;;  %v8326_v41 = vpop.f32.mrf.mxu1  ;;  %v8314_v58 = vadd.f32 %v8313_v10, %v15846_v16  ;;  %v11727_v17 = vld [vmem:[#allocation5 + $0x1238] sm:$0xf0]  ;;  %v11991_v20 = vld [vmem:[#allocation5 + $0x1448] sm:$0xf0] }
 0x368   :  { %8555 = vmatpush.bf16.msra.mxu2 %v11538_v6  ;;  %v14625_v6 = vld [vmem:[#allocation5 + $0x12e4] sm:$0xf]  ;;  %v11730_v26 = vor.u32 %v14603_v62, %v11727_v17  ;;  %v11951_v10 = vld [vmem:[#allocation5 + $0x13f8] sm:$0xf0] }
 0x369   :  { %8545 = vmatpush.bf16.msrb.mxu3 %v11450_v29  ;;  %8520 = vmatmul.bf16.vlgmr.msrb.gmra.mxu0 %v16005_v5  ;;  %v11818_v23 = vor.u32 %v14625_v6, %v11815_v12  ;;  %v11602_v29 = vor.u32 %v14571_v45, %v11599_v11  ;;  %v8327_v39 = vadd.f32 %v8326_v41, %v8314_v58  ;;  %v14583_v5 = vld [vmem:[#allocation5 + $0x1194] sm:$0xf]  ;;  %v14617_v6 = vld [vmem:[#allocation5 + $0x12a4] sm:$0xf]  ;;  %v11783_v45 = vld [vmem:[#allocation5 + $0x12a8] sm:$0xf0] }
 0x36a   :  { %8564 = vmatpush.bf16.msra.mxu0 %v11634_v33  ;;  %8533 = vmatmul.bf16.vlgmr.msrb.gmra.mxu1 %v16006_v48  ;;  %v16008_v33 = vld [vmem:[#allocation29_spill] sm:$0xff]  ;;  %v14659_v11 = vld [vmem:[#allocation5 + $0x13f4] sm:$0xf]  ;;  %v11786_v17 = vor.u32 %v14617_v6, %v11783_v45 }
 0x36b   :  { %8577 = vmatpush.bf16.msra.mxu1 %v11698_v57  ;;  %v14569_v57 = vld [vmem:[#allocation5 + $0x1124] sm:$0xf]  ;;  %v14675_v41 = vld [vmem:[#allocation5 + $0x1474] sm:$0xf] }
 0x36c   :  { %8556 = vmatpush.bf16.msra.mxu2 %v11530_v24  ;;  %8546 = vmatmul.bf16.vlgmr.msrb.gmra.mxu3 %v16007_v54  ;;  %v14623_v24 = vld [vmem:[#allocation5 + $0x12d4] sm:$0xf] }
 0x36d   :  { %8590 = vmatpush.bf16.msra.mxu3 %v11762_v14  ;;  %v11591_v14 = vld [vmem:[#allocation5 + $0x1128] sm:$0xf0]  ;;  %v11810_v16 = vor.u32 %v14623_v24, %v11807_v43  ;;  %v14599_v54 = vld [vmem:[#allocation5 + $0x1214] sm:$0xf]  ;;  %v14641_v24 = vld [vmem:[#allocation5 + $0x1364] sm:$0xf] }
 0x36e   :  { %8565 = vmatpush.bf16.msra.mxu0 %v11626_v13  ;;  %v11594_v13 = vor.u32 %v14569_v57, %v11591_v14  ;;  %v8315_v48 = vpop.f32.mrf.mxu0  ;;  %v11879_v43 = vld [vmem:[#allocation5 + $0x1368] sm:$0xf0]  ;;  %v11775_v57 = vld [vmem:[#allocation5 + $0x1298] sm:$0xf0]  ;;  %v14657_v14 = vld [vmem:[#allocation5 + $0x13e4] sm:$0xf] }
 0x36f   :  { %8578 = vmatpush.bf16.msra.mxu1 %v11690_v42  ;;  %v8339_v21 = vpop.f32.mrf.mxu3  ;;  %v14567_v42 = vld [vmem:[#allocation5 + $0x1114] sm:$0xf]  ;;  %v8328_v25 = vpop.f32.mrf.mxu1  ;;  %v11999_v48 = vld [vmem:[#allocation5 + $0x1458] sm:$0xf0] }
 0x370   :  { %8557 = vmatpush.bf16.msra.mxu2 %v11522_v47  ;;  %v14621_v47 = vld [vmem:[#allocation5 + $0x12c4] sm:$0xf]  ;;  %v8340_v30 = vadd.f32 %v8339_v21, %v8327_v39  ;;  %v12018_v39 = vor.u32 %v14675_v41, %v12015_v63  ;;  %v16009_v21 = vld [vmem:[#allocation28_spill] sm:$0xff]  ;;  %v11919_v41 = vld [vmem:[#allocation5 + $0x13b8] sm:$0xf0] }
 0x371   :  { %8591 = vmatpush.bf16.msra.mxu3 %v11754_v59  ;;  %v11583_v59 = vld [vmem:[#allocation5 + $0x1118] sm:$0xf0]  ;;  %v11802_v32 = vor.u32 %v14621_v47, %v11799_v27  ;;  %v14639_v47 = vld [vmem:[#allocation5 + $0x1354] sm:$0xf] }
 0x372   :  { %8566 = vmatpush.bf16.msra.mxu0 %v11618_v19  ;;  %v11711_v19 = vld [vmem:[#allocation5 + $0x1218] sm:$0xf0]  ;;  %v11586_v46 = vor.u32 %v14567_v42, %v11583_v59  ;;  %v14655_v59 = vld [vmem:[#allocation5 + $0x13d4] sm:$0xf] }
 0x373   :  { %8579 = vmatpush.bf16.msra.mxu1 %v11682_v37  ;;  %v11650_v37 = vor.u32 %v14583_v5, %v11647_v31  ;;  %v11871_v27 = vld [vmem:[#allocation5 + $0x1358] sm:$0xf0]  ;;  %v16011_v5 = vld [vmem:[#allocation30_spill] sm:$0xff]  ;;  %v14691_v25 = vld [vmem:[#allocation5 + $0x14f4] sm:$0xf] }
 0x374   :  { %8558 = vmatpush.bf16.msra.mxu2 %v11514_v50  ;;  %v14565_v50 = vld [vmem:[#allocation5 + $0x1104] sm:$0xf]  ;;  %v14635_v6 = vld [vmem:[#allocation5 + $0x1334] sm:$0xf] }
 0x375   :  { %8592 = vmatpush.bf16.msra.mxu3 %v11746_v34  ;;  %v11714_v34 = vor.u32 %v14599_v54, %v11711_v19  ;;  %v11578_v12 = vor.u32 %v14565_v50, %v11575_v18  ;;  %v11874_v54 = vor.u32 %v14639_v47, %v11871_v27  ;;  %v14667_v63 = vld [vmem:[#allocation5 + $0x1434] sm:$0xf] }
 0x376   :  { %8567 = vmatpush.bf16.msra.mxu0 %v11610_v55  ;;  %v11703_v55 = vld [vmem:[#allocation5 + $0x1208] sm:$0xf0]  ;;  %v14631_v27 = vld [vmem:[#allocation5 + $0x1314] sm:$0xf] }
 0x377   :  { %8559 = vmatmul.bf16.vlgmr.msra.gmra.mxu2 %v16008_v33  ;;  %8580 = vmatpush.bf16.msra.mxu1 %v11674_v35  ;;  %v8341_v58 = vpop.f32.mrf.mxu3  ;;  %v11706_v62 = vor.u32 %v14597_v1, %v11703_v55  ;;  %v11954_v33 = vor.u32 %v14659_v11, %v11951_v10 }
 0x378   :  { %8603 = vmatpush.bf16.msrb.mxu2 %v11826_v22  ;;  %v14643_v22 = vld [vmem:[#allocation5 + $0x1374] sm:$0xf]  ;;  %v11983_v58 = vld [vmem:[#allocation5 + $0x1438] sm:$0xf0] }
 0x379   :  { %8593 = vmatpush.bf16.msra.mxu3 %v11738_v61  ;;  %v11890_v61 = vor.u32 %v14643_v22, %v11887_v4  ;;  %v14689_v22 = vld [vmem:[#allocation5 + $0x14e4] sm:$0xf]  ;;  %v12071_v4 = vld [vmem:[#allocation5 + $0x14e8] sm:$0xf0] }
 0x37a   :  { %8568 = vmatpush.bf16.msra.mxu0 %v11602_v29  ;;  %v8352_v35 = vpop.f32.mrf.mxu2  ;;  %v14615_v29 = vld [vmem:[#allocation5 + $0x1294] sm:$0xf] }
 0x37b   :  { %8581 = vmatpush.bf16.msra.mxu1 %v11666_v38  ;;  %v11943_v38 = vld [vmem:[#allocation5 + $0x13e8] sm:$0xf0]  ;;  %v11778_v28 = vor.u32 %v14615_v29, %v11775_v57 }
 0x37c   :  { %8604 = vmatpush.bf16.msrb.mxu2 %v11818_v23  ;;  %v15853_v23 = vadd.f32 %v8352_v35, %v8340_v30  ;;  %v11946_v56 = vor.u32 %v14657_v14, %v11943_v38  ;;  %v11935_v30 = vld [vmem:[#allocation5 + $0x13d8] sm:$0xf0]  ;;  %v12074_v35 = vor.u32 %v14689_v22, %v12071_v4  ;;  %v14649_v14 = vld [vmem:[#allocation5 + $0x13a4] sm:$0xf]  ;;  %v11911_v38 = vld [vmem:[#allocation5 + $0x13a8] sm:$0xf0] }
 0x37d   :  { %8594 = vmatpush.bf16.msra.mxu3 %v11730_v26  ;;  %v14673_v26 = vld [vmem:[#allocation5 + $0x1464] sm:$0xf]  ;;  %v11914_v47 = vor.u32 %v14649_v14, %v11911_v38  ;;  %v12143_v22 = vld [vmem:[#allocation5 + $0x1578] sm:$0xf0] }
 0x37e   :  { %8569 = vmatpush.bf16.msra.mxu0 %v11594_v13  ;;  %v11767_v13 = vld [vmem:[#allocation5 + $0x1288] sm:$0xf0]  ;;  %v12010_v42 = vor.u32 %v14673_v26, %v12007_v40  ;;  %v14665_v26 = vld [vmem:[#allocation5 + $0x1424] sm:$0xf] }
 0x37f   :  { %8582 = vmatpush.bf16.msra.mxu1 %v11658_v49  ;;  %v14671_v49 = vld [vmem:[#allocation5 + $0x1454] sm:$0xf]  ;;  %v11770_v19 = vor.u32 %v14613_v44, %v11767_v13  ;;  %v11975_v40 = vld [vmem:[#allocation5 + $0x1428] sm:$0xf0]  ;;  %v14681_v4 = vld [vmem:[#allocation5 + $0x14a4] sm:$0xf] }
 0x380   :  { %8605 = vmatpush.bf16.msrb.mxu2 %v11810_v16  ;;  %v11882_v16 = vor.u32 %v14641_v24, %v11879_v43  ;;  %v12002_v50 = vor.u32 %v14671_v49, %v11999_v48  ;;  %v14633_v43 = vld [vmem:[#allocation5 + $0x1324] sm:$0xf]  ;;  %v12055_v44 = vld [vmem:[#allocation5 + $0x14c8] sm:$0xf0]  ;;  %v14647_v49 = vld [vmem:[#allocation5 + $0x1394] sm:$0xf] }
 0x381   :  { %8595 = vmatpush.bf16.msra.mxu3 %v11722_v7  ;;  %v16010_v7 = vld [vmem:[#allocation31_spill] sm:$0xff] }
 0x382   :  { %8570 = vmatpush.bf16.msra.mxu0 %v11586_v46  ;;  %v8354_v31 = vpop.f32.mrf.mxu2  ;;  %v11938_v46 = vor.u32 %v14655_v59, %v11935_v30  ;;  %v11978_v59 = vor.u32 %v14665_v26, %v11975_v40  ;;  %v14703_v26 = vld [vmem:[#allocation5 + $0x1554] sm:$0xf]  ;;  %v12127_v40 = vld [vmem:[#allocation5 + $0x1558] sm:$0xf0] }
 0x383   :  { %8583 = vmatpush.bf16.msra.mxu1 %v11650_v37  ;;  %v11927_v37 = vld [vmem:[#allocation5 + $0x13c8] sm:$0xf0]  ;;  %v12047_v31 = vld [vmem:[#allocation5 + $0x14b8] sm:$0xf0] }
 0x384   :  { %8606 = vmatpush.bf16.msrb.mxu2 %v11802_v32  ;;  %v12079_v32 = vld [vmem:[#allocation5 + $0x14f8] sm:$0xf0]  ;;  %v11930_v55 = vor.u32 %v14653_v0, %v11927_v37 }
 0x385   :  { %8596 = vmatpush.bf16.msra.mxu3 %v11714_v34  ;;  %v12082_v18 = vor.u32 %v14691_v25, %v12079_v32  ;;  %v14669_v34 = vld [vmem:[#allocation5 + $0x1444] sm:$0xf]  ;;  %v11967_v25 = vld [vmem:[#allocation5 + $0x1418] sm:$0xf0]  ;;  %v14683_v32 = vld [vmem:[#allocation5 + $0x14b4] sm:$0xf] }
 0x386   :  { %8571 = vmatpush.bf16.msra.mxu0 %v11578_v12  ;;  %v8365_v1 = vpop.f32.mrf.mxu0  ;;  %v11855_v12 = vld [vmem:[#allocation5 + $0x1338] sm:$0xf0]  ;;  %v11994_v11 = vor.u32 %v14669_v34, %v11991_v20  ;;  %v12050_v37 = vor.u32 %v14683_v32, %v12047_v31  ;;  %v11959_v34 = vld [vmem:[#allocation5 + $0x1408] sm:$0xf0]  ;;  %v14707_v20 = vld [vmem:[#allocation5 + $0x1574] sm:$0xf] }
 0x387   :  { %8584 = vmatpush.bf16.msra.mxu1 %v11642_v60  ;;  %v8366_v45 = vadd.f32 %v8365_v1, %v15853_v23  ;;  %v8378_v10 = vpop.f32.mrf.mxu1  ;;  %v14687_v60 = vld [vmem:[#allocation5 + $0x14d4] sm:$0xf]  ;;  %v11858_v29 = vor.u32 %v14635_v6, %v11855_v12  ;;  %v11986_v23 = vor.u32 %v14667_v63, %v11983_v58  ;;  %v12207_v6 = vld [vmem:[#allocation5 + $0x15f8] sm:$0xf0]  ;;  %v14701_v32 = vld [vmem:[#allocation5 + $0x1544] sm:$0xf] }
 0x388   :  { %8607 = vmatpush.bf16.msrb.mxu2 %v11794_v8  ;;  %v11866_v8 = vor.u32 %v14637_v36, %v11863_v15  ;;  %v14645_v15 = vld [vmem:[#allocation5 + $0x1384] sm:$0xf]  ;;  %v14723_v1 = vld [vmem:[#allocation5 + $0x15f4] sm:$0xf]  ;;  %v12119_v31 = vld [vmem:[#allocation5 + $0x1548] sm:$0xf0] }
 0x389   :  { %8597 = vmatpush.bf16.msra.mxu3 %v11706_v62  ;;  %8572 = vmatmul.bf16.vlgmr.msra.gmra.mxu0 %v16009_v21  ;;  %v12063_v62 = vld [vmem:[#allocation5 + $0x14d8] sm:$0xf0]  ;;  %v14739_v12 = vld [vmem:[#allocation5 + $0x1674] sm:$0xf] }
 0x38a   :  { %8616 = vmatpush.bf16.msrb.mxu0 %v11890_v61  ;;  %8585 = vmatmul.bf16.vlgmr.msra.gmra.mxu1 %v16011_v5  ;;  %v14651_v61 = vld [vmem:[#allocation5 + $0x13b4] sm:$0xf]  ;;  %v12066_v57 = vor.u32 %v14687_v60, %v12063_v62  ;;  %v11839_v21 = vld [vmem:[#allocation5 + $0x1318] sm:$0xf0]  ;;  %v14705_v60 = vld [vmem:[#allocation5 + $0x1564] sm:$0xf] }
 0x38b   :  { %8629 = vmatpush.bf16.msrb.mxu1 %v11954_v33  ;;  %v8379_v33 = vadd.f32 %v8378_v10, %v8366_v45  ;;  %v11922_v24 = vor.u32 %v14651_v61, %v11919_v41  ;;  %v14663_v5 = vld [vmem:[#allocation5 + $0x1414] sm:$0xf]  ;;  %v12271_v45 = vld [vmem:[#allocation5 + $0x1678] sm:$0xf0]  ;;  %v12146_v61 = vor.u32 %v14707_v20, %v12143_v22  ;;  %v12135_v62 = vld [vmem:[#allocation5 + $0x1568] sm:$0xf0] }
 0x38c   :  { %8608 = vmatpush.bf16.msrb.mxu2 %v11786_v17  ;;  %8598 = vmatmul.bf16.vlgmr.msra.gmra.mxu3 %v16010_v7  ;;  %v16012_v17 = vld [vmem:[#allocation33_spill] sm:$0xff]  ;;  %v11970_v0 = vor.u32 %v14663_v5, %v11967_v25  ;;  %v12138_v14 = vor.u32 %v14705_v60, %v12135_v62  ;;  %v14699_v20 = vld [vmem:[#allocation5 + $0x1534] sm:$0xf] }
 0x38d   :  { %8642 = vmatpush.bf16.msrb.mxu3 %v12018_v39  ;;  %v11847_v39 = vld [vmem:[#allocation5 + $0x1328] sm:$0xf0]  ;;  %v11903_v7 = vld [vmem:[#allocation5 + $0x1398] sm:$0xf0] }
 0x38e   :  { %8617 = vmatpush.bf16.msrb.mxu0 %v11882_v16  ;;  %v14685_v16 = vld [vmem:[#allocation5 + $0x14c4] sm:$0xf]  ;;  %v11906_v36 = vor.u32 %v14647_v49, %v11903_v7  ;;  %v12130_v49 = vor.u32 %v14703_v26, %v12127_v40  ;;  %v14755_v7 = vld [vmem:[#allocation5 + $0x16f4] sm:$0xf]  ;;  %v12335_v5 = vld [vmem:[#allocation5 + $0x16f8] sm:$0xf0] }
 0x38f   :  { %8630 = vmatpush.bf16.msrb.mxu1 %v11946_v56  ;;  %v11850_v56 = vor.u32 %v14633_v43, %v11847_v39  ;;  %v12058_v30 = vor.u32 %v14685_v16, %v12055_v44  ;;  %v8380_v48 = vpop.f32.mrf.mxu1  ;;  %v14721_v43 = vld [vmem:[#allocation5 + $0x15e4] sm:$0xf]  ;;  %v12199_v39 = vld [vmem:[#allocation5 + $0x15e8] sm:$0xf0]  ;;  %v12111_v22 = vld [vmem:[#allocation5 + $0x1538] sm:$0xf0] }
 0x390   :  { %8609 = vmatpush.bf16.msrb.mxu2 %v11778_v28  ;;  %v8391_v28 = vpop.f32.mrf.mxu3  ;;  %v12202_v16 = vor.u32 %v14721_v43, %v12199_v39  ;;  %v12319_v60 = vld [vmem:[#allocation5 + $0x16d8] sm:$0xf0]  ;;  %v14713_v43 = vld [vmem:[#allocation5 + $0x15a4] sm:$0xf]  ;;  %v12167_v39 = vld [vmem:[#allocation5 + $0x15a8] sm:$0xf0] }
 0x391   :  { %8643 = vmatpush.bf16.msrb.mxu3 %v12010_v42  ;;  %v8392_v13 = vadd.f32 %v8391_v28, %v8379_v33  ;;  %v8367_v42 = vpop.f32.mrf.mxu0  ;;  %v12274_v33 = vor.u32 %v14739_v12, %v12271_v45  ;;  %v14677_v28 = vld [vmem:[#allocation5 + $0x1484] sm:$0xf]  ;;  %v12311_v26 = vld [vmem:[#allocation5 + $0x16c8] sm:$0xf0] }
 0x392   :  { %8618 = vmatpush.bf16.msrb.mxu0 %v11874_v54  ;;  %v11842_v54 = vor.u32 %v14631_v27, %v11839_v21  ;;  %v16014_v27 = vld [vmem:[#allocation34_spill] sm:$0xff]  ;;  %v12191_v21 = vld [vmem:[#allocation5 + $0x15d8] sm:$0xf0]  ;;  %v14735_v42 = vld [vmem:[#allocation5 + $0x1654] sm:$0xf] }
 0x393   :  { %8631 = vmatpush.bf16.msrb.mxu1 %v11938_v46  ;;  %v11831_v46 = vld [vmem:[#allocation5 + $0x1308] sm:$0xf0] }
 0x394   :  { %8610 = vmatpush.bf16.msrb.mxu2 %v11770_v19  ;;  %v14629_v19 = vld [vmem:[#allocation5 + $0x1304] sm:$0xf] }
 0x395   :  { %8644 = vmatpush.bf16.msrb.mxu3 %v12002_v50  ;;  %v11895_v50 = vld [vmem:[#allocation5 + $0x1388] sm:$0xf0] }
 0x396   :  { %8619 = vmatpush.bf16.msrb.mxu0 %v11866_v8  ;;  %v12039_v8 = vld [vmem:[#allocation5 + $0x14a8] sm:$0xf0] }
 0x397   :  { %8611 = vmatmul.bf16.vlgmr.msrb.gmra.mxu2 %v16012_v17  ;;  %8632 = vmatpush.bf16.msrb.mxu1 %v11930_v55  ;;  %v11834_v55 = vor.u32 %v14629_v19, %v11831_v46  ;;  %v12042_v58 = vor.u32 %v14681_v4, %v12039_v8  ;;  %v12210_v17 = vor.u32 %v14723_v1, %v12207_v6  ;;  %v14717_v46 = vld [vmem:[#allocation5 + $0x15c4] sm:$0xf]  ;;  %v14715_v6 = vld [vmem:[#allocation5 + $0x15b4] sm:$0xf] }
 0x398   :  { %8655 = vmatpush.bf16.msra.mxu2 %v12082_v18  ;;  %v14661_v18 = vld [vmem:[#allocation5 + $0x1404] sm:$0xf] }
 0x399   :  { %8645 = vmatpush.bf16.msrb.mxu3 %v11994_v11  ;;  %v8393_v11 = vpop.f32.mrf.mxu3  ;;  %v11962_v63 = vor.u32 %v14661_v18, %v11959_v34  ;;  %v12247_v18 = vld [vmem:[#allocation5 + $0x1648] sm:$0xf0] }
 0x39a   :  { %8620 = vmatpush.bf16.msrb.mxu0 %v11858_v29  ;;  %v8404_v10 = vpop.f32.mrf.mxu2  ;;  %v14679_v29 = vld [vmem:[#allocation5 + $0x1494] sm:$0xf]  ;;  %v12327_v34 = vld [vmem:[#allocation5 + $0x16e8] sm:$0xf0]  ;;  %v12175_v11 = vld [vmem:[#allocation5 + $0x15b8] sm:$0xf0] }
 0x39b   :  { %8633 = vmatpush.bf16.msrb.mxu1 %v11922_v24  ;;  %v15860_v41 = vadd.f32 %v8404_v10, %v8392_v13  ;;  %v12031_v24 = vld [vmem:[#allocation5 + $0x1498] sm:$0xf0]  ;;  %v14719_v13 = vld [vmem:[#allocation5 + $0x15d4] sm:$0xf] }
 0x39c   :  { %8656 = vmatpush.bf16.msra.mxu2 %v12074_v35  ;;  %v11898_v35 = vor.u32 %v14645_v15, %v11895_v50  ;;  %v12034_v38 = vor.u32 %v14679_v29, %v12031_v24  ;;  %v12183_v15 = vld [vmem:[#allocation5 + $0x15c8] sm:$0xf0]  ;;  %v14733_v50 = vld [vmem:[#allocation5 + $0x1644] sm:$0xf]  ;;  %v14731_v10 = vld [vmem:[#allocation5 + $0x1634] sm:$0xf]  ;;  %v12178_v29 = vor.u32 %v14715_v6, %v12175_v11 }
 0x39d   :  { %8646 = vmatpush.bf16.msrb.mxu3 %v11986_v23  ;;  %v14737_v23 = vld [vmem:[#allocation5 + $0x1664] sm:$0xf]  ;;  %v12186_v8 = vor.u32 %v14717_v46, %v12183_v15  ;;  %v12250_v1 = vor.u32 %v14733_v50, %v12247_v18  ;;  %v12151_v46 = vld [vmem:[#allocation5 + $0x1588] sm:$0xf0]  ;;  %v12399_v15 = vld [vmem:[#allocation5 + $0x1778] sm:$0xf0] }
 0x39e   :  { %8621 = vmatpush.bf16.msrb.mxu0 %v11850_v56  ;;  %v12023_v56 = vld [vmem:[#allocation5 + $0x1488] sm:$0xf0]  ;;  %v14725_v18 = vld [vmem:[#allocation5 + $0x1604] sm:$0xf]  ;;  %v12527_v6 = vld [vmem:[#allocation5 + $0x1878] sm:$0xf0] }
 0x39f   :  { %8634 = vmatpush.bf16.msrb.mxu1 %v11914_v47  ;;  %v16013_v47 = vld [vmem:[#allocation32_spill] sm:$0xff]  ;;  %v12026_v25 = vor.u32 %v14677_v28, %v12023_v56  ;;  %v12170_v56 = vor.u32 %v14713_v43, %v12167_v39  ;;  %v12519_v43 = vld [vmem:[#allocation5 + $0x1868] sm:$0xf0]  ;;  %v14741_v39 = vld [vmem:[#allocation5 + $0x1684] sm:$0xf] }
 0x3a0   :  { %8657 = vmatpush.bf16.msra.mxu2 %v12066_v57  ;;  %v12263_v57 = vld [vmem:[#allocation5 + $0x1668] sm:$0xf0] }
 0x3a1   :  { %8647 = vmatpush.bf16.msrb.mxu3 %v11978_v59  ;;  %v12266_v44 = vor.u32 %v14737_v23, %v12263_v57  ;;  %v12255_v59 = vld [vmem:[#allocation5 + $0x1658] sm:$0xf0]  ;;  %v14729_v23 = vld [vmem:[#allocation5 + $0x1624] sm:$0xf]  ;;  %v12231_v57 = vld [vmem:[#allocation5 + $0x1628] sm:$0xf0] }
 0x3a2   :  { %8622 = vmatpush.bf16.msrb.mxu0 %v11842_v54  ;;  %v8406_v48 = vpop.f32.mrf.mxu2  ;;  %v12194_v54 = vor.u32 %v14719_v13, %v12191_v21  ;;  %v12258_v19 = vor.u32 %v14735_v42, %v12255_v59  ;;  %v12234_v13 = vor.u32 %v14729_v23, %v12231_v57  ;;  %v12159_v59 = vld [vmem:[#allocation5 + $0x1598] sm:$0xf0] }
 0x3a3   :  { %8635 = vmatpush.bf16.msrb.mxu1 %v11906_v36  ;;  %v12338_v36 = vor.u32 %v14755_v7, %v12335_v5  ;;  %v14747_v5 = vld [vmem:[#allocation5 + $0x16b4] sm:$0xf]  ;;  %v12303_v48 = vld [vmem:[#allocation5 + $0x16b8] sm:$0xf0] }
 0x3a4   :  { %8658 = vmatpush.bf16.msra.mxu2 %v12058_v30  ;;  %v16015_v30 = vld [vmem:[#allocation35_spill] sm:$0xff]  ;;  %v12306_v50 = vor.u32 %v14747_v5, %v12303_v48  ;;  %v14765_v5 = vld [vmem:[#allocation5 + $0x1744] sm:$0xf] }
 0x3a5   :  { %8648 = vmatpush.bf16.msrb.mxu3 %v11970_v0  ;;  %v12122_v0 = vor.u32 %v14701_v32, %v12119_v31  ;;  %v12087_v32 = vld [vmem:[#allocation5 + $0x1508] sm:$0xf0]  ;;  %v14709_v31 = vld [vmem:[#allocation5 + $0x1584] sm:$0xf] }
 0x3a6   :  { %8623 = vmatpush.bf16.msrb.mxu0 %v11834_v55  ;;  %v8417_v4 = vpop.f32.mrf.mxu0  ;;  %v12154_v11 = vor.u32 %v14709_v31, %v12151_v46  ;;  %v12375_v48 = vld [vmem:[#allocation5 + $0x1748] sm:$0xf0]  ;;  %v14781_v31 = vld [vmem:[#allocation5 + $0x17c4] sm:$0xf] }
 0x3a7   :  { %8636 = vmatpush.bf16.msrb.mxu1 %v11898_v35  ;;  %v8430_v55 = vpop.f32.mrf.mxu1  ;;  %v8418_v12 = vadd.f32 %v8417_v4, %v15860_v41  ;;  %v12239_v35 = vld [vmem:[#allocation5 + $0x1638] sm:$0xf0]  ;;  %v12503_v46 = vld [vmem:[#allocation5 + $0x1848] sm:$0xf0] }
 0x3a8   :  { %8659 = vmatpush.bf16.msra.mxu2 %v12050_v37  ;;  %v14753_v37 = vld [vmem:[#allocation5 + $0x16e4] sm:$0xf]  ;;  %v12242_v24 = vor.u32 %v14731_v10, %v12239_v35  ;;  %v12463_v4 = vld [vmem:[#allocation5 + $0x17f8] sm:$0xf0] }
 0x3a9   :  { %8649 = vmatpush.bf16.msrb.mxu3 %v11962_v63  ;;  %8624 = vmatmul.bf16.vlgmr.msrb.gmra.mxu0 %v16013_v47  ;;  %v12330_v45 = vor.u32 %v14753_v37, %v12327_v34  ;;  %v12114_v63 = vor.u32 %v14699_v20, %v12111_v22  ;;  %v8431_v62 = vadd.f32 %v8430_v55, %v8418_v12  ;;  %v14711_v47 = vld [vmem:[#allocation5 + $0x1594] sm:$0xf]  ;;  %v14745_v37 = vld [vmem:[#allocation5 + $0x16a4] sm:$0xf]  ;;  %v12295_v20 = vld [vmem:[#allocation5 + $0x16a8] sm:$0xf0] }
 0x3aa   :  { %8668 = vmatpush.bf16.msra.mxu0 %v12146_v61  ;;  %8637 = vmatmul.bf16.vlgmr.msrb.gmra.mxu1 %v16014_v27  ;;  %v16016_v61 = vld [vmem:[#allocation37_spill] sm:$0xff]  ;;  %v14787_v22 = vld [vmem:[#allocation5 + $0x17f4] sm:$0xf]  ;;  %v12298_v35 = vor.u32 %v14745_v37, %v12295_v20 }
 0x3ab   :  { %8681 = vmatpush.bf16.msra.mxu1 %v12210_v17  ;;  %v14697_v17 = vld [vmem:[#allocation5 + $0x1524] sm:$0xf]  ;;  %v14803_v55 = vld [vmem:[#allocation5 + $0x1874] sm:$0xf] }
 0x3ac   :  { %8660 = vmatpush.bf16.msra.mxu2 %v12042_v58  ;;  %8650 = vmatmul.bf16.vlgmr.msrb.gmra.mxu3 %v16015_v30  ;;  %v14751_v58 = vld [vmem:[#allocation5 + $0x16d4] sm:$0xf] }
 0x3ad   :  { %8694 = vmatpush.bf16.msra.mxu3 %v12274_v33  ;;  %v12103_v33 = vld [vmem:[#allocation5 + $0x1528] sm:$0xf0]  ;;  %v12322_v41 = vor.u32 %v14751_v58, %v12319_v60  ;;  %v14727_v30 = vld [vmem:[#allocation5 + $0x1614] sm:$0xf]  ;;  %v14769_v58 = vld [vmem:[#allocation5 + $0x1764] sm:$0xf] }
 0x3ae   :  { %8669 = vmatpush.bf16.msra.mxu0 %v12138_v14  ;;  %v12106_v14 = vor.u32 %v14697_v17, %v12103_v33  ;;  %v8419_v27 = vpop.f32.mrf.mxu0  ;;  %v12391_v60 = vld [vmem:[#allocation5 + $0x1768] sm:$0xf0]  ;;  %v12287_v17 = vld [vmem:[#allocation5 + $0x1698] sm:$0xf0]  ;;  %v14785_v33 = vld [vmem:[#allocation5 + $0x17e4] sm:$0xf] }
 0x3af   :  { %8682 = vmatpush.bf16.msra.mxu1 %v12202_v16  ;;  %v8443_v40 = vpop.f32.mrf.mxu3  ;;  %v14695_v16 = vld [vmem:[#allocation5 + $0x1514] sm:$0xf]  ;;  %v8432_v21 = vpop.f32.mrf.mxu1  ;;  %v12511_v27 = vld [vmem:[#allocation5 + $0x1858] sm:$0xf0] }
 0x3b0   :  { %8661 = vmatpush.bf16.msra.mxu2 %v12034_v38  ;;  %v14749_v38 = vld [vmem:[#allocation5 + $0x16c4] sm:$0xf]  ;;  %v8444_v28 = vadd.f32 %v8443_v40, %v8431_v62  ;;  %v12530_v62 = vor.u32 %v14803_v55, %v12527_v6  ;;  %v16017_v40 = vld [vmem:[#allocation36_spill] sm:$0xff]  ;;  %v12431_v55 = vld [vmem:[#allocation5 + $0x17b8] sm:$0xf0] }
 0x3b1   :  { %8695 = vmatpush.bf16.msra.mxu3 %v12266_v44  ;;  %v12095_v44 = vld [vmem:[#allocation5 + $0x1518] sm:$0xf0]  ;;  %v12314_v42 = vor.u32 %v14749_v38, %v12311_v26  ;;  %v14767_v38 = vld [vmem:[#allocation5 + $0x1754] sm:$0xf] }
 0x3b2   :  { %8670 = vmatpush.bf16.msra.mxu0 %v12130_v49  ;;  %v12223_v49 = vld [vmem:[#allocation5 + $0x1618] sm:$0xf0]  ;;  %v12098_v7 = vor.u32 %v14695_v16, %v12095_v44  ;;  %v14783_v44 = vld [vmem:[#allocation5 + $0x17d4] sm:$0xf] }
 0x3b3   :  { %8683 = vmatpush.bf16.msra.mxu1 %v12194_v54  ;;  %v12162_v54 = vor.u32 %v14711_v47, %v12159_v59  ;;  %v12383_v26 = vld [vmem:[#allocation5 + $0x1758] sm:$0xf0]  ;;  %v16019_v47 = vld [vmem:[#allocation38_spill] sm:$0xff]  ;;  %v14819_v21 = vld [vmem:[#allocation5 + $0x18f4] sm:$0xf] }
 0x3b4   :  { %8662 = vmatpush.bf16.msra.mxu2 %v12026_v25  ;;  %v14693_v25 = vld [vmem:[#allocation5 + $0x1504] sm:$0xf]  ;;  %v14763_v37 = vld [vmem:[#allocation5 + $0x1734] sm:$0xf] }
 0x3b5   :  { %8696 = vmatpush.bf16.msra.mxu3 %v12258_v19  ;;  %v12226_v19 = vor.u32 %v14727_v30, %v12223_v49  ;;  %v12090_v34 = vor.u32 %v14693_v25, %v12087_v32  ;;  %v12386_v30 = vor.u32 %v14767_v38, %v12383_v26  ;;  %v14795_v6 = vld [vmem:[#allocation5 + $0x1834] sm:$0xf] }
 0x3b6   :  { %8671 = vmatpush.bf16.msra.mxu0 %v12122_v0  ;;  %v12215_v0 = vld [vmem:[#allocation5 + $0x1608] sm:$0xf0]  ;;  %v14759_v26 = vld [vmem:[#allocation5 + $0x1714] sm:$0xf] }
 0x3b7   :  { %8663 = vmatmul.bf16.vlgmr.msra.gmra.mxu2 %v16016_v61  ;;  %8684 = vmatpush.bf16.msra.mxu1 %v12186_v8  ;;  %v8445_v12 = vpop.f32.mrf.mxu3  ;;  %v12218_v10 = vor.u32 %v14725_v18, %v12215_v0  ;;  %v12466_v61 = vor.u32 %v14787_v22, %v12463_v4 }
 0x3b8   :  { %8707 = vmatpush.bf16.msrb.mxu2 %v12338_v36  ;;  %v14771_v36 = vld [vmem:[#allocation5 + $0x1774] sm:$0xf]  ;;  %v12495_v12 = vld [vmem:[#allocation5 + $0x1838] sm:$0xf0] }
 0x3b9   :  { %8697 = vmatpush.bf16.msra.mxu3 %v12250_v1  ;;  %v12402_v1 = vor.u32 %v14771_v36, %v12399_v15  ;;  %v14817_v36 = vld [vmem:[#allocation5 + $0x18e4] sm:$0xf]  ;;  %v12583_v15 = vld [vmem:[#allocation5 + $0x18e8] sm:$0xf0] }
 0x3ba   :  { %8672 = vmatpush.bf16.msra.mxu0 %v12114_v63  ;;  %v8456_v8 = vpop.f32.mrf.mxu2  ;;  %v14743_v63 = vld [vmem:[#allocation5 + $0x1694] sm:$0xf] }
 0x3bb   :  { %8685 = vmatpush.bf16.msra.mxu1 %v12178_v29  ;;  %v12455_v29 = vld [vmem:[#allocation5 + $0x17e8] sm:$0xf0]  ;;  %v12290_v23 = vor.u32 %v14743_v63, %v12287_v17 }
 0x3bc   :  { %8708 = vmatpush.bf16.msrb.mxu2 %v12330_v45  ;;  %v15867_v45 = vadd.f32 %v8456_v8, %v8444_v28  ;;  %v12458_v57 = vor.u32 %v14785_v33, %v12455_v29  ;;  %v12447_v28 = vld [vmem:[#allocation5 + $0x17d8] sm:$0xf0]  ;;  %v12586_v8 = vor.u32 %v14817_v36, %v12583_v15  ;;  %v14777_v33 = vld [vmem:[#allocation5 + $0x17a4] sm:$0xf]  ;;  %v12423_v29 = vld [vmem:[#allocation5 + $0x17a8] sm:$0xf0] }
 0x3bd   :  { %8698 = vmatpush.bf16.msra.mxu3 %v12242_v24  ;;  %v14801_v24 = vld [vmem:[#allocation5 + $0x1864] sm:$0xf]  ;;  %v12426_v38 = vor.u32 %v14777_v33, %v12423_v29  ;;  %v12655_v36 = vld [vmem:[#allocation5 + $0x1978] sm:$0xf0] }
 0x3be   :  { %8673 = vmatpush.bf16.msra.mxu0 %v12106_v14  ;;  %v12279_v14 = vld [vmem:[#allocation5 + $0x1688] sm:$0xf0]  ;;  %v12522_v16 = vor.u32 %v14801_v24, %v12519_v43  ;;  %v14793_v24 = vld [vmem:[#allocation5 + $0x1824] sm:$0xf] }
 0x3bf   :  { %8686 = vmatpush.bf16.msra.mxu1 %v12170_v56  ;;  %v14799_v56 = vld [vmem:[#allocation5 + $0x1854] sm:$0xf]  ;;  %v12282_v49 = vor.u32 %v14741_v39, %v12279_v14  ;;  %v12487_v43 = vld [vmem:[#allocation5 + $0x1828] sm:$0xf0]  ;;  %v14809_v15 = vld [vmem:[#allocation5 + $0x18a4] sm:$0xf] }
 0x3c0   :  { %8709 = vmatpush.bf16.msrb.mxu2 %v12322_v41  ;;  %v12394_v41 = vor.u32 %v14769_v58, %v12391_v60  ;;  %v12514_v25 = vor.u32 %v14799_v56, %v12511_v27  ;;  %v14761_v60 = vld [vmem:[#allocation5 + $0x1724] sm:$0xf]  ;;  %v12567_v39 = vld [vmem:[#allocation5 + $0x18c8] sm:$0xf0]  ;;  %v14775_v56 = vld [vmem:[#allocation5 + $0x1794] sm:$0xf] }
 0x3c1   :  { %8699 = vmatpush.bf16.msra.mxu3 %v12234_v13  ;;  %v16018_v13 = vld [vmem:[#allocation39_spill] sm:$0xff] }
 0x3c2   :  { %8674 = vmatpush.bf16.msra.mxu0 %v12098_v7  ;;  %v8458_v59 = vpop.f32.mrf.mxu2  ;;  %v12450_v7 = vor.u32 %v14783_v44, %v12447_v28  ;;  %v12490_v44 = vor.u32 %v14793_v24, %v12487_v43  ;;  %v14831_v24 = vld [vmem:[#allocation5 + $0x1954] sm:$0xf]  ;;  %v12639_v43 = vld [vmem:[#allocation5 + $0x1958] sm:$0xf0] }
 0x3c3   :  { %8687 = vmatpush.bf16.msra.mxu1 %v12162_v54  ;;  %v12439_v54 = vld [vmem:[#allocation5 + $0x17c8] sm:$0xf0]  ;;  %v12559_v59 = vld [vmem:[#allocation5 + $0x18b8] sm:$0xf0] }
 0x3c4   :  { %8710 = vmatpush.bf16.msrb.mxu2 %v12314_v42  ;;  %v12591_v42 = vld [vmem:[#allocation5 + $0x18f8] sm:$0xf0]  ;;  %v12442_v0 = vor.u32 %v14781_v31, %v12439_v54 }
 0x3c5   :  { %8700 = vmatpush.bf16.msra.mxu3 %v12226_v19  ;;  %v12594_v32 = vor.u32 %v14819_v21, %v12591_v42  ;;  %v14797_v19 = vld [vmem:[#allocation5 + $0x1844] sm:$0xf]  ;;  %v12479_v21 = vld [vmem:[#allocation5 + $0x1818] sm:$0xf0]  ;;  %v14811_v42 = vld [vmem:[#allocation5 + $0x18b4] sm:$0xf] }
 0x3c6   :  { %8675 = vmatpush.bf16.msra.mxu0 %v12090_v34  ;;  %v8469_v18 = vpop.f32.mrf.mxu0  ;;  %v12367_v34 = vld [vmem:[#allocation5 + $0x1738] sm:$0xf0]  ;;  %v12506_v22 = vor.u32 %v14797_v19, %v12503_v46  ;;  %v12562_v54 = vor.u32 %v14811_v42, %v12559_v59  ;;  %v12471_v19 = vld [vmem:[#allocation5 + $0x1808] sm:$0xf0]  ;;  %v14835_v46 = vld [vmem:[#allocation5 + $0x1974] sm:$0xf] }
 0x3c7   :  { %8688 = vmatpush.bf16.msra.mxu1 %v12154_v11  ;;  %v8470_v20 = vadd.f32 %v8469_v18, %v15867_v45  ;;  %v8482_v4 = vpop.f32.mrf.mxu1  ;;  %v14815_v11 = vld [vmem:[#allocation5 + $0x18d4] sm:$0xf]  ;;  %v12370_v63 = vor.u32 %v14763_v37, %v12367_v34  ;;  %v12498_v45 = vor.u32 %v14795_v6, %v12495_v12  ;;  %v12719_v37 = vld [vmem:[#allocation5 + $0x19f8] sm:$0xf0]  ;;  %v14829_v42 = vld [vmem:[#allocation5 + $0x1944] sm:$0xf] }
 0x3c8   :  { %8711 = vmatpush.bf16.msrb.mxu2 %v12306_v50  ;;  %v12378_v50 = vor.u32 %v14765_v5, %v12375_v48  ;;  %v14773_v48 = vld [vmem:[#allocation5 + $0x1784] sm:$0xf]  ;;  %v14851_v18 = vld [vmem:[#allocation5 + $0x19f4] sm:$0xf]  ;;  %v12631_v59 = vld [vmem:[#allocation5 + $0x1948] sm:$0xf0] }
 0x3c9   :  { %8701 = vmatpush.bf16.msra.mxu3 %v12218_v10  ;;  %8676 = vmatmul.bf16.vlgmr.msra.gmra.mxu0 %v16017_v40  ;;  %v12575_v10 = vld [vmem:[#allocation5 + $0x18d8] sm:$0xf0]  ;;  %v14867_v34 = vld [vmem:[#allocation5 + $0x1a74] sm:$0xf] }
 0x3ca   :  { %8720 = vmatpush.bf16.msrb.mxu0 %v12402_v1  ;;  %8689 = vmatmul.bf16.vlgmr.msra.gmra.mxu1 %v16019_v47  ;;  %v14779_v1 = vld [vmem:[#allocation5 + $0x17b4] sm:$0xf]  ;;  %v12578_v17 = vor.u32 %v14815_v11, %v12575_v10  ;;  %v12351_v40 = vld [vmem:[#allocation5 + $0x1718] sm:$0xf0]  ;;  %v14833_v11 = vld [vmem:[#allocation5 + $0x1964] sm:$0xf] }
 0x3cb   :  { %8733 = vmatpush.bf16.msrb.mxu1 %v12466_v61  ;;  %v8483_v61 = vadd.f32 %v8482_v4, %v8470_v20  ;;  %v12434_v58 = vor.u32 %v14779_v1, %v12431_v55  ;;  %v14791_v47 = vld [vmem:[#allocation5 + $0x1814] sm:$0xf]  ;;  %v12783_v20 = vld [vmem:[#allocation5 + $0x1a78] sm:$0xf0]  ;;  %v12658_v1 = vor.u32 %v14835_v46, %v12655_v36  ;;  %v12647_v10 = vld [vmem:[#allocation5 + $0x1968] sm:$0xf0] }
 0x3cc   :  { %8712 = vmatpush.bf16.msrb.mxu2 %v12298_v35  ;;  %8702 = vmatmul.bf16.vlgmr.msra.gmra.mxu3 %v16018_v13  ;;  %v16020_v35 = vld [vmem:[#allocation41_spill] sm:$0xff]  ;;  %v12482_v31 = vor.u32 %v14791_v47, %v12479_v21  ;;  %v12650_v33 = vor.u32 %v14833_v11, %v12647_v10  ;;  %v14827_v46 = vld [vmem:[#allocation5 + $0x1934] sm:$0xf] }
 0x3cd   :  { %8746 = vmatpush.bf16.msrb.mxu3 %v12530_v62  ;;  %v12359_v62 = vld [vmem:[#allocation5 + $0x1728] sm:$0xf0]  ;;  %v12415_v13 = vld [vmem:[#allocation5 + $0x1798] sm:$0xf0] }
 0x3ce   :  { %8721 = vmatpush.bf16.msrb.mxu0 %v12394_v41  ;;  %v14813_v41 = vld [vmem:[#allocation5 + $0x18c4] sm:$0xf]  ;;  %v12418_v5 = vor.u32 %v14775_v56, %v12415_v13  ;;  %v12642_v56 = vor.u32 %v14831_v24, %v12639_v43  ;;  %v14883_v13 = vld [vmem:[#allocation5 + $0x1af4] sm:$0xf]  ;;  %v12847_v47 = vld [vmem:[#allocation5 + $0x1af8] sm:$0xf0] }
 0x3cf   :  { %8734 = vmatpush.bf16.msrb.mxu1 %v12458_v57  ;;  %v12362_v57 = vor.u32 %v14761_v60, %v12359_v62  ;;  %v12570_v28 = vor.u32 %v14813_v41, %v12567_v39  ;;  %v8484_v27 = vpop.f32.mrf.mxu1  ;;  %v14849_v60 = vld [vmem:[#allocation5 + $0x19e4] sm:$0xf]  ;;  %v12711_v62 = vld [vmem:[#allocation5 + $0x19e8] sm:$0xf0]  ;;  %v12623_v36 = vld [vmem:[#allocation5 + $0x1938] sm:$0xf0] }
 0x3d0   :  { %8713 = vmatpush.bf16.msrb.mxu2 %v12290_v23  ;;  %v8495_v23 = vpop.f32.mrf.mxu3  ;;  %v12714_v41 = vor.u32 %v14849_v60, %v12711_v62  ;;  %v12831_v11 = vld [vmem:[#allocation5 + $0x1ad8] sm:$0xf0]  ;;  %v14841_v60 = vld [vmem:[#allocation5 + $0x19a4] sm:$0xf]  ;;  %v12679_v62 = vld [vmem:[#allocation5 + $0x19a8] sm:$0xf0] }
 0x3d1   :  { %8747 = vmatpush.bf16.msrb.mxu3 %v12522_v16  ;;  %v8496_v14 = vadd.f32 %v8495_v23, %v8483_v61  ;;  %v8471_v16 = vpop.f32.mrf.mxu0  ;;  %v12786_v61 = vor.u32 %v14867_v34, %v12783_v20  ;;  %v14805_v23 = vld [vmem:[#allocation5 + $0x1884] sm:$0xf]  ;;  %v12823_v24 = vld [vmem:[#allocation5 + $0x1ac8] sm:$0xf0] }
 0x3d2   :  { %8722 = vmatpush.bf16.msrb.mxu0 %v12386_v30  ;;  %v12354_v30 = vor.u32 %v14759_v26, %v12351_v40  ;;  %v16022_v26 = vld [vmem:[#allocation42_spill] sm:$0xff]  ;;  %v12703_v40 = vld [vmem:[#allocation5 + $0x19d8] sm:$0xf0]  ;;  %v14863_v16 = vld [vmem:[#allocation5 + $0x1a54] sm:$0xf] }
 0x3d3   :  { %8735 = vmatpush.bf16.msrb.mxu1 %v12450_v7  ;;  %v12343_v7 = vld [vmem:[#allocation5 + $0x1708] sm:$0xf0] }
 0x3d4   :  { %8714 = vmatpush.bf16.msrb.mxu2 %v12282_v49  ;;  %v14757_v49 = vld [vmem:[#allocation5 + $0x1704] sm:$0xf] }
 0x3d5   :  { %8748 = vmatpush.bf16.msrb.mxu3 %v12514_v25  ;;  %v12407_v25 = vld [vmem:[#allocation5 + $0x1788] sm:$0xf0] }
 0x3d6   :  { %8723 = vmatpush.bf16.msrb.mxu0 %v12378_v50  ;;  %v12551_v50 = vld [vmem:[#allocation5 + $0x18a8] sm:$0xf0] }
 0x3d7   :  { %8715 = vmatmul.bf16.vlgmr.msrb.gmra.mxu2 %v16020_v35  ;;  %8736 = vmatpush.bf16.msrb.mxu1 %v12442_v0  ;;  %v12346_v0 = vor.u32 %v14757_v49, %v12343_v7  ;;  %v12554_v12 = vor.u32 %v14809_v15, %v12551_v50  ;;  %v12722_v35 = vor.u32 %v14851_v18, %v12719_v37  ;;  %v14845_v7 = vld [vmem:[#allocation5 + $0x19c4] sm:$0xf]  ;;  %v14843_v37 = vld [vmem:[#allocation5 + $0x19b4] sm:$0xf] }
 0x3d8   :  { %8759 = vmatpush.bf16.msra.mxu2 %v12594_v32  ;;  %v14789_v32 = vld [vmem:[#allocation5 + $0x1804] sm:$0xf] }
 0x3d9   :  { %8749 = vmatpush.bf16.msrb.mxu3 %v12506_v22  ;;  %v8497_v22 = vpop.f32.mrf.mxu3  ;;  %v12474_v6 = vor.u32 %v14789_v32, %v12471_v19  ;;  %v12759_v32 = vld [vmem:[#allocation5 + $0x1a48] sm:$0xf0] }
 0x3da   :  { %8724 = vmatpush.bf16.msrb.mxu0 %v12370_v63  ;;  %v8508_v4 = vpop.f32.mrf.mxu2  ;;  %v14807_v63 = vld [vmem:[#allocation5 + $0x1894] sm:$0xf]  ;;  %v12839_v19 = vld [vmem:[#allocation5 + $0x1ae8] sm:$0xf0]  ;;  %v12687_v22 = vld [vmem:[#allocation5 + $0x19b8] sm:$0xf0] }
 0x3db   :  { %8737 = vmatpush.bf16.msrb.mxu1 %v12434_v58  ;;  %v15874_v55 = vadd.f32 %v8508_v4, %v8496_v14  ;;  %v12543_v58 = vld [vmem:[#allocation5 + $0x1898] sm:$0xf0]  ;;  %v14847_v14 = vld [vmem:[#allocation5 + $0x19d4] sm:$0xf] }
 0x3dc   :  { %8760 = vmatpush.bf16.msra.mxu2 %v12586_v8  ;;  %v12410_v8 = vor.u32 %v14773_v48, %v12407_v25  ;;  %v12546_v29 = vor.u32 %v14807_v63, %v12543_v58  ;;  %v12695_v48 = vld [vmem:[#allocation5 + $0x19c8] sm:$0xf0]  ;;  %v14861_v25 = vld [vmem:[#allocation5 + $0x1a44] sm:$0xf]  ;;  %v14859_v4 = vld [vmem:[#allocation5 + $0x1a34] sm:$0xf]  ;;  %v12690_v63 = vor.u32 %v14843_v37, %v12687_v22 }
 0x3dd   :  { %8750 = vmatpush.bf16.msrb.mxu3 %v12498_v45  ;;  %v14865_v45 = vld [vmem:[#allocation5 + $0x1a64] sm:$0xf]  ;;  %v12698_v50 = vor.u32 %v14845_v7, %v12695_v48  ;;  %v12762_v18 = vor.u32 %v14861_v25, %v12759_v32  ;;  %v12663_v7 = vld [vmem:[#allocation5 + $0x1988] sm:$0xf0]  ;;  %v12911_v48 = vld [vmem:[#allocation5 + $0x1b78] sm:$0xf0] }
 0x3de   :  { %8725 = vmatpush.bf16.msrb.mxu0 %v12362_v57  ;;  %v12535_v57 = vld [vmem:[#allocation5 + $0x1888] sm:$0xf0]  ;;  %v14853_v32 = vld [vmem:[#allocation5 + $0x1a04] sm:$0xf]  ;;  %v13039_v37 = vld [vmem:[#allocation5 + $0x1c78] sm:$0xf0] }
 0x3df   :  { %8738 = vmatpush.bf16.msrb.mxu1 %v12426_v38  ;;  %v16021_v38 = vld [vmem:[#allocation40_spill] sm:$0xff]  ;;  %v12538_v21 = vor.u32 %v14805_v23, %v12535_v57  ;;  %v12682_v57 = vor.u32 %v14841_v60, %v12679_v62  ;;  %v13031_v60 = vld [vmem:[#allocation5 + $0x1c68] sm:$0xf0]  ;;  %v14869_v62 = vld [vmem:[#allocation5 + $0x1a84] sm:$0xf] }
 0x3e0   :  { %8761 = vmatpush.bf16.msra.mxu2 %v12578_v17  ;;  %v12775_v17 = vld [vmem:[#allocation5 + $0x1a68] sm:$0xf0] }
 0x3e1   :  { %8751 = vmatpush.bf16.msrb.mxu3 %v12490_v44  ;;  %v12778_v39 = vor.u32 %v14865_v45, %v12775_v17  ;;  %v12767_v44 = vld [vmem:[#allocation5 + $0x1a58] sm:$0xf0]  ;;  %v14857_v45 = vld [vmem:[#allocation5 + $0x1a24] sm:$0xf]  ;;  %v12743_v17 = vld [vmem:[#allocation5 + $0x1a28] sm:$0xf0] }
 0x3e2   :  { %8726 = vmatpush.bf16.msrb.mxu0 %v12354_v30  ;;  %v8510_v27 = vpop.f32.mrf.mxu2  ;;  %v12706_v30 = vor.u32 %v14847_v14, %v12703_v40  ;;  %v12770_v49 = vor.u32 %v14863_v16, %v12767_v44  ;;  %v12746_v14 = vor.u32 %v14857_v45, %v12743_v17  ;;  %v12671_v44 = vld [vmem:[#allocation5 + $0x1998] sm:$0xf0] }
 0x3e3   :  { %8739 = vmatpush.bf16.msrb.mxu1 %v12418_v5  ;;  %v12850_v5 = vor.u32 %v14883_v13, %v12847_v47  ;;  %v14875_v47 = vld [vmem:[#allocation5 + $0x1ab4] sm:$0xf]  ;;  %v12815_v27 = vld [vmem:[#allocation5 + $0x1ab8] sm:$0xf0] }
 0x3e4   :  { %8762 = vmatpush.bf16.msra.mxu2 %v12570_v28  ;;  %v16023_v28 = vld [vmem:[#allocation43_spill] sm:$0xff]  ;;  %v12818_v25 = vor.u32 %v14875_v47, %v12815_v27  ;;  %v14893_v47 = vld [vmem:[#allocation5 + $0x1b44] sm:$0xf] }
 0x3e5   :  { %8752 = vmatpush.bf16.msrb.mxu3 %v12482_v31  ;;  %v12634_v31 = vor.u32 %v14829_v42, %v12631_v59  ;;  %v12599_v42 = vld [vmem:[#allocation5 + $0x1908] sm:$0xf0]  ;;  %v14837_v59 = vld [vmem:[#allocation5 + $0x1984] sm:$0xf] }
 0x3e6   :  { %8727 = vmatpush.bf16.msrb.mxu0 %v12346_v0  ;;  %v8521_v15 = vpop.f32.mrf.mxu0  ;;  %v12666_v22 = vor.u32 %v14837_v59, %v12663_v7  ;;  %v12887_v27 = vld [vmem:[#allocation5 + $0x1b48] sm:$0xf0]  ;;  %v14909_v59 = vld [vmem:[#allocation5 + $0x1bc4] sm:$0xf] }
 0x3e7   :  { %8740 = vmatpush.bf16.msrb.mxu1 %v12410_v8  ;;  %v8534_v0 = vpop.f32.mrf.mxu1  ;;  %v8522_v34 = vadd.f32 %v8521_v15, %v15874_v55  ;;  %v12751_v8 = vld [vmem:[#allocation5 + $0x1a38] sm:$0xf0]  ;;  %v13015_v7 = vld [vmem:[#allocation5 + $0x1c48] sm:$0xf0] }
 0x3e8   :  { %8763 = vmatpush.bf16.msra.mxu2 %v12562_v54  ;;  %v14881_v54 = vld [vmem:[#allocation5 + $0x1ae4] sm:$0xf]  ;;  %v12754_v58 = vor.u32 %v14859_v4, %v12751_v8  ;;  %v12975_v15 = vld [vmem:[#allocation5 + $0x1bf8] sm:$0xf0] }
 0x3e9   :  { %8753 = vmatpush.bf16.msrb.mxu3 %v12474_v6  ;;  %8728 = vmatmul.bf16.vlgmr.msrb.gmra.mxu0 %v16021_v38  ;;  %v12842_v20 = vor.u32 %v14881_v54, %v12839_v19  ;;  %v12626_v6 = vor.u32 %v14827_v46, %v12623_v36  ;;  %v8535_v10 = vadd.f32 %v8534_v0, %v8522_v34  ;;  %v14839_v38 = vld [vmem:[#allocation5 + $0x1994] sm:$0xf]  ;;  %v14873_v54 = vld [vmem:[#allocation5 + $0x1aa4] sm:$0xf]  ;;  %v12807_v46 = vld [vmem:[#allocation5 + $0x1aa8] sm:$0xf0] }
 0x3ea   :  { %8772 = vmatpush.bf16.msra.mxu0 %v12658_v1  ;;  %8741 = vmatmul.bf16.vlgmr.msrb.gmra.mxu1 %v16022_v26  ;;  %v16024_v1 = vld [vmem:[#allocation45_spill] sm:$0xff]  ;;  %v14915_v36 = vld [vmem:[#allocation5 + $0x1bf4] sm:$0xf]  ;;  %v12810_v8 = vor.u32 %v14873_v54, %v12807_v46 }
 0x3eb   :  { %8785 = vmatpush.bf16.msra.mxu1 %v12722_v35  ;;  %v14825_v35 = vld [vmem:[#allocation5 + $0x1924] sm:$0xf]  ;;  %v14931_v0 = vld [vmem:[#allocation5 + $0x1c74] sm:$0xf] }
 0x3ec   :  { %8764 = vmatpush.bf16.msra.mxu2 %v12554_v12  ;;  %8754 = vmatmul.bf16.vlgmr.msrb.gmra.mxu3 %v16023_v28  ;;  %v14879_v12 = vld [vmem:[#allocation5 + $0x1ad4] sm:$0xf] }
 0x3ed   :  { %8798 = vmatpush.bf16.msra.mxu3 %v12786_v61  ;;  %v12615_v61 = vld [vmem:[#allocation5 + $0x1928] sm:$0xf0]  ;;  %v12834_v55 = vor.u32 %v14879_v12, %v12831_v11  ;;  %v14855_v28 = vld [vmem:[#allocation5 + $0x1a14] sm:$0xf]  ;;  %v14897_v12 = vld [vmem:[#allocation5 + $0x1b64] sm:$0xf] }
 0x3ee   :  { %8773 = vmatpush.bf16.msra.mxu0 %v12650_v33  ;;  %v12618_v33 = vor.u32 %v14825_v35, %v12615_v61  ;;  %v8523_v26 = vpop.f32.mrf.mxu0  ;;  %v12903_v11 = vld [vmem:[#allocation5 + $0x1b68] sm:$0xf0]  ;;  %v12799_v35 = vld [vmem:[#allocation5 + $0x1a98] sm:$0xf0]  ;;  %v14913_v61 = vld [vmem:[#allocation5 + $0x1be4] sm:$0xf] }
 0x3ef   :  { %8786 = vmatpush.bf16.msra.mxu1 %v12714_v41  ;;  %v8547_v43 = vpop.f32.mrf.mxu3  ;;  %v14823_v41 = vld [vmem:[#allocation5 + $0x1914] sm:$0xf]  ;;  %v8536_v40 = vpop.f32.mrf.mxu1  ;;  %v13023_v26 = vld [vmem:[#allocation5 + $0x1c58] sm:$0xf0] }
 0x3f0   :  { %8765 = vmatpush.bf16.msra.mxu2 %v12546_v29  ;;  %v14877_v29 = vld [vmem:[#allocation5 + $0x1ac4] sm:$0xf]  ;;  %v8548_v23 = vadd.f32 %v8547_v43, %v8535_v10  ;;  %v13042_v10 = vor.u32 %v14931_v0, %v13039_v37  ;;  %v16025_v43 = vld [vmem:[#allocation44_spill] sm:$0xff]  ;;  %v12943_v0 = vld [vmem:[#allocation5 + $0x1bb8] sm:$0xf0] }
 0x3f1   :  { %8799 = vmatpush.bf16.msra.mxu3 %v12778_v39  ;;  %v12607_v39 = vld [vmem:[#allocation5 + $0x1918] sm:$0xf0]  ;;  %v12826_v16 = vor.u32 %v14877_v29, %v12823_v24  ;;  %v14895_v29 = vld [vmem:[#allocation5 + $0x1b54] sm:$0xf] }
 0x3f2   :  { %8774 = vmatpush.bf16.msra.mxu0 %v12642_v56  ;;  %v12735_v56 = vld [vmem:[#allocation5 + $0x1a18] sm:$0xf0]  ;;  %v12610_v13 = vor.u32 %v14823_v41, %v12607_v39  ;;  %v14911_v39 = vld [vmem:[#allocation5 + $0x1bd4] sm:$0xf] }
 0x3f3   :  { %8787 = vmatpush.bf16.msra.mxu1 %v12706_v30  ;;  %v12674_v30 = vor.u32 %v14839_v38, %v12671_v44  ;;  %v12895_v24 = vld [vmem:[#allocation5 + $0x1b58] sm:$0xf0]  ;;  %v16027_v38 = vld [vmem:[#allocation46_spill] sm:$0xff]  ;;  %v14947_v40 = vld [vmem:[#allocation5 + $0x1cf4] sm:$0xf] }
 0x3f4   :  { %8766 = vmatpush.bf16.msra.mxu2 %v12538_v21  ;;  %v14821_v21 = vld [vmem:[#allocation5 + $0x1904] sm:$0xf]  ;;  %v14891_v54 = vld [vmem:[#allocation5 + $0x1b34] sm:$0xf] }
 0x3f5   :  { %8800 = vmatpush.bf16.msra.mxu3 %v12770_v49  ;;  %v12738_v49 = vor.u32 %v14855_v28, %v12735_v56  ;;  %v12602_v19 = vor.u32 %v14821_v21, %v12599_v42  ;;  %v12898_v28 = vor.u32 %v14895_v29, %v12895_v24  ;;  %v14923_v37 = vld [vmem:[#allocation5 + $0x1c34] sm:$0xf] }
 0x3f6   :  { %8775 = vmatpush.bf16.msra.mxu0 %v12634_v31  ;;  %v12727_v31 = vld [vmem:[#allocation5 + $0x1a08] sm:$0xf0]  ;;  %v14887_v24 = vld [vmem:[#allocation5 + $0x1b14] sm:$0xf] }
 0x3f7   :  { %8767 = vmatmul.bf16.vlgmr.msra.gmra.mxu2 %v16024_v1  ;;  %8788 = vmatpush.bf16.msra.mxu1 %v12698_v50  ;;  %v8549_v34 = vpop.f32.mrf.mxu3  ;;  %v12730_v4 = vor.u32 %v14853_v32, %v12727_v31  ;;  %v12978_v1 = vor.u32 %v14915_v36, %v12975_v15 }
 0x3f8   :  { %8811 = vmatpush.bf16.msrb.mxu2 %v12850_v5  ;;  %v14899_v5 = vld [vmem:[#allocation5 + $0x1b74] sm:$0xf]  ;;  %v13007_v34 = vld [vmem:[#allocation5 + $0x1c38] sm:$0xf0] }
 0x3f9   :  { %8801 = vmatpush.bf16.msra.mxu3 %v12762_v18  ;;  %v12914_v18 = vor.u32 %v14899_v5, %v12911_v48  ;;  %v14945_v5 = vld [vmem:[#allocation5 + $0x1ce4] sm:$0xf]  ;;  %v13095_v48 = vld [vmem:[#allocation5 + $0x1ce8] sm:$0xf0] }
 0x3fa   :  { %8776 = vmatpush.bf16.msra.mxu0 %v12626_v6  ;;  %v8560_v50 = vpop.f32.mrf.mxu2  ;;  %v14871_v6 = vld [vmem:[#allocation5 + $0x1a94] sm:$0xf] }
 0x3fb   :  { %8789 = vmatpush.bf16.msra.mxu1 %v12690_v63  ;;  %v12967_v63 = vld [vmem:[#allocation5 + $0x1be8] sm:$0xf0]  ;;  %v12802_v45 = vor.u32 %v14871_v6, %v12799_v35 }
 0x3fc   :  { %8812 = vmatpush.bf16.msrb.mxu2 %v12842_v20  ;;  %v15881_v20 = vadd.f32 %v8560_v50, %v8548_v23  ;;  %v12970_v17 = vor.u32 %v14913_v61, %v12967_v63  ;;  %v12959_v23 = vld [vmem:[#allocation5 + $0x1bd8] sm:$0xf0]  ;;  %v13098_v50 = vor.u32 %v14945_v5, %v13095_v48  ;;  %v14905_v61 = vld [vmem:[#allocation5 + $0x1ba4] sm:$0xf]  ;;  %v12935_v63 = vld [vmem:[#allocation5 + $0x1ba8] sm:$0xf0] }
 0x3fd   :  { %8802 = vmatpush.bf16.msra.mxu3 %v12754_v58  ;;  %v14929_v58 = vld [vmem:[#allocation5 + $0x1c64] sm:$0xf]  ;;  %v12938_v29 = vor.u32 %v14905_v61, %v12935_v63  ;;  %v13167_v5 = vld [vmem:[#allocation5 + $0x1d78] sm:$0xf0] }
 0x3fe   :  { %8777 = vmatpush.bf16.msra.mxu0 %v12618_v33  ;;  %v12791_v33 = vld [vmem:[#allocation5 + $0x1a88] sm:$0xf0]  ;;  %v13034_v41 = vor.u32 %v14929_v58, %v13031_v60  ;;  %v14921_v58 = vld [vmem:[#allocation5 + $0x1c24] sm:$0xf] }
 0x3ff   :  { %8790 = vmatpush.bf16.msra.mxu1 %v12682_v57  ;;  %v14927_v57 = vld [vmem:[#allocation5 + $0x1c54] sm:$0xf]  ;;  %v12794_v56 = vor.u32 %v14869_v62, %v12791_v33  ;;  %v12999_v60 = vld [vmem:[#allocation5 + $0x1c28] sm:$0xf0]  ;;  %v14937_v48 = vld [vmem:[#allocation5 + $0x1ca4] sm:$0xf] }
 0x400   :  { %8813 = vmatpush.bf16.msrb.mxu2 %v12834_v55  ;;  %v12906_v55 = vor.u32 %v14897_v12, %v12903_v11  ;;  %v13026_v21 = vor.u32 %v14927_v57, %v13023_v26  ;;  %v14889_v11 = vld [vmem:[#allocation5 + $0x1b24] sm:$0xf]  ;;  %v13079_v62 = vld [vmem:[#allocation5 + $0x1cc8] sm:$0xf0]  ;;  %v14903_v57 = vld [vmem:[#allocation5 + $0x1b94] sm:$0xf] }
 0x401   :  { %8803 = vmatpush.bf16.msra.mxu3 %v12746_v14  ;;  %v16026_v14 = vld [vmem:[#allocation47_spill] sm:$0xff] }
 0x402   :  { %8778 = vmatpush.bf16.msra.mxu0 %v12610_v13  ;;  %v8562_v44 = vpop.f32.mrf.mxu2  ;;  %v12962_v13 = vor.u32 %v14911_v39, %v12959_v23  ;;  %v13002_v39 = vor.u32 %v14921_v58, %v12999_v60  ;;  %v14959_v58 = vld [vmem:[#allocation5 + $0x1d54] sm:$0xf]  ;;  %v13151_v60 = vld [vmem:[#allocation5 + $0x1d58] sm:$0xf0] }
 0x403   :  { %8791 = vmatpush.bf16.msra.mxu1 %v12674_v30  ;;  %v12951_v30 = vld [vmem:[#allocation5 + $0x1bc8] sm:$0xf0]  ;;  %v13071_v44 = vld [vmem:[#allocation5 + $0x1cb8] sm:$0xf0] }
 0x404   :  { %8814 = vmatpush.bf16.msrb.mxu2 %v12826_v16  ;;  %v13103_v16 = vld [vmem:[#allocation5 + $0x1cf8] sm:$0xf0]  ;;  %v12954_v31 = vor.u32 %v14909_v59, %v12951_v30 }
 0x405   :  { %8804 = vmatpush.bf16.msra.mxu3 %v12738_v49  ;;  %v13106_v42 = vor.u32 %v14947_v40, %v13103_v16  ;;  %v14925_v49 = vld [vmem:[#allocation5 + $0x1c44] sm:$0xf]  ;;  %v12991_v40 = vld [vmem:[#allocation5 + $0x1c18] sm:$0xf0]  ;;  %v14939_v16 = vld [vmem:[#allocation5 + $0x1cb4] sm:$0xf] }
 0x406   :  { %8779 = vmatpush.bf16.msra.mxu0 %v12602_v19  ;;  %v8573_v32 = vpop.f32.mrf.mxu0  ;;  %v12879_v19 = vld [vmem:[#allocation5 + $0x1b38] sm:$0xf0]  ;;  %v13018_v36 = vor.u32 %v14925_v49, %v13015_v7  ;;  %v13074_v30 = vor.u32 %v14939_v16, %v13071_v44  ;;  %v12983_v49 = vld [vmem:[#allocation5 + $0x1c08] sm:$0xf0]  ;;  %v14963_v7 = vld [vmem:[#allocation5 + $0x1d74] sm:$0xf] }
 0x407   :  { %8792 = vmatpush.bf16.msra.mxu1 %v12666_v22  ;;  %v8574_v46 = vadd.f32 %v8573_v32, %v15881_v20  ;;  %v8586_v15 = vpop.f32.mrf.mxu1  ;;  %v14943_v22 = vld [vmem:[#allocation5 + $0x1cd4] sm:$0xf]  ;;  %v12882_v6 = vor.u32 %v14891_v54, %v12879_v19  ;;  %v13010_v20 = vor.u32 %v14923_v37, %v13007_v34  ;;  %v13231_v54 = vld [vmem:[#allocation5 + $0x1df8] sm:$0xf0]  ;;  %v14957_v16 = vld [vmem:[#allocation5 + $0x1d44] sm:$0xf] }
 0x408   :  { %8815 = vmatpush.bf16.msrb.mxu2 %v12818_v25  ;;  %v12890_v25 = vor.u32 %v14893_v47, %v12887_v27  ;;  %v14901_v27 = vld [vmem:[#allocation5 + $0x1b84] sm:$0xf]  ;;  %v14979_v32 = vld [vmem:[#allocation5 + $0x1df4] sm:$0xf]  ;;  %v13143_v44 = vld [vmem:[#allocation5 + $0x1d48] sm:$0xf0] }
 0x409   :  { %8805 = vmatpush.bf16.msra.mxu3 %v12730_v4  ;;  %8780 = vmatmul.bf16.vlgmr.msra.gmra.mxu0 %v16025_v43  ;;  %v13087_v4 = vld [vmem:[#allocation5 + $0x1cd8] sm:$0xf0]  ;;  %v14995_v19 = vld [vmem:[#allocation5 + $0x1e74] sm:$0xf] }
 0x40a   :  { %8824 = vmatpush.bf16.msrb.mxu0 %v12914_v18  ;;  %8793 = vmatmul.bf16.vlgmr.msra.gmra.mxu1 %v16027_v38  ;;  %v14907_v18 = vld [vmem:[#allocation5 + $0x1bb4] sm:$0xf]  ;;  %v13090_v35 = vor.u32 %v14943_v22, %v13087_v4  ;;  %v12863_v43 = vld [vmem:[#allocation5 + $0x1b18] sm:$0xf0]  ;;  %v14961_v22 = vld [vmem:[#allocation5 + $0x1d64] sm:$0xf] }
 0x40b   :  { %8837 = vmatpush.bf16.msrb.mxu1 %v12978_v1  ;;  %v8587_v1 = vadd.f32 %v8586_v15, %v8574_v46  ;;  %v12946_v12 = vor.u32 %v14907_v18, %v12943_v0  ;;  %v14919_v38 = vld [vmem:[#allocation5 + $0x1c14] sm:$0xf]  ;;  %v13295_v46 = vld [vmem:[#allocation5 + $0x1e78] sm:$0xf0]  ;;  %v13170_v18 = vor.u32 %v14963_v7, %v13167_v5  ;;  %v13159_v4 = vld [vmem:[#allocation5 + $0x1d68] sm:$0xf0] }
 0x40c   :  { %8816 = vmatpush.bf16.msrb.mxu2 %v12810_v8  ;;  %8806 = vmatmul.bf16.vlgmr.msra.gmra.mxu3 %v16026_v14  ;;  %v16028_v8 = vld [vmem:[#allocation49_spill] sm:$0xff]  ;;  %v12994_v59 = vor.u32 %v14919_v38, %v12991_v40  ;;  %v13162_v61 = vor.u32 %v14961_v22, %v13159_v4  ;;  %v14955_v7 = vld [vmem:[#allocation5 + $0x1d34] sm:$0xf] }
 0x40d   :  { %8850 = vmatpush.bf16.msrb.mxu3 %v13042_v10  ;;  %v12871_v10 = vld [vmem:[#allocation5 + $0x1b28] sm:$0xf0]  ;;  %v12927_v14 = vld [vmem:[#allocation5 + $0x1b98] sm:$0xf0] }
 0x40e   :  { %8825 = vmatpush.bf16.msrb.mxu0 %v12906_v55  ;;  %v14941_v55 = vld [vmem:[#allocation5 + $0x1cc4] sm:$0xf]  ;;  %v12930_v47 = vor.u32 %v14903_v57, %v12927_v14  ;;  %v13154_v57 = vor.u32 %v14959_v58, %v13151_v60  ;;  %v15011_v14 = vld [vmem:[#allocation5 + $0x1ef4] sm:$0xf]  ;;  %v13359_v38 = vld [vmem:[#allocation5 + $0x1ef8] sm:$0xf0] }
 0x40f   :  { %8838 = vmatpush.bf16.msrb.mxu1 %v12970_v17  ;;  %v12874_v17 = vor.u32 %v14889_v11, %v12871_v10  ;;  %v13082_v23 = vor.u32 %v14941_v55, %v13079_v62  ;;  %v8588_v26 = vpop.f32.mrf.mxu1  ;;  %v14977_v11 = vld [vmem:[#allocation5 + $0x1de4] sm:$0xf]  ;;  %v13223_v10 = vld [vmem:[#allocation5 + $0x1de8] sm:$0xf0]  ;;  %v13135_v5 = vld [vmem:[#allocation5 + $0x1d38] sm:$0xf0] }
 0x410   :  { %8817 = vmatpush.bf16.msrb.mxu2 %v12802_v45  ;;  %v8599_v45 = vpop.f32.mrf.mxu3  ;;  %v13226_v55 = vor.u32 %v14977_v11, %v13223_v10  ;;  %v13343_v22 = vld [vmem:[#allocation5 + $0x1ed8] sm:$0xf0]  ;;  %v14969_v11 = vld [vmem:[#allocation5 + $0x1da4] sm:$0xf]  ;;  %v13191_v10 = vld [vmem:[#allocation5 + $0x1da8] sm:$0xf0] }
 0x411   :  { %8851 = vmatpush.bf16.msrb.mxu3 %v13034_v41  ;;  %v8600_v33 = vadd.f32 %v8599_v45, %v8587_v1  ;;  %v8575_v41 = vpop.f32.mrf.mxu0  ;;  %v13298_v1 = vor.u32 %v14995_v19, %v13295_v46  ;;  %v14933_v45 = vld [vmem:[#allocation5 + $0x1c84] sm:$0xf]  ;;  %v13335_v58 = vld [vmem:[#allocation5 + $0x1ec8] sm:$0xf0] }
 0x412   :  { %8826 = vmatpush.bf16.msrb.mxu0 %v12898_v28  ;;  %v12866_v28 = vor.u32 %v14887_v24, %v12863_v43  ;;  %v16030_v24 = vld [vmem:[#allocation50_spill] sm:$0xff]  ;;  %v13215_v43 = vld [vmem:[#allocation5 + $0x1dd8] sm:$0xf0]  ;;  %v14991_v41 = vld [vmem:[#allocation5 + $0x1e54] sm:$0xf] }
 0x413   :  { %8839 = vmatpush.bf16.msrb.mxu1 %v12962_v13  ;;  %v12855_v13 = vld [vmem:[#allocation5 + $0x1b08] sm:$0xf0] }
 0x414   :  { %8818 = vmatpush.bf16.msrb.mxu2 %v12794_v56  ;;  %v14885_v56 = vld [vmem:[#allocation5 + $0x1b04] sm:$0xf] }
 0x415   :  { %8852 = vmatpush.bf16.msrb.mxu3 %v13026_v21  ;;  %v12919_v21 = vld [vmem:[#allocation5 + $0x1b88] sm:$0xf0] }
 0x416   :  { %8827 = vmatpush.bf16.msrb.mxu0 %v12890_v25  ;;  %v13063_v25 = vld [vmem:[#allocation5 + $0x1ca8] sm:$0xf0] }
 0x417   :  { %8819 = vmatmul.bf16.vlgmr.msrb.gmra.mxu2 %v16028_v8  ;;  %8840 = vmatpush.bf16.msrb.mxu1 %v12954_v31  ;;  %v12858_v31 = vor.u32 %v14885_v56, %v12855_v13  ;;  %v13066_v34 = vor.u32 %v14937_v48, %v13063_v25  ;;  %v13234_v8 = vor.u32 %v14979_v32, %v13231_v54  ;;  %v14973_v13 = vld [vmem:[#allocation5 + $0x1dc4] sm:$0xf]  ;;  %v14971_v54 = vld [vmem:[#allocation5 + $0x1db4] sm:$0xf] }
 0x418   :  { %8863 = vmatpush.bf16.msra.mxu2 %v13106_v42  ;;  %v14917_v42 = vld [vmem:[#allocation5 + $0x1c04] sm:$0xf] }
 0x419   :  { %8853 = vmatpush.bf16.msrb.mxu3 %v13018_v36  ;;  %v8601_v36 = vpop.f32.mrf.mxu3  ;;  %v12986_v37 = vor.u32 %v14917_v42, %v12983_v49  ;;  %v13271_v42 = vld [vmem:[#allocation5 + $0x1e48] sm:$0xf0] }
 0x41a   :  { %8828 = vmatpush.bf16.msrb.mxu0 %v12882_v6  ;;  %v8612_v15 = vpop.f32.mrf.mxu2  ;;  %v14935_v6 = vld [vmem:[#allocation5 + $0x1c94] sm:$0xf]  ;;  %v13351_v49 = vld [vmem:[#allocation5 + $0x1ee8] sm:$0xf0]  ;;  %v13199_v36 = vld [vmem:[#allocation5 + $0x1db8] sm:$0xf0] }
 0x41b   :  { %8841 = vmatpush.bf16.msrb.mxu1 %v12946_v12  ;;  %v15888_v0 = vadd.f32 %v8612_v15, %v8600_v33  ;;  %v13055_v12 = vld [vmem:[#allocation5 + $0x1c98] sm:$0xf0]  ;;  %v14975_v33 = vld [vmem:[#allocation5 + $0x1dd4] sm:$0xf] }
 0x41c   :  { %8864 = vmatpush.bf16.msra.mxu2 %v13098_v50  ;;  %v12922_v50 = vor.u32 %v14901_v27, %v12919_v21  ;;  %v13058_v63 = vor.u32 %v14935_v6, %v13055_v12  ;;  %v13207_v27 = vld [vmem:[#allocation5 + $0x1dc8] sm:$0xf0]  ;;  %v14989_v21 = vld [vmem:[#allocation5 + $0x1e44] sm:$0xf]  ;;  %v14987_v15 = vld [vmem:[#allocation5 + $0x1e34] sm:$0xf]  ;;  %v13202_v6 = vor.u32 %v14971_v54, %v13199_v36 }
 0x41d   :  { %8854 = vmatpush.bf16.msrb.mxu3 %v13010_v20  ;;  %v14993_v20 = vld [vmem:[#allocation5 + $0x1e64] sm:$0xf]  ;;  %v13210_v25 = vor.u32 %v14973_v13, %v13207_v27  ;;  %v13274_v32 = vor.u32 %v14989_v21, %v13271_v42  ;;  %v13175_v13 = vld [vmem:[#allocation5 + $0x1d88] sm:$0xf0]  ;;  %v13423_v27 = vld [vmem:[#allocation5 + $0x1f78] sm:$0xf0] }
 0x41e   :  { %8829 = vmatpush.bf16.msrb.mxu0 %v12874_v17  ;;  %v13047_v17 = vld [vmem:[#allocation5 + $0x1c88] sm:$0xf0]  ;;  %v14981_v42 = vld [vmem:[#allocation5 + $0x1e04] sm:$0xf]  ;;  %v13551_v54 = vld [vmem:[#allocation5 + $0x2078] sm:$0xf0] }
 0x41f   :  { %8842 = vmatpush.bf16.msrb.mxu1 %v12938_v29  ;;  %v16029_v29 = vld [vmem:[#allocation48_spill] sm:$0xff]  ;;  %v13050_v40 = vor.u32 %v14933_v45, %v13047_v17  ;;  %v13194_v17 = vor.u32 %v14969_v11, %v13191_v10  ;;  %v13543_v11 = vld [vmem:[#allocation5 + $0x2068] sm:$0xf0]  ;;  %v14997_v10 = vld [vmem:[#allocation5 + $0x1e84] sm:$0xf] }
 0x420   :  { %8865 = vmatpush.bf16.msra.mxu2 %v13090_v35  ;;  %v13287_v35 = vld [vmem:[#allocation5 + $0x1e68] sm:$0xf0] }
 0x421   :  { %8855 = vmatpush.bf16.msrb.mxu3 %v13002_v39  ;;  %v13290_v62 = vor.u32 %v14993_v20, %v13287_v35  ;;  %v13279_v39 = vld [vmem:[#allocation5 + $0x1e58] sm:$0xf0]  ;;  %v14985_v20 = vld [vmem:[#allocation5 + $0x1e24] sm:$0xf]  ;;  %v13255_v35 = vld [vmem:[#allocation5 + $0x1e28] sm:$0xf0] }
 0x422   :  { %8830 = vmatpush.bf16.msrb.mxu0 %v12866_v28  ;;  %v8614_v26 = vpop.f32.mrf.mxu2  ;;  %v13218_v28 = vor.u32 %v14975_v33, %v13215_v43  ;;  %v13282_v56 = vor.u32 %v14991_v41, %v13279_v39  ;;  %v13258_v33 = vor.u32 %v14985_v20, %v13255_v35  ;;  %v13183_v39 = vld [vmem:[#allocation5 + $0x1d98] sm:$0xf0] }
 0x423   :  { %8843 = vmatpush.bf16.msrb.mxu1 %v12930_v47  ;;  %v13362_v47 = vor.u32 %v15011_v14, %v13359_v38  ;;  %v15003_v38 = vld [vmem:[#allocation5 + $0x1eb4] sm:$0xf]  ;;  %v13327_v26 = vld [vmem:[#allocation5 + $0x1eb8] sm:$0xf0] }
 0x424   :  { %8866 = vmatpush.bf16.msra.mxu2 %v13082_v23  ;;  %v16031_v23 = vld [vmem:[#allocation51_spill] sm:$0xff]  ;;  %v13330_v21 = vor.u32 %v15003_v38, %v13327_v26 }
 0x425   :  { %8856 = vmatpush.bf16.msrb.mxu3 %v12994_v59  ;;  %v13146_v59 = vor.u32 %v14957_v16, %v13143_v44  ;;  %v13111_v16 = vld [vmem:[#allocation5 + $0x1d08] sm:$0xf0]  ;;  %v14965_v44 = vld [vmem:[#allocation5 + $0x1d84] sm:$0xf] }
 0x426   :  { %8831 = vmatpush.bf16.msrb.mxu0 %v12858_v31  ;;  %v8625_v48 = vpop.f32.mrf.mxu0  ;;  %v13178_v36 = vor.u32 %v14965_v44, %v13175_v13  ;;  %v13399_v38 = vld [vmem:[#allocation5 + $0x1f48] sm:$0xf0] }
 0x427   :  { %8844 = vmatpush.bf16.msrb.mxu1 %v12922_v50  ;;  %v8638_v31 = vpop.f32.mrf.mxu1  ;;  %v8626_v19 = vadd.f32 %v8625_v48, %v15888_v0  ;;  %v13263_v50 = vld [vmem:[#allocation5 + $0x1e38] sm:$0xf0]  ;;  %v13463_v44 = vld [vmem:[#allocation5 + $0x1fc8] sm:$0xf0] }
 0x428   :  { %8867 = vmatpush.bf16.msra.mxu2 %v13074_v30  ;;  %v15009_v30 = vld [vmem:[#allocation5 + $0x1ee4] sm:$0xf]  ;;  %v13266_v12 = vor.u32 %v14987_v15, %v13263_v50  ;;  %v13487_v48 = vld [vmem:[#allocation5 + $0x1ff8] sm:$0xf0]  ;;  %v13607_v13 = vld [vmem:[#allocation5 + $0x20e8] sm:$0xf0] }
 0x429   :  { %8857 = vmatpush.bf16.msrb.mxu3 %v12986_v37  ;;  %8832 = vmatmul.bf16.vlgmr.msrb.gmra.mxu0 %v16029_v29  ;;  %v13354_v46 = vor.u32 %v15009_v30, %v13351_v49  ;;  %v13138_v37 = vor.u32 %v14955_v7, %v13135_v5  ;;  %v8639_v4 = vadd.f32 %v8638_v31, %v8626_v19  ;;  %v14967_v29 = vld [vmem:[#allocation5 + $0x1d94] sm:$0xf]  ;;  %v15001_v30 = vld [vmem:[#allocation5 + $0x1ea4] sm:$0xf]  ;;  %v13319_v7 = vld [vmem:[#allocation5 + $0x1ea8] sm:$0xf0] }
 0x42a   :  { %8876 = vmatpush.bf16.msra.mxu0 %v13170_v18  ;;  %8845 = vmatmul.bf16.vlgmr.msrb.gmra.mxu1 %v16030_v24  ;;  %v16032_v18 = vld [vmem:[#allocation53_spill] sm:$0xff]  ;;  %v15043_v5 = vld [vmem:[#allocation5 + $0x1ff4] sm:$0xf]  ;;  %v13322_v50 = vor.u32 %v15001_v30, %v13319_v7 }
 0x42b   :  { %8889 = vmatpush.bf16.msra.mxu1 %v13234_v8  ;;  %v14953_v8 = vld [vmem:[#allocation5 + $0x1d24] sm:$0xf]  ;;  %v15059_v31 = vld [vmem:[#allocation5 + $0x2074] sm:$0xf] }
 0x42c   :  { %8868 = vmatpush.bf16.msra.mxu2 %v13066_v34  ;;  %8858 = vmatmul.bf16.vlgmr.msrb.gmra.mxu3 %v16031_v23  ;;  %v15007_v34 = vld [vmem:[#allocation5 + $0x1ed4] sm:$0xf] }
 0x42d   :  { %8902 = vmatpush.bf16.msra.mxu3 %v13298_v1  ;;  %v13127_v1 = vld [vmem:[#allocation5 + $0x1d28] sm:$0xf0]  ;;  %v13346_v0 = vor.u32 %v15007_v34, %v13343_v22  ;;  %v14983_v23 = vld [vmem:[#allocation5 + $0x1e14] sm:$0xf]  ;;  %v15025_v34 = vld [vmem:[#allocation5 + $0x1f64] sm:$0xf] }
 0x42e   :  { %8877 = vmatpush.bf16.msra.mxu0 %v13162_v61  ;;  %v13130_v61 = vor.u32 %v14953_v8, %v13127_v1  ;;  %v8627_v24 = vpop.f32.mrf.mxu0  ;;  %v13415_v22 = vld [vmem:[#allocation5 + $0x1f68] sm:$0xf0]  ;;  %v13311_v8 = vld [vmem:[#allocation5 + $0x1e98] sm:$0xf0]  ;;  %v15041_v1 = vld [vmem:[#allocation5 + $0x1fe4] sm:$0xf] }
 0x42f   :  { %8890 = vmatpush.bf16.msra.mxu1 %v13226_v55  ;;  %v8651_v60 = vpop.f32.mrf.mxu3  ;;  %v14951_v55 = vld [vmem:[#allocation5 + $0x1d14] sm:$0xf]  ;;  %v8640_v43 = vpop.f32.mrf.mxu1 }
 0x430   :  { %8869 = vmatpush.bf16.msra.mxu2 %v13058_v63  ;;  %v15005_v63 = vld [vmem:[#allocation5 + $0x1ec4] sm:$0xf]  ;;  %v8652_v45 = vadd.f32 %v8651_v60, %v8639_v4  ;;  %v13554_v4 = vor.u32 %v15059_v31, %v13551_v54  ;;  %v16033_v60 = vld [vmem:[#allocation52_spill] sm:$0xff]  ;;  %v13615_v43 = vld [vmem:[#allocation5 + $0x20f8] sm:$0xf0] }
 0x431   :  { %8903 = vmatpush.bf16.msra.mxu3 %v13290_v62  ;;  %v13119_v62 = vld [vmem:[#allocation5 + $0x1d18] sm:$0xf0]  ;;  %v13338_v41 = vor.u32 %v15005_v63, %v13335_v58  ;;  %v15023_v63 = vld [vmem:[#allocation5 + $0x1f54] sm:$0xf] }
 0x432   :  { %8878 = vmatpush.bf16.msra.mxu0 %v13154_v57  ;;  %v13247_v57 = vld [vmem:[#allocation5 + $0x1e18] sm:$0xf0]  ;;  %v13122_v14 = vor.u32 %v14951_v55, %v13119_v62  ;;  %v15039_v62 = vld [vmem:[#allocation5 + $0x1fd4] sm:$0xf] }
 0x433   :  { %8891 = vmatpush.bf16.msra.mxu1 %v13218_v28  ;;  %v13186_v28 = vor.u32 %v14967_v29, %v13183_v39  ;;  %v13407_v58 = vld [vmem:[#allocation5 + $0x1f58] sm:$0xf0]  ;;  %v15075_v24 = vld [vmem:[#allocation5 + $0x20f4] sm:$0xf] }
 0x434   :  { %8870 = vmatpush.bf16.msra.mxu2 %v13050_v40  ;;  %v14949_v40 = vld [vmem:[#allocation5 + $0x1d04] sm:$0xf]  ;;  %v13535_v29 = vld [vmem:[#allocation5 + $0x2058] sm:$0xf0]  ;;  %v13410_v39 = vor.u32 %v15023_v63, %v13407_v58  ;;  %v15071_v54 = vld [vmem:[#allocation5 + $0x20d4] sm:$0xf] }
 0x435   :  { %8904 = vmatpush.bf16.msra.mxu3 %v13282_v56  ;;  %v13250_v56 = vor.u32 %v14983_v23, %v13247_v57  ;;  %v13114_v49 = vor.u32 %v14949_v40, %v13111_v16  ;;  %v13618_v40 = vor.u32 %v15075_v24, %v13615_v43  ;;  %v15037_v16 = vld [vmem:[#allocation5 + $0x1fc4] sm:$0xf]  ;;  %v13519_v31 = vld [vmem:[#allocation5 + $0x2038] sm:$0xf0] }
 0x436   :  { %8879 = vmatpush.bf16.msra.mxu0 %v13146_v59  ;;  %v13239_v59 = vld [vmem:[#allocation5 + $0x1e08] sm:$0xf0]  ;;  %v15013_v43 = vld [vmem:[#allocation5 + $0x1f04] sm:$0xf] }
 0x437   :  { %8871 = vmatmul.bf16.vlgmr.msra.gmra.mxu2 %v16032_v18  ;;  %8892 = vmatpush.bf16.msra.mxu1 %v13210_v25  ;;  %v8653_v19 = vpop.f32.mrf.mxu3  ;;  %v13242_v15 = vor.u32 %v14981_v42, %v13239_v59  ;;  %v13490_v18 = vor.u32 %v15043_v5, %v13487_v48  ;;  %v15019_v42 = vld [vmem:[#allocation5 + $0x1f34] sm:$0xf]  ;;  %v13391_v59 = vld [vmem:[#allocation5 + $0x1f38] sm:$0xf0] }
 0x438   :  { %8915 = vmatpush.bf16.msrb.mxu2 %v13362_v47  ;;  %v15027_v47 = vld [vmem:[#allocation5 + $0x1f74] sm:$0xf]  ;;  %v13599_v19 = vld [vmem:[#allocation5 + $0x20d8] sm:$0xf0] }
 0x439   :  { %8905 = vmatpush.bf16.msra.mxu3 %v13274_v32  ;;  %v13426_v32 = vor.u32 %v15027_v47, %v13423_v27  ;;  %v15035_v48 = vld [vmem:[#allocation5 + $0x1fb4] sm:$0xf] }
 0x43a   :  { %8880 = vmatpush.bf16.msra.mxu0 %v13138_v37  ;;  %v8664_v25 = vpop.f32.mrf.mxu2  ;;  %v14999_v37 = vld [vmem:[#allocation5 + $0x1e94] sm:$0xf] }
 0x43b   :  { %8893 = vmatpush.bf16.msra.mxu1 %v13202_v6  ;;  %v13479_v6 = vld [vmem:[#allocation5 + $0x1fe8] sm:$0xf0]  ;;  %v13314_v20 = vor.u32 %v14999_v37, %v13311_v8  ;;  %v15049_v8 = vld [vmem:[#allocation5 + $0x2024] sm:$0xf] }
 0x43c   :  { %8916 = vmatpush.bf16.msrb.mxu2 %v13354_v46  ;;  %v15895_v46 = vadd.f32 %v8664_v25, %v8652_v45  ;;  %v13482_v35 = vor.u32 %v15041_v1, %v13479_v6  ;;  %v13471_v45 = vld [vmem:[#allocation5 + $0x1fd8] sm:$0xf0]  ;;  %v13383_v37 = vld [vmem:[#allocation5 + $0x1f28] sm:$0xf0]  ;;  %v15069_v6 = vld [vmem:[#allocation5 + $0x20c4] sm:$0xf] }
 0x43d   :  { %8906 = vmatpush.bf16.msra.mxu3 %v13266_v12  ;;  %v15057_v12 = vld [vmem:[#allocation5 + $0x2064] sm:$0xf]  ;;  %v13474_v57 = vor.u32 %v15039_v62, %v13471_v45  ;;  %v13455_v25 = vld [vmem:[#allocation5 + $0x1fb8] sm:$0xf0]  ;;  %v13511_v1 = vld [vmem:[#allocation5 + $0x2028] sm:$0xf0] }
 0x43e   :  { %8881 = vmatpush.bf16.msra.mxu0 %v13130_v61  ;;  %v13303_v61 = vld [vmem:[#allocation5 + $0x1e88] sm:$0xf0]  ;;  %v13546_v55 = vor.u32 %v15057_v12, %v13543_v11  ;;  %v13514_v63 = vor.u32 %v15049_v8, %v13511_v1  ;;  %v15047_v62 = vld [vmem:[#allocation5 + $0x2014] sm:$0xf] }
 0x43f   :  { %8894 = vmatpush.bf16.msra.mxu1 %v13194_v17  ;;  %v15055_v17 = vld [vmem:[#allocation5 + $0x2054] sm:$0xf]  ;;  %v13306_v23 = vor.u32 %v14997_v10, %v13303_v61  ;;  %v13591_v12 = vld [vmem:[#allocation5 + $0x20c8] sm:$0xf0] }
 0x440   :  { %8917 = vmatpush.bf16.msrb.mxu2 %v13346_v0  ;;  %v13418_v0 = vor.u32 %v15025_v34, %v13415_v22  ;;  %v13538_v26 = vor.u32 %v15055_v17, %v13535_v29  ;;  %v13602_v34 = vor.u32 %v15071_v54, %v13599_v19  ;;  %v15033_v22 = vld [vmem:[#allocation5 + $0x1fa4] sm:$0xf]  ;;  %v13594_v58 = vor.u32 %v15069_v6, %v13591_v12  ;;  %v13503_v17 = vld [vmem:[#allocation5 + $0x2018] sm:$0xf0]  ;;  %v15063_v19 = vld [vmem:[#allocation5 + $0x2094] sm:$0xf] }
 0x441   :  { %8907 = vmatpush.bf16.msra.mxu3 %v13258_v33  ;;  %v16034_v33 = vld [vmem:[#allocation54_spill] sm:$0xff]  ;;  %v13583_v29 = vld [vmem:[#allocation5 + $0x20b8] sm:$0xf0]  ;;  %v13559_v12 = vld [vmem:[#allocation5 + $0x2088] sm:$0xf0] }
 0x442   :  { %8882 = vmatpush.bf16.msra.mxu0 %v13122_v14  ;;  %v15021_v14 = vld [vmem:[#allocation5 + $0x1f44] sm:$0xf] }
 0x443   :  { %8895 = vmatpush.bf16.msra.mxu1 %v13186_v28  ;;  %v13527_v28 = vld [vmem:[#allocation5 + $0x2048] sm:$0xf0]  ;;  %v13402_v47 = vor.u32 %v15021_v14, %v13399_v38  ;;  %v15045_v14 = vld [vmem:[#allocation5 + $0x2004] sm:$0xf]  ;;  %v13506_v38 = vor.u32 %v15047_v62, %v13503_v17 }
 0x444   :  { %8918 = vmatpush.bf16.msrb.mxu2 %v13338_v41  ;;  %v8666_v41 = vpop.f32.mrf.mxu2  ;;  %v15061_v6 = vld [vmem:[#allocation5 + $0x2084] sm:$0xf] }
 0x445   :  { %8908 = vmatpush.bf16.msra.mxu3 %v13250_v56  ;;  %v15073_v56 = vld [vmem:[#allocation5 + $0x20e4] sm:$0xf]  ;;  %v13367_v41 = vld [vmem:[#allocation5 + $0x1f08] sm:$0xf0] }
 0x446   :  { %8883 = vmatpush.bf16.msra.mxu0 %v13114_v49  ;;  %v8677_v27 = vpop.f32.mrf.mxu0  ;;  %v13610_v5 = vor.u32 %v15073_v56, %v13607_v13  ;;  %v15107_v56 = vld [vmem:[#allocation5 + $0x21f4] sm:$0xf]  ;;  %v13370_v13 = vor.u32 %v15013_v43, %v13367_v41  ;;  %v15085_v62 = vld [vmem:[#allocation5 + $0x2144] sm:$0xf]  ;;  %v13719_v43 = vld [vmem:[#allocation5 + $0x21c8] sm:$0xf0] }
 0x447   :  { %8896 = vmatpush.bf16.msra.mxu1 %v13178_v36  ;;  %v8678_v30 = vadd.f32 %v8677_v27, %v15895_v46  ;;  %v8690_v7 = vpop.f32.mrf.mxu1  ;;  %v15123_v27 = vld [vmem:[#allocation5 + $0x2274] sm:$0xf]  ;;  %v15117_v41 = vld [vmem:[#allocation5 + $0x2244] sm:$0xf] }
 0x448   :  { %8919 = vmatpush.bf16.msrb.mxu2 %v13330_v21  ;;  %v13466_v21 = vor.u32 %v15037_v16, %v13463_v44  ;;  %v15091_v16 = vld [vmem:[#allocation5 + $0x2174] sm:$0xf]  ;;  %v13679_v44 = vld [vmem:[#allocation5 + $0x2178] sm:$0xf0] }
 0x449   :  { %8909 = vmatpush.bf16.msra.mxu3 %v13242_v15  ;;  %8884 = vmatmul.bf16.vlgmr.msra.gmra.mxu0 %v16033_v60  ;;  %v8691_v36 = vadd.f32 %v8690_v7, %v8678_v30  ;;  %v13394_v15 = vor.u32 %v15019_v42, %v13391_v59  ;;  %v15031_v60 = vld [vmem:[#allocation5 + $0x1f94] sm:$0xf] }
 0x44a   :  { %8928 = vmatpush.bf16.msrb.mxu0 %v13426_v32  ;;  %8897 = vmatmul.bf16.vlgmr.msra.gmra.mxu1 %v16034_v33  ;;  %v15051_v32 = vld [vmem:[#allocation5 + $0x2034] sm:$0xf] }
 0x44b   :  { %8941 = vmatpush.bf16.msrb.mxu1 %v13490_v18  ;;  %v15017_v18 = vld [vmem:[#allocation5 + $0x1f24] sm:$0xf]  ;;  %v13522_v46 = vor.u32 %v15051_v32, %v13519_v31  ;;  %v15067_v33 = vld [vmem:[#allocation5 + $0x20b4] sm:$0xf]  ;;  %v13671_v32 = vld [vmem:[#allocation5 + $0x2168] sm:$0xf0] }
 0x44c   :  { %8920 = vmatpush.bf16.msrb.mxu2 %v13322_v50  ;;  %8910 = vmatmul.bf16.vlgmr.msra.gmra.mxu3 %v15751_v52  ;;  %v15053_v52 = vld [vmem:[#allocation5 + $0x2044] sm:$0xf]  ;;  %v13458_v50 = vor.u32 %v15035_v48, %v13455_v25 }
 0x44d   :  { %8954 = vmatpush.bf16.msrb.mxu3 %v13554_v4  ;;  %v13530_v49 = vor.u32 %v15053_v52, %v13527_v28  ;;  %v13447_v4 = vld [vmem:[#allocation5 + $0x1fa8] sm:$0xf0]  ;;  %v15065_v52 = vld [vmem:[#allocation5 + $0x20a4] sm:$0xf] }
 0x44e   :  { %8929 = vmatpush.bf16.msrb.mxu0 %v13418_v0  ;;  %v13450_v10 = vor.u32 %v15033_v22, %v13447_v4  ;;  %v8679_v61 = vpop.f32.mrf.mxu0  ;;  %v13575_v28 = vld [vmem:[#allocation5 + $0x20a8] sm:$0xf0]  ;;  %v15089_v25 = vld [vmem:[#allocation5 + $0x2164] sm:$0xf]  ;;  %v15087_v22 = vld [vmem:[#allocation5 + $0x2154] sm:$0xf] }
 0x44f   :  { %8942 = vmatpush.bf16.msrb.mxu1 %v13482_v35  ;;  %v8703_v11 = vpop.f32.mrf.mxu3  ;;  %v13375_v35 = vld [vmem:[#allocation5 + $0x1f18] sm:$0xf0]  ;;  %v8692_v45 = vpop.f32.mrf.mxu1  ;;  %v13578_v48 = vor.u32 %v15065_v52, %v13575_v28  ;;  %v15099_v52 = vld [vmem:[#allocation5 + $0x21b4] sm:$0xf] }
 0x450   :  { %8921 = vmatpush.bf16.msrb.mxu2 %v13314_v20  ;;  %v8704_v0 = vadd.f32 %v8703_v11, %v8691_v36  ;;  %v15015_v20 = vld [vmem:[#allocation5 + $0x1f14] sm:$0xf]  ;;  %v13567_v36 = vld [vmem:[#allocation5 + $0x2098] sm:$0xf0]  ;;  %v13655_v45 = vld [vmem:[#allocation5 + $0x2148] sm:$0xf0] }
 0x451   :  { %8955 = vmatpush.bf16.msrb.mxu3 %v13546_v55  ;;  %v13439_v55 = vld [vmem:[#allocation5 + $0x1f98] sm:$0xf0]  ;;  %v13378_v24 = vor.u32 %v15015_v20, %v13375_v35  ;;  %v15103_v11 = vld [vmem:[#allocation5 + $0x21d4] sm:$0xf] }
 0x452   :  { %8930 = vmatpush.bf16.msrb.mxu0 %v13410_v39  ;;  %v13442_v39 = vor.u32 %v15031_v60, %v13439_v55  ;;  %v13663_v4 = vld [vmem:[#allocation5 + $0x2158] sm:$0xf0]  ;;  %v15119_v20 = vld [vmem:[#allocation5 + $0x2254] sm:$0xf]  ;;  %v13562_v55 = vor.u32 %v15061_v6, %v13559_v12  ;;  %v15195_v12 = vld [vmem:[#allocation5 + $0x2320] sm:$0xff] }
 0x453   :  { %8943 = vmatpush.bf16.msrb.mxu1 %v13474_v57  ;;  %v13431_v57 = vld [vmem:[#allocation5 + $0x1f88] sm:$0xf0]  ;;  %v13791_v35 = vld [vmem:[#allocation5 + $0x2258] sm:$0xf0]  ;;  %v13666_v61 = vor.u32 %v15087_v22, %v13663_v4 }
 0x454   :  { %8922 = vmatpush.bf16.msrb.mxu2 %v13306_v23  ;;  %v15029_v23 = vld [vmem:[#allocation5 + $0x1f84] sm:$0xf] }
 0x455   :  { %8956 = vmatpush.bf16.msrb.mxu3 %v13538_v26  ;;  %v13586_v26 = vor.u32 %v15067_v33, %v13583_v29  ;;  %v13434_v30 = vor.u32 %v15029_v23, %v13431_v57  ;;  %v13794_v33 = vor.u32 %v15119_v20, %v13791_v35  ;;  %v15101_v29 = vld [vmem:[#allocation5 + $0x21c4] sm:$0xf]  ;;  %v13863_v57 = vld [vmem:[#allocation5 + $0x22e8] sm:$0xf0]  ;;  %v15111_v20 = vld [vmem:[#allocation5 + $0x2214] sm:$0xf] }
 0x456   :  { %8931 = vmatpush.bf16.msrb.mxu0 %v13402_v47  ;;  %v13743_v47 = vld [vmem:[#allocation5 + $0x21f8] sm:$0xf0]  ;;  %v15137_v23 = vld [vmem:[#allocation5 + $0x22e4] sm:$0xf] }
 0x457   :  { %8923 = vmatmul.bf16.vlgmr.msrb.gmra.mxu2 %v15755_v51  ;;  %8944 = vmatpush.bf16.msrb.mxu1 %v13466_v21  ;;  %v13386_v51 = vor.u32 %v15017_v18, %v13383_v37  ;;  %v13807_v21 = vld [vmem:[#allocation5 + $0x2278] sm:$0xf0]  ;;  %v8705_v42 = vpop.f32.mrf.mxu3  ;;  %v13746_v31 = vor.u32 %v15107_v56, %v13743_v47  ;;  %v15121_v18 = vld [vmem:[#allocation5 + $0x2264] sm:$0xf]  ;;  %v13799_v37 = vld [vmem:[#allocation5 + $0x2268] sm:$0xf0]  ;;  %v13866_v56 = vor.u32 %v15137_v23, %v13863_v57 }
 0x458   :  { %8967 = vmatpush.bf16.msra.mxu2 %v13618_v40  ;;  %v13495_v40 = vld [vmem:[#allocation5 + $0x2008] sm:$0xf0]  ;;  %v13810_v54 = vor.u32 %v15123_v27, %v13807_v21  ;;  %v13802_v1 = vor.u32 %v15121_v18, %v13799_v37  ;;  %v15115_v47 = vld [vmem:[#allocation5 + $0x2234] sm:$0xf]  ;;  %v13775_v27 = vld [vmem:[#allocation5 + $0x2238] sm:$0xf0] }
 0x459   :  { %8957 = vmatpush.bf16.msrb.mxu3 %v13530_v49  ;;  %v13682_v49 = vor.u32 %v15091_v16, %v13679_v44  ;;  %v16037_v21 = vld [vmem:[#allocation58_spill] sm:$0xff]  ;;  %v13847_v18 = vld [vmem:[#allocation5 + $0x22c8] sm:$0xf0]  ;;  %v13759_v35 = vld [vmem:[#allocation5 + $0x2218] sm:$0xf0] }
 0x45a   :  { %8932 = vmatpush.bf16.msrb.mxu0 %v13394_v15  ;;  %v8716_v59 = vpop.f32.mrf.mxu2  ;;  %v15105_v15 = vld [vmem:[#allocation5 + $0x21e4] sm:$0xf]  ;;  %v13831_v23 = vld [vmem:[#allocation5 + $0x22a8] sm:$0xf0] }
 0x45b   :  { %8945 = vmatpush.bf16.msrb.mxu1 %v13458_v50  ;;  %v15902_v7 = vadd.f32 %v8716_v59, %v8704_v0  ;;  %v13735_v50 = vld [vmem:[#allocation5 + $0x21e8] sm:$0xf0]  ;;  %v16036_v0 = vld [vmem:[#allocation56_spill] sm:$0xff] }
 0x45c   :  { %8968 = vmatpush.bf16.msra.mxu2 %v13610_v5  ;;  %v13498_v5 = vor.u32 %v15045_v14, %v13495_v40  ;;  %v13738_v8 = vor.u32 %v15105_v15, %v13735_v50  ;;  %v15083_v14 = vld [vmem:[#allocation5 + $0x2134] sm:$0xf]  ;;  %v13722_v40 = vor.u32 %v15101_v29, %v13719_v43  ;;  %v15133_v50 = vld [vmem:[#allocation5 + $0x22c4] sm:$0xf] }
 0x45d   :  { %8958 = vmatpush.bf16.msrb.mxu3 %v13522_v46  ;;  %v13674_v46 = vor.u32 %v15089_v25, %v13671_v32  ;;  %v15135_v59 = vld [vmem:[#allocation5 + $0x22d4] sm:$0xf]  ;;  %v13778_v32 = vor.u32 %v15115_v47, %v13775_v27  ;;  %v15109_v43 = vld [vmem:[#allocation5 + $0x2204] sm:$0xf]  ;;  %v13823_v47 = vld [vmem:[#allocation5 + $0x2298] sm:$0xf0] }
 0x45e   :  { %8933 = vmatpush.bf16.msrb.mxu0 %v13386_v51  ;;  %v16035_v51 = vld [vmem:[#allocation55_spill] sm:$0xff] }
 0x45f   :  { %8946 = vmatpush.bf16.msrb.mxu1 %v13450_v10  ;;  %v13727_v10 = vld [vmem:[#allocation5 + $0x21d8] sm:$0xf0] }
 0x460   :  { %8969 = vmatpush.bf16.msra.mxu2 %v13602_v34  ;;  %v13570_v34 = vor.u32 %v15063_v19, %v13567_v36  ;;  %v13730_v17 = vor.u32 %v15103_v11, %v13727_v10  ;;  %v15113_v19 = vld [vmem:[#allocation5 + $0x2224] sm:$0xf]  ;;  %v13767_v36 = vld [vmem:[#allocation5 + $0x2228] sm:$0xf0]  ;;  %v4937_v11 = vunpack.c.h.b16 %v15195_v12  ;;  %v13695_v10 = vld [vmem:[#allocation5 + $0x2198] sm:$0xf0] }
 0x461   :  { %8959 = vmatpush.bf16.msrb.mxu3 %v13514_v63  ;;  %v15139_v63 = vld [vmem:[#allocation5 + $0x22f4] sm:$0xf] }
 0x462   :  { %8934 = vmatpush.bf16.msrb.mxu0 %v13378_v24  ;;  %v8718_v60 = vpop.f32.mrf.mxu2 }
 0x463   :  { %8947 = vmatpush.bf16.msrb.mxu1 %v13442_v39  ;;  %v13783_v39 = vld [vmem:[#allocation5 + $0x2248] sm:$0xf0]  ;;  %v15077_v60 = vld [vmem:[#allocation5 + $0x2104] sm:$0xf] }
 0x464   :  { %8970 = vmatpush.bf16.msra.mxu2 %v13594_v58  ;;  %v13871_v58 = vld [vmem:[#allocation5 + $0x22f8] sm:$0xf0]  ;;  %v13786_v16 = vor.u32 %v15117_v41, %v13783_v39  ;;  %v13751_v41 = vld [vmem:[#allocation5 + $0x2208] sm:$0xf0] }
 0x465   :  { %8960 = vmatpush.bf16.msrb.mxu3 %v13506_v38  ;;  %v13874_v24 = vor.u32 %v15139_v63, %v13871_v58  ;;  %v13647_v38 = vld [vmem:[#allocation5 + $0x2138] sm:$0xf0]  ;;  %v15131_v63 = vld [vmem:[#allocation5 + $0x22b4] sm:$0xf] }
 0x466   :  { %8935 = vmatpush.bf16.msrb.mxu0 %v13370_v13  ;;  %v13711_v13 = vld [vmem:[#allocation5 + $0x21b8] sm:$0xf0]  ;;  %v13650_v42 = vor.u32 %v15083_v14, %v13647_v38 }
 0x467   :  { %8948 = vmatpush.bf16.msrb.mxu1 %v13434_v30  ;;  %v8742_v44 = vpop.f32.mrf.mxu1  ;;  %v13855_v30 = vld [vmem:[#allocation5 + $0x22d8] sm:$0xf0]  ;;  %v13714_v25 = vor.u32 %v15099_v52, %v13711_v13  ;;  %v15152_v52 = vld [vmem:[#allocation8 + $0x38] sm:$0xff]  ;;  %v15127_v13 = vld [vmem:[#allocation5 + $0x2294] sm:$0xf] }
 0x468   :  { %8971 = vmatpush.bf16.msra.mxu2 %v13586_v26  ;;  %v8729_v26 = vpop.f32.mrf.mxu0  ;;  %v13839_v58 = vld [vmem:[#allocation5 + $0x22b8] sm:$0xf0] }
 0x469   :  { %8961 = vmatpush.bf16.msrb.mxu3 %v13498_v5  ;;  %8936 = vmatmul.bf16.vlgmr.msrb.gmra.mxu0 %v16035_v51  ;;  %v8730_v28 = vadd.f32 %v8729_v26, %v15902_v7  ;;  %v15081_v5 = vld [vmem:[#allocation5 + $0x2124] sm:$0xf]  ;;  %v13858_v7 = vor.u32 %v15135_v59, %v13855_v30  ;;  %v13842_v29 = vor.u32 %v15131_v63, %v13839_v58  ;;  %v13879_v30 = vld [vmem:[#allocation5 + $0x2308] sm:$0xf0] }
 0x46a   :  { %8980 = vmatpush.bf16.msra.mxu0 %v13682_v49  ;;  %8949 = vmatmul.bf16.vlgmr.msrb.gmra.mxu1 %v16036_v0  ;;  %v13850_v0 = vor.u32 %v15133_v50, %v13847_v18  ;;  %v15141_v59 = vld [vmem:[#allocation5 + $0x2304] sm:$0xf] }
 0x46b   :  { %8993 = vmatpush.bf16.msra.mxu1 %v13746_v31  ;;  %v8743_v49 = vadd.f32 %v8742_v44, %v8730_v28  ;;  %v15097_v31 = vld [vmem:[#allocation5 + $0x21a4] sm:$0xf]  ;;  %v15143_v28 = vld [vmem:[#allocation5 + $0x2314] sm:$0xf] }
 0x46c   :  { %8972 = vmatpush.bf16.msra.mxu2 %v13578_v48  ;;  %8962 = vmatmul.bf16.vlgmr.msrb.gmra.mxu3 %v15767_v2  ;;  %v13658_v2 = vor.u32 %v15085_v62, %v13655_v45  ;;  %v13639_v48 = vld [vmem:[#allocation5 + $0x2128] sm:$0xf0]  ;;  %v13762_v45 = vor.u32 %v15111_v20, %v13759_v35 }
 0x46d   :  { %9006 = vmatpush.bf16.msra.mxu3 %v13810_v54  ;;  %v13703_v54 = vld [vmem:[#allocation5 + $0x21a8] sm:$0xf0]  ;;  %v13642_v15 = vor.u32 %v15081_v5, %v13639_v48  ;;  %v15125_v5 = vld [vmem:[#allocation5 + $0x2284] sm:$0xf] }
 0x46e   :  { %8981 = vmatpush.bf16.msra.mxu0 %v13674_v46  ;;  %v15079_v46 = vld [vmem:[#allocation5 + $0x2114] sm:$0xf]  ;;  %v13706_v4 = vor.u32 %v15097_v31, %v13703_v54  ;;  %v13815_v48 = vld [vmem:[#allocation5 + $0x2288] sm:$0xf0]  ;;  %v13882_v31 = vor.u32 %v15141_v59, %v13879_v30 }
 0x46f   :  { %8994 = vmatpush.bf16.msra.mxu1 %v13738_v8  ;;  %v8755_v37 = vpop.f32.mrf.mxu3  ;;  %v13770_v8 = vor.u32 %v15113_v19, %v13767_v36  ;;  %v8744_v51 = vpop.f32.mrf.mxu1  ;;  %v15150_v54 = vld [vmem:[#allocation8 + $0x28] sm:$0xff]  ;;  %v15149_v36 = vld [vmem:[#allocation8 + $0x20] sm:$0xff] }
 0x470   :  { %8973 = vmatpush.bf16.msra.mxu2 %v13570_v34  ;;  %v13631_v34 = vld [vmem:[#allocation5 + $0x2118] sm:$0xf0]  ;;  %v8756_v22 = vadd.f32 %v8755_v37, %v8743_v49  ;;  %v8731_v6 = vpop.f32.mrf.mxu0  ;;  %v15153_v59 = vld [vmem:[#allocation8 + $0x40] sm:$0xff] }
 0x471   :  { %9007 = vmatpush.bf16.msra.mxu3 %v13802_v1  ;;  %v15095_v1 = vld [vmem:[#allocation5 + $0x2194] sm:$0xf]  ;;  %v16038_v49 = vld [vmem:[#allocation57_spill] sm:$0xff] }
 0x472   :  { %8982 = vmatpush.bf16.msra.mxu0 %v13666_v61  ;;  %v13634_v61 = vor.u32 %v15079_v46, %v13631_v34  ;;  %v13698_v62 = vor.u32 %v15095_v1, %v13695_v10  ;;  %v15147_v34 = vld [vmem:[#allocation8 + $0x10] sm:$0xff]  ;;  %v15146_v1 = vld [vmem:[#allocation8 + $0x8] sm:$0xff] }
 0x473   :  { %8995 = vmatpush.bf16.msra.mxu1 %v13730_v17  ;;  %v15093_v17 = vld [vmem:[#allocation5 + $0x2184] sm:$0xf] }
 0x474   :  { %8974 = vmatpush.bf16.msra.mxu2 %v13562_v55  ;;  %v13623_v55 = vld [vmem:[#allocation5 + $0x2108] sm:$0xf0] }
 0x475   :  { %9008 = vmatpush.bf16.msra.mxu3 %v13794_v33  ;;  %v6063_v33 = vpack.c.b16 %v4937_v11, %v4937_v11  ;;  %v13626_v39 = vor.u32 %v15077_v60, %v13623_v55  ;;  %v15145_v11 = vld [vmem:[#allocation8] sm:$0xff] }
 0x476   :  { %8983 = vmatpush.bf16.msra.mxu0 %v13658_v2  ;;  %v15129_v2 = vld [vmem:[#allocation5 + $0x22a4] sm:$0xf] }
 0x477   :  { %8975 = vmatmul.bf16.vlgmr.msra.gmra.mxu2 %v16037_v21  ;;  %8996 = vmatpush.bf16.msra.mxu1 %v13722_v40  ;;  %v8757_v14 = vpop.f32.mrf.mxu3  ;;  %v13754_v40 = vor.u32 %v15109_v43, %v13751_v41  ;;  %v13834_v44 = vor.u32 %v15129_v2, %v13831_v23  ;;  %v13826_v21 = vor.u32 %v15127_v13, %v13823_v47  ;;  %v15160_v2 = vld [vmem:[#allocation8 + $0x78] sm:$0xff] }
 0x478   :  { %9019 = vmatpush.bf16.msrb.mxu2 %v13874_v24  ;;  %v13687_v24 = vld [vmem:[#allocation5 + $0x2188] sm:$0xf0]  ;;  %v15159_v14 = vld [vmem:[#allocation8 + $0x70] sm:$0xff] }
 0x479   :  { %9009 = vmatpush.bf16.msra.mxu3 %v13786_v16  ;;  %v13690_v26 = vor.u32 %v15093_v17, %v13687_v24  ;;  %v7197_v16 = vsel %vm7192_vm0, %v6063_v33, 0 }
 0x47a   :  { %8984 = vmatpush.bf16.msra.mxu0 %v13650_v42  ;;  %v8768_v57 = vpop.f32.mrf.mxu2  ;;  %v15151_v42 = vld [vmem:[#allocation8 + $0x30] sm:$0xff] }
 0x47b   :  { %8997 = vmatpush.bf16.msra.mxu1 %v13714_v25  ;;  %v8769_v38 = vadd.f32 %v8768_v57, %v8756_v22  ;;  %v16039_v25 = vld [vmem:[#allocation59_spill] sm:$0xff] }
 0x47c   :  { %9020 = vmatpush.bf16.msrb.mxu2 %v13866_v56  ;;  %v13887_v56 = vld [vmem:[#allocation5 + $0x2318] sm:$0xf0] }
 0x47d   :  { %9010 = vmatpush.bf16.msra.mxu3 %v13778_v32  ;;  %v13890_v27 = vor.u32 %v15143_v28, %v13887_v56  ;;  %v15155_v56 = vld [vmem:[#allocation8 + $0x50] sm:$0xff] }
 0x47e   :  { %8985 = vmatpush.bf16.msra.mxu0 %v13642_v15 }
 0x47f   :  { %8998 = vmatpush.bf16.msra.mxu1 %v13706_v4  ;;  %v16040_v4 = vld [vmem:[#allocation60_spill] sm:$0xff] }
 0x480   :  { %9021 = vmatpush.bf16.msrb.mxu2 %v13858_v7  ;;  %v13818_v7 = vor.u32 %v15125_v5, %v13815_v48 }
 0x481   :  { %9011 = vmatpush.bf16.msra.mxu3 %v13770_v8 }
 0x482   :  { %8986 = vmatpush.bf16.msra.mxu0 %v13634_v61  ;;  %v8770_v32 = vpop.f32.mrf.mxu2 }
 0x483   :  { %8999 = vmatpush.bf16.msra.mxu1 %v13698_v62 }
 0x484   :  { %9022 = vmatpush.bf16.msrb.mxu2 %v13850_v0 }
 0x485   :  { %9012 = vmatpush.bf16.msra.mxu3 %v13762_v45 }
 0x486   :  { %8987 = vmatpush.bf16.msra.mxu0 %v13626_v39  ;;  %v8781_v19 = vpop.f32.mrf.mxu0 }
 0x487   :  { %9000 = vmatpush.bf16.msra.mxu1 %v13690_v26  ;;  %v8782_v15 = vadd.f32 %v8781_v19, %v8769_v38  ;;  %v8794_v50 = vpop.f32.mrf.mxu1  ;;  %v15158_v26 = vld [vmem:[#allocation8 + $0x68] sm:$0xff] }
 0x488   :  { %9023 = vmatpush.bf16.msrb.mxu2 %v13842_v29 }
 0x489   :  { %9013 = vmatpush.bf16.msra.mxu3 %v13754_v40  ;;  %8988 = vmatmul.bf16.vlgmr.msra.gmra.mxu0 %v16038_v49  ;;  %v8795_v18 = vadd.f32 %v8794_v50, %v8782_v15 }
 0x48a   :  { %9037 = vmatpush.bf16.msrb.mxu0 %v7197_v16  ;;  %9001 = vmatmul.bf16.vlgmr.msra.gmra.mxu1 %v16039_v25 }
 0x48b   :  { %9181 = vmatpush.bf16.msrb.mxu1 %v15152_v52  ;;  %v15156_v52 = vld [vmem:[#allocation8 + $0x58] sm:$0xff] }
 0x48c   :  { %9024 = vmatpush.bf16.msrb.mxu2 %v13834_v44  ;;  %9014 = vmatmul.bf16.vlgmr.msra.gmra.mxu3 %v15786_v53  ;;  %v15148_v53 = vld [vmem:[#allocation8 + $0x18] sm:$0xff]  ;;  %v15157_v44 = vld [vmem:[#allocation8 + $0x60] sm:$0xff] }
 0x48d   :  { %9194 = vmatpush.bf16.msrb.mxu3 %v15160_v2 }
 0x48e   :  { %9038 = vmatpush.bf16.msrb.mxu0 %v13890_v27  ;;  %v8783_v22 = vpop.f32.mrf.mxu0  ;;  %v15154_v27 = vld [vmem:[#allocation8 + $0x48] sm:$0xff] }
 0x48f   :  { %9182 = vmatpush.bf16.msrb.mxu1 %v15151_v42  ;;  %v8807_v37 = vpop.f32.mrf.mxu3  ;;  %v8796_v8 = vpop.f32.mrf.mxu1 }
 0x490   :  { %9025 = vmatpush.bf16.msrb.mxu2 %v13826_v21  ;;  %v8808_v46 = vadd.f32 %v8807_v37, %v8795_v18 }
 0x491   :  { %9195 = vmatpush.bf16.msrb.mxu3 %v15159_v14  ;;  %v15170_v14 = vld [vmem:[#allocation14 + $0x8] sm:$0xff] }
 0x492   :  { %9039 = vmatpush.bf16.msrb.mxu0 %v13882_v31 }
 0x493   :  { %9183 = vmatpush.bf16.msrb.mxu1 %v15150_v54 }
 0x494   :  { %9026 = vmatpush.bf16.msrb.mxu2 %v13818_v7 }
 0x495   :  { %9196 = vmatpush.bf16.msrb.mxu3 %v15158_v26  ;;  %v15192_v26 = vld [vmem:[#allocation13] ss:$0 sm:$0xff] }
 0x497   :  { %9027 = vmatmul.bf16.vlgmr.msrb.gmra.mxu2 %v15788_v9  ;;  %9184 = vmatpush.bf16.msrb.mxu1 %v15149_v36  ;;  %v8809_v6 = vpop.f32.mrf.mxu3  ;;  %v9045_v9 = vmax.f32 %v15823_v3, 0.0  ;;  %v15168_v36 = vld [vmem:[#allocation11 + $0x38] sm:$0xff] }
 0x498   :  { %9277 = vmatpush.bf16.msra.mxu0 %v15168_v36 }
 0x499   :  { %13892 = vmatmul.msk.bf16.vlgmr.msrb.gmra.mxu0 %vm7188_vm1, %v16040_v4  ;;  %v9047_v0 = vpack.c.bf16 %v9045_v9, %v9045_v9  ;;  %9197 = vmatpush.bf16.msrb.mxu3 %v15157_v44 }
 0x49a   :  { %v8820_v12 = vpop.f32.mrf.mxu2 }
 0x49b   :  { %9185 = vmatpush.bf16.msrb.mxu1 %v15148_v53  ;;  %v8821_v51 = vadd.f32 %v8820_v12, %v8808_v46  ;;  %v15167_v53 = vld [vmem:[#allocation11 + $0x30] sm:$0xff]  ;;  %v15165_v12 = vld [vmem:[#allocation11 + $0x20] sm:$0xff] }
 0x49c   :  { %9278 = vmatpush.bf16.msra.mxu0 %v15167_v53 }
 0x49d   :  { %9198 = vmatpush.bf16.msrb.mxu3 %v15156_v52 }
 0x49f   :  { %9186 = vmatpush.bf16.msrb.mxu1 %v15147_v34  ;;  %v15166_v34 = vld [vmem:[#allocation11 + $0x28] sm:$0xff] }
 0x4a0   :  { %9279 = vmatpush.bf16.msra.mxu0 %v15166_v34 }
 0x4a1   :  { %9199 = vmatpush.bf16.msrb.mxu3 %v15155_v56  ;;  %v15193_v56 = vld [vmem:[#allocation16] ss:$0 sm:$0xff] }
 0x4a2   :  { %v8822_v10 = vpop.f32.mrf.mxu2 }
 0x4a3   :  { %9187 = vmatpush.bf16.msrb.mxu1 %v15146_v1 }
 0x4a4   :  { %9280 = vmatpush.bf16.msra.mxu0 %v15165_v12 }
 0x4a5   :  { %9200 = vmatpush.bf16.msrb.mxu3 %v15154_v27 }
 0x4a6   :  { %v8833_v20 = vpop.f32.mrf.mxu0 }
 0x4a7   :  { %9188 = vmatpush.bf16.msrb.mxu1 %v15145_v11  ;;  %v8846_v35 = vpop.f32.mrf.mxu1  ;;  %v8834_v61 = vadd.f32 %v8833_v20, %v8821_v51  ;;  %v15164_v51 = vld [vmem:[#allocation11 + $0x18] sm:$0xff] }
 0x4a8   :  { %9281 = vmatpush.bf16.msra.mxu0 %v15164_v51 }
 0x4a9   :  { %v8847_v63 = vadd.f32 %v8846_v35, %v8834_v61  ;;  %9201 = vmatpush.bf16.msrb.mxu3 %v15153_v59  ;;  %v15163_v61 = vld [vmem:[#allocation11 + $0x10] sm:$0xff] }
 0x4aa   :  { %9189 = vmatmul.bf16.vlgmr.msrb.gmra.mxu1 %v9047_v0 }
 0x4ac   :  { %9282 = vmatpush.bf16.msra.mxu0 %v15163_v61 }
 0x4ae   :  { %v8835_v55 = vpop.f32.mrf.mxu0 }
 0x4af   :  { %v8859_v58 = vpop.f32.mrf.mxu3  ;;  %v8848_v62 = vpop.f32.mrf.mxu1  ;;  %v15161_v55 = vld [vmem:[#allocation11] sm:$0xff] }
 0x4b0   :  { %v8860_v60 = vadd.f32 %v8859_v58, %v8847_v63  ;;  %v15176_v62 = vld [vmem:[#allocation14 + $0x38] sm:$0xff] }
 0x4b1   :  { %9360 = vmatpush.bf16.msra.mxu2 %v15176_v62 }
 0x4b7   :  { %v8861_v17 = vpop.f32.mrf.mxu3 }
 0x4b8   :  { %v15174_v17 = vld [vmem:[#allocation14 + $0x28] sm:$0xff] }
 0x4ba   :  { %v8872_v45 = vpop.f32.mrf.mxu2 }
 0x4bb   :  { %v8873_v33 = vadd.f32 %v8872_v45, %v8860_v60  ;;  %v15162_v60 = vld [vmem:[#allocation11 + $0x8] sm:$0xff]  ;;  %v15175_v45 = vld [vmem:[#allocation14 + $0x30] sm:$0xff] }
 0x4bc   :  { %9283 = vmatpush.bf16.msra.mxu0 %v15162_v60  ;;  %9361 = vmatpush.bf16.msra.mxu2 %v15175_v45 }
 0x4c0   :  { %9284 = vmatpush.bf16.msra.mxu0 %v15161_v55  ;;  %9362 = vmatpush.bf16.msra.mxu2 %v15174_v17 }
 0x4c2   :  { %v8874_v29 = vpop.f32.mrf.mxu2 }
 0x4c3   :  { %v15172_v29 = vld [vmem:[#allocation14 + $0x18] sm:$0xff] }
 0x4c6   :  { %v8885_v24 = vpop.f32.mrf.mxu0 }
 0x4c7   :  { %v8898_v43 = vpop.f32.mrf.mxu1  ;;  %v8886_v30 = vadd.f32 %v8885_v24, %v8873_v33  ;;  %v15173_v33 = vld [vmem:[#allocation14 + $0x20] sm:$0xff]  ;;  %v15171_v24 = vld [vmem:[#allocation14 + $0x10] sm:$0xff] }
 0x4c8   :  { %9363 = vmatpush.bf16.msra.mxu2 %v15173_v33 }
 0x4c9   :  { %v8899_v49 = vadd.f32 %v8898_v43, %v8886_v30  ;;  %v15191_v43 = vld [vmem:[#allocation10] ss:$0 sm:$0xff] }
 0x4cc   :  { %9364 = vmatpush.bf16.msra.mxu2 %v15172_v29 }
 0x4ce   :  { %v8887_v41 = vpop.f32.mrf.mxu0 }
 0x4cf   :  { %v8911_v3 = vpop.f32.mrf.mxu3  ;;  %v8900_v39 = vpop.f32.mrf.mxu1 }
 0x4d0   :  { %v8912_v48 = vadd.f32 %v8911_v3, %v8899_v49  ;;  %9365 = vmatpush.bf16.msra.mxu2 %v15171_v24 }
 0x4d4   :  { %9366 = vmatpush.bf16.msra.mxu2 %v15170_v14 }
 0x4d7   :  { %v8913_v23 = vpop.f32.mrf.mxu3 }
 0x4da   :  { %v8924_v57 = vpop.f32.mrf.mxu2 }
 0x4db   :  { %v8925_v25 = vadd.f32 %v8924_v57, %v8912_v48 }
 0x4e2   :  { %v8926_v38 = vpop.f32.mrf.mxu2 }
 0x4e3   :  { %v15169_v38 = vld [vmem:[#allocation14] sm:$0xff] }
 0x4e4   :  { %9367 = vmatpush.bf16.msra.mxu2 %v15169_v38 }
 0x4e6   :  { %v8937_v40 = vpop.f32.mrf.mxu0 }
 0x4e7   :  { %v8950_v16 = vpop.f32.mrf.mxu1  ;;  %v8938_v32 = vadd.f32 %v8937_v40, %v8925_v25 }
 0x4e9   :  { %v8951_v54 = vadd.f32 %v8950_v16, %v8938_v32 }
 0x4ee   :  { %v8939_v13 = vpop.f32.mrf.mxu0 }
 0x4ef   :  { %v8963_v28 = vpop.f32.mrf.mxu3  ;;  %v8952_v47 = vpop.f32.mrf.mxu1 }
 0x4f0   :  { %v8964_v19 = vadd.f32 %v8963_v28, %v8951_v54 }
 0x4f7   :  { %v8965_v42 = vpop.f32.mrf.mxu3 }
 0x4fa   :  { %v8976_v21 = vpop.f32.mrf.mxu2 }
 0x4fb   :  { %v8977_v15 = vadd.f32 %v8976_v21, %v8964_v19 }
 0x502   :  { %v8978_v5 = vpop.f32.mrf.mxu2 }
 0x506   :  { %v8989_v31 = vpop.f32.mrf.mxu0 }
 0x507   :  { %v9002_v7 = vpop.f32.mrf.mxu1  ;;  %v8990_v37 = vadd.f32 %v8989_v31, %v8977_v15 }
 0x509   :  { %v9003_v22 = vadd.f32 %v9002_v7, %v8990_v37 }
 0x50e   :  { %v8991_v18 = vpop.f32.mrf.mxu0 }
 0x50f   :  { %v9015_v50 = vpop.f32.mrf.mxu3  ;;  %v9004_v46 = vpop.f32.mrf.mxu1 }
 0x510   :  { %v9016_v4 = vadd.f32 %v9015_v50, %v9003_v22 }
 0x516   :  { %v9041_v6 = vpop.f32.mrf.mxu0 }
 0x517   :  { %v9017_v8 = vpop.f32.mrf.mxu3 }
 0x51a   :  { %v9028_v1 = vpop.f32.mrf.mxu2 }
 0x51b   :  { %v9029_v11 = vadd.f32 %v9028_v1, %v9016_v4 }
 0x51d   :  { %v9042_v9 = vadd.f32 %v9041_v6, %v9029_v11 }
 0x51e   :  { %v9043_v35 = vpop.f32.mrf.mxu0 }
 0x51f   :  { %v9046_v0 = vmax.f32 %v9042_v9, 0.0 }
 0x521   :  { %v9048_v10 = vpack.c.bf16 %v9046_v0, %v9046_v0 }
 0x522   :  { %v9030_v20 = vpop.f32.mrf.mxu2 }
 0x523   :  { %9202 = vmatmul.bf16.vlgmr.msrb.gmra.mxu3 %v9048_v10 }
 0x527   :  { %v9190_v63 = vpop.f32.mrf.mxu1 }
 0x528   :  { %v9191_v3 = vadd.f32 %v15191_v43, %v9190_v63 }
 0x52f   :  { %v9192_v58 = vpop.f32.mrf.mxu1 }
 0x5a6   :  { %v9203_v41 = vpop.f32.mrf.mxu3 }
 0x5a7   :  { %v9204_v39 = vadd.f32 %v9203_v41, %v9191_v3 }
 0x5a9   :  { %v9207_v2 = vmax.f32 %v9204_v39, 0.0 }
 0x5ab   :  { %v9208_v23 = vpack.c.bf16 %v9207_v2, %v9207_v2 }
 0x5ad   :  { %9285 = vmatmul.bf16.vlgmr.msra.gmra.mxu0 %v9208_v23 }
 0x5ae   :  { %v9205_v57 = vpop.f32.mrf.mxu3 }
 0x62a   :  { %v9286_v40 = vpop.f32.mrf.mxu0 }
 0x62b   :  { %v9287_v16 = vadd.f32 %v15192_v26, %v9286_v40 }
 0x62d   :  { %v9290_v44 = vmax.f32 %v9287_v16, 0.0 }
 0x62f   :  { %v9291_v52 = vpack.c.bf16 %v9290_v44, %v9290_v44 }
 0x631   :  { %9368 = vmatmul.bf16.vlgmr.msra.gmra.mxu2 %v9291_v52 }
 0x632   :  { %v9288_v28 = vpop.f32.mrf.mxu0 }
 0x6b4   :  { %v9369_v13 = vpop.f32.mrf.mxu2 }
 0x6b5   :  { %v9370_v47 = vadd.f32 %v15193_v56, %v9369_v13 }
 0x6b7   :  { %9373 = vst [vmem:[#allocation17] sm:$0x3] %v9370_v47 }
 0x6b8   :  { %9384 = dma.vmem_to_hbm [thread:$0]  %s9380_s8, 32, %s9382_s30, [#allocation4]  }
 0x6bc   :  { %v9371_v27 = vpop.f32.mrf.mxu2 }
 0x6bd   :  { %15446 = dma.done.wait [#allocation4], 32  }
 0x6be   :  { %15447 = vsyncadd [#allocation4], 4294967264 }
 0x6bf   :  { %9389 = vsyncpa [#allocation3], 1 }
 0x6c0   :  { %9390 = vsyncpa [#allocation6], 1 }
 0x6c1   :  { %9391 = vsyncpa [#allocation9], 1 }
 0x6c2   :  { %9392 = vsyncpa [#allocation12], 1 }
 0x6c3   :  { %9393 = vsyncpa [#allocation15], 1 }
 0x6c4   :  { %9394 = vsyncpa [#allocation4], 1 }

</bundles_post_ra>
